<compile_context>
chip_gen: v5e
topology: v5e:2x2
jax: 0.10.0
libtpu: 0.0.40
codegen_flags: <defaults>
</compile_context>

<pallas_src>
import functools

import numpy as np
import jax
import jax.numpy as jnp
from jax.experimental import pallas as pl
from jax.experimental.pallas import tpu as pltpu

NUM_CLASSES = 10   # TODO(synk): stand-in for len(dt.ear_class); dt is undefined in the spec.
CIN = 3
CIN_PAD = 8        # conv1 input channels padded 3 -> 8 (sublane-aligned K)
C1, C2, C3 = 32, 64, 128
FC1 = 512
OUT_PAD = 128      # fc2 output padded to a lane-dense 128; sliced to NUM_CLASSES in glue


def _round_up(x, m):
    return (x + m - 1) // m * m


def _derive_dims(H, W):
    """Static geometry of the flattened, ring-padded layouts."""
    assert H % 4 == 0 and W % 4 == 0, "spatial dims must be divisible by 4"
    wp1 = W + 2                                   # padded width, H x W stage
    a1 = H * wp1                                  # conv1/conv2 anchor rows
    xr1 = _round_up(a1 + 2 * wp1 + 2, 8)          # padded flat slab rows
    Ho, Wo = H // 2, W // 2
    lv2 = 2 * wp1 * (Ho - 1) + 2 * (Wo - 1) + 1   # pooled-max slab rows
    wp3 = Wo + 2
    a3 = Ho * wp3
    xr3 = _round_up(a3 + 2 * wp3 + 2, 8)
    Ho3, Wo3 = Ho // 2, Wo // 2
    lv3 = 2 * wp3 * (Ho3 - 1) + 2 * (Wo3 - 1) + 1
    return dict(H=H, W=W, wp1=wp1, a1=a1, xr1=xr1, Ho=Ho, Wo=Wo, lv2=lv2,
                wp3=wp3, a3=a3, xr3=xr3, Ho3=Ho3, Wo3=Wo3, lv3=lv3)


@functools.lru_cache(maxsize=None)
def _selection_constants(H, W):
    """Constant 0/1 relayout matrices, applied inside the kernel as MXU matmuls."""
    d = _derive_dims(H, W)
    # g1: ring-pads conv1's flat output into conv2's padded flat input layout.
    g1 = np.zeros((d["xr1"], d["a1"]), np.float32)
    for yp in range(1, H + 1):
        for xp in range(1, W + 1):
            g1[yp * d["wp1"] + xp, (yp - 1) * d["wp1"] + (xp - 1)] = 1.0
    # g2: gathers maxpooled values into conv3's ring-padded flat input layout.
    g2 = np.zeros((d["xr3"], d["lv2"]), np.float32)
    for yp in range(1, d["Ho"] + 1):
        for xp in range(1, d["Wo"] + 1):
            g2[yp * d["wp3"] + xp, 2 * d["wp1"] * (yp - 1) + 2 * (xp - 1)] = 1.0
    # gsel: averaging weights over the final Ho3 x Wo3 pooled map (global avg pool).
    gsel = np.zeros((1, d["lv3"]), np.float32)
    inv = 1.0 / float(d["Ho3"] * d["Wo3"])
    for yo in range(d["Ho3"]):
        for xo in range(d["Wo3"]):
            gsel[0, 2 * d["wp3"] * yo + 2 * xo] = inv
    return d, g1, g2, gsel


# ----------------------------------------------------------------------------
# Kernel
# ----------------------------------------------------------------------------
def _conv3x3_flat(x, w_ref, n_anchor, wp):
    """3x3/stride-1 conv on a flattened zero-ring-padded slab.

    x: (rows, Cin) f32 value, row r = yp * wp + xp of the padded image.
    w_ref: (9, Cin, Cout) bf16 ref. Returns (n_anchor, Cout) f32; row r holds
    the conv output at (y = r // wp, x = r % wp); rows with x >= wp - 2 are junk
    and are never selected downstream.
    """
    acc = None
    for dy in range(3):
        for dx in range(3):
            off = dy * wp + dx
            lhs = x[off:off + n_anchor, :].astype(jnp.bfloat16)
            part = jnp.dot(lhs, w_ref[3 * dy + dx],
                           preferred_element_type=jnp.float32)
            acc = part if acc is None else acc + part
    return acc


def _maxpool2x2_flat(r, wp, lv):
    """2x2/stride-2 maxpool; pooled (yo, xo) lands at row 2*yo*wp + 2*xo."""
    return jnp.maximum(jnp.maximum(r[0:lv, :], r[1:lv + 1, :]),
                       jnp.maximum(r[wp:wp + lv, :], r[wp + 1:wp + 1 + lv, :]))


def _cnn_kernel(x_ref, w1_ref, b1_ref, w2_ref, b2_ref, s2_ref, t2_ref,
                w3_ref, b3_ref, s3_ref, t3_ref, g1_ref, g2_ref, gsel_ref,
                fc1w_ref, fc1b_ref, fc2w_ref, fc2b_ref, o_ref, *, dims):
    d = dims
    bf16 = jnp.bfloat16
    f32 = jnp.float32

    x = x_ref[0].astype(f32)                                        # (xr1, CIN_PAD)

    # block1: Conv2d(3->32, 3x3, pad 1) + ReLU
    r1 = _conv3x3_flat(x, w1_ref, d["a1"], d["wp1"])
    r1 = jnp.maximum(r1 + b1_ref[...], 0.0)

    # zero-ring re-pad of the conv1 map for block2 (constant selection matmul)
    x2 = jnp.dot(g1_ref[...], r1.astype(bf16), preferred_element_type=f32)

    # block2: Conv2d(32->64) + ReLU + BatchNorm (folded) + MaxPool(2,2)
    # NOTE: the module's order really is Conv -> ReLU -> BatchNorm.
    r2 = _conv3x3_flat(x2, w2_ref, d["a1"], d["wp1"])
    r2 = jnp.maximum(r2 + b2_ref[...], 0.0) * s2_ref[...] + t2_ref[...]
    vm2 = _maxpool2x2_flat(r2, d["wp1"], d["lv2"])                  # (lv2, 64)

    # re-pad pooled map into conv3's flat layout (constant selection matmul)
    x3 = jnp.dot(g2_ref[...], vm2.astype(bf16), preferred_element_type=f32)

    # block3: Conv2d(64->128) + ReLU + BatchNorm (folded) + MaxPool(2,2)
    r3 = _conv3x3_flat(x3, w3_ref, d["a3"], d["wp3"])
    r3 = jnp.maximum(r3 + b3_ref[...], 0.0) * s3_ref[...] + t3_ref[...]
    vm3 = _maxpool2x2_flat(r3, d["wp3"], d["lv3"])                  # (lv3, 128)

    # global average pool over the final Ho3 x Wo3 map (constant averaging dot)
    gap = jnp.dot(gsel_ref[...], vm3, preferred_element_type=f32)   # (1, 128)

    # classifier: fc1 -> Dropout(eval identity) -> fc2 (output padded to 128)
    h = jnp.dot(gap.astype(bf16), fc1w_ref[...],
                preferred_element_type=f32) + fc1b_ref[...]         # (1, 512)
    # TODO(synk): Dropout(0.5) is train-time stochastic; eval-mode identity here.
    out = jnp.dot(h.astype(bf16), fc2w_ref[...],
                  preferred_element_type=f32) + fc2b_ref[...]       # (1, 128)
    o_ref[0] = out.astype(o_ref.dtype)


# ----------------------------------------------------------------------------
# Wrapper (glue: layout plumbing only)
# ----------------------------------------------------------------------------
def _const_spec(a):
    nd = a.ndim
    return pl.BlockSpec(a.shape, lambda n: (0,) * nd)


def standard_cnn_forward(params, x_nchw):
    """Forward of _StandardCnn. x_nchw: (N, 3, H, W) float32 -> (N, NUM_CLASSES)."""
    N, Cin, H, W = x_nchw.shape
    assert Cin == CIN
    d, g1_np, g2_np, gsel_np = _selection_constants(H, W)

    # glue: NCHW -> NHWC, zero ring + channel pad, flatten per image, bf16 once.
    x = jnp.transpose(x_nchw, (0, 2, 3, 1))
    x = jnp.pad(x, ((0, 0), (1, 1), (1, 1), (0, CIN_PAD - CIN)))
    x = x.reshape(N, (H + 2) * d["wp1"], CIN_PAD)
    x = jnp.pad(x, ((0, 0), (0, d["xr1"] - (H + 2) * d["wp1"]), (0, 0)))
    x = x.astype(jnp.bfloat16)

    g1 = jnp.asarray(g1_np, jnp.bfloat16)
    g2 = jnp.asarray(g2_np, jnp.bfloat16)
    gsel = jnp.asarray(gsel_np, jnp.float32)

    args = (x,
            params["w1"], params["b1"],
            params["w2"], params["b2"], params["bn2_scale"], params["bn2_shift"],
            params["w3"], params["b3"], params["bn3_scale"], params["bn3_shift"],
            g1, g2, gsel,
            params["fc1_w"], params["fc1_b"], params["fc2_w"], params["fc2_b"])

    in_specs = [pl.BlockSpec((1, d["xr1"], CIN_PAD), lambda n: (n, 0, 0))]
    in_specs += [_const_spec(a) for a in args[1:]]

    out = pl.pallas_call(
        functools.partial(_cnn_kernel, dims=d),
        out_shape=jax.ShapeDtypeStruct((N, 1, OUT_PAD), jnp.float32),
        grid=(N,),
        in_specs=in_specs,
        out_specs=pl.BlockSpec((1, 1, OUT_PAD), lambda n: (n, 0, 0)),
        compiler_params=pltpu.CompilerParams(
            dimension_semantics=("parallel",),
            vmem_limit_bytes=32 * 1024 * 1024),
    )(*args)
    return out.reshape(N, OUT_PAD)[:, :NUM_CLASSES]


# ----------------------------------------------------------------------------
# Parameters (deterministic, synthetic, pre-packed into kernel layouts)
# ----------------------------------------------------------------------------
def init_params(key):
    keys = jax.random.split(key, 10)

    def rnd(k, shape, fan_in):
        return jax.random.normal(k, shape, jnp.float32) / jnp.sqrt(float(fan_in))

    w1 = rnd(keys[0], (3, 3, CIN, C1), 9 * CIN)           # HWIO
    w2 = rnd(keys[2], (3, 3, C1, C2), 9 * C1)
    w3 = rnd(keys[4], (3, 3, C2, C3), 9 * C2)
    fc1_w = rnd(keys[6], (C3, FC1), C3)
    fc2_w = rnd(keys[8], (FC1, NUM_CLASSES), FC1)

    # pack once (outside the forward): conv weights -> (9, Cin, Cout) bf16
    # (conv1 Cin zero-padded to 8); fc2 zero-padded to 128 outputs.
    w1k = jnp.pad(w1, ((0, 0), (0, 0), (0, CIN_PAD - CIN), (0, 0)))
    w1k = w1k.reshape(9, CIN_PAD, C1).astype(jnp.bfloat16)
    w2k = w2.reshape(9, C1, C2).astype(jnp.bfloat16)
    w3k = w3.reshape(9, C2, C3).astype(jnp.bfloat16)
    fc2_wk = jnp.pad(fc2_w, ((0, 0), (0, OUT_PAD - NUM_CLASSES))).astype(jnp.bfloat16)
    fc2_bk = jnp.pad(rnd(keys[9], (1, NUM_CLASSES), FC1),
                     ((0, 0), (0, OUT_PAD - NUM_CLASSES)))

    p = {
        "w1": w1k, "b1": rnd(keys[1], (1, C1), 9 * CIN),
        "w2": w2k, "b2": rnd(keys[3], (1, C2), 9 * C1),
        "w3": w3k, "b3": rnd(keys[5], (1, C3), 9 * C2),
        "fc1_w": fc1_w.astype(jnp.bfloat16), "fc1_b": rnd(keys[7], (1, FC1), C3),
        "fc2_w": fc2_wk, "fc2_b": fc2_bk,
    }
    # BatchNorm2d folded to scale/shift (eval mode; PyTorch defaults:
    # gamma=1, beta=0, running_mean=0, running_var=1, eps=1e-5).
    # TODO(synk): with real checkpoints, fold the actual running stats here.
    eps = 1e-5
    for name, c in (("bn2", C2), ("bn3", C3)):
        gamma = jnp.ones((c,), jnp.float32)
        beta = jnp.zeros((c,), jnp.float32)
        mean = jnp.zeros((c,), jnp.float32)
        var = jnp.ones((c,), jnp.float32)
        scale = gamma / jnp.sqrt(var + eps)
        shift = beta - mean * scale
        p[name + "_scale"] = scale.reshape(1, c)
        p[name + "_shift"] = shift.reshape(1, c)
    return p


if __name__ == "__main__":
    key = jax.random.PRNGKey(0)
    pkey, xkey = jax.random.split(key)
    params = init_params(pkey)
    x = jax.random.normal(xkey, (2, CIN, 16, 16), jnp.float32)    # NCHW like PyTorch
    fwd = jax.jit(standard_cnn_forward)
    out = jax.block_until_ready(fwd(params, x))
    assert out.shape == (2, NUM_CLASSES) and out.dtype == jnp.float32
    print("KERNEL_OK")
</pallas_src>

<mosaic_0001>
module attributes {stable_mosaic.version = 11 : i64} {
  func.func @_cnn_kernel(%arg0: i32, %arg1: memref<1x328x8xbf16, #tpu.memory_space<vmem>>, %arg2: memref<9x8x32xbf16, #tpu.memory_space<vmem>>, %arg3: memref<1x32xf32, #tpu.memory_space<vmem>>, %arg4: memref<9x32x64xbf16, #tpu.memory_space<vmem>>, %arg5: memref<1x64xf32, #tpu.memory_space<vmem>>, %arg6: memref<1x64xf32, #tpu.memory_space<vmem>>, %arg7: memref<1x64xf32, #tpu.memory_space<vmem>>, %arg8: memref<9x64x128xbf16, #tpu.memory_space<vmem>>, %arg9: memref<1x128xf32, #tpu.memory_space<vmem>>, %arg10: memref<1x128xf32, #tpu.memory_space<vmem>>, %arg11: memref<1x128xf32, #tpu.memory_space<vmem>>, %arg12: memref<328x288xbf16, #tpu.memory_space<vmem>>, %arg13: memref<104x267xbf16, #tpu.memory_space<vmem>>, %arg14: memref<1x67xf32, #tpu.memory_space<vmem>>, %arg15: memref<128x512xbf16, #tpu.memory_space<vmem>>, %arg16: memref<1x512xf32, #tpu.memory_space<vmem>>, %arg17: memref<512x128xbf16, #tpu.memory_space<vmem>>, %arg18: memref<1x128xf32, #tpu.memory_space<vmem>>, %arg19: memref<1x1x128xf32, #tpu.memory_space<vmem>>) attributes {dimension_semantics = [#tpu.dimension_semantics<parallel>], iteration_bounds = array<i64: 2>, scalar_prefetch = 0 : i64, scratch_operands = 0 : i64, tpu.core_type = #tpu.core_type<tc>, window_params = [{transform_indices = @transform_0, window_bounds = array<i64: 1, 328, 8>}, {pipeline_mode = #tpu.pipeline_mode<synchronous>, transform_indices = @transform_1, window_bounds = array<i64: 9, 8, 32>}, {pipeline_mode = #tpu.pipeline_mode<synchronous>, transform_indices = @transform_2, window_bounds = array<i64: 1, 32>}, {pipeline_mode = #tpu.pipeline_mode<synchronous>, transform_indices = @transform_3, window_bounds = array<i64: 9, 32, 64>}, {pipeline_mode = #tpu.pipeline_mode<synchronous>, transform_indices = @transform_4, window_bounds = array<i64: 1, 64>}, {pipeline_mode = #tpu.pipeline_mode<synchronous>, transform_indices = @transform_5, window_bounds = array<i64: 1, 64>}, {pipeline_mode = #tpu.pipeline_mode<synchronous>, transform_indices = @transform_6, window_bounds = array<i64: 1, 64>}, {pipeline_mode = #tpu.pipeline_mode<synchronous>, transform_indices = @transform_7, window_bounds = array<i64: 9, 64, 128>}, {pipeline_mode = #tpu.pipeline_mode<synchronous>, transform_indices = @transform_8, window_bounds = array<i64: 1, 128>}, {pipeline_mode = #tpu.pipeline_mode<synchronous>, transform_indices = @transform_9, window_bounds = array<i64: 1, 128>}, {pipeline_mode = #tpu.pipeline_mode<synchronous>, transform_indices = @transform_10, window_bounds = array<i64: 1, 128>}, {pipeline_mode = #tpu.pipeline_mode<synchronous>, transform_indices = @transform_11, window_bounds = array<i64: 328, 288>}, {pipeline_mode = #tpu.pipeline_mode<synchronous>, transform_indices = @transform_12, window_bounds = array<i64: 104, 267>}, {pipeline_mode = #tpu.pipeline_mode<synchronous>, transform_indices = @transform_13, window_bounds = array<i64: 1, 67>}, {pipeline_mode = #tpu.pipeline_mode<synchronous>, transform_indices = @transform_14, window_bounds = array<i64: 128, 512>}, {pipeline_mode = #tpu.pipeline_mode<synchronous>, transform_indices = @transform_15, window_bounds = array<i64: 1, 512>}, {pipeline_mode = #tpu.pipeline_mode<synchronous>, transform_indices = @transform_16, window_bounds = array<i64: 512, 128>}, {pipeline_mode = #tpu.pipeline_mode<synchronous>, transform_indices = @transform_17, window_bounds = array<i64: 1, 128>}, {transform_indices = @transform_18, window_bounds = array<i64: 1, 1, 128>}]} {
    %c0 = arith.constant 0 : index
    %c0_0 = arith.constant 0 : index
    %c0_1 = arith.constant 0 : index
    %0 = vector.load %arg1[%c0, %c0_0, %c0_1] : memref<1x328x8xbf16, #tpu.memory_space<vmem>>, vector<1x328x8xbf16>
    %1 = vector.shape_cast %0 : vector<1x328x8xbf16> to vector<328x8xbf16>
    %2 = arith.extf %1 : vector<328x8xbf16> to vector<328x8xf32>
    %3 = vector.extract_strided_slice %2 {offsets = [0, 0], sizes = [288, 8], strides = [1, 1]} : vector<328x8xf32> to vector<288x8xf32>
    %4 = arith.truncf %3 : vector<288x8xf32> to vector<288x8xbf16>
    %c0_2 = arith.constant 0 : index
    %c0_3 = arith.constant 0 : index
    %c0_4 = arith.constant 0 : index
    %5 = vector.load %arg2[%c0_2, %c0_3, %c0_4] : memref<9x8x32xbf16, #tpu.memory_space<vmem>>, vector<1x8x32xbf16>
    %6 = vector.shape_cast %5 : vector<1x8x32xbf16> to vector<8x32xbf16>
    %cst = arith.constant dense<0.000000e+00> : vector<288x32xf32>
    %7 = tpu.matmul %4, %6, %cst {dimension_numbers = #tpu.dot_dimension_numbers<[1], [0], [0], [1], [0, 0, 1, 1], [], []>} : vector<288x8xbf16>, vector<8x32xbf16>, vector<288x32xf32> -> vector<288x32xf32>
    %8 = vector.extract_strided_slice %2 {offsets = [1, 0], sizes = [288, 8], strides = [1, 1]} : vector<328x8xf32> to vector<288x8xf32>
    %9 = arith.truncf %8 : vector<288x8xf32> to vector<288x8xbf16>
    %c1 = arith.constant 1 : index
    %c0_5 = arith.constant 0 : index
    %c0_6 = arith.constant 0 : index
    %10 = vector.load %arg2[%c1, %c0_5, %c0_6] : memref<9x8x32xbf16, #tpu.memory_space<vmem>>, vector<1x8x32xbf16>
    %11 = vector.shape_cast %10 : vector<1x8x32xbf16> to vector<8x32xbf16>
    %cst_7 = arith.constant dense<0.000000e+00> : vector<288x32xf32>
    %12 = tpu.matmul %9, %11, %cst_7 {dimension_numbers = #tpu.dot_dimension_numbers<[1], [0], [0], [1], [0, 0, 1, 1], [], []>} : vector<288x8xbf16>, vector<8x32xbf16>, vector<288x32xf32> -> vector<288x32xf32>
    %13 = arith.addf %7, %12 : vector<288x32xf32>
    %14 = vector.extract_strided_slice %2 {offsets = [2, 0], sizes = [288, 8], strides = [1, 1]} : vector<328x8xf32> to vector<288x8xf32>
    %15 = arith.truncf %14 : vector<288x8xf32> to vector<288x8xbf16>
    %c2 = arith.constant 2 : index
    %c0_8 = arith.constant 0 : index
    %c0_9 = arith.constant 0 : index
    %16 = vector.load %arg2[%c2, %c0_8, %c0_9] : memref<9x8x32xbf16, #tpu.memory_space<vmem>>, vector<1x8x32xbf16>
    %17 = vector.shape_cast %16 : vector<1x8x32xbf16> to vector<8x32xbf16>
    %cst_10 = arith.constant dense<0.000000e+00> : vector<288x32xf32>
    %18 = tpu.matmul %15, %17, %cst_10 {dimension_numbers = #tpu.dot_dimension_numbers<[1], [0], [0], [1], [0, 0, 1, 1], [], []>} : vector<288x8xbf16>, vector<8x32xbf16>, vector<288x32xf32> -> vector<288x32xf32>
    %19 = arith.addf %13, %18 : vector<288x32xf32>
    %20 = vector.extract_strided_slice %2 {offsets = [18, 0], sizes = [288, 8], strides = [1, 1]} : vector<328x8xf32> to vector<288x8xf32>
    %21 = arith.truncf %20 : vector<288x8xf32> to vector<288x8xbf16>
    %c3 = arith.constant 3 : index
    %c0_11 = arith.constant 0 : index
    %c0_12 = arith.constant 0 : index
    %22 = vector.load %arg2[%c3, %c0_11, %c0_12] : memref<9x8x32xbf16, #tpu.memory_space<vmem>>, vector<1x8x32xbf16>
    %23 = vector.shape_cast %22 : vector<1x8x32xbf16> to vector<8x32xbf16>
    %cst_13 = arith.constant dense<0.000000e+00> : vector<288x32xf32>
    %24 = tpu.matmul %21, %23, %cst_13 {dimension_numbers = #tpu.dot_dimension_numbers<[1], [0], [0], [1], [0, 0, 1, 1], [], []>} : vector<288x8xbf16>, vector<8x32xbf16>, vector<288x32xf32> -> vector<288x32xf32>
    %25 = arith.addf %19, %24 : vector<288x32xf32>
    %26 = vector.extract_strided_slice %2 {offsets = [19, 0], sizes = [288, 8], strides = [1, 1]} : vector<328x8xf32> to vector<288x8xf32>
    %27 = arith.truncf %26 : vector<288x8xf32> to vector<288x8xbf16>
    %c4 = arith.constant 4 : index
    %c0_14 = arith.constant 0 : index
    %c0_15 = arith.constant 0 : index
    %28 = vector.load %arg2[%c4, %c0_14, %c0_15] : memref<9x8x32xbf16, #tpu.memory_space<vmem>>, vector<1x8x32xbf16>
    %29 = vector.shape_cast %28 : vector<1x8x32xbf16> to vector<8x32xbf16>
    %cst_16 = arith.constant dense<0.000000e+00> : vector<288x32xf32>
    %30 = tpu.matmul %27, %29, %cst_16 {dimension_numbers = #tpu.dot_dimension_numbers<[1], [0], [0], [1], [0, 0, 1, 1], [], []>} : vector<288x8xbf16>, vector<8x32xbf16>, vector<288x32xf32> -> vector<288x32xf32>
    %31 = arith.addf %25, %30 : vector<288x32xf32>
    %32 = vector.extract_strided_slice %2 {offsets = [20, 0], sizes = [288, 8], strides = [1, 1]} : vector<328x8xf32> to vector<288x8xf32>
    %33 = arith.truncf %32 : vector<288x8xf32> to vector<288x8xbf16>
    %c5 = arith.constant 5 : index
    %c0_17 = arith.constant 0 : index
    %c0_18 = arith.constant 0 : index
    %34 = vector.load %arg2[%c5, %c0_17, %c0_18] : memref<9x8x32xbf16, #tpu.memory_space<vmem>>, vector<1x8x32xbf16>
    %35 = vector.shape_cast %34 : vector<1x8x32xbf16> to vector<8x32xbf16>
    %cst_19 = arith.constant dense<0.000000e+00> : vector<288x32xf32>
    %36 = tpu.matmul %33, %35, %cst_19 {dimension_numbers = #tpu.dot_dimension_numbers<[1], [0], [0], [1], [0, 0, 1, 1], [], []>} : vector<288x8xbf16>, vector<8x32xbf16>, vector<288x32xf32> -> vector<288x32xf32>
    %37 = arith.addf %31, %36 : vector<288x32xf32>
    %38 = vector.extract_strided_slice %2 {offsets = [36, 0], sizes = [288, 8], strides = [1, 1]} : vector<328x8xf32> to vector<288x8xf32>
    %39 = arith.truncf %38 : vector<288x8xf32> to vector<288x8xbf16>
    %c6 = arith.constant 6 : index
    %c0_20 = arith.constant 0 : index
    %c0_21 = arith.constant 0 : index
    %40 = vector.load %arg2[%c6, %c0_20, %c0_21] : memref<9x8x32xbf16, #tpu.memory_space<vmem>>, vector<1x8x32xbf16>
    %41 = vector.shape_cast %40 : vector<1x8x32xbf16> to vector<8x32xbf16>
    %cst_22 = arith.constant dense<0.000000e+00> : vector<288x32xf32>
    %42 = tpu.matmul %39, %41, %cst_22 {dimension_numbers = #tpu.dot_dimension_numbers<[1], [0], [0], [1], [0, 0, 1, 1], [], []>} : vector<288x8xbf16>, vector<8x32xbf16>, vector<288x32xf32> -> vector<288x32xf32>
    %43 = arith.addf %37, %42 : vector<288x32xf32>
    %44 = vector.extract_strided_slice %2 {offsets = [37, 0], sizes = [288, 8], strides = [1, 1]} : vector<328x8xf32> to vector<288x8xf32>
    %45 = arith.truncf %44 : vector<288x8xf32> to vector<288x8xbf16>
    %c7 = arith.constant 7 : index
    %c0_23 = arith.constant 0 : index
    %c0_24 = arith.constant 0 : index
    %46 = vector.load %arg2[%c7, %c0_23, %c0_24] : memref<9x8x32xbf16, #tpu.memory_space<vmem>>, vector<1x8x32xbf16>
    %47 = vector.shape_cast %46 : vector<1x8x32xbf16> to vector<8x32xbf16>
    %cst_25 = arith.constant dense<0.000000e+00> : vector<288x32xf32>
    %48 = tpu.matmul %45, %47, %cst_25 {dimension_numbers = #tpu.dot_dimension_numbers<[1], [0], [0], [1], [0, 0, 1, 1], [], []>} : vector<288x8xbf16>, vector<8x32xbf16>, vector<288x32xf32> -> vector<288x32xf32>
    %49 = arith.addf %43, %48 : vector<288x32xf32>
    %50 = vector.extract_strided_slice %2 {offsets = [38, 0], sizes = [288, 8], strides = [1, 1]} : vector<328x8xf32> to vector<288x8xf32>
    %51 = arith.truncf %50 : vector<288x8xf32> to vector<288x8xbf16>
    %c8 = arith.constant 8 : index
    %c0_26 = arith.constant 0 : index
    %c0_27 = arith.constant 0 : index
    %52 = vector.load %arg2[%c8, %c0_26, %c0_27] : memref<9x8x32xbf16, #tpu.memory_space<vmem>>, vector<1x8x32xbf16>
    %53 = vector.shape_cast %52 : vector<1x8x32xbf16> to vector<8x32xbf16>
    %cst_28 = arith.constant dense<0.000000e+00> : vector<288x32xf32>
    %54 = tpu.matmul %51, %53, %cst_28 {dimension_numbers = #tpu.dot_dimension_numbers<[1], [0], [0], [1], [0, 0, 1, 1], [], []>} : vector<288x8xbf16>, vector<8x32xbf16>, vector<288x32xf32> -> vector<288x32xf32>
    %55 = arith.addf %49, %54 : vector<288x32xf32>
    %c0_29 = arith.constant 0 : index
    %c0_30 = arith.constant 0 : index
    %56 = vector.load %arg3[%c0_29, %c0_30] : memref<1x32xf32, #tpu.memory_space<vmem>>, vector<1x32xf32>
    %57 = vector.broadcast %56 : vector<1x32xf32> to vector<288x32xf32>
    %58 = arith.addf %55, %57 : vector<288x32xf32>
    %cst_31 = arith.constant 0.000000e+00 : f32
    %59 = vector.broadcast %cst_31 : f32 to vector<288x32xf32>
    %60 = arith.maximumf %58, %59 : vector<288x32xf32>
    %c0_32 = arith.constant 0 : index
    %c0_33 = arith.constant 0 : index
    %61 = vector.load %arg12[%c0_32, %c0_33] : memref<328x288xbf16, #tpu.memory_space<vmem>>, vector<328x288xbf16>
    %62 = arith.truncf %60 : vector<288x32xf32> to vector<288x32xbf16>
    %cst_34 = arith.constant dense<0.000000e+00> : vector<328x32xf32>
    %63 = tpu.matmul %61, %62, %cst_34 {dimension_numbers = #tpu.dot_dimension_numbers<[1], [0], [0], [1], [0, 0, 1, 1], [], []>} : vector<328x288xbf16>, vector<288x32xbf16>, vector<328x32xf32> -> vector<328x32xf32>
    %64 = vector.extract_strided_slice %63 {offsets = [0, 0], sizes = [288, 32], strides = [1, 1]} : vector<328x32xf32> to vector<288x32xf32>
    %65 = arith.truncf %64 : vector<288x32xf32> to vector<288x32xbf16>
    %c0_35 = arith.constant 0 : index
    %c0_36 = arith.constant 0 : index
    %c0_37 = arith.constant 0 : index
    %66 = vector.load %arg4[%c0_35, %c0_36, %c0_37] : memref<9x32x64xbf16, #tpu.memory_space<vmem>>, vector<1x32x64xbf16>
    %67 = vector.shape_cast %66 : vector<1x32x64xbf16> to vector<32x64xbf16>
    %cst_38 = arith.constant dense<0.000000e+00> : vector<288x64xf32>
    %68 = tpu.matmul %65, %67, %cst_38 {dimension_numbers = #tpu.dot_dimension_numbers<[1], [0], [0], [1], [0, 0, 1, 1], [], []>} : vector<288x32xbf16>, vector<32x64xbf16>, vector<288x64xf32> -> vector<288x64xf32>
    %69 = vector.extract_strided_slice %63 {offsets = [1, 0], sizes = [288, 32], strides = [1, 1]} : vector<328x32xf32> to vector<288x32xf32>
    %70 = arith.truncf %69 : vector<288x32xf32> to vector<288x32xbf16>
    %c1_39 = arith.constant 1 : index
    %c0_40 = arith.constant 0 : index
    %c0_41 = arith.constant 0 : index
    %71 = vector.load %arg4[%c1_39, %c0_40, %c0_41] : memref<9x32x64xbf16, #tpu.memory_space<vmem>>, vector<1x32x64xbf16>
    %72 = vector.shape_cast %71 : vector<1x32x64xbf16> to vector<32x64xbf16>
    %cst_42 = arith.constant dense<0.000000e+00> : vector<288x64xf32>
    %73 = tpu.matmul %70, %72, %cst_42 {dimension_numbers = #tpu.dot_dimension_numbers<[1], [0], [0], [1], [0, 0, 1, 1], [], []>} : vector<288x32xbf16>, vector<32x64xbf16>, vector<288x64xf32> -> vector<288x64xf32>
    %74 = arith.addf %68, %73 : vector<288x64xf32>
    %75 = vector.extract_strided_slice %63 {offsets = [2, 0], sizes = [288, 32], strides = [1, 1]} : vector<328x32xf32> to vector<288x32xf32>
    %76 = arith.truncf %75 : vector<288x32xf32> to vector<288x32xbf16>
    %c2_43 = arith.constant 2 : index
    %c0_44 = arith.constant 0 : index
    %c0_45 = arith.constant 0 : index
    %77 = vector.load %arg4[%c2_43, %c0_44, %c0_45] : memref<9x32x64xbf16, #tpu.memory_space<vmem>>, vector<1x32x64xbf16>
    %78 = vector.shape_cast %77 : vector<1x32x64xbf16> to vector<32x64xbf16>
    %cst_46 = arith.constant dense<0.000000e+00> : vector<288x64xf32>
    %79 = tpu.matmul %76, %78, %cst_46 {dimension_numbers = #tpu.dot_dimension_numbers<[1], [0], [0], [1], [0, 0, 1, 1], [], []>} : vector<288x32xbf16>, vector<32x64xbf16>, vector<288x64xf32> -> vector<288x64xf32>
    %80 = arith.addf %74, %79 : vector<288x64xf32>
    %81 = vector.extract_strided_slice %63 {offsets = [18, 0], sizes = [288, 32], strides = [1, 1]} : vector<328x32xf32> to vector<288x32xf32>
    %82 = arith.truncf %81 : vector<288x32xf32> to vector<288x32xbf16>
    %c3_47 = arith.constant 3 : index
    %c0_48 = arith.constant 0 : index
    %c0_49 = arith.constant 0 : index
    %83 = vector.load %arg4[%c3_47, %c0_48, %c0_49] : memref<9x32x64xbf16, #tpu.memory_space<vmem>>, vector<1x32x64xbf16>
    %84 = vector.shape_cast %83 : vector<1x32x64xbf16> to vector<32x64xbf16>
    %cst_50 = arith.constant dense<0.000000e+00> : vector<288x64xf32>
    %85 = tpu.matmul %82, %84, %cst_50 {dimension_numbers = #tpu.dot_dimension_numbers<[1], [0], [0], [1], [0, 0, 1, 1], [], []>} : vector<288x32xbf16>, vector<32x64xbf16>, vector<288x64xf32> -> vector<288x64xf32>
    %86 = arith.addf %80, %85 : vector<288x64xf32>
    %87 = vector.extract_strided_slice %63 {offsets = [19, 0], sizes = [288, 32], strides = [1, 1]} : vector<328x32xf32> to vector<288x32xf32>
    %88 = arith.truncf %87 : vector<288x32xf32> to vector<288x32xbf16>
    %c4_51 = arith.constant 4 : index
    %c0_52 = arith.constant 0 : index
    %c0_53 = arith.constant 0 : index
    %89 = vector.load %arg4[%c4_51, %c0_52, %c0_53] : memref<9x32x64xbf16, #tpu.memory_space<vmem>>, vector<1x32x64xbf16>
    %90 = vector.shape_cast %89 : vector<1x32x64xbf16> to vector<32x64xbf16>
    %cst_54 = arith.constant dense<0.000000e+00> : vector<288x64xf32>
    %91 = tpu.matmul %88, %90, %cst_54 {dimension_numbers = #tpu.dot_dimension_numbers<[1], [0], [0], [1], [0, 0, 1, 1], [], []>} : vector<288x32xbf16>, vector<32x64xbf16>, vector<288x64xf32> -> vector<288x64xf32>
    %92 = arith.addf %86, %91 : vector<288x64xf32>
    %93 = vector.extract_strided_slice %63 {offsets = [20, 0], sizes = [288, 32], strides = [1, 1]} : vector<328x32xf32> to vector<288x32xf32>
    %94 = arith.truncf %93 : vector<288x32xf32> to vector<288x32xbf16>
    %c5_55 = arith.constant 5 : index
    %c0_56 = arith.constant 0 : index
    %c0_57 = arith.constant 0 : index
    %95 = vector.load %arg4[%c5_55, %c0_56, %c0_57] : memref<9x32x64xbf16, #tpu.memory_space<vmem>>, vector<1x32x64xbf16>
    %96 = vector.shape_cast %95 : vector<1x32x64xbf16> to vector<32x64xbf16>
    %cst_58 = arith.constant dense<0.000000e+00> : vector<288x64xf32>
    %97 = tpu.matmul %94, %96, %cst_58 {dimension_numbers = #tpu.dot_dimension_numbers<[1], [0], [0], [1], [0, 0, 1, 1], [], []>} : vector<288x32xbf16>, vector<32x64xbf16>, vector<288x64xf32> -> vector<288x64xf32>
    %98 = arith.addf %92, %97 : vector<288x64xf32>
    %99 = vector.extract_strided_slice %63 {offsets = [36, 0], sizes = [288, 32], strides = [1, 1]} : vector<328x32xf32> to vector<288x32xf32>
    %100 = arith.truncf %99 : vector<288x32xf32> to vector<288x32xbf16>
    %c6_59 = arith.constant 6 : index
    %c0_60 = arith.constant 0 : index
    %c0_61 = arith.constant 0 : index
    %101 = vector.load %arg4[%c6_59, %c0_60, %c0_61] : memref<9x32x64xbf16, #tpu.memory_space<vmem>>, vector<1x32x64xbf16>
    %102 = vector.shape_cast %101 : vector<1x32x64xbf16> to vector<32x64xbf16>
    %cst_62 = arith.constant dense<0.000000e+00> : vector<288x64xf32>
    %103 = tpu.matmul %100, %102, %cst_62 {dimension_numbers = #tpu.dot_dimension_numbers<[1], [0], [0], [1], [0, 0, 1, 1], [], []>} : vector<288x32xbf16>, vector<32x64xbf16>, vector<288x64xf32> -> vector<288x64xf32>
    %104 = arith.addf %98, %103 : vector<288x64xf32>
    %105 = vector.extract_strided_slice %63 {offsets = [37, 0], sizes = [288, 32], strides = [1, 1]} : vector<328x32xf32> to vector<288x32xf32>
    %106 = arith.truncf %105 : vector<288x32xf32> to vector<288x32xbf16>
    %c7_63 = arith.constant 7 : index
    %c0_64 = arith.constant 0 : index
    %c0_65 = arith.constant 0 : index
    %107 = vector.load %arg4[%c7_63, %c0_64, %c0_65] : memref<9x32x64xbf16, #tpu.memory_space<vmem>>, vector<1x32x64xbf16>
    %108 = vector.shape_cast %107 : vector<1x32x64xbf16> to vector<32x64xbf16>
    %cst_66 = arith.constant dense<0.000000e+00> : vector<288x64xf32>
    %109 = tpu.matmul %106, %108, %cst_66 {dimension_numbers = #tpu.dot_dimension_numbers<[1], [0], [0], [1], [0, 0, 1, 1], [], []>} : vector<288x32xbf16>, vector<32x64xbf16>, vector<288x64xf32> -> vector<288x64xf32>
    %110 = arith.addf %104, %109 : vector<288x64xf32>
    %111 = vector.extract_strided_slice %63 {offsets = [38, 0], sizes = [288, 32], strides = [1, 1]} : vector<328x32xf32> to vector<288x32xf32>
    %112 = arith.truncf %111 : vector<288x32xf32> to vector<288x32xbf16>
    %c8_67 = arith.constant 8 : index
    %c0_68 = arith.constant 0 : index
    %c0_69 = arith.constant 0 : index
    %113 = vector.load %arg4[%c8_67, %c0_68, %c0_69] : memref<9x32x64xbf16, #tpu.memory_space<vmem>>, vector<1x32x64xbf16>
    %114 = vector.shape_cast %113 : vector<1x32x64xbf16> to vector<32x64xbf16>
    %cst_70 = arith.constant dense<0.000000e+00> : vector<288x64xf32>
    %115 = tpu.matmul %112, %114, %cst_70 {dimension_numbers = #tpu.dot_dimension_numbers<[1], [0], [0], [1], [0, 0, 1, 1], [], []>} : vector<288x32xbf16>, vector<32x64xbf16>, vector<288x64xf32> -> vector<288x64xf32>
    %116 = arith.addf %110, %115 : vector<288x64xf32>
    %c0_71 = arith.constant 0 : index
    %c0_72 = arith.constant 0 : index
    %117 = vector.load %arg5[%c0_71, %c0_72] : memref<1x64xf32, #tpu.memory_space<vmem>>, vector<1x64xf32>
    %118 = vector.broadcast %117 : vector<1x64xf32> to vector<288x64xf32>
    %119 = arith.addf %116, %118 : vector<288x64xf32>
    %cst_73 = arith.constant 0.000000e+00 : f32
    %120 = vector.broadcast %cst_73 : f32 to vector<288x64xf32>
    %121 = arith.maximumf %119, %120 : vector<288x64xf32>
    %c0_74 = arith.constant 0 : index
    %c0_75 = arith.constant 0 : index
    %122 = vector.load %arg6[%c0_74, %c0_75] : memref<1x64xf32, #tpu.memory_space<vmem>>, vector<1x64xf32>
    %123 = vector.broadcast %122 : vector<1x64xf32> to vector<288x64xf32>
    %124 = arith.mulf %121, %123 : vector<288x64xf32>
    %c0_76 = arith.constant 0 : index
    %c0_77 = arith.constant 0 : index
    %125 = vector.load %arg7[%c0_76, %c0_77] : memref<1x64xf32, #tpu.memory_space<vmem>>, vector<1x64xf32>
    %126 = vector.broadcast %125 : vector<1x64xf32> to vector<288x64xf32>
    %127 = arith.addf %124, %126 : vector<288x64xf32>
    %128 = vector.extract_strided_slice %127 {offsets = [0, 0], sizes = [267, 64], strides = [1, 1]} : vector<288x64xf32> to vector<267x64xf32>
    %129 = vector.extract_strided_slice %127 {offsets = [1, 0], sizes = [267, 64], strides = [1, 1]} : vector<288x64xf32> to vector<267x64xf32>
    %130 = arith.maximumf %128, %129 : vector<267x64xf32>
    %131 = vector.extract_strided_slice %127 {offsets = [18, 0], sizes = [267, 64], strides = [1, 1]} : vector<288x64xf32> to vector<267x64xf32>
    %132 = vector.extract_strided_slice %127 {offsets = [19, 0], sizes = [267, 64], strides = [1, 1]} : vector<288x64xf32> to vector<267x64xf32>
    %133 = arith.maximumf %131, %132 : vector<267x64xf32>
    %134 = arith.maximumf %130, %133 : vector<267x64xf32>
    %c0_78 = arith.constant 0 : index
    %c0_79 = arith.constant 0 : index
    %135 = vector.load %arg13[%c0_78, %c0_79] : memref<104x267xbf16, #tpu.memory_space<vmem>>, vector<104x267xbf16>
    %136 = arith.truncf %134 : vector<267x64xf32> to vector<267x64xbf16>
    %cst_80 = arith.constant dense<0.000000e+00> : vector<104x64xf32>
    %137 = tpu.matmul %135, %136, %cst_80 {dimension_numbers = #tpu.dot_dimension_numbers<[1], [0], [0], [1], [0, 0, 1, 1], [], []>} : vector<104x267xbf16>, vector<267x64xbf16>, vector<104x64xf32> -> vector<104x64xf32>
    %138 = vector.extract_strided_slice %137 {offsets = [0, 0], sizes = [80, 64], strides = [1, 1]} : vector<104x64xf32> to vector<80x64xf32>
    %139 = arith.truncf %138 : vector<80x64xf32> to vector<80x64xbf16>
    %c0_81 = arith.constant 0 : index
    %c0_82 = arith.constant 0 : index
    %c0_83 = arith.constant 0 : index
    %140 = vector.load %arg8[%c0_81, %c0_82, %c0_83] : memref<9x64x128xbf16, #tpu.memory_space<vmem>>, vector<1x64x128xbf16>
    %141 = vector.shape_cast %140 : vector<1x64x128xbf16> to vector<64x128xbf16>
    %cst_84 = arith.constant dense<0.000000e+00> : vector<80x128xf32>
    %142 = tpu.matmul %139, %141, %cst_84 {dimension_numbers = #tpu.dot_dimension_numbers<[1], [0], [0], [1], [0, 0, 1, 1], [], []>} : vector<80x64xbf16>, vector<64x128xbf16>, vector<80x128xf32> -> vector<80x128xf32>
    %143 = vector.extract_strided_slice %137 {offsets = [1, 0], sizes = [80, 64], strides = [1, 1]} : vector<104x64xf32> to vector<80x64xf32>
    %144 = arith.truncf %143 : vector<80x64xf32> to vector<80x64xbf16>
    %c1_85 = arith.constant 1 : index
    %c0_86 = arith.constant 0 : index
    %c0_87 = arith.constant 0 : index
    %145 = vector.load %arg8[%c1_85, %c0_86, %c0_87] : memref<9x64x128xbf16, #tpu.memory_space<vmem>>, vector<1x64x128xbf16>
    %146 = vector.shape_cast %145 : vector<1x64x128xbf16> to vector<64x128xbf16>
    %cst_88 = arith.constant dense<0.000000e+00> : vector<80x128xf32>
    %147 = tpu.matmul %144, %146, %cst_88 {dimension_numbers = #tpu.dot_dimension_numbers<[1], [0], [0], [1], [0, 0, 1, 1], [], []>} : vector<80x64xbf16>, vector<64x128xbf16>, vector<80x128xf32> -> vector<80x128xf32>
    %148 = arith.addf %142, %147 : vector<80x128xf32>
    %149 = vector.extract_strided_slice %137 {offsets = [2, 0], sizes = [80, 64], strides = [1, 1]} : vector<104x64xf32> to vector<80x64xf32>
    %150 = arith.truncf %149 : vector<80x64xf32> to vector<80x64xbf16>
    %c2_89 = arith.constant 2 : index
    %c0_90 = arith.constant 0 : index
    %c0_91 = arith.constant 0 : index
    %151 = vector.load %arg8[%c2_89, %c0_90, %c0_91] : memref<9x64x128xbf16, #tpu.memory_space<vmem>>, vector<1x64x128xbf16>
    %152 = vector.shape_cast %151 : vector<1x64x128xbf16> to vector<64x128xbf16>
    %cst_92 = arith.constant dense<0.000000e+00> : vector<80x128xf32>
    %153 = tpu.matmul %150, %152, %cst_92 {dimension_numbers = #tpu.dot_dimension_numbers<[1], [0], [0], [1], [0, 0, 1, 1], [], []>} : vector<80x64xbf16>, vector<64x128xbf16>, vector<80x128xf32> -> vector<80x128xf32>
    %154 = arith.addf %148, %153 : vector<80x128xf32>
    %155 = vector.extract_strided_slice %137 {offsets = [10, 0], sizes = [80, 64], strides = [1, 1]} : vector<104x64xf32> to vector<80x64xf32>
    %156 = arith.truncf %155 : vector<80x64xf32> to vector<80x64xbf16>
    %c3_93 = arith.constant 3 : index
    %c0_94 = arith.constant 0 : index
    %c0_95 = arith.constant 0 : index
    %157 = vector.load %arg8[%c3_93, %c0_94, %c0_95] : memref<9x64x128xbf16, #tpu.memory_space<vmem>>, vector<1x64x128xbf16>
    %158 = vector.shape_cast %157 : vector<1x64x128xbf16> to vector<64x128xbf16>
    %cst_96 = arith.constant dense<0.000000e+00> : vector<80x128xf32>
    %159 = tpu.matmul %156, %158, %cst_96 {dimension_numbers = #tpu.dot_dimension_numbers<[1], [0], [0], [1], [0, 0, 1, 1], [], []>} : vector<80x64xbf16>, vector<64x128xbf16>, vector<80x128xf32> -> vector<80x128xf32>
    %160 = arith.addf %154, %159 : vector<80x128xf32>
    %161 = vector.extract_strided_slice %137 {offsets = [11, 0], sizes = [80, 64], strides = [1, 1]} : vector<104x64xf32> to vector<80x64xf32>
    %162 = arith.truncf %161 : vector<80x64xf32> to vector<80x64xbf16>
    %c4_97 = arith.constant 4 : index
    %c0_98 = arith.constant 0 : index
    %c0_99 = arith.constant 0 : index
    %163 = vector.load %arg8[%c4_97, %c0_98, %c0_99] : memref<9x64x128xbf16, #tpu.memory_space<vmem>>, vector<1x64x128xbf16>
    %164 = vector.shape_cast %163 : vector<1x64x128xbf16> to vector<64x128xbf16>
    %cst_100 = arith.constant dense<0.000000e+00> : vector<80x128xf32>
    %165 = tpu.matmul %162, %164, %cst_100 {dimension_numbers = #tpu.dot_dimension_numbers<[1], [0], [0], [1], [0, 0, 1, 1], [], []>} : vector<80x64xbf16>, vector<64x128xbf16>, vector<80x128xf32> -> vector<80x128xf32>
    %166 = arith.addf %160, %165 : vector<80x128xf32>
    %167 = vector.extract_strided_slice %137 {offsets = [12, 0], sizes = [80, 64], strides = [1, 1]} : vector<104x64xf32> to vector<80x64xf32>
    %168 = arith.truncf %167 : vector<80x64xf32> to vector<80x64xbf16>
    %c5_101 = arith.constant 5 : index
    %c0_102 = arith.constant 0 : index
    %c0_103 = arith.constant 0 : index
    %169 = vector.load %arg8[%c5_101, %c0_102, %c0_103] : memref<9x64x128xbf16, #tpu.memory_space<vmem>>, vector<1x64x128xbf16>
    %170 = vector.shape_cast %169 : vector<1x64x128xbf16> to vector<64x128xbf16>
    %cst_104 = arith.constant dense<0.000000e+00> : vector<80x128xf32>
    %171 = tpu.matmul %168, %170, %cst_104 {dimension_numbers = #tpu.dot_dimension_numbers<[1], [0], [0], [1], [0, 0, 1, 1], [], []>} : vector<80x64xbf16>, vector<64x128xbf16>, vector<80x128xf32> -> vector<80x128xf32>
    %172 = arith.addf %166, %171 : vector<80x128xf32>
    %173 = vector.extract_strided_slice %137 {offsets = [20, 0], sizes = [80, 64], strides = [1, 1]} : vector<104x64xf32> to vector<80x64xf32>
    %174 = arith.truncf %173 : vector<80x64xf32> to vector<80x64xbf16>
    %c6_105 = arith.constant 6 : index
    %c0_106 = arith.constant 0 : index
    %c0_107 = arith.constant 0 : index
    %175 = vector.load %arg8[%c6_105, %c0_106, %c0_107] : memref<9x64x128xbf16, #tpu.memory_space<vmem>>, vector<1x64x128xbf16>
    %176 = vector.shape_cast %175 : vector<1x64x128xbf16> to vector<64x128xbf16>
    %cst_108 = arith.constant dense<0.000000e+00> : vector<80x128xf32>
    %177 = tpu.matmul %174, %176, %cst_108 {dimension_numbers = #tpu.dot_dimension_numbers<[1], [0], [0], [1], [0, 0, 1, 1], [], []>} : vector<80x64xbf16>, vector<64x128xbf16>, vector<80x128xf32> -> vector<80x128xf32>
    %178 = arith.addf %172, %177 : vector<80x128xf32>
    %179 = vector.extract_strided_slice %137 {offsets = [21, 0], sizes = [80, 64], strides = [1, 1]} : vector<104x64xf32> to vector<80x64xf32>
    %180 = arith.truncf %179 : vector<80x64xf32> to vector<80x64xbf16>
    %c7_109 = arith.constant 7 : index
    %c0_110 = arith.constant 0 : index
    %c0_111 = arith.constant 0 : index
    %181 = vector.load %arg8[%c7_109, %c0_110, %c0_111] : memref<9x64x128xbf16, #tpu.memory_space<vmem>>, vector<1x64x128xbf16>
    %182 = vector.shape_cast %181 : vector<1x64x128xbf16> to vector<64x128xbf16>
    %cst_112 = arith.constant dense<0.000000e+00> : vector<80x128xf32>
    %183 = tpu.matmul %180, %182, %cst_112 {dimension_numbers = #tpu.dot_dimension_numbers<[1], [0], [0], [1], [0, 0, 1, 1], [], []>} : vector<80x64xbf16>, vector<64x128xbf16>, vector<80x128xf32> -> vector<80x128xf32>
    %184 = arith.addf %178, %183 : vector<80x128xf32>
    %185 = vector.extract_strided_slice %137 {offsets = [22, 0], sizes = [80, 64], strides = [1, 1]} : vector<104x64xf32> to vector<80x64xf32>
    %186 = arith.truncf %185 : vector<80x64xf32> to vector<80x64xbf16>
    %c8_113 = arith.constant 8 : index
    %c0_114 = arith.constant 0 : index
    %c0_115 = arith.constant 0 : index
    %187 = vector.load %arg8[%c8_113, %c0_114, %c0_115] : memref<9x64x128xbf16, #tpu.memory_space<vmem>>, vector<1x64x128xbf16>
    %188 = vector.shape_cast %187 : vector<1x64x128xbf16> to vector<64x128xbf16>
    %cst_116 = arith.constant dense<0.000000e+00> : vector<80x128xf32>
    %189 = tpu.matmul %186, %188, %cst_116 {dimension_numbers = #tpu.dot_dimension_numbers<[1], [0], [0], [1], [0, 0, 1, 1], [], []>} : vector<80x64xbf16>, vector<64x128xbf16>, vector<80x128xf32> -> vector<80x128xf32>
    %190 = arith.addf %184, %189 : vector<80x128xf32>
    %c0_117 = arith.constant 0 : index
    %c0_118 = arith.constant 0 : index
    %191 = vector.load %arg9[%c0_117, %c0_118] : memref<1x128xf32, #tpu.memory_space<vmem>>, vector<1x128xf32>
    %192 = vector.broadcast %191 : vector<1x128xf32> to vector<80x128xf32>
    %193 = arith.addf %190, %192 : vector<80x128xf32>
    %cst_119 = arith.constant 0.000000e+00 : f32
    %194 = vector.broadcast %cst_119 : f32 to vector<80x128xf32>
    %195 = arith.maximumf %193, %194 : vector<80x128xf32>
    %c0_120 = arith.constant 0 : index
    %c0_121 = arith.constant 0 : index
    %196 = vector.load %arg10[%c0_120, %c0_121] : memref<1x128xf32, #tpu.memory_space<vmem>>, vector<1x128xf32>
    %197 = vector.broadcast %196 : vector<1x128xf32> to vector<80x128xf32>
    %198 = arith.mulf %195, %197 : vector<80x128xf32>
    %c0_122 = arith.constant 0 : index
    %c0_123 = arith.constant 0 : index
    %199 = vector.load %arg11[%c0_122, %c0_123] : memref<1x128xf32, #tpu.memory_space<vmem>>, vector<1x128xf32>
    %200 = vector.broadcast %199 : vector<1x128xf32> to vector<80x128xf32>
    %201 = arith.addf %198, %200 : vector<80x128xf32>
    %202 = vector.extract_strided_slice %201 {offsets = [0, 0], sizes = [67, 128], strides = [1, 1]} : vector<80x128xf32> to vector<67x128xf32>
    %203 = vector.extract_strided_slice %201 {offsets = [1, 0], sizes = [67, 128], strides = [1, 1]} : vector<80x128xf32> to vector<67x128xf32>
    %204 = arith.maximumf %202, %203 : vector<67x128xf32>
    %205 = vector.extract_strided_slice %201 {offsets = [10, 0], sizes = [67, 128], strides = [1, 1]} : vector<80x128xf32> to vector<67x128xf32>
    %206 = vector.extract_strided_slice %201 {offsets = [11, 0], sizes = [67, 128], strides = [1, 1]} : vector<80x128xf32> to vector<67x128xf32>
    %207 = arith.maximumf %205, %206 : vector<67x128xf32>
    %208 = arith.maximumf %204, %207 : vector<67x128xf32>
    %c0_124 = arith.constant 0 : index
    %c0_125 = arith.constant 0 : index
    %209 = vector.load %arg14[%c0_124, %c0_125] : memref<1x67xf32, #tpu.memory_space<vmem>>, vector<1x67xf32>
    %cst_126 = arith.constant dense<0.000000e+00> : vector<1x128xf32>
    %210 = tpu.matmul %209, %208, %cst_126 {dimension_numbers = #tpu.dot_dimension_numbers<[1], [0], [0], [1], [0, 0, 1, 1], [], []>} : vector<1x67xf32>, vector<67x128xf32>, vector<1x128xf32> -> vector<1x128xf32>
    %211 = arith.truncf %210 : vector<1x128xf32> to vector<1x128xbf16>
    %c0_127 = arith.constant 0 : index
    %c0_128 = arith.constant 0 : index
    %212 = vector.load %arg15[%c0_127, %c0_128] : memref<128x512xbf16, #tpu.memory_space<vmem>>, vector<128x512xbf16>
    %cst_129 = arith.constant dense<0.000000e+00> : vector<1x512xf32>
    %213 = tpu.matmul %211, %212, %cst_129 {dimension_numbers = #tpu.dot_dimension_numbers<[1], [0], [0], [1], [0, 0, 1, 1], [], []>} : vector<1x128xbf16>, vector<128x512xbf16>, vector<1x512xf32> -> vector<1x512xf32>
    %c0_130 = arith.constant 0 : index
    %c0_131 = arith.constant 0 : index
    %214 = vector.load %arg16[%c0_130, %c0_131] : memref<1x512xf32, #tpu.memory_space<vmem>>, vector<1x512xf32>
    %215 = arith.addf %213, %214 : vector<1x512xf32>
    %216 = arith.truncf %215 : vector<1x512xf32> to vector<1x512xbf16>
    %c0_132 = arith.constant 0 : index
    %c0_133 = arith.constant 0 : index
    %217 = vector.load %arg17[%c0_132, %c0_133] : memref<512x128xbf16, #tpu.memory_space<vmem>>, vector<512x128xbf16>
    %cst_134 = arith.constant dense<0.000000e+00> : vector<1x128xf32>
    %218 = tpu.matmul %216, %217, %cst_134 {dimension_numbers = #tpu.dot_dimension_numbers<[1], [0], [0], [1], [0, 0, 1, 1], [], []>} : vector<1x512xbf16>, vector<512x128xbf16>, vector<1x128xf32> -> vector<1x128xf32>
    %c0_135 = arith.constant 0 : index
    %c0_136 = arith.constant 0 : index
    %219 = vector.load %arg18[%c0_135, %c0_136] : memref<1x128xf32, #tpu.memory_space<vmem>>, vector<1x128xf32>
    %220 = arith.addf %218, %219 : vector<1x128xf32>
    %c0_137 = arith.constant 0 : index
    %c0_138 = arith.constant 0 : index
    %c0_139 = arith.constant 0 : index
    %221 = vector.load %arg19[%c0_137, %c0_138, %c0_139] : memref<1x1x128xf32, #tpu.memory_space<vmem>>, vector<1x1x128xf32>
    %222 = vector.shape_cast %221 : vector<1x1x128xf32> to vector<1x128xf32>
    %223 = vector.shape_cast %220 : vector<1x128xf32> to vector<1x1x128xf32>
    tpu.vector_store %arg19[%c0_137, %c0_138, %c0_139], %223 {strides = array<i32>} : memref<1x1x128xf32, #tpu.memory_space<vmem>>, vector<1x1x128xf32>,
    return
  }
  func.func @transform_0(%arg0: i32) -> (i32, i32, i32) {
    %c0_i32 = arith.constant 0 : i32
    %c0_i32_0 = arith.constant 0 : i32
    %c0_i32_1 = arith.constant 0 : i32
    return %arg0, %c0_i32, %c0_i32_0 : i32, i32, i32
  }
  func.func @transform_1(%arg0: i32) -> (i32, i32, i32) {
    %c0_i32 = arith.constant 0 : i32
    %c0_i32_0 = arith.constant 0 : i32
    %c0_i32_1 = arith.constant 0 : i32
    %c0_i32_2 = arith.constant 0 : i32
    return %c0_i32, %c0_i32_0, %c0_i32_1 : i32, i32, i32
  }
  func.func @transform_2(%arg0: i32) -> (i32, i32) {
    %c0_i32 = arith.constant 0 : i32
    %c0_i32_0 = arith.constant 0 : i32
    %c0_i32_1 = arith.constant 0 : i32
    return %c0_i32, %c0_i32_0 : i32, i32
  }
  func.func @transform_3(%arg0: i32) -> (i32, i32, i32) {
    %c0_i32 = arith.constant 0 : i32
    %c0_i32_0 = arith.constant 0 : i32
    %c0_i32_1 = arith.constant 0 : i32
    %c0_i32_2 = arith.constant 0 : i32
    return %c0_i32, %c0_i32_0, %c0_i32_1 : i32, i32, i32
  }
  func.func @transform_4(%arg0: i32) -> (i32, i32) {
    %c0_i32 = arith.constant 0 : i32
    %c0_i32_0 = arith.constant 0 : i32
    %c0_i32_1 = arith.constant 0 : i32
    return %c0_i32, %c0_i32_0 : i32, i32
  }
  func.func @transform_5(%arg0: i32) -> (i32, i32) {
    %c0_i32 = arith.constant 0 : i32
    %c0_i32_0 = arith.constant 0 : i32
    %c0_i32_1 = arith.constant 0 : i32
    return %c0_i32, %c0_i32_0 : i32, i32
  }
  func.func @transform_6(%arg0: i32) -> (i32, i32) {
    %c0_i32 = arith.constant 0 : i32
    %c0_i32_0 = arith.constant 0 : i32
    %c0_i32_1 = arith.constant 0 : i32
    return %c0_i32, %c0_i32_0 : i32, i32
  }
  func.func @transform_7(%arg0: i32) -> (i32, i32, i32) {
    %c0_i32 = arith.constant 0 : i32
    %c0_i32_0 = arith.constant 0 : i32
    %c0_i32_1 = arith.constant 0 : i32
    %c0_i32_2 = arith.constant 0 : i32
    return %c0_i32, %c0_i32_0, %c0_i32_1 : i32, i32, i32
  }
  func.func @transform_8(%arg0: i32) -> (i32, i32) {
    %c0_i32 = arith.constant 0 : i32
    %c0_i32_0 = arith.constant 0 : i32
    %c0_i32_1 = arith.constant 0 : i32
    return %c0_i32, %c0_i32_0 : i32, i32
  }
  func.func @transform_9(%arg0: i32) -> (i32, i32) {
    %c0_i32 = arith.constant 0 : i32
    %c0_i32_0 = arith.constant 0 : i32
    %c0_i32_1 = arith.constant 0 : i32
    return %c0_i32, %c0_i32_0 : i32, i32
  }
  func.func @transform_10(%arg0: i32) -> (i32, i32) {
    %c0_i32 = arith.constant 0 : i32
    %c0_i32_0 = arith.constant 0 : i32
    %c0_i32_1 = arith.constant 0 : i32
    return %c0_i32, %c0_i32_0 : i32, i32
  }
  func.func @transform_11(%arg0: i32) -> (i32, i32) {
    %c0_i32 = arith.constant 0 : i32
    %c0_i32_0 = arith.constant 0 : i32
    %c0_i32_1 = arith.constant 0 : i32
    return %c0_i32, %c0_i32_0 : i32, i32
  }
  func.func @transform_12(%arg0: i32) -> (i32, i32) {
    %c0_i32 = arith.constant 0 : i32
    %c0_i32_0 = arith.constant 0 : i32
    %c0_i32_1 = arith.constant 0 : i32
    return %c0_i32, %c0_i32_0 : i32, i32
  }
  func.func @transform_13(%arg0: i32) -> (i32, i32) {
    %c0_i32 = arith.constant 0 : i32
    %c0_i32_0 = arith.constant 0 : i32
    %c0_i32_1 = arith.constant 0 : i32
    return %c0_i32, %c0_i32_0 : i32, i32
  }
  func.func @transform_14(%arg0: i32) -> (i32, i32) {
    %c0_i32 = arith.constant 0 : i32
    %c0_i32_0 = arith.constant 0 : i32
    %c0_i32_1 = arith.constant 0 : i32
    return %c0_i32, %c0_i32_0 : i32, i32
  }
  func.func @transform_15(%arg0: i32) -> (i32, i32) {
    %c0_i32 = arith.constant 0 : i32
    %c0_i32_0 = arith.constant 0 : i32
    %c0_i32_1 = arith.constant 0 : i32
    return %c0_i32, %c0_i32_0 : i32, i32
  }
  func.func @transform_16(%arg0: i32) -> (i32, i32) {
    %c0_i32 = arith.constant 0 : i32
    %c0_i32_0 = arith.constant 0 : i32
    %c0_i32_1 = arith.constant 0 : i32
    return %c0_i32, %c0_i32_0 : i32, i32
  }
  func.func @transform_17(%arg0: i32) -> (i32, i32) {
    %c0_i32 = arith.constant 0 : i32
    %c0_i32_0 = arith.constant 0 : i32
    %c0_i32_1 = arith.constant 0 : i32
    return %c0_i32, %c0_i32_0 : i32, i32
  }
  func.func @transform_18(%arg0: i32) -> (i32, i32, i32) {
    %c0_i32 = arith.constant 0 : i32
    %c0_i32_0 = arith.constant 0 : i32
    %c0_i32_1 = arith.constant 0 : i32
    return %arg0, %c0_i32, %c0_i32_0 : i32, i32, i32
  }
}

</mosaic_0001>

<bundles_post_ra>
// kernel: standard_cnn_forward.1
= control target key start
LH: loop header
LB: loop body
LE: loop exit
PB: predicated region body
PF: predicated region fallthrough
CT: control target
= control target key end

     0   :  { %s14590_s0 = inlined_call_operand.vmem [shape: bf16[2,328,8], index: 0, kind: input, shape index: {}]   ;;  %s14591_s1 = inlined_call_operand.hbm [shape: bf16[9,8,32], index: 1, kind: input, shape index: {}]   ;;  %s14592_s2 = inlined_call_operand.vmem [shape: f32[1,32], index: 2, kind: input, shape index: {}]   ;;  %s14593_s3 = inlined_call_operand.vmem [shape: bf16[9,32,64], index: 3, kind: input, shape index: {}]   ;;  %s14594_s4 = inlined_call_operand.vmem [shape: f32[1,64], index: 4, kind: input, shape index: {}]   ;;  %s14595_s5 = inlined_call_operand.vmem [shape: f32[1,64], index: 5, kind: input, shape index: {}]   ;;  %s14596_s6 = inlined_call_operand.vmem [shape: f32[1,64], index: 6, kind: input, shape index: {}]   ;;  %s14597_s7 = inlined_call_operand.vmem [shape: bf16[9,64,128], index: 7, kind: input, shape index: {}]   ;;  %s14598_s8 = inlined_call_operand.vmem [shape: f32[1,128], index: 8, kind: input, shape index: {}]   ;;  %s14599_s9 = inlined_call_operand.vmem [shape: f32[1,128], index: 9, kind: input, shape index: {}]   ;;  %s14600_s10 = inlined_call_operand.vmem [shape: f32[1,128], index: 10, kind: input, shape index: {}]   ;;  %s14601_s11 = inlined_call_operand.vmem [shape: bf16[328,288], index: 11, kind: input, shape index: {}]   ;;  %s14602_s12 = inlined_call_operand.vmem [shape: bf16[104,267], index: 12, kind: input, shape index: {}]   ;;  %s14603_s13 = inlined_call_operand.vmem [shape: f32[1,67], index: 13, kind: input, shape index: {}]   ;;  %s14604_s14 = inlined_call_operand.vmem [shape: bf16[128,512], index: 14, kind: input, shape index: {}]   ;;  %s14605_s15 = inlined_call_operand.vmem [shape: f32[1,512], index: 15, kind: input, shape index: {}]   ;;  %s14606_s16 = inlined_call_operand.vmem [shape: bf16[512,128], index: 16, kind: input, shape index: {}]   ;;  %s14607_s17 = inlined_call_operand.vmem [shape: f32[1,128], index: 17, kind: input, shape index: {}]   ;;  %s14608_s18 = inlined_call_operand.hbm [shape: f32[2,1,128], index: 18, kind: output, shape index: {}]  }
   0x1   :  { %14663 = sst [smem:[#allocation76_spill]] %s14590_s0 }
   0x2   :  { %14664 = sst [smem:[#allocation77_spill]] %s14591_s1 }
   0x3   :  { %14665 = sst [smem:[#allocation78_spill]] %s14592_s2 }
   0x4   :  { %14666 = sst [smem:[#allocation79_spill]] %s14593_s3 }
   0x5   :  { %14667 = sst [smem:[#allocation80_spill]] %s14594_s4 }
   0x6   :  { %23 = vsyncpa [#allocation3], 0 }
   0x7   :  { %24 = vsyncpa [#allocation4], 0 }
   0x8   :  { %26 = vsyncpa [#allocation4 + $0x1], 0  ;;  %s10275_s27 = smov 0   ;;  %s10277_s28 = smov 0  }
   0x9   :  { %s10279_s29 = smov 0   ;;  %s10281_s30 = smov 0  }
   0xa LB: > { %14668 = sst [smem:[#allocation8_spill]] %s10170_s29  ;;  %s10296_s0 = sadd.s32 4294967295, %s10174_s30   ;;  %s10174_s30 = sphi %s10281_s30, %s14952_s30   ;;  %s10170_s29 = sphi %s10279_s29, %s14954_s29   ;;  %s10166_s28 = sphi %s10277_s28, %s14956_s28   ;;  %s10162_s27 = sphi %s10275_s27, %s14955_s27  }
   0xb   : > { %s8411_s19 = sadd.s32 4294967294, %s10174_s30   ;;  %s10300_s1 = sadd.s32 1, %s10174_s30  }
   0xc   : > { %14669 = sst [smem:[#allocation9_spill]] %s10300_s1  ;;  %s422_s20 = sadd.s32 1, %s10170_s29 }
   0xd   : > { %s419_s21 = ssub.s32 %s10174_s30, %s10300_s1  ;;  %p432_p0 = scmp.ne.s32.totalorder %s10170_s29, %s10166_s28 }
   0xe   : > { %p420_p1 = scmp.eq.s32.totalorder %s419_s21, 0  ;;  %p433_p2 = scmp.eq.s32.totalorder %s10296_s0, 1 }
   0xf   : > { %p438_p3 = scmp.ne.s32.totalorder %s10166_s28, %s10162_s27  ;;  %p439_p4 = scmp.eq.s32.totalorder %s8411_s19, 1 }
  0x10   : > { %s10311_s22 = scalar_select %p420_p1, %s10170_s29, %s422_s20  }
  0x11   : > { %p10313_p5 = por %p433_p2, %p432_p0  ;;  %p10317_p6 = por %p439_p4, %p438_p3 }
  0x12   : > { %14670 = sst [smem:[#allocation10_spill]] %s10311_s22  ;;  %p8412_p7 = scmp.ge.s32.totalorder %s10174_s30, 1 }
  0x13   : > { %s14672_s23 = scalar_select %p10317_p6, 1, 0 }
  0x14   : > { %p446_p8 = scmp.lt.s32.totalorder %s10174_s30, 3  ;;  %p10011_p9 = scmp.eq.s32.totalorder %s10296_s0, 0 }
  0x15   : > { %14673 = sst [smem:[#allocation11_spill]] %s14672_s23  ;;  %s10176_s19 = smov [#allocation2]  }
  0x16   : > { %p447_p10 = pnand %p8412_p7, %p446_p8  ;;  %s14674_s26 = sld [smem:[#allocation77_spill]] }
  0x17   : > { %s459_s20 = sshll.u32 %s10176_s19, 4  ;;  %s10177_s22 = smov 64   ;;  %s460_s20 = int_to_ptr.vmem [resolvable:$true] %s459_s20 }
  0x18   : > { %p10003_p11 = pneg %p447_p10  ;;  %s10178_s29 = smov 4  }
  0x19   : > { %531 = sbr.rel (%p447_p10) target bundleno = 3215 (0xc8f), region = 92 }
  0x1a   : > { %p10004_p12 = pnand %p10011_p9, %p10003_p11 }
  0x1c   : > { %s457_s21 = sshll.u32 %s14674_s26, 4  ;;  %s458_s21 = int_to_ptr.hbm [resolvable:$true] %s457_s21 }
  0x1d   : > { %10006 = dma.hbm_to_vmem [thread:$0]  (!%p10004_p12), %s458_s21, 576, %s460_s20, [#allocation3], %s10177_s22, %s10177_s22, %s10178_s29  }
  0x1e   : > { %10153 = dma.done.wait (%p10011_p9), [#allocation3], 576  }
  0x1f   : > { %10155 = vsyncadd (%p10011_p9), [#allocation3], 4294966720  ;;  %p585_p13 = scmp.lt.s32.totalorder %s10296_s0, 1  ;;  %vm899_vm0 = vcmask 1043456   ;;  %s14675_s1 = sld [smem:[#allocation76_spill]]  ;;  %vm1161_vm2 = vcmask 1046528  }
  0x20   : > { %v694_v0 = vld [vmem:[#allocation2 + $0x4] sm:$0xf]  ;;  %vm695_vm1 = vsmask.f32 7424  ;;  %v1141_v6 = vld [vmem:[#allocation2 + $0x8] sm:$0xf]  ;;  %s8340_s29 = scalar_lea.hbm %s14608_s18, %s10296_s0 }
  0x21   : > { %s586_s24 = scalar_select %p585_p13, %s10296_s0, 1  ;;  %v901_v3 = vsel %vm899_vm0, %v694_v0, 0  ;;  %v1394_v11 = vld [vmem:[#allocation2 + $0xc] sm:$0xf]  ;;  %v1254_v15 = vsel %vm899_vm0, %v1141_v6, 0  ;;  %vm844_vm3 = vcmask 64512  }
  0x22   : > { %910 = vmatpush.bf16.msra.mxu0 %v901_v3  ;;  %9995 = vmatpush.bf16.msra.mxu1 %v901_v3  ;;  %v1408_v16 = vsel %vm899_vm0, %v1394_v11, 0  ;;  %v691_v17 = vld [vmem:[#allocation2] sm:$0xf]  ;;  %vm1547_vm4 = vsmask.f32 6400  ;;  %vm1827_vm5 = vcmask 1045504  }
  0x23   : > { %s9996_s25 = smul.u32 164, %s586_s24  ;;  %1263 = vmatpush.bf16.msra.mxu2 %v1254_v15  ;;  %1417 = vmatpush.bf16.msra.mxu3 %v1408_v16  ;;  %v1039_v24 = vsel %vm899_vm0, %v691_v17, 0  ;;  %vm2213_vm6 = vsmask.f32 5376  ;;  %vm2493_vm7 = vcmask 1044480   ;;  %s14752_s22 = sld [smem:[#allocation78_spill]] }
  0x24   : > { %vm3209_vm8 = vcmask 261120   ;;  %s14768_s3 = sld [smem:[#allocation79_spill]]  ;;  %vm6413_vm9 = vcmask 89088   ;;  %vm6661_vm10 = vcmask 523264   ;;  %vm7738_vm11 = vcmask 1042432   ;;  %s10128_s19 = scalar_lea.hbm %s14608_s18, 2 }
  0x25   : > { %s10338_s23 = scalar_lea.vmem %s14675_s1, %s9996_s25  ;;  %s14908_s4 = sld [smem:[#allocation80_spill]]  ;;  %vm7734_vm12 = vcmask 547840  }
  0x26   : > { %v9771_v1 = vld [vmem:[%s10338_s23] sm:$0xff]  ;;  %v10342_v2 = vld [vmem:[%s10338_s23 + $0x8] sm:$0xff]  ;;  %v10349_v5 = vld [vmem:[%s10338_s23 + $0x90] sm:$0xff]   ;;  %1048 = vmatpush.bf16.msrb.mxu1 %v1039_v24  ;;  %s583_s25 = sand.u32 1, %s10166_s28  }
  0x27   : > { %v10346_v4 = vld [vmem:[%s10338_s23 + $0x88] sm:$0xff]  ;;  %v697_v7 = vshrl.u32 %v9771_v1, 16  ;;  %v699_v8 = vshll.u32 %v9771_v1, 16  ;;  %v14615_v9 = vshll.u32 %v10342_v2, 16  ;;  %v9987_v10 = vunpack.c.l.bf16 %v10349_v5  ;;  %v10354_v12 = vld [vmem:[%s10338_s23 + $0x10] sm:$0xff]  ;;  %v10389_v36 = vld [vmem:[%s10338_s23 + $0x18] sm:$0xff] }
  0x28   : > { %v10357_v13 = vshll.u32 %v10346_v4, 16  ;;  %v10360_v14 = vshrl.u32 %v10346_v4, 16  ;;  %v1162_v22 = vrot.slane %v9771_v1, 1  ;;  %v1163_v23 = vrot.slane %v10342_v2, 1  ;;  %v10408_v44 = vld [vmem:[%s10338_s23 + $0x20] sm:$0xff]  ;;  %v10427_v52 = vld [vmem:[%s10338_s23 + $0x28] sm:$0xff] }
  0x29   : > { %v701_v18 = vrot.slane %v699_v8, 1  ;;  %v706_v19 = vrot.slane %v14615_v9, 1  ;;  %v10366_v20 = vpack.c.bf16 %v9987_v10, %v9987_v10  ;;  %v1165_v27 = vrot.slane %v10354_v12, 1  ;;  %v10446_v60 = vld [vmem:[%s10338_s23 + $0x30] sm:$0xff]  ;;  %s584_s1 = scalar_lea.vmem [#allocation5], %s583_s25  ;;  %s8332_s21 = scalar_lea.sflag [#allocation4], %s583_s25 }
  0x2a   : > { %14676 = vst [vmem:[#allocation12_spill] sm:$0xff] %v10360_v14  ;;  %v14613_v21 = vrot.slane %v10357_v13, 1  ;;  %v1164_v29 = vsel %vm1161_vm2, %v1162_v22, %v1163_v23  ;;  %v14614_v34 = vshrl.u32 %v10342_v2, 16  ;;  %v10386_v35 = vshll.u32 %v10354_v12, 16 }
  0x2b   : > { %v702_v25 = vor.u32 %v701_v18, %v697_v7  ;;  %v840_v26 = vshll.u32 %v10366_v20, 16  ;;  %8526 = vmatmul.msk.bf16.vlgmr.msra.gmra.mxu2 %vm844_vm3, %v1164_v29  ;;  %v1166_v32 = vsel %vm1161_vm2, %v1163_v23, %v1165_v27  ;;  %v1167_v39 = vrot.slane %v10389_v36, 1  ;;  %v10465_v7 = vld [vmem:[%s10338_s23 + $0x38] sm:$0xff]  ;;  %v10503_v29 = vld [vmem:[%s10338_s23 + $0x48] sm:$0xff] }
  0x2c   : > { %v838_v28 = vor.u32 %v10360_v14, %v14613_v21  ;;  %8544 = vmatmul.msk.bf16.vlgmr.msra.gmra.mxu3 %vm844_vm3, %v1166_v32  ;;  %v710_v37 = vor.u32 %v14614_v34, %v706_v19  ;;  %v714_v38 = vrot.slane %v10386_v35, 1  ;;  %v10402_v42 = vshrl.u32 %v10354_v12, 16 }
  0x2d   : > { %v707_v30 = vsel %vm695_vm1, %v702_v25, %v706_v19  ;;  %v842_v31 = vrot.slane %v840_v26, 1  ;;  %v1168_v41 = vsel %vm1161_vm2, %v1165_v27, %v1167_v39  ;;  %v10405_v43 = vshll.u32 %v10389_v36, 16  ;;  %v10484_v19 = vld [vmem:[%s10338_s23 + $0x40] sm:$0xff] }
  0x2e   : > { %8490 = vmatmul.msk.bf16.vlgmr.msra.gmra.mxu0 %vm844_vm3, %v707_v30  ;;  %v715_v40 = vsel %vm695_vm1, %v710_v37, %v714_v38  ;;  %v718_v45 = vor.u32 %v10402_v42, %v714_v38  ;;  %v1169_v47 = vrot.slane %v10408_v44, 1  ;;  %v10421_v50 = vshrl.u32 %v10389_v36, 16 }
  0x2f   : > { %v843_v33 = vsel %vm695_vm1, %v838_v28, %v842_v31  ;;  %v722_v46 = vrot.slane %v10405_v43, 1  ;;  %v10424_v51 = vshll.u32 %v10408_v44, 16  ;;  %v1171_v55 = vrot.slane %v10427_v52, 1 }
  0x30   : > { %8507 = vmatmul.msk.bf16.vlgmr.msra.gmra.mxu1 %vm844_vm3, %v843_v33  ;;  %v1170_v49 = vsel %vm1161_vm2, %v1167_v39, %v1169_v47  ;;  %v10440_v58 = vshrl.u32 %v10408_v44, 16  ;;  %v10443_v59 = vshll.u32 %v10427_v52, 16  ;;  %v1173_v63 = vrot.slane %v10446_v60, 1 }
  0x31   : > { %v723_v48 = vsel %vm695_vm1, %v718_v45, %v722_v46  ;;  %v726_v53 = vor.u32 %v10421_v50, %v722_v46  ;;  %v730_v54 = vrot.slane %v10424_v51, 1  ;;  %v1172_v57 = vsel %vm1161_vm2, %v1169_v47, %v1171_v55 }
  0x32   : > { %v738_v62 = vrot.slane %v10443_v59, 1  ;;  %v10459_v3 = vshrl.u32 %v10427_v52, 16  ;;  %v10462_v6 = vshll.u32 %v10446_v60, 16  ;;  %v1175_v11 = vrot.slane %v10465_v7, 1 }
  0x33   : > { %v731_v56 = vsel %vm695_vm1, %v726_v53, %v730_v54  ;;  %v734_v61 = vor.u32 %v10440_v58, %v730_v54  ;;  %v10478_v17 = vshrl.u32 %v10446_v60, 16  ;;  %v10481_v18 = vshll.u32 %v10465_v7, 16 }
  0x34   : > { %v742_v8 = vor.u32 %v10459_v3, %v738_v62  ;;  %v746_v10 = vrot.slane %v10462_v6, 1  ;;  %v1176_v16 = vsel %vm1161_vm2, %v1173_v63, %v1175_v11  ;;  %v1177_v24 = vrot.slane %v10484_v19, 1 }
  0x35   : > { %v739_v0 = vsel %vm695_vm1, %v734_v61, %v738_v62  ;;  %v754_v23 = vrot.slane %v10481_v18, 1  ;;  %v10497_v27 = vshrl.u32 %v10465_v7, 16  ;;  %v10500_v28 = vshll.u32 %v10484_v19, 16  ;;  %v10543_v62 = vld [vmem:[%s10338_s23 + $0x58] sm:$0xff] }
  0x36   : > { %v747_v15 = vsel %vm695_vm1, %v742_v8, %v746_v10  ;;  %v750_v22 = vor.u32 %v10478_v17, %v746_v10  ;;  %v1178_v26 = vsel %vm1161_vm2, %v1175_v11, %v1177_v24  ;;  %v10516_v38 = vshrl.u32 %v10484_v19, 16  ;;  %14678 = vst [vmem:[#allocation14_spill] sm:$0xff] %v10543_v62 }
  0x37   : > { %v758_v30 = vor.u32 %v10497_v27, %v754_v23  ;;  %v762_v31 = vrot.slane %v10500_v28, 1  ;;  %v10519_v39 = vshll.u32 %v10503_v29, 16  ;;  %v1183_v8 = vrot.slane %v10543_v62, 1 }
  0x38   : > { %v755_v25 = vsel %vm695_vm1, %v750_v22, %v754_v23 }
  0x39   : > { %v763_v33 = vsel %vm695_vm1, %v758_v30, %v762_v31  ;;  %v770_v45 = vrot.slane %v10519_v39, 1 }
  0x3b   : > { %8527 = vmatmul.msk.bf16.gmra.mxu2 %vm844_vm3, %v1166_v32  ;;  %v1179_v32 = vrot.slane %v10503_v29, 1 }
  0x3c   : > { %8545 = vmatmul.msk.bf16.gmra.mxu3 %vm844_vm3, %v1168_v41 }
  0x3d   : > { %v1180_v37 = vsel %vm1161_vm2, %v1177_v24, %v1179_v32 }
  0x3e   : > { %8491 = vmatmul.msk.bf16.gmra.mxu0 %vm844_vm3, %v715_v40  ;;  %v10522_v40 = vld [vmem:[%s10338_s23 + $0x50] sm:$0xff] }
  0x3f   : > { %v1181_v46 = vrot.slane %v10522_v40, 1  ;;  %v10540_v61 = vshll.u32 %v10522_v40, 16 }
  0x40   : > { %8508 = vmatmul.msk.bf16.vlgmr.msrb.gmra.mxu1 %vm844_vm3, %v9771_v1  ;;  %v1174_v1 = vsel %vm1161_vm2, %v1171_v55, %v1173_v63 }
  0x41   : > { %v1184_v22 = vsel %vm1161_vm2, %v1181_v46, %v1183_v8 }
  0x4b   : > { %8528 = vmatmul.msk.bf16.gmra.mxu2 %vm844_vm3, %v1168_v41  ;;  %v766_v41 = vor.u32 %v10516_v38, %v762_v31 }
  0x4c   : > { %8546 = vmatmul.msk.bf16.gmra.mxu3 %vm844_vm3, %v1170_v49 }
  0x4e   : > { %8492 = vmatmul.msk.bf16.gmra.mxu0 %vm844_vm3, %v723_v48  ;;  %v771_v48 = vsel %vm695_vm1, %v766_v41, %v770_v45  ;;  %v10566_v41 = vld [vmem:[%s10338_s23 + $0x60] sm:$0xff] }
  0x4f   : > { %14680 = vst [vmem:[#allocation16_spill] sm:$0xff] %v10566_v41 }
  0x50   : > { %8509 = vmatmul.msk.bf16.gmra.mxu1 %vm844_vm3, %v10342_v2 }
  0x5b   : > { %8529 = vmatmul.msk.bf16.gmra.mxu2 %vm844_vm3, %v1170_v49  ;;  %v1182_v49 = vsel %vm1161_vm2, %v1179_v32, %v1181_v46 }
  0x5c   : > { %8547 = vmatmul.msk.bf16.gmra.mxu3 %vm844_vm3, %v1172_v57 }
  0x5e   : > { %8493 = vmatmul.msk.bf16.gmra.mxu0 %vm844_vm3, %v731_v56 }
  0x60   : > { %8510 = vmatmul.msk.bf16.gmra.mxu1 %vm844_vm3, %v10354_v12 }
  0x6b   : > { %8530 = vmatmul.msk.bf16.gmra.mxu2 %vm844_vm3, %v1172_v57  ;;  %v10537_v57 = vshrl.u32 %v10503_v29, 16 }
  0x6c   : > { %8548 = vmatmul.msk.bf16.gmra.mxu3 %vm844_vm3, %v1174_v1 }
  0x6e   : > { %8494 = vmatmul.msk.bf16.gmra.mxu0 %vm844_vm3, %v739_v0  ;;  %v774_v0 = vor.u32 %v10537_v57, %v770_v45 }
  0x70   : > { %8511 = vmatmul.msk.bf16.gmra.mxu1 %vm844_vm3, %v10389_v36 }
  0x7b   : > { %8531 = vmatmul.msk.bf16.gmra.mxu2 %vm844_vm3, %v1174_v1  ;;  %v778_v1 = vrot.slane %v10540_v61, 1 }
  0x7c   : > { %8549 = vmatmul.msk.bf16.gmra.mxu3 %vm844_vm3, %v1176_v16 }
  0x7e   : > { %8495 = vmatmul.msk.bf16.gmra.mxu0 %vm844_vm3, %v747_v15 }
  0x80   : > { %8512 = vmatmul.msk.bf16.gmra.mxu1 %vm844_vm3, %v10408_v44 }
  0x8b   : > { %8532 = vmatmul.msk.bf16.gmra.mxu2 %vm844_vm3, %v1176_v16  ;;  %v779_v16 = vsel %vm695_vm1, %v774_v0, %v778_v1 }
  0x8c   : > { %8550 = vmatmul.msk.bf16.gmra.mxu3 %vm844_vm3, %v1178_v26 }
  0x8e   : > { %8496 = vmatmul.msk.bf16.gmra.mxu0 %vm844_vm3, %v755_v25 }
  0x90   : > { %8513 = vmatmul.msk.bf16.gmra.mxu1 %vm844_vm3, %v10427_v52 }
  0x9b   : > { %8533 = vmatmul.msk.bf16.gmra.mxu2 %vm844_vm3, %v1178_v26 }
  0x9c   : > { %8551 = vmatmul.msk.bf16.gmra.mxu3 %vm844_vm3, %v1180_v37 }
  0x9e   : > { %8497 = vmatmul.msk.bf16.gmra.mxu0 %vm844_vm3, %v763_v33  ;;  %v10560_v33 = vshrl.u32 %v10522_v40, 16 }
  0xa0   : > { %8514 = vmatmul.msk.bf16.gmra.mxu1 %vm844_vm3, %v10446_v60 }
  0xab   : > { %v912_v47 = vpop.f32.mrf.mxu0  ;;  %8534 = vmatmul.msk.bf16.gmra.mxu2 %vm844_vm3, %v1180_v37  ;;  %v10563_v37 = vshll.u32 %v10543_v62, 16 }
  0xac   : > { %8552 = vmatmul.msk.bf16.gmra.mxu3 %vm844_vm3, %v1182_v49 }
  0xad   : > { %v10529_v53 = vpop.f32.mrf.mxu1 }
  0xae   : > { %14677 = vst [vmem:[#allocation13_spill] sm:$0xff] %v10529_v53  ;;  %8498 = vmatmul.msk.bf16.gmra.mxu0 %vm844_vm3, %v771_v48  ;;  %v1265_v54 = vpop.f32.mrf.mxu2  ;;  %v786_v48 = vrot.slane %v10563_v37, 1 }
  0xaf   : > { %v1419_v55 = vpop.f32.mrf.mxu3 }
  0xb0   : > { %8515 = vmatmul.msk.bf16.gmra.mxu1 %vm844_vm3, %v10465_v7 }
  0xb3   : > { %v914_v56 = vpop.f32.mrf.mxu0 }
  0xb5   : > { %v10545_v63 = vpop.f32.mrf.mxu1 }
  0xb6   : > { %14679 = vst [vmem:[#allocation15_spill] sm:$0xff] %v10545_v63  ;;  %v1267_v10 = vpop.f32.mrf.mxu2 }
  0xb7   : > { %v1421_v11 = vpop.f32.mrf.mxu3 }
  0xbb   : > { %v917_v15 = vpop.f32.mrf.mxu0  ;;  %8535 = vmatmul.msk.bf16.gmra.mxu2 %vm844_vm3, %v1182_v49  ;;  %v1185_v49 = vrot.slane %v10566_v41, 1 }
  0xbc   : > { %8553 = vmatmul.msk.bf16.gmra.mxu3 %vm844_vm3, %v1184_v22 }
  0xbd   : > { %v1050_v23 = vpop.f32.mrf.mxu1 }
  0xbe   : > { %v1051_v24 = vadd.f32 %v1050_v23, %v912_v47  ;;  %8499 = vmatmul.msk.bf16.gmra.mxu0 %vm844_vm3, %v779_v16  ;;  %v1270_v26 = vpop.f32.mrf.mxu2  ;;  %v782_v47 = vor.u32 %v10560_v33, %v778_v1 }
  0xbf   : > { %v1424_v30 = vpop.f32.mrf.mxu3 }
  0xc0   : > { %v1355_v25 = vadd.f32 %v1265_v54, %v1051_v24  ;;  %8516 = vmatmul.msk.bf16.gmra.mxu1 %vm844_vm3, %v10484_v19  ;;  %v787_v24 = vsel %vm695_vm1, %v782_v47, %v786_v48  ;;  %v10583_v47 = vshrl.u32 %v10543_v62, 16 }
  0xc2   : > { %v10557_v31 = vadd.f32 %v1419_v55, %v1355_v25  ;;  %v1186_v25 = vsel %vm1161_vm2, %v1183_v8, %v1185_v49  ;;  %v10586_v8 = vshll.u32 %v10566_v41, 16 }
  0xc3   : > { %v919_v32 = vpop.f32.mrf.mxu0 }
  0xc4   : > { %14683 = vst [vmem:[#allocation19_spill] sm:$0xff] %v10586_v8 }
  0xc5   : > { %v1052_v45 = vpop.f32.mrf.mxu1 }
  0xc6   : > { %v1053_v46 = vadd.f32 %v1052_v45, %v914_v56  ;;  %v1272_v55 = vpop.f32.mrf.mxu2 }
  0xc7   : > { %v1426_v0 = vpop.f32.mrf.mxu3 }
  0xc8   : > { %v1356_v54 = vadd.f32 %v1267_v10, %v1053_v46 }
  0xca   : > { %v10571_v16 = vadd.f32 %v1421_v11, %v1356_v54  ;;  %v794_v54 = vrot.slane %v10586_v8, 1 }
  0xcb   : > { %v922_v23 = vpop.f32.mrf.mxu0  ;;  %8536 = vmatmul.msk.bf16.gmra.mxu2 %vm844_vm3, %v1184_v22 }
  0xcc   : > { %14681 = vst [vmem:[#allocation17_spill] sm:$0xff] %v10571_v16  ;;  %8554 = vmatmul.msk.bf16.gmra.mxu3 %vm844_vm3, %v1186_v25 }
  0xcd   : > { %v1055_v21 = vpop.f32.mrf.mxu1 }
  0xce   : > { %v1056_v56 = vadd.f32 %v1055_v21, %v917_v15  ;;  %8500 = vmatmul.msk.bf16.gmra.mxu0 %vm844_vm3, %v787_v24  ;;  %v1275_v10 = vpop.f32.mrf.mxu2  ;;  %v10589_v21 = vld [vmem:[%s10338_s23 + $0x68] sm:$0xff] }
  0xcf   : > { %v1429_v11 = vpop.f32.mrf.mxu3  ;;  %v1187_v24 = vrot.slane %v10589_v21, 1 }
  0xd0   : > { %v1357_v1 = vadd.f32 %v1270_v26, %v1056_v56  ;;  %8517 = vmatmul.msk.bf16.gmra.mxu1 %vm844_vm3, %v10503_v29  ;;  %v790_v26 = vor.u32 %v10583_v47, %v786_v48 }
  0xd1   : > { %v1188_v63 = vsel %vm1161_vm2, %v1185_v49, %v1187_v24  ;;  %v10609_v49 = vshll.u32 %v10589_v21, 16 }
  0xd2   : > { %v10580_v45 = vadd.f32 %v1424_v30, %v1357_v1  ;;  %v795_v14 = vsel %vm695_vm1, %v790_v26, %v794_v54  ;;  %v10606_v26 = vshrl.u32 %v10566_v41, 16 }
  0xd3   : > { %v924_v46 = vpop.f32.mrf.mxu0  ;;  %14687 = vst [vmem:[#allocation23_spill] sm:$0xff] %v10609_v49 }
  0xd4   : > { %14682 = vst [vmem:[#allocation18_spill] sm:$0xff] %v10580_v45 }
  0xd5   : > { %v1057_v15 = vpop.f32.mrf.mxu1  ;;  %14686 = vst [vmem:[#allocation22_spill] sm:$0xff] %v10606_v26 }
  0xd6   : > { %v1058_v22 = vadd.f32 %v1057_v15, %v919_v32  ;;  %v1277_v30 = vpop.f32.mrf.mxu2 }
  0xd7   : > { %v1431_v1 = vpop.f32.mrf.mxu3 }
  0xd8   : > { %v1358_v56 = vadd.f32 %v1272_v55, %v1058_v22 }
  0xda   : > { %v10594_v34 = vadd.f32 %v1426_v0, %v1358_v56 }
  0xdb   : > { %v927_v9 = vpop.f32.mrf.mxu0  ;;  %8537 = vmatmul.msk.bf16.gmra.mxu2 %vm844_vm3, %v1186_v25  ;;  %v798_v25 = vor.u32 %v10606_v26, %v794_v54 }
  0xdc   : > { %14684 = vst [vmem:[#allocation20_spill] sm:$0xff] %v10594_v34  ;;  %8555 = vmatmul.msk.bf16.gmra.mxu3 %vm844_vm3, %v1188_v63 }
  0xdd   : > { %v1060_v53 = vpop.f32.mrf.mxu1 }
  0xde   : > { %v1061_v32 = vadd.f32 %v1060_v53, %v922_v23  ;;  %8501 = vmatmul.msk.bf16.gmra.mxu0 %vm844_vm3, %v795_v14  ;;  %v1280_v55 = vpop.f32.mrf.mxu2  ;;  %v10612_v53 = vld [vmem:[%s10338_s23 + $0x70] sm:$0xff] }
  0xdf   : > { %v1434_v0 = vpop.f32.mrf.mxu3  ;;  %14688 = vst [vmem:[#allocation24_spill] sm:$0xff] %v10612_v53  ;;  %v1189_v56 = vrot.slane %v10612_v53, 1 }
  0xe0   : > { %v1359_v48 = vadd.f32 %v1275_v10, %v1061_v32  ;;  %8518 = vmatmul.msk.bf16.gmra.mxu1 %vm844_vm3, %v10522_v40  ;;  %v802_v10 = vrot.slane %v10609_v49, 1 }
  0xe1   : > { %v1190_v45 = vsel %vm1161_vm2, %v1187_v24, %v1189_v56  ;;  %v10632_v24 = vshll.u32 %v10612_v53, 16 }
  0xe2   : > { %v10603_v15 = vadd.f32 %v1429_v11, %v1359_v48  ;;  %v803_v8 = vsel %vm695_vm1, %v798_v25, %v802_v10  ;;  %v10629_v25 = vshrl.u32 %v10589_v21, 16 }
  0xe3   : > { %v929_v22 = vpop.f32.mrf.mxu0  ;;  %14692 = vst [vmem:[#allocation28_spill] sm:$0xff] %v10632_v24 }
  0xe4   : > { %14685 = vst [vmem:[#allocation21_spill] sm:$0xff] %v10603_v15 }
  0xe5   : > { %v1062_v14 = vpop.f32.mrf.mxu1  ;;  %14691 = vst [vmem:[#allocation27_spill] sm:$0xff] %v10629_v25 }
  0xe6   : > { %v1063_v23 = vadd.f32 %v1062_v14, %v924_v46  ;;  %v1282_v11 = vpop.f32.mrf.mxu2 }
  0xe7   : > { %v1436_v48 = vpop.f32.mrf.mxu3 }
  0xe8   : > { %v1360_v32 = vadd.f32 %v1277_v30, %v1063_v23 }
  0xea   : > { %v10617_v15 = vadd.f32 %v1431_v1, %v1360_v32 }
  0xeb   : > { %v932_v34 = vpop.f32.mrf.mxu0  ;;  %8538 = vmatmul.msk.bf16.gmra.mxu2 %vm844_vm3, %v1188_v63 }
  0xec   : > { %14689 = vst [vmem:[#allocation25_spill] sm:$0xff] %v10617_v15  ;;  %8556 = vmatmul.msk.bf16.gmra.mxu3 %vm844_vm3, %v1190_v45 }
  0xed   : > { %v1065_v16 = vpop.f32.mrf.mxu1 }
  0xee   : > { %v1066_v46 = vadd.f32 %v1065_v16, %v927_v9  ;;  %8502 = vmatmul.msk.bf16.gmra.mxu0 %vm844_vm3, %v803_v8  ;;  %v1285_v30 = vpop.f32.mrf.mxu2  ;;  %v10635_v9 = vld [vmem:[%s10338_s23 + $0x78] sm:$0xff]  ;;  %v806_v8 = vor.u32 %v10629_v25, %v802_v10 }
  0xef   : > { %v1439_v1 = vpop.f32.mrf.mxu3  ;;  %v1191_v32 = vrot.slane %v10635_v9, 1 }
  0xf0   : > { %v1361_v54 = vadd.f32 %v1280_v55, %v1066_v46  ;;  %8519 = vmatmul.msk.bf16.gmra.mxu1 %vm844_vm3, %v10543_v62  ;;  %v810_v55 = vrot.slane %v10632_v24, 1 }
  0xf1   : > { %v1192_v26 = vsel %vm1161_vm2, %v1189_v56, %v1191_v32  ;;  %v10655_v56 = vshll.u32 %v10635_v9, 16 }
  0xf2   : > { %v10626_v14 = vadd.f32 %v1434_v0, %v1361_v54  ;;  %v811_v49 = vsel %vm695_vm1, %v806_v8, %v810_v55  ;;  %v10652_v8 = vshrl.u32 %v10612_v53, 16 }
  0xf3   : > { %v934_v23 = vpop.f32.mrf.mxu0  ;;  %14696 = vst [vmem:[#allocation32_spill] sm:$0xff] %v10655_v56 }
  0xf4   : > { %14690 = vst [vmem:[#allocation26_spill] sm:$0xff] %v10626_v14 }
  0xf5   : > { %v1067_v63 = vpop.f32.mrf.mxu1  ;;  %14695 = vst [vmem:[#allocation31_spill] sm:$0xff] %v10652_v8 }
  0xf6   : > { %v1068_v16 = vadd.f32 %v1067_v63, %v929_v22  ;;  %v1287_v0 = vpop.f32.mrf.mxu2 }
  0xf7   : > { %v1441_v54 = vpop.f32.mrf.mxu3 }
  0xf8   : > { %v1362_v46 = vadd.f32 %v1282_v11, %v1068_v16 }
  0xfa   : > { %v10640_v14 = vadd.f32 %v1436_v48, %v1362_v46 }
  0xfb   : > { %v937_v15 = vpop.f32.mrf.mxu0  ;;  %8539 = vmatmul.msk.bf16.gmra.mxu2 %vm844_vm3, %v1190_v45 }
  0xfc   : > { %14693 = vst [vmem:[#allocation29_spill] sm:$0xff] %v10640_v14  ;;  %8557 = vmatmul.msk.bf16.gmra.mxu3 %vm844_vm3, %v1192_v26 }
  0xfd   : > { %v1070_v62 = vpop.f32.mrf.mxu1 }
  0xfe   : > { %v1071_v22 = vadd.f32 %v1070_v62, %v932_v34  ;;  %8503 = vmatmul.msk.bf16.gmra.mxu0 %vm844_vm3, %v811_v49  ;;  %v1290_v11 = vpop.f32.mrf.mxu2  ;;  %v10658_v34 = vld [vmem:[%s10338_s23 + $0x80] sm:$0xff]  ;;  %v814_v49 = vor.u32 %v10652_v8, %v810_v55 }
  0xff   : > { %v1444_v48 = vpop.f32.mrf.mxu3  ;;  %v1193_v46 = vrot.slane %v10658_v34, 1 }
 0x100   : > { %v1363_v10 = vadd.f32 %v1285_v30, %v1071_v22  ;;  %8520 = vmatmul.msk.bf16.gmra.mxu1 %vm844_vm3, %v10566_v41  ;;  %v818_v30 = vrot.slane %v10655_v56, 1 }
 0x101   : > { %v1194_v25 = vsel %vm1161_vm2, %v1191_v32, %v1193_v46  ;;  %v10678_v32 = vshll.u32 %v10658_v34, 16 }
 0x102   : > { %v10649_v63 = vadd.f32 %v1439_v1, %v1363_v10  ;;  %v819_v24 = vsel %vm695_vm1, %v814_v49, %v818_v30  ;;  %v10675_v49 = vshrl.u32 %v10635_v9, 16 }
 0x103   : > { %v939_v16 = vpop.f32.mrf.mxu0  ;;  %14700 = vst [vmem:[#allocation36_spill] sm:$0xff] %v10678_v32 }
 0x104   : > { %14694 = vst [vmem:[#allocation30_spill] sm:$0xff] %v10649_v63 }
 0x105   : > { %v1072_v62 = vpop.f32.mrf.mxu1  ;;  %14699 = vst [vmem:[#allocation35_spill] sm:$0xff] %v10675_v49 }
 0x106   : > { %v1073_v45 = vadd.f32 %v1072_v62, %v934_v23  ;;  %v1292_v1 = vpop.f32.mrf.mxu2 }
 0x107   : > { %v1446_v10 = vpop.f32.mrf.mxu3 }
 0x108   : > { %v1364_v22 = vadd.f32 %v1287_v0, %v1073_v45 }
 0x10a   : > { %v10663_v63 = vadd.f32 %v1441_v54, %v1364_v22  ;;  %v14701_v22 = vshll.u32 %v10342_v2, 16 }
 0x10b   : > { %v942_v14 = vpop.f32.mrf.mxu0  ;;  %8540 = vmatmul.msk.bf16.gmra.mxu2 %vm844_vm3, %v1192_v26  ;;  %v822_v26 = vor.u32 %v10675_v49, %v818_v30 }
 0x10c   : > { %14697 = vst [vmem:[#allocation33_spill] sm:$0xff] %v10663_v63  ;;  %8558 = vmatmul.msk.bf16.gmra.mxu3 %vm844_vm3, %v1194_v25 }
 0x10d   : > { %v1075_v41 = vpop.f32.mrf.mxu1 }
 0x10e   : > { %v1076_v23 = vadd.f32 %v1075_v41, %v937_v15  ;;  %8504 = vmatmul.msk.bf16.gmra.mxu0 %vm844_vm3, %v819_v24  ;;  %v1295_v0 = vpop.f32.mrf.mxu2  ;;  %v826_v24 = vrot.slane %v10678_v32, 1 }
 0x10f   : > { %v1449_v54 = vpop.f32.mrf.mxu3 }
 0x110   : > { %v1365_v55 = vadd.f32 %v1290_v11, %v1076_v23  ;;  %8521 = vmatmul.msk.bf16.gmra.mxu1 %vm844_vm3, %v10589_v21  ;;  %v10683_v11 = vrot.slane %v10346_v4, 1  ;;  %v14702_v23 = vshrl.u32 %v10342_v2, 16 }
 0x112   : > { %v10672_v62 = vadd.f32 %v1444_v48, %v1365_v55  ;;  %v10687_v48 = vrot.slane %v14701_v22, 2  ;;  %v10691_v55 = vrot.slane %v14702_v23, 1  ;;  %v1196_v32 = vsel %vm1161_vm2, %v1193_v46, %v10683_v11 }
 0x113   : > { %v944_v45 = vpop.f32.mrf.mxu0 }
 0x114   : > { %14698 = vst [vmem:[#allocation34_spill] sm:$0xff] %v10672_v62  ;;  %v1550_v22 = vor.u32 %v10687_v48, %v10691_v55  ;;  %v1397_v55 = vrot.slane %v10349_v5, 1 }
 0x115   : > { %v1077_v41 = vpop.f32.mrf.mxu1 }
 0x116   : > { %v1078_v15 = vadd.f32 %v1077_v41, %v939_v16  ;;  %v1297_v63 = vpop.f32.mrf.mxu2  ;;  %v1546_v16 = vld [vmem:[#allocation2 + $0x10] sm:$0xf]  ;;  %v827_v41 = vsel %vm695_vm1, %v822_v26, %v826_v24  ;;  %v10709_v26 = vshrl.u32 %v10658_v34, 16 }
 0x117   : > { %v1451_v56 = vpop.f32.mrf.mxu3  ;;  %v1688_v49 = vsel %vm899_vm0, %v1546_v16, 0 }
 0x118   : > { %v1366_v62 = vadd.f32 %v1292_v1, %v1078_v15  ;;  %1697 = vmatpush.bf16.msrb.mxu0 %v1688_v49 }
 0x11a   : > { %v10693_v8 = vadd.f32 %v1446_v10, %v1366_v62 }
 0x11b   : > { %v947_v30 = vpop.f32.mrf.mxu0  ;;  %8541 = vmatmul.msk.bf16.gmra.mxu2 %vm844_vm3, %v1194_v25 }
 0x11c   : > { %14703 = vst [vmem:[#allocation37_spill] sm:$0xff] %v10693_v8  ;;  %8559 = vmatmul.msk.bf16.gmra.mxu3 %vm844_vm3, %v1196_v32  ;;  %v14706_v8 = vrot.slane %v10357_v13, 1 }
 0x11d   : > { %v1080_v23 = vpop.f32.mrf.mxu1 }
 0x11e   : > { %v1081_v1 = vadd.f32 %v1080_v23, %v942_v14  ;;  %8505 = vmatmul.msk.bf16.gmra.mxu0 %vm844_vm3, %v827_v41  ;;  %v1300_v62 = vpop.f32.mrf.mxu2  ;;  %v830_v14 = vor.u32 %v10709_v26, %v826_v24 }
 0x11f   : > { %v1454_v46 = vpop.f32.mrf.mxu3 }
 0x120   : > { %v1367_v10 = vadd.f32 %v1295_v0, %v1081_v1  ;;  %8522 = vmatmul.msk.bf16.gmra.mxu1 %vm844_vm3, %v10612_v53 }
 0x122   : > { %v10706_v15 = vadd.f32 %v1449_v54, %v1367_v10  ;;  %v835_v54 = vsel %vm695_vm1, %v830_v14, %v14706_v8  ;;  %v1398_v10 = vsel %vm1161_vm2, %v10683_v11, %v1397_v55  ;;  %v1552_v14 = vrot.slane %v10386_v35, 2 }
 0x123   : > { %v949_v49 = vpop.f32.mrf.mxu0 }
 0x124   : > { %14704 = vst [vmem:[#allocation38_spill] sm:$0xff] %v10706_v15  ;;  %v9994_v15 = vld [vmem:[%s10338_s23 + $0x98] sm:$0xff]  }
 0x125   : > { %v1082_v48 = vpop.f32.mrf.mxu1  ;;  %v9991_v5 = vunpack.c.l.bf16 %v9994_v15 }
 0x126   : > { %v1083_v25 = vadd.f32 %v1082_v48, %v944_v45  ;;  %v1302_v0 = vpop.f32.mrf.mxu2 }
 0x127   : > { %v1456_v41 = vpop.f32.mrf.mxu3 }
 0x128   : > { %v1368_v16 = vadd.f32 %v1297_v63, %v1083_v25  ;;  %v1551_v25 = vrot.slane %v10402_v42, 1 }
 0x12a   : > { %v10713_v23 = vadd.f32 %v1451_v56, %v1368_v16  ;;  %v1197_v16 = vrot.slane %v10366_v20, 1  ;;  %v1553_v15 = vor.u32 %v1552_v14, %v1551_v25 }
 0x12b   : > { %v952_v1 = vpop.f32.mrf.mxu0  ;;  %8542 = vmatmul.msk.bf16.gmra.mxu2 %vm844_vm3, %v1196_v32  ;;  %v10730_v32 = vpack.c.bf16 %v9991_v5, %v9991_v5 }
 0x12c   : > { %14705 = vst [vmem:[#allocation39_spill] sm:$0xff] %v10713_v23  ;;  %8560 = vmatmul.msk.bf16.gmra.mxu3 %vm844_vm3, %v1398_v10  ;;  %v1198_v5 = vsel %vm1161_vm2, %v10683_v11, %v1197_v16  ;;  %v1554_v25 = vsel %vm1547_vm4, %v1550_v22, %v1553_v15  ;;  %v1555_v16 = vrot.slane %v10421_v50, 1 }
 0x12d   : > { %v1085_v53 = vpop.f32.mrf.mxu1 }
 0x12e   : > { %v1086_v45 = vadd.f32 %v1085_v53, %v947_v30  ;;  %8506 = vmatmul.msk.bf16.gmra.mxu0 %vm844_vm3, %v835_v54  ;;  %v1305_v56 = vpop.f32.mrf.mxu2  ;;  %v2060_v54 = vld [vmem:[#allocation2 + $0x18] sm:$0xf] }
 0x12f   : > { %v1459_v24 = vpop.f32.mrf.mxu3 }
 0x130   : > { %v1369_v63 = vadd.f32 %v1300_v62, %v1086_v45  ;;  %8523 = vmatmul.msk.bf16.gmra.mxu1 %vm844_vm3, %v10635_v9  ;;  %v1399_v62 = vrot.slane %v10730_v32, 1 }
 0x132   : > { %v10726_v8 = vadd.f32 %v1454_v46, %v1369_v63  ;;  %v2074_v46 = vsel %vm899_vm0, %v2060_v54, 0  ;;  %v1400_v14 = vsel %vm1161_vm2, %v1397_v55, %v1399_v62  ;;  %v1556_v62 = vrot.slane %v10405_v43, 2 }
 0x133   : > { %v954_v48 = vpop.f32.mrf.mxu0  ;;  %2083 = vmatpush.bf16.msrb.mxu2 %v2074_v46  ;;  %v2217_v46 = vrot.slane %v10421_v50, 2 }
 0x134   : > { %14707 = vst [vmem:[#allocation40_spill] sm:$0xff] %v10726_v8  ;;  %v2212_v8 = vld [vmem:[#allocation2 + $0x1c] sm:$0xf] }
 0x135   : > { %v1087_v53 = vpop.f32.mrf.mxu1 }
 0x136   : > { %v1088_v30 = vadd.f32 %v1087_v53, %v949_v49  ;;  %v1307_v45 = vpop.f32.mrf.mxu2  ;;  %v2354_v49 = vsel %vm899_vm0, %v2212_v8, 0 }
 0x137   : > { %v1461_v63 = vpop.f32.mrf.mxu3  ;;  %2363 = vmatpush.bf16.msrb.mxu3 %v2354_v49 }
 0x138   : > { %v1370_v10 = vadd.f32 %v1302_v0, %v1088_v30  ;;  %v1826_v0 = vld [vmem:[#allocation2 + $0x14] sm:$0xf] }
 0x139   : > { %v1920_v53 = vsel %vm899_vm0, %v1826_v0, 0 }
 0x13a   : > { %v10735_v23 = vadd.f32 %v1456_v41, %v1370_v10  ;;  %1929 = vmatpush.bf16.msra.mxu1 %v1920_v53  ;;  %v2214_v10 = vrot.slane %v10402_v42, 2 }
 0x13b   : > { %v957_v20 = vpop.f32.mrf.mxu0  ;;  %8543 = vmatmul.msk.bf16.gmra.mxu2 %vm844_vm3, %v1198_v5 }
 0x13c   : > { %8561 = vmatmul.msk.bf16.gmra.mxu3 %vm844_vm3, %v1400_v14  ;;  %v1557_v14 = vor.u32 %v1556_v62, %v1555_v16 }
 0x13d   : > { %v1090_v30 = vpop.f32.mrf.mxu1 }
 0x13e   : > { %v1091_v41 = vadd.f32 %v1090_v30, %v952_v1  ;;  %8562 = vmatmul.msk.bf16.vlgmr.msrb.gmra.mxu0 %vm844_vm3, %v1554_v25  ;;  %v1310_v22 = vpop.f32.mrf.mxu2  ;;  %v2215_v1 = vrot.slane %v10386_v35, 3  ;;  %v1829_v25 = vrot.slane %v10354_v12, 2  ;;  %v1558_v50 = vsel %vm1547_vm4, %v1553_v15, %v1557_v14 }
 0x13f   : > { %v1464_v8 = vpop.f32.mrf.mxu3 }
 0x140   : > { %v1371_v11 = vadd.f32 %v1305_v56, %v1091_v41  ;;  %8524 = vmatmul.msk.bf16.gmra.mxu1 %vm844_vm3, %v10658_v34  ;;  %v2218_v56 = vrot.slane %v10405_v43, 3  ;;  %v2216_v0 = vor.u32 %v2215_v1, %v2214_v10  ;;  %v1559_v10 = vrot.slane %v10440_v58, 1 }
 0x141   : > { %v1560_v1 = vrot.slane %v10424_v51, 2 }
 0x142   : > { %v10748_v55 = vadd.f32 %v1459_v24, %v1371_v11  ;;  %v1831_v24 = vrot.slane %v10389_v36, 2  ;;  %v2219_v53 = vor.u32 %v2218_v56, %v2217_v46  ;;  %v2221_v46 = vrot.slane %v10440_v58, 2 }
 0x143   : > { %v959_v54 = vpop.f32.mrf.mxu0 }
 0x144   : > { %v10761_v35 = vsel %vm1827_vm5, %v1829_v25, %v1831_v24  ;;  %v2220_v12 = vsel %vm2213_vm6, %v2216_v0, %v2219_v53 }
 0x145   : > { %v1092_v5 = vpop.f32.mrf.mxu1 }
 0x146   : > { %v1093_v49 = vadd.f32 %v1092_v5, %v954_v48  ;;  %v1312_v41 = vpop.f32.mrf.mxu2 }
 0x147   : > { %v1466_v42 = vpop.f32.mrf.mxu3 }
 0x148   : > { %v1372_v30 = vadd.f32 %v1307_v45, %v1093_v49  ;;  %v1561_v49 = vor.u32 %v1560_v1, %v1559_v10  ;;  %v2225_v10 = vrot.slane %v10459_v3, 2 }
 0x14a   : > { %v10758_v11 = vadd.f32 %v1461_v63, %v1372_v30  ;;  %v1562_v58 = vsel %vm1547_vm4, %v1557_v14, %v1561_v49 }
 0x14b   : > { %v962_v43 = vpop.f32.mrf.mxu0  ;;  %8598 = vmatmul.msk.bf16.vlgmr.msrb.gmra.mxu2 %vm844_vm3, %v10761_v35 }
 0x14c   : > { %8616 = vmatmul.msk.bf16.vlgmr.msrb.gmra.mxu3 %vm844_vm3, %v2220_v12 }
 0x14d   : > { %v1095_v48 = vpop.f32.mrf.mxu1 }
 0x14e   : > { %v1096_v36 = vadd.f32 %v1095_v48, %v957_v20  ;;  %8563 = vmatmul.msk.bf16.gmra.mxu0 %vm844_vm3, %v1558_v50  ;;  %v1315_v63 = vpop.f32.mrf.mxu2  ;;  %v2222_v20 = vrot.slane %v10424_v51, 3 }
 0x14f   : > { %v1469_v16 = vpop.f32.mrf.mxu3 }
 0x150   : > { %v1373_v45 = vadd.f32 %v1310_v22, %v1096_v36  ;;  %8525 = vmatmul.msk.bf16.gmra.mxu1 %vm844_vm3, %v10346_v4  ;;  %v1833_v22 = vrot.slane %v10408_v44, 2  ;;  %v2223_v0 = vor.u32 %v2222_v20, %v2221_v46  ;;  %v1835_v20 = vrot.slane %v10427_v52, 2 }
 0x152   : > { %v10771_v62 = vadd.f32 %v1464_v8, %v1373_v45  ;;  %v1828_v8 = vrot.slane %v10342_v2, 2  ;;  %v10782_v48 = vsel %vm1827_vm5, %v1831_v24, %v1833_v22  ;;  %v2224_v51 = vsel %vm2213_vm6, %v2219_v53, %v2223_v0 }
 0x153   : > { %v964_v15 = vpop.f32.mrf.mxu0  ;;  %v1563_v53 = vrot.slane %v10459_v3, 1 }
 0x154   : > { %v1830_v44 = vsel %vm1827_vm5, %v1828_v8, %v1829_v25  ;;  %v1564_v25 = vrot.slane %v10443_v59, 2 }
 0x155   : > { %v1097_v56 = vpop.f32.mrf.mxu1 }
 0x156   : > { %v1098_v5 = vadd.f32 %v1097_v56, %v959_v54  ;;  %v1317_v30 = vpop.f32.mrf.mxu2 }
 0x157   : > { %v1471_v50 = vpop.f32.mrf.mxu3 }
 0x158   : > { %v1374_v4 = vadd.f32 %v1312_v41, %v1098_v5 }
 0x15a   : > { %v10779_v12 = vadd.f32 %v1466_v42, %v1374_v4 }
 0x15b   : > { %v967_v36 = vpop.f32.mrf.mxu0  ;;  %8599 = vmatmul.msk.bf16.gmra.mxu2 %vm844_vm3, %v10782_v48 }
 0x15c   : > { %8617 = vmatmul.msk.bf16.gmra.mxu3 %vm844_vm3, %v2224_v51 }
 0x15d   : > { %v1100_v54 = vpop.f32.mrf.mxu1 }
 0x15e   : > { %v1101_v41 = vadd.f32 %v1100_v54, %v962_v43  ;;  %8564 = vmatmul.msk.bf16.gmra.mxu0 %vm844_vm3, %v1562_v58  ;;  %v1320_v24 = vpop.f32.mrf.mxu2  ;;  %v2226_v43 = vrot.slane %v10443_v59, 3  ;;  %v10802_v58 = vsel %vm1827_vm5, %v1833_v22, %v1835_v20 }
 0x15f   : > { %v1474_v42 = vpop.f32.mrf.mxu3 }
 0x160   : > { %v1375_v2 = vadd.f32 %v1315_v63, %v1101_v41  ;;  %8580 = vmatmul.msk.bf16.vlgmr.msra.gmra.mxu1 %vm844_vm3, %v1830_v44  ;;  %v1565_v63 = vor.u32 %v1564_v25, %v1563_v53  ;;  %v2227_v56 = vor.u32 %v2226_v43, %v2225_v10  ;;  %v1568_v44 = vrot.slane %v10462_v6, 2 }
 0x161   : > { %v2229_v41 = vrot.slane %v10478_v17, 2 }
 0x162   : > { %v10792_v45 = vadd.f32 %v1469_v16, %v1375_v2  ;;  %v1566_v54 = vsel %vm1547_vm4, %v1561_v49, %v1565_v63  ;;  %v2228_v3 = vsel %vm2213_vm6, %v2223_v0, %v2227_v56  ;;  %v1567_v0 = vrot.slane %v10478_v17, 1 }
 0x163   : > { %v969_v14 = vpop.f32.mrf.mxu0 }
 0x164   : > { %v1569_v25 = vor.u32 %v1568_v44, %v1567_v0 }
 0x165   : > { %v1102_v1 = vpop.f32.mrf.mxu1 }
 0x166   : > { %v1103_v46 = vadd.f32 %v1102_v1, %v964_v15  ;;  %v1322_v4 = vpop.f32.mrf.mxu2 }
 0x167   : > { %v1476_v8 = vpop.f32.mrf.mxu3 }
 0x168   : > { %v1376_v5 = vadd.f32 %v1317_v30, %v1103_v46 }
 0x16a   : > { %v10799_v16 = vadd.f32 %v1471_v50, %v1376_v5 }
 0x16b   : > { %v972_v51 = vpop.f32.mrf.mxu0  ;;  %8600 = vmatmul.msk.bf16.gmra.mxu2 %vm844_vm3, %v10802_v58 }
 0x16c   : > { %8618 = vmatmul.msk.bf16.gmra.mxu3 %vm844_vm3, %v2228_v3  ;;  %v1572_v3 = vrot.slane %v10481_v18, 2 }
 0x16d   : > { %v1105_v59 = vpop.f32.mrf.mxu1 }
 0x16e   : > { %v1106_v52 = vadd.f32 %v1105_v59, %v967_v36  ;;  %8565 = vmatmul.msk.bf16.gmra.mxu0 %vm844_vm3, %v1566_v54  ;;  %v1325_v22 = vpop.f32.mrf.mxu2  ;;  %v2230_v36 = vrot.slane %v10462_v6, 3  ;;  %v1570_v54 = vsel %vm1547_vm4, %v1565_v63, %v1569_v25  ;;  %v2233_v59 = vrot.slane %v10497_v27, 2 }
 0x16f   : > { %v1479_v30 = vpop.f32.mrf.mxu3 }
 0x170   : > { %v1377_v15 = vadd.f32 %v1320_v24, %v1106_v52  ;;  %8581 = vmatmul.msk.bf16.gmra.mxu1 %vm844_vm3, %v10761_v35  ;;  %v1837_v24 = vrot.slane %v10446_v60, 2  ;;  %v2231_v10 = vor.u32 %v2230_v36, %v2229_v41 }
 0x172   : > { %v10812_v50 = vadd.f32 %v1474_v42, %v1377_v15  ;;  %v10822_v46 = vsel %vm1827_vm5, %v1835_v20, %v1837_v24  ;;  %v2232_v17 = vsel %vm2213_vm6, %v2227_v56, %v2231_v10  ;;  %v1571_v56 = vrot.slane %v10497_v27, 1 }
 0x173   : > { %v974_v49 = vpop.f32.mrf.mxu0 }
 0x174   : > { %v1573_v0 = vor.u32 %v1572_v3, %v1571_v56 }
 0x175   : > { %v1107_v2 = vpop.f32.mrf.mxu1 }
 0x176   : > { %v1108_v53 = vadd.f32 %v1107_v2, %v969_v14  ;;  %v1327_v43 = vpop.f32.mrf.mxu2 }
 0x177   : > { %v1481_v1 = vpop.f32.mrf.mxu3 }
 0x178   : > { %v1378_v35 = vadd.f32 %v1322_v4, %v1108_v53 }
 0x17a   : > { %v10819_v42 = vadd.f32 %v1476_v8, %v1378_v35  ;;  %v1574_v35 = vsel %vm1547_vm4, %v1569_v25, %v1573_v0 }
 0x17b   : > { %v977_v5 = vpop.f32.mrf.mxu0  ;;  %8601 = vmatmul.msk.bf16.gmra.mxu2 %vm844_vm3, %v10822_v46 }
 0x17c   : > { %8619 = vmatmul.msk.bf16.gmra.mxu3 %vm844_vm3, %v2232_v17  ;;  %v2237_v17 = vrot.slane %v10516_v38, 2 }
 0x17d   : > { %v1110_v6 = vpop.f32.mrf.mxu1 }
 0x17e   : > { %v1111_v60 = vadd.f32 %v1110_v6, %v972_v51  ;;  %8566 = vmatmul.msk.bf16.gmra.mxu0 %vm844_vm3, %v1570_v54  ;;  %v1330_v20 = vpop.f32.mrf.mxu2  ;;  %v2234_v51 = vrot.slane %v10481_v18, 3  ;;  %v1576_v54 = vrot.slane %v10500_v28, 2 }
 0x17f   : > { %v1484_v4 = vpop.f32.mrf.mxu3 }
 0x180   : > { %v1379_v14 = vadd.f32 %v1325_v22, %v1111_v60  ;;  %8582 = vmatmul.msk.bf16.gmra.mxu1 %vm844_vm3, %v10782_v48  ;;  %v1839_v22 = vrot.slane %v10465_v7, 2  ;;  %v2235_v44 = vor.u32 %v2234_v51, %v2233_v59 }
 0x182   : > { %v10832_v8 = vadd.f32 %v1479_v30, %v1379_v14  ;;  %v10842_v2 = vsel %vm1827_vm5, %v1837_v24, %v1839_v22  ;;  %v2236_v27 = vsel %vm2213_vm6, %v2231_v10, %v2235_v44  ;;  %v1575_v10 = vrot.slane %v10516_v38, 1 }
 0x183   : > { %v979_v63 = vpop.f32.mrf.mxu0  ;;  %v1841_v14 = vrot.slane %v10484_v19, 2 }
 0x185   : > { %v1112_v52 = vpop.f32.mrf.mxu1  ;;  %v10862_v51 = vsel %vm1827_vm5, %v1839_v22, %v1841_v14 }
 0x186   : > { %v1113_v15 = vadd.f32 %v1112_v52, %v974_v49  ;;  %v1332_v41 = vpop.f32.mrf.mxu2 }
 0x187   : > { %v1486_v36 = vpop.f32.mrf.mxu3 }
 0x188   : > { %v1380_v48 = vadd.f32 %v1327_v43, %v1113_v15 }
 0x18a   : > { %v10839_v30 = vadd.f32 %v1481_v1, %v1380_v48 }
 0x18b   : > { %v982_v53 = vpop.f32.mrf.mxu0  ;;  %8602 = vmatmul.msk.bf16.gmra.mxu2 %vm844_vm3, %v10842_v2 }
 0x18c   : > { %8620 = vmatmul.msk.bf16.gmra.mxu3 %vm844_vm3, %v2236_v27 }
 0x18d   : > { %v1115_v18 = vpop.f32.mrf.mxu1 }
 0x18e   : > { %v1116_v7 = vadd.f32 %v1115_v18, %v977_v5  ;;  %8567 = vmatmul.msk.bf16.gmra.mxu0 %vm844_vm3, %v1574_v35  ;;  %v1335_v24 = vpop.f32.mrf.mxu2  ;;  %v2238_v5 = vrot.slane %v10500_v28, 3  ;;  %v2241_v35 = vrot.slane %v10537_v57, 2 }
 0x18f   : > { %v1489_v43 = vpop.f32.mrf.mxu3 }
 0x190   : > { %v1381_v49 = vadd.f32 %v1330_v20, %v1116_v7  ;;  %8583 = vmatmul.msk.bf16.gmra.mxu1 %vm844_vm3, %v10802_v58  ;;  %v1577_v20 = vor.u32 %v1576_v54, %v1575_v10  ;;  %v2239_v56 = vor.u32 %v2238_v5, %v2237_v17  ;;  %v1843_v7 = vrot.slane %v10503_v29, 2 }
 0x192   : > { %v10852_v1 = vadd.f32 %v1484_v4, %v1381_v49  ;;  %v1578_v15 = vsel %vm1547_vm4, %v1573_v0, %v1577_v20  ;;  %v2240_v38 = vsel %vm2213_vm6, %v2235_v44, %v2239_v56  ;;  %v1579_v44 = vrot.slane %v10537_v57, 1 }
 0x193   : > { %v984_v25 = vpop.f32.mrf.mxu0  ;;  %v10882_v17 = vsel %vm1827_vm5, %v1841_v14, %v1843_v7 }
 0x195   : > { %v1117_v6 = vpop.f32.mrf.mxu1 }
 0x196   : > { %v1118_v60 = vadd.f32 %v1117_v6, %v979_v63  ;;  %v1337_v3 = vpop.f32.mrf.mxu2 }
 0x197   : > { %v1491_v59 = vpop.f32.mrf.mxu3 }
 0x198   : > { %v1382_v58 = vadd.f32 %v1332_v41, %v1118_v60 }
 0x19a   : > { %v10859_v4 = vadd.f32 %v1486_v36, %v1382_v58  ;;  %v1580_v36 = vrot.slane %v10519_v39, 2 }
 0x19b   : > { %v987_v52 = vpop.f32.mrf.mxu0  ;;  %8603 = vmatmul.msk.bf16.gmra.mxu2 %vm844_vm3, %v10862_v51 }
 0x19c   : > { %8621 = vmatmul.msk.bf16.gmra.mxu3 %vm844_vm3, %v2240_v38  ;;  %v1581_v49 = vor.u32 %v1580_v36, %v1579_v44 }
 0x19d   : > { %v1120_v28 = vpop.f32.mrf.mxu1 }
 0x19e   : > { %v1121_v19 = vadd.f32 %v1120_v28, %v982_v53  ;;  %8568 = vmatmul.msk.bf16.gmra.mxu0 %vm844_vm3, %v1578_v15  ;;  %v1340_v22 = vpop.f32.mrf.mxu2  ;;  %v2242_v53 = vrot.slane %v10519_v39, 3  ;;  %v1582_v6 = vsel %vm1547_vm4, %v1577_v20, %v1581_v49  ;;  %v1845_v28 = vrot.slane %v10522_v40, 2 }
 0x19f   : > { %v1494_v48 = vpop.f32.mrf.mxu3 }
 0x1a0   : > { %v1383_v63 = vadd.f32 %v1335_v24, %v1121_v19  ;;  %8584 = vmatmul.msk.bf16.gmra.mxu1 %vm844_vm3, %v10822_v46  ;;  %v2243_v24 = vor.u32 %v2242_v53, %v2241_v35  ;;  %v10902_v36 = vsel %vm1827_vm5, %v1843_v7, %v1845_v28 }
 0x1a2   : > { %v10872_v41 = vadd.f32 %v1489_v43, %v1383_v63  ;;  %v2244_v57 = vsel %vm2213_vm6, %v2239_v56, %v2243_v24  ;;  %v1583_v56 = vrot.slane %v10560_v33, 1 }
 0x1a3   : > { %v989_v0 = vpop.f32.mrf.mxu0 }
 0x1a5   : > { %v1122_v27 = vpop.f32.mrf.mxu1 }
 0x1a6   : > { %v1123_v18 = vadd.f32 %v1122_v27, %v984_v25  ;;  %v1342_v10 = vpop.f32.mrf.mxu2 }
 0x1a7   : > { %v1496_v54 = vpop.f32.mrf.mxu3 }
 0x1a8   : > { %v1384_v46 = vadd.f32 %v1337_v3, %v1123_v18  ;;  %v1584_v3 = vrot.slane %v10540_v61, 2 }
 0x1aa   : > { %v10879_v43 = vadd.f32 %v1491_v59, %v1384_v46  ;;  %v2245_v59 = vrot.slane %v10560_v33, 2  ;;  %v1585_v19 = vor.u32 %v1584_v3, %v1583_v56  ;;  %v1588_v46 = vrot.slane %v10563_v37, 2 }
 0x1ab   : > { %v992_v5 = vpop.f32.mrf.mxu0  ;;  %8604 = vmatmul.msk.bf16.gmra.mxu2 %vm844_vm3, %v10882_v17 }
 0x1ac   : > { %8622 = vmatmul.msk.bf16.gmra.mxu3 %vm844_vm3, %v2244_v57  ;;  %v1586_v53 = vsel %vm1547_vm4, %v1581_v49, %v1585_v19 }
 0x1ad   : > { %v1125_v39 = vpop.f32.mrf.mxu1 }
 0x1ae   : > { %v1126_v29 = vadd.f32 %v1125_v39, %v987_v52  ;;  %8569 = vmatmul.msk.bf16.gmra.mxu0 %vm844_vm3, %v1582_v6  ;;  %v1345_v60 = vpop.f32.mrf.mxu2  ;;  %v2246_v52 = vrot.slane %v10540_v61, 3 }
 0x1af   : > { %v1499_v14 = vpop.f32.mrf.mxu3 }
 0x1b0   : > { %v1385_v25 = vadd.f32 %v1340_v22, %v1126_v29  ;;  %8585 = vmatmul.msk.bf16.gmra.mxu1 %vm844_vm3, %v10842_v2  ;;  %v2247_v63 = vor.u32 %v2246_v52, %v2245_v59  ;;  %v14709_v29 = vld [vmem:[#allocation14_spill] sm:$0xff] }
 0x1b2   : > { %v10892_v58 = vadd.f32 %v1494_v48, %v1385_v25  ;;  %v2248_v33 = vsel %vm2213_vm6, %v2243_v24, %v2247_v63  ;;  %v1847_v25 = vrot.slane %v14709_v29, 2 }
 0x1b3   : > { %v994_v20 = vpop.f32.mrf.mxu0 }
 0x1b4   : > { %v10926_v52 = vsel %vm1827_vm5, %v1845_v28, %v1847_v25 }
 0x1b5   : > { %v1127_v15 = vpop.f32.mrf.mxu1 }
 0x1b6   : > { %v1128_v38 = vadd.f32 %v1127_v15, %v989_v0  ;;  %v1347_v22 = vpop.f32.mrf.mxu2 }
 0x1b7   : > { %v1501_v44 = vpop.f32.mrf.mxu3 }
 0x1b8   : > { %v1386_v2 = vadd.f32 %v1342_v10, %v1128_v38  ;;  %v2249_v10 = vrot.slane %v10583_v47, 2  ;;  %v14710_v38 = vld [vmem:[#allocation18_spill] sm:$0xff] }
 0x1ba   : > { %v10899_v48 = vadd.f32 %v1496_v54, %v1386_v2  ;;  %v2250_v54 = vrot.slane %v10563_v37, 3 }
 0x1bb   : > { %v1699_v35 = vpop.f32.mrf.mxu0  ;;  %8605 = vmatmul.msk.bf16.gmra.mxu2 %vm844_vm3, %v10902_v36 }
 0x1bc   : > { %v10907_v61 = vadd.f32 %v1699_v35, %v10557_v31  ;;  %8623 = vmatmul.msk.bf16.gmra.mxu3 %vm844_vm3, %v2248_v33  ;;  %v1587_v31 = vrot.slane %v10583_v47, 1  ;;  %v14712_v33 = vld [vmem:[#allocation22_spill] sm:$0xff] }
 0x1bd   : > { %v1130_v0 = vpop.f32.mrf.mxu1 }
 0x1be   : > { %v1131_v40 = vadd.f32 %v1130_v0, %v992_v5  ;;  %8570 = vmatmul.msk.bf16.gmra.mxu0 %vm844_vm3, %v1586_v53  ;;  %v1350_v18 = vpop.f32.mrf.mxu2  ;;  %v14708_v5 = vld [vmem:[#allocation17_spill] sm:$0xff]  ;;  %v1591_v0 = vrot.slane %v14712_v33, 1 }
 0x1bf   : > { %v1504_v7 = vpop.f32.mrf.mxu3 }
 0x1c0   : > { %v1387_v27 = vadd.f32 %v1345_v60, %v1131_v40  ;;  %8586 = vmatmul.msk.bf16.gmra.mxu1 %vm844_vm3, %v10862_v51  ;;  %v1589_v51 = vor.u32 %v1588_v46, %v1587_v31  ;;  %v2251_v60 = vor.u32 %v2250_v54, %v2249_v10  ;;  %v14713_v40 = vld [vmem:[#allocation19_spill] sm:$0xff]  ;;  %v14714_v46 = vld [vmem:[#allocation20_spill] sm:$0xff] }
 0x1c1   : > { %v2254_v31 = vrot.slane %v14713_v40, 3 }
 0x1c2   : > { %v10915_v49 = vadd.f32 %v1499_v14, %v1387_v27  ;;  %v1590_v47 = vsel %vm1547_vm4, %v1585_v19, %v1589_v51  ;;  %v2252_v37 = vsel %vm2213_vm6, %v2247_v63, %v2251_v60  ;;  %v1592_v27 = vrot.slane %v14713_v40, 2 }
 0x1c3   : > { %v1701_v24 = vpop.f32.mrf.mxu0 }
 0x1c4   : > { %v1790_v6 = vadd.f32 %v1701_v24, %v14708_v5  ;;  %v2253_v24 = vrot.slane %v14712_v33, 2 }
 0x1c5   : > { %v1132_v57 = vpop.f32.mrf.mxu1 }
 0x1c6   : > { %v1133_v39 = vadd.f32 %v1132_v57, %v994_v20  ;;  %v1352_v14 = vpop.f32.mrf.mxu2  ;;  %v14716_v57 = vld [vmem:[#allocation16_spill] sm:$0xff]  ;;  %v2255_v29 = vor.u32 %v2254_v31, %v2253_v24 }
 0x1c7   : > { %v1506_v3 = vpop.f32.mrf.mxu3 }
 0x1c8   : > { %v1388_v56 = vadd.f32 %v1347_v22, %v1133_v39  ;;  %v14711_v22 = vld [vmem:[#allocation13_spill] sm:$0xff]  ;;  %v1593_v39 = vor.u32 %v1592_v27, %v1591_v0  ;;  %v14718_v0 = vld [vmem:[#allocation27_spill] sm:$0xff] }
 0x1c9   : > { %v1595_v40 = vrot.slane %v14718_v0, 1  ;;  %v14719_v27 = vld [vmem:[#allocation23_spill] sm:$0xff]  ;;  %v2257_v31 = vrot.slane %v14718_v0, 2 }
 0x1ca   : > { %v10923_v59 = vadd.f32 %v1501_v44, %v1388_v56  ;;  %v1596_v24 = vrot.slane %v14719_v27, 2  ;;  %v14722_v0 = vld [vmem:[#allocation31_spill] sm:$0xff] }
 0x1cb   : > { %v1704_v15 = vpop.f32.mrf.mxu0  ;;  %8606 = vmatmul.msk.bf16.gmra.mxu2 %vm844_vm3, %v10926_v52 }
 0x1cc   : > { %v10931_v2 = vadd.f32 %v1704_v15, %v14710_v38  ;;  %8624 = vmatmul.msk.bf16.gmra.mxu3 %vm844_vm3, %v2252_v37 }
 0x1cd   : > { %v1135_v20 = vpop.f32.mrf.mxu1 }
 0x1ce   : > { %v1136_v35 = vadd.f32 %v1135_v20, %v14711_v22  ;;  %8571 = vmatmul.msk.bf16.gmra.mxu0 %vm844_vm3, %v1590_v47  ;;  %v2085_v19 = vpop.f32.mrf.mxu2  ;;  %v1594_v20 = vsel %vm1547_vm4, %v1589_v51, %v1593_v39  ;;  %v2256_v22 = vsel %vm2213_vm6, %v2251_v60, %v2255_v29 }
 0x1cf   : > { %v2365_v44 = vpop.f32.mrf.mxu3 }
 0x1d0   : > { %v1389_v28 = vadd.f32 %v1350_v18, %v1136_v35  ;;  %8587 = vmatmul.msk.bf16.gmra.mxu1 %vm844_vm3, %v10882_v17  ;;  %v14715_v18 = vld [vmem:[#allocation15_spill] sm:$0xff]  ;;  %v1849_v17 = vrot.slane %v14716_v57, 2  ;;  %v14717_v35 = vld [vmem:[#allocation21_spill] sm:$0xff] }
 0x1d2   : > { %v10940_v63 = vadd.f32 %v1504_v7, %v1389_v28  ;;  %v10952_v37 = vsel %vm1827_vm5, %v1847_v25, %v1849_v17 }
 0x1d3   : > { %v1706_v53 = vpop.f32.mrf.mxu0 }
 0x1d4   : > { %v1792_v10 = vadd.f32 %v1706_v53, %v14714_v46  ;;  %v14720_v46 = vld [vmem:[#allocation25_spill] sm:$0xff] }
 0x1d5   : > { %v1137_v54 = vpop.f32.mrf.mxu1 }
 0x1d6   : > { %v1138_v5 = vadd.f32 %v1137_v54, %v14715_v18  ;;  %v2087_v56 = vpop.f32.mrf.mxu2 }
 0x1d7   : > { %v2367_v15 = vpop.f32.mrf.mxu3 }
 0x1d8   : > { %v1390_v7 = vadd.f32 %v1352_v14, %v1138_v5  ;;  %v1851_v5 = vrot.slane %v10589_v21, 2 }
 0x1da   : > { %v10949_v47 = vadd.f32 %v1506_v3, %v1390_v7 }
 0x1db   : > { %v1709_v38 = vpop.f32.mrf.mxu0  ;;  %8607 = vmatmul.msk.bf16.gmra.mxu2 %vm844_vm3, %v10952_v37 }
 0x1dc   : > { %v10957_v28 = vadd.f32 %v1709_v38, %v14717_v35  ;;  %8625 = vmatmul.msk.bf16.gmra.mxu3 %vm844_vm3, %v2256_v22  ;;  %v10977_v22 = vsel %vm1827_vm5, %v1849_v17, %v1851_v5 }
 0x1dd   : > { %v1931_v53 = vpop.f32.mrf.mxu1 }
 0x1de   : > { %v2021_v14 = vadd.f32 %v1931_v53, %v10907_v61  ;;  %8572 = vmatmul.msk.bf16.gmra.mxu0 %vm844_vm3, %v1594_v20  ;;  %v2090_v51 = vpop.f32.mrf.mxu2  ;;  %v2258_v61 = vrot.slane %v14719_v27, 3  ;;  %v14723_v27 = vld [vmem:[#allocation28_spill] sm:$0xff] }
 0x1df   : > { %v2370_v3 = vpop.f32.mrf.mxu3 }
 0x1e0   : > { %v2175_v25 = vadd.f32 %v2085_v19, %v2021_v14  ;;  %8588 = vmatmul.msk.bf16.gmra.mxu1 %vm844_vm3, %v10902_v36  ;;  %v1597_v36 = vor.u32 %v1596_v24, %v1595_v40  ;;  %v2259_v57 = vor.u32 %v2258_v61, %v2257_v31  ;;  %v1599_v40 = vrot.slane %v14722_v0, 1  ;;  %v14724_v61 = vld [vmem:[#allocation29_spill] sm:$0xff] }
 0x1e1   : > { %v1600_v24 = vrot.slane %v14723_v27, 2  ;;  %v2261_v31 = vrot.slane %v14722_v0, 2 }
 0x1e2   : > { %v10966_v60 = vadd.f32 %v2365_v44, %v2175_v25  ;;  %v1598_v53 = vsel %vm1547_vm4, %v1593_v39, %v1597_v36  ;;  %v2260_v14 = vsel %vm2213_vm6, %v2255_v29, %v2259_v57  ;;  %v14721_v25 = vld [vmem:[#allocation26_spill] sm:$0xff] }
 0x1e3   : > { %v1711_v33 = vpop.f32.mrf.mxu0 }
 0x1e4   : > { %v1794_v54 = vadd.f32 %v1711_v33, %v14720_v46 }
 0x1e5   : > { %v1933_v18 = vpop.f32.mrf.mxu1 }
 0x1e6   : > { %v2022_v19 = vadd.f32 %v1933_v18, %v1790_v6  ;;  %v2092_v44 = vpop.f32.mrf.mxu2 }
 0x1e7   : > { %v2372_v38 = vpop.f32.mrf.mxu3 }
 0x1e8   : > { %v2176_v7 = vadd.f32 %v2087_v56, %v2022_v19  ;;  %v14725_v19 = vld [vmem:[#allocation24_spill] sm:$0xff] }
 0x1ea   : > { %v10974_v20 = vadd.f32 %v2367_v15, %v2176_v7  ;;  %v1853_v7 = vrot.slane %v14725_v19, 2 }
 0x1eb   : > { %v1714_v35 = vpop.f32.mrf.mxu0  ;;  %8608 = vmatmul.msk.bf16.gmra.mxu2 %vm844_vm3, %v10977_v22 }
 0x1ec   : > { %v10982_v33 = vadd.f32 %v1714_v35, %v14721_v25  ;;  %8626 = vmatmul.msk.bf16.gmra.mxu3 %vm844_vm3, %v2260_v14 }
 0x1ed   : > { %v1936_v6 = vpop.f32.mrf.mxu1 }
 0x1ee   : > { %v2023_v21 = vadd.f32 %v1936_v6, %v10931_v2  ;;  %8573 = vmatmul.msk.bf16.gmra.mxu0 %vm844_vm3, %v1598_v53  ;;  %v2095_v39 = vpop.f32.mrf.mxu2  ;;  %v2262_v2 = vrot.slane %v14723_v27, 3  ;;  %v11002_v6 = vsel %vm1827_vm5, %v1851_v5, %v1853_v7 }
 0x1ef   : > { %v2375_v56 = vpop.f32.mrf.mxu3 }
 0x1f0   : > { %v2177_v17 = vadd.f32 %v2090_v51, %v2023_v21  ;;  %8589 = vmatmul.msk.bf16.gmra.mxu1 %vm844_vm3, %v10926_v52  ;;  %v1601_v52 = vor.u32 %v1600_v24, %v1599_v40  ;;  %v2263_v35 = vor.u32 %v2262_v2, %v2261_v31  ;;  %v14727_v24 = vld [vmem:[#allocation35_spill] sm:$0xff]  ;;  %v14728_v2 = vld [vmem:[#allocation32_spill] sm:$0xff] }
 0x1f1   : > { %v1603_v31 = vrot.slane %v14727_v24, 1 }
 0x1f2   : > { %v10991_v29 = vadd.f32 %v2370_v3, %v2177_v17  ;;  %v1602_v17 = vsel %vm1547_vm4, %v1597_v36, %v1601_v52  ;;  %v2264_v0 = vsel %vm2213_vm6, %v2259_v57, %v2263_v35 }
 0x1f3   : > { %v1716_v15 = vpop.f32.mrf.mxu0 }
 0x1f4   : > { %v1796_v46 = vadd.f32 %v1716_v15, %v14724_v61  ;;  %v14726_v15 = vld [vmem:[#allocation30_spill] sm:$0xff]  ;;  %v1604_v61 = vrot.slane %v14728_v2, 2 }
 0x1f5   : > { %v1938_v18 = vpop.f32.mrf.mxu1 }
 0x1f6   : > { %v2024_v51 = vadd.f32 %v1938_v18, %v1792_v10  ;;  %v2097_v3 = vpop.f32.mrf.mxu2  ;;  %v2265_v18 = vrot.slane %v14727_v24, 2 }
 0x1f7   : > { %v2377_v14 = vpop.f32.mrf.mxu3 }
 0x1f8   : > { %v2178_v53 = vadd.f32 %v2092_v44, %v2024_v51  ;;  %v14729_v51 = vld [vmem:[#allocation33_spill] sm:$0xff] }
 0x1fa   : > { %v10999_v25 = vadd.f32 %v2372_v38, %v2178_v53 }
 0x1fb   : > { %v1719_v21 = vpop.f32.mrf.mxu0  ;;  %8609 = vmatmul.msk.bf16.gmra.mxu2 %vm844_vm3, %v11002_v6 }
 0x1fc   : > { %v11007_v27 = vadd.f32 %v1719_v21, %v14726_v15  ;;  %8627 = vmatmul.msk.bf16.gmra.mxu3 %vm844_vm3, %v2264_v0  ;;  %v1855_v21 = vrot.slane %v10635_v9, 2 }
 0x1fd   : > { %v1941_v10 = vpop.f32.mrf.mxu1 }
 0x1fe   : > { %v2025_v44 = vadd.f32 %v1941_v10, %v10957_v28  ;;  %8574 = vmatmul.msk.bf16.gmra.mxu0 %vm844_vm3, %v1602_v17  ;;  %v2100_v36 = vpop.f32.mrf.mxu2  ;;  %v2266_v28 = vrot.slane %v14728_v2, 3 }
 0x1ff   : > { %v2380_v38 = vpop.f32.mrf.mxu3 }
 0x200   : > { %v2179_v5 = vadd.f32 %v2095_v39, %v2025_v44  ;;  %8590 = vmatmul.msk.bf16.gmra.mxu1 %vm844_vm3, %v10952_v37  ;;  %v1605_v37 = vor.u32 %v1604_v61, %v1603_v31  ;;  %v2267_v17 = vor.u32 %v2266_v28, %v2265_v18  ;;  %v11027_v44 = vsel %vm1827_vm5, %v1853_v7, %v1855_v21  ;;  %v14731_v61 = vld [vmem:[#allocation36_spill] sm:$0xff] }
 0x201   : > { %v1607_v31 = vrot.slane %v10709_v26, 1  ;;  %v1608_v18 = vrot.slane %v14731_v61, 2  ;;  %v2269_v28 = vrot.slane %v10709_v26, 2 }
 0x202   : > { %v11016_v57 = vadd.f32 %v2375_v56, %v2179_v5  ;;  %v1606_v24 = vsel %vm1547_vm4, %v1601_v52, %v1605_v37  ;;  %v2268_v2 = vsel %vm2213_vm6, %v2263_v35, %v2267_v17 }
 0x203   : > { %v1721_v40 = vpop.f32.mrf.mxu0 }
 0x204   : > { %v1798_v19 = vadd.f32 %v1721_v40, %v14729_v51  ;;  %v14730_v40 = vld [vmem:[#allocation34_spill] sm:$0xff] }
 0x205   : > { %v1943_v53 = vpop.f32.mrf.mxu1 }
 0x206   : > { %v2026_v39 = vadd.f32 %v1943_v53, %v1794_v54  ;;  %v2102_v56 = vpop.f32.mrf.mxu2  ;;  %v14732_v53 = vld [vmem:[#allocation37_spill] sm:$0xff] }
 0x207   : > { %v2382_v15 = vpop.f32.mrf.mxu3 }
 0x208   : > { %v2180_v0 = vadd.f32 %v2097_v3, %v2026_v39 }
 0x20a   : > { %v11024_v10 = vadd.f32 %v2377_v14, %v2180_v0 }
 0x20b   : > { %v1724_v5 = vpop.f32.mrf.mxu0  ;;  %8610 = vmatmul.msk.bf16.gmra.mxu2 %vm844_vm3, %v11027_v44 }
 0x20c   : > { %v11032_v51 = vadd.f32 %v1724_v5, %v14730_v40  ;;  %8628 = vmatmul.msk.bf16.gmra.mxu3 %vm844_vm3, %v2268_v2  ;;  %v1609_v5 = vor.u32 %v1608_v18, %v1607_v31  ;;  %v14734_v31 = vld [vmem:[#allocation12_spill] sm:$0xff] }
 0x20d   : > { %v1946_v54 = vpop.f32.mrf.mxu1  ;;  %v1611_v18 = vrot.slane %v14734_v31, 1 }
 0x20e   : > { %v2027_v9 = vadd.f32 %v1946_v54, %v10982_v33  ;;  %8575 = vmatmul.msk.bf16.gmra.mxu0 %vm844_vm3, %v1606_v24  ;;  %v2105_v52 = vpop.f32.mrf.mxu2  ;;  %v2270_v33 = vrot.slane %v14731_v61, 3  ;;  %v14733_v61 = vld [vmem:[#allocation38_spill] sm:$0xff] }
 0x20f   : > { %v2385_v3 = vpop.f32.mrf.mxu3 }
 0x210   : > { %v2181_v7 = vadd.f32 %v2100_v36, %v2027_v9  ;;  %8591 = vmatmul.msk.bf16.gmra.mxu1 %vm844_vm3, %v10977_v22  ;;  %v1857_v22 = vrot.slane %v10658_v34, 2  ;;  %v2271_v24 = vor.u32 %v2270_v33, %v2269_v28  ;;  %v1612_v28 = vrot.slane %v10357_v13, 2 }
 0x211   : > { %v2274_v33 = vrot.slane %v10357_v13, 3 }
 0x212   : > { %v11041_v35 = vadd.f32 %v2380_v38, %v2181_v7  ;;  %v11054_v9 = vsel %vm1827_vm5, %v1855_v21, %v1857_v22  ;;  %v1610_v7 = vsel %vm1547_vm4, %v1605_v37, %v1609_v5 }
 0x213   : > { %v1726_v14 = vpop.f32.mrf.mxu0 }
 0x214   : > { %v11048_v39 = vadd.f32 %v1726_v14, %v14732_v53  ;;  %v2272_v14 = vsel %vm2213_vm6, %v2267_v17, %v2271_v24 }
 0x215   : > { %v1948_v36 = vpop.f32.mrf.mxu1 }
 0x216   : > { %v2028_v0 = vadd.f32 %v1948_v36, %v1796_v46  ;;  %v2107_v2 = vpop.f32.mrf.mxu2  ;;  %v14735_v36 = vld [vmem:[#allocation39_spill] sm:$0xff] }
 0x217   : > { %v2387_v40 = vpop.f32.mrf.mxu3 }
 0x218   : > { %v2182_v38 = vadd.f32 %v2102_v56, %v2028_v0 }
 0x21a   : > { %v11051_v54 = vadd.f32 %v2382_v15, %v2182_v38 }
 0x21b   : > { %v1729_v26 = vpop.f32.mrf.mxu0  ;;  %8611 = vmatmul.msk.bf16.gmra.mxu2 %vm844_vm3, %v11054_v9 }
 0x21c   : > { %v11059_v53 = vadd.f32 %v1729_v26, %v14733_v61  ;;  %8629 = vmatmul.msk.bf16.gmra.mxu3 %vm844_vm3, %v2272_v14  ;;  %v11078_v26 = vld [vmem:[%s10338_s23 + $0x88] sm:$0xff] }
 0x21d   : > { %v1951_v46 = vpop.f32.mrf.mxu1 }
 0x21e   : > { %v2029_v34 = vadd.f32 %v1951_v46, %v11007_v27  ;;  %8576 = vmatmul.msk.bf16.gmra.mxu0 %vm844_vm3, %v1610_v7  ;;  %v2110_v37 = vpop.f32.mrf.mxu2  ;;  %v2273_v27 = vrot.slane %v14734_v31, 2  ;;  %v14736_v31 = vld [vmem:[#allocation40_spill] sm:$0xff] }
 0x21f   : > { %v2390_v17 = vpop.f32.mrf.mxu3 }
 0x220   : > { %v2183_v21 = vadd.f32 %v2105_v52, %v2029_v34  ;;  %8592 = vmatmul.msk.bf16.gmra.mxu1 %vm844_vm3, %v11002_v6  ;;  %v1859_v6 = vrot.slane %v11078_v26, 2  ;;  %v2275_v7 = vor.u32 %v2274_v33, %v2273_v27 }
 0x222   : > { %v11068_v56 = vadd.f32 %v2385_v3, %v2183_v21  ;;  %v1613_v3 = vor.u32 %v1612_v28, %v1611_v18  ;;  %v11084_v21 = vsel %vm1827_vm5, %v1857_v22, %v1859_v6  ;;  %v11097_v22 = vld [vmem:[%s10338_s23 + $0x90] sm:$0xff]  }
 0x223   : > { %v1731_v15 = vpop.f32.mrf.mxu0  ;;  %14738 = vst [vmem:[#allocation14_spill] sm:$0xff] %v11097_v22 }
 0x224   : > { %v11075_v0 = vadd.f32 %v1731_v15, %v14735_v36  ;;  %v1614_v15 = vsel %vm1547_vm4, %v1609_v5, %v1613_v3  ;;  %v1619_v5 = vshll.u32 %v11097_v22, 16 }
 0x225   : > { %v1953_v52 = vpop.f32.mrf.mxu1 }
 0x226   : > { %v2030_v38 = vadd.f32 %v1953_v52, %v1798_v19  ;;  %v2112_v61 = vpop.f32.mrf.mxu2  ;;  %v2276_v19 = vsel %vm2213_vm6, %v2271_v24, %v2275_v7 }
 0x227   : > { %v2392_v46 = vpop.f32.mrf.mxu3 }
 0x228   : > { %v2184_v14 = vadd.f32 %v2107_v2, %v2030_v38  ;;  %v1621_v38 = vrot.slane %v1619_v5, 2 }
 0x22a   : > { %v11081_v34 = vadd.f32 %v2387_v40, %v2184_v14  ;;  %v1616_v40 = vshrl.u32 %v11097_v22, 16 }
 0x22b   : > { %v1734_v13 = vpop.f32.mrf.mxu0  ;;  %8612 = vmatmul.msk.bf16.gmra.mxu2 %vm844_vm3, %v11084_v21 }
 0x22c   : > { %v11089_v36 = vadd.f32 %v1734_v13, %v14736_v31  ;;  %8630 = vmatmul.msk.bf16.gmra.mxu3 %vm844_vm3, %v2276_v19  ;;  %v1618_v33 = vrot.slane %v1616_v40, 1  ;;  %v2277_v14 = vrot.slane %v1616_v40, 2  ;;  %v2278_v13 = vrot.slane %v1619_v5, 3  ;;  %v2492_v40 = vld [vmem:[#allocation2 + $0x20] sm:$0xf] }
 0x22d   : > { %v1956_v52 = vpop.f32.mrf.mxu1  ;;  %v11114_v31 = vrot.slane %v11097_v22, 2 }
 0x22e   : > { %14737 = vst [vmem:[#allocation17_spill] sm:$0xff] %v11089_v36  ;;  %v2031_v2 = vadd.f32 %v1956_v52, %v11032_v51  ;;  %8577 = vmatmul.msk.bf16.gmra.mxu0 %vm844_vm3, %v1614_v15  ;;  %v11103_v18 = vpop.f32.mrf.mxu2  ;;  %v2279_v52 = vor.u32 %v2278_v13, %v2277_v14 }
 0x22f   : > { %v11105_v28 = vpop.f32.mrf.mxu3 }
 0x230   : > { %v2185_v24 = vadd.f32 %v2110_v37, %v2031_v2  ;;  %8593 = vmatmul.msk.bf16.gmra.mxu1 %vm844_vm3, %v11027_v44  ;;  %v1622_v44 = vor.u32 %v1621_v38, %v1618_v33  ;;  %v2586_v33 = vsel %vm899_vm0, %v2492_v40, 0 }
 0x231   : > { %2595 = vmatpush.bf16.msra.mxu0 %v2586_v33 }
 0x232   : > { %v11107_v27 = vadd.f32 %v2390_v17, %v2185_v24 }
 0x233   : > { %v1736_v51 = vpop.f32.mrf.mxu0 }
 0x234   : > { %v11110_v15 = vadd.f32 %v1736_v51, %v10735_v23  ;;  %v11124_v23 = vsel %vm1827_vm5, %v1859_v6, %v11114_v31  ;;  %v2280_v51 = vsel %vm2213_vm6, %v2275_v7, %v2279_v52  ;;  %v1625_v6 = vshrl.u32 %v10730_v32, 16  ;;  %v11141_v7 = vld [vmem:[%s10338_s23 + $0x98] sm:$0xff]  }
 0x235   : > { %v1958_v19 = vpop.f32.mrf.mxu1  ;;  %14742 = vst [vmem:[#allocation19_spill] sm:$0xff] %v11141_v7 }
 0x236   : > { %14739 = vst [vmem:[#allocation18_spill] sm:$0xff] %v11110_v15  ;;  %v2032_v37 = vadd.f32 %v1958_v19, %v11048_v39  ;;  %v11116_v36 = vpop.f32.mrf.mxu2  ;;  %v1623_v39 = vsel %vm1547_vm4, %v1613_v3, %v1622_v44  ;;  %v1628_v3 = vshll.u32 %v10730_v32, 16  ;;  %v2063_v15 = vrot.slane %v11141_v7, 2 }
 0x237   : > { %14740 = vst [vmem:[#allocation13_spill] sm:$0xff] %v11116_v36  ;;  %v11118_v17 = vpop.f32.mrf.mxu3 }
 0x238   : > { %v2186_v2 = vadd.f32 %v2112_v61, %v2032_v37  ;;  %14741 = vst [vmem:[#allocation22_spill] sm:$0xff] %v11118_v17  ;;  %v1627_v37 = vrot.slane %v1625_v6, 1  ;;  %v2064_v6 = vsel %vm1827_vm5, %v11114_v31, %v2063_v15 }
 0x23a   : > { %v11120_v24 = vadd.f32 %v2392_v46, %v2186_v2  ;;  %v2285_v46 = vshll.u32 %v11141_v7, 16  ;;  %v1630_v2 = vrot.slane %v1628_v3, 2 }
 0x23b   : > { %v1739_v5 = vpop.f32.mrf.mxu0  ;;  %8613 = vmatmul.msk.bf16.gmra.mxu2 %vm844_vm3, %v11124_v23 }
 0x23c   : > { %v11130_v61 = vadd.f32 %v1739_v5, %v10748_v55  ;;  %8631 = vmatmul.msk.bf16.gmra.mxu3 %vm844_vm3, %v2280_v51  ;;  %v2282_v55 = vshrl.u32 %v11141_v7, 16  ;;  %v2287_v5 = vrot.slane %v2285_v46, 3  ;;  %v631_v51 = vld [vmem:[%s10338_s23 + $0xa0] sm:$0xf]  ;;  %v1631_v22 = vor.u32 %v1630_v2, %v1627_v37 }
 0x23d   : > { %v11132_v38 = vpop.f32.mrf.mxu1 }
 0x23e   : > { %8578 = vmatmul.msk.bf16.gmra.mxu0 %vm844_vm3, %v1623_v39  ;;  %v11147_v14 = vpop.f32.mrf.mxu2  ;;  %v2284_v40 = vrot.slane %v2282_v55, 2  ;;  %v1632_v55 = vsel %vm1547_vm4, %v1622_v44, %v1631_v22 }
 0x23f   : > { %14743 = vst [vmem:[#allocation20_spill] sm:$0xff] %v11147_v14  ;;  %v11149_v13 = vpop.f32.mrf.mxu3 }
 0x240   : > { %8594 = vmatmul.msk.bf16.gmra.mxu1 %vm844_vm3, %v11054_v9  ;;  %v2288_v17 = vor.u32 %v2287_v5, %v2284_v40  ;;  %v672_v9 = vunpack.c.l.bf16 %v631_v51 }
 0x242   : > { %v11166_v46 = vpack.c.bf16 %v672_v9, %v672_v9 }
 0x243   : > { %v1741_v19 = vpop.f32.mrf.mxu0 }
 0x244   : > { %v11152_v39 = vadd.f32 %v1741_v19, %v10758_v11  ;;  %v2289_v11 = vsel %vm2213_vm6, %v2279_v52, %v2288_v17  ;;  %14746 = vst [vmem:[#allocation21_spill] sm:$0xff] %v11166_v46  ;;  %v2291_v2 = vshrl.u32 %v11166_v46, 16  ;;  %v2294_v22 = vshll.u32 %v11166_v46, 16 }
 0x245   : > { %v11155_v33 = vpop.f32.mrf.mxu1 }
 0x246   : > { %14744 = vst [vmem:[#allocation15_spill] sm:$0xff] %v11152_v39  ;;  %v11158_v36 = vpop.f32.mrf.mxu2  ;;  %v2293_v40 = vrot.slane %v2291_v2, 2  ;;  %v2296_v5 = vrot.slane %v2294_v22, 3 }
 0x247   : > { %v11160_v14 = vpop.f32.mrf.mxu3 }
 0x248   : > { %14745 = vst [vmem:[#allocation16_spill] sm:$0xff] %v11160_v14  ;;  %v2297_v7 = vor.u32 %v2296_v5, %v2293_v40 }
 0x24b   : > { %v1744_v3 = vpop.f32.mrf.mxu0  ;;  %8614 = vmatmul.msk.bf16.gmra.mxu2 %vm844_vm3, %v2064_v6  ;;  %v2065_v6 = vrot.slane %v11166_v46, 2 }
 0x24c   : > { %v1807_v19 = vadd.f32 %v1744_v3, %v10771_v62  ;;  %8632 = vmatmul.msk.bf16.gmra.mxu3 %vm844_vm3, %v2289_v11  ;;  %v10060_v3 = vld [vmem:[%s10338_s23 + $0x10] sm:$0xff]  ;;  %v10061_v11 = vld [vmem:[%s10338_s23 + $0x18] sm:$0xff] }
 0x24d   : > { %v11169_v37 = vpop.f32.mrf.mxu1  ;;  %v2495_v39 = vrot.slane %v10061_v11, 3  ;;  %v2066_v2 = vsel %vm1827_vm5, %v2063_v15, %v2065_v6 }
 0x24e   : > { %8579 = vmatmul.msk.bf16.gmra.mxu0 %vm844_vm3, %v1632_v55  ;;  %v2125_v44 = vpop.f32.mrf.mxu2  ;;  %v2494_v55 = vrot.slane %v10060_v3, 3 }
 0x24f   : > { %v2405_v52 = vpop.f32.mrf.mxu3 }
 0x250   : > { %8595 = vmatmul.msk.bf16.gmra.mxu1 %vm844_vm3, %v11084_v21 }
 0x253   : > { %v1746_v62 = vpop.f32.mrf.mxu0 }
 0x254   : > { %v11179_v51 = vadd.f32 %v1746_v62, %v10779_v12  ;;  %v2496_v12 = vsel %vm2493_vm7, %v2494_v55, %v2495_v39  ;;  %v2298_v62 = vsel %vm2213_vm6, %v2288_v17, %v2297_v7  ;;  %v10062_v55 = vld [vmem:[%s10338_s23 + $0x20] sm:$0xff] }
 0x255   : > { %v11181_v9 = vpop.f32.mrf.mxu1 }
 0x256   : > { %14747 = vst [vmem:[#allocation27_spill] sm:$0xff] %v11179_v51  ;;  %v11186_v14 = vpop.f32.mrf.mxu2 }
 0x257   : > { %v11188_v21 = vpop.f32.mrf.mxu3 }
 0x25b   : > { %v1749_v22 = vpop.f32.mrf.mxu0  ;;  %8615 = vmatmul.msk.bf16.gmra.mxu2 %vm844_vm3, %v2066_v2 }
 0x25c   : > { %v1809_v51 = vadd.f32 %v1749_v22, %v10792_v45  ;;  %8633 = vmatmul.msk.bf16.gmra.mxu3 %vm844_vm3, %v2298_v62 }
 0x25d   : > { %v1971_v46 = vpop.f32.mrf.mxu1 }
 0x25e   : > { %v2037_v40 = vadd.f32 %v1971_v46, %v11130_v61  ;;  %8634 = vmatmul.msk.bf16.vlgmr.msra.gmra.mxu0 %vm844_vm3, %v2496_v12  ;;  %v2130_v15 = vpop.f32.mrf.mxu2  ;;  %v2497_v61 = vrot.slane %v10062_v55, 3  ;;  %v1863_v46 = vrot.slane %v10730_v32, 2 }
 0x25f   : > { %v2410_v17 = vpop.f32.mrf.mxu3 }
 0x260   : > { %v2191_v5 = vadd.f32 %v2125_v44, %v2037_v40  ;;  %8596 = vmatmul.msk.bf16.gmra.mxu1 %vm844_vm3, %v11124_v23  ;;  %v2498_v44 = vsel %vm2493_vm7, %v2495_v39, %v2497_v61  ;;  %v1864_v22 = vsel %vm1827_vm5, %v11114_v31, %v1863_v46 }
 0x262   : > { %v11200_v6 = vadd.f32 %v2405_v52, %v2191_v5 }
 0x263   : > { %v1751_v3 = vpop.f32.mrf.mxu0 }
 0x264   : > { %v11203_v45 = vadd.f32 %v1751_v3, %v10799_v16  ;;  %v10063_v3 = vld [vmem:[%s10338_s23 + $0x28] sm:$0xff] }
 0x265   : > { %v11205_v7 = vpop.f32.mrf.mxu1  ;;  %v2499_v31 = vrot.slane %v10063_v3, 3 }
 0x266   : > { %v11210_v2 = vpop.f32.mrf.mxu2 }
 0x267   : > { %v11215_v16 = vpop.f32.mrf.mxu3 }
 0x26b   : > { %v1754_v11 = vpop.f32.mrf.mxu0 }
 0x26c   : > { %v1811_v23 = vadd.f32 %v1754_v11, %v10812_v50 }
 0x26d   : > { %v1976_v52 = vpop.f32.mrf.mxu1 }
 0x26e   : > { %v2039_v12 = vadd.f32 %v1976_v52, %v1807_v19  ;;  %8635 = vmatmul.msk.bf16.gmra.mxu0 %vm844_vm3, %v2498_v44  ;;  %v2135_v50 = vpop.f32.mrf.mxu2  ;;  %v2500_v19 = vsel %vm2493_vm7, %v2497_v61, %v2499_v31  ;;  %v10064_v61 = vld [vmem:[%s10338_s23 + $0x30] sm:$0xff] }
 0x26f   : > { %v2415_v55 = vpop.f32.mrf.mxu3  ;;  %v2501_v3 = vrot.slane %v10064_v61, 3 }
 0x270   : > { %v2193_v62 = vadd.f32 %v2130_v15, %v2039_v12  ;;  %8597 = vmatmul.msk.bf16.gmra.mxu1 %vm844_vm3, %v1864_v22 }
 0x272   : > { %v11219_v32 = vadd.f32 %v2410_v17, %v2193_v62 }
 0x273   : > { %v1756_v40 = vpop.f32.mrf.mxu0 }
 0x274   : > { %v11222_v39 = vadd.f32 %v1756_v40, %v10819_v42 }
 0x275   : > { %v11224_v5 = vpop.f32.mrf.mxu1 }
 0x276   : > { %v11230_v17 = vpop.f32.mrf.mxu2 }
 0x277   : > { %v11232_v52 = vpop.f32.mrf.mxu3 }
 0x27b   : > { %v1759_v46 = vpop.f32.mrf.mxu0 }
 0x27c   : > { %v1813_v15 = vadd.f32 %v1759_v46, %v10832_v8  ;;  %v2502_v46 = vsel %vm2493_vm7, %v2499_v31, %v2501_v3 }
 0x27d   : > { %v1981_v11 = vpop.f32.mrf.mxu1 }
 0x27e   : > { %v2041_v44 = vadd.f32 %v1981_v11, %v1809_v51  ;;  %8636 = vmatmul.msk.bf16.gmra.mxu0 %vm844_vm3, %v2500_v19  ;;  %v2140_v8 = vpop.f32.mrf.mxu2 }
 0x27f   : > { %v2420_v19 = vpop.f32.mrf.mxu3 }
 0x280   : > { %v2195_v42 = vadd.f32 %v2135_v50, %v2041_v44 }
 0x282   : > { %v11234_v22 = vadd.f32 %v2415_v55, %v2195_v42 }
 0x283   : > { %v1761_v12 = vpop.f32.mrf.mxu0 }
 0x284   : > { %v11237_v62 = vadd.f32 %v1761_v12, %v10839_v30 }
 0x285   : > { %v11239_v40 = vpop.f32.mrf.mxu1 }
 0x286   : > { %14748 = vst [vmem:[#allocation23_spill] sm:$0xff] %v11237_v62  ;;  %v11249_v12 = vpop.f32.mrf.mxu2 }
 0x287   : > { %v11256_v31 = vpop.f32.mrf.mxu3 }
 0x288   : > { %14751 = vst [vmem:[#allocation31_spill] sm:$0xff] %v11256_v31 }
 0x28b   : > { %v1764_v51 = vpop.f32.mrf.mxu0 }
 0x28c   : > { %v11244_v50 = vadd.f32 %v1764_v51, %v10852_v1  ;;  %v10065_v1 = vld [vmem:[%s10338_s23 + $0x38] sm:$0xff] }
 0x28d   : > { %v1986_v11 = vpop.f32.mrf.mxu1  ;;  %v2503_v51 = vrot.slane %v10065_v1, 3  ;;  %v10066_v1 = vld [vmem:[%s10338_s23 + $0x40] sm:$0xff] }
 0x28e   : > { %14749 = vst [vmem:[#allocation25_spill] sm:$0xff] %v11244_v50  ;;  %v2043_v55 = vadd.f32 %v1986_v11, %v1811_v23  ;;  %8637 = vmatmul.msk.bf16.gmra.mxu0 %vm844_vm3, %v2502_v46 }
 0x28f   : > { %v2504_v23 = vsel %vm2493_vm7, %v2501_v3, %v2503_v51  ;;  %v2505_v3 = vrot.slane %v10066_v1, 3 }
 0x290   : > { %v2197_v44 = vadd.f32 %v2140_v8, %v2043_v55 }
 0x292   : > { %v11247_v30 = vadd.f32 %v2420_v19, %v2197_v44  ;;  %v2145_v19 = vpop.f32.mrf.mxu2 }
 0x293   : > { %v1766_v42 = vpop.f32.mrf.mxu0 }
 0x294   : > { %v11252_v61 = vadd.f32 %v1766_v42, %v10859_v4  ;;  %v2425_v4 = vpop.f32.mrf.mxu3 }
 0x295   : > { %v11254_v62 = vpop.f32.mrf.mxu1 }
 0x296   : > { %14750 = vst [vmem:[#allocation26_spill] sm:$0xff] %v11252_v61 }
 0x29b   : > { %v1769_v50 = vpop.f32.mrf.mxu0 }
 0x29c   : > { %v11261_v8 = vadd.f32 %v1769_v50, %v10872_v41  ;;  %v2506_v41 = vsel %vm2493_vm7, %v2503_v51, %v2505_v3 }
 0x29d   : > { %v1991_v46 = vpop.f32.mrf.mxu1 }
 0x29e   : > { %v2045_v11 = vadd.f32 %v1991_v46, %v1813_v15  ;;  %8638 = vmatmul.msk.bf16.gmra.mxu0 %vm844_vm3, %v2504_v23  ;;  %v10067_v46 = vld [vmem:[%s10338_s23 + $0x48] sm:$0xff] }
 0x2a0   : > { %v2199_v55 = vadd.f32 %v2145_v19, %v2045_v11  ;;  %v2507_v19 = vrot.slane %v10067_v46, 3 }
 0x2a2   : > { %v11264_v44 = vadd.f32 %v2425_v4, %v2199_v55  ;;  %v2508_v11 = vsel %vm2493_vm7, %v2505_v3, %v2507_v19 }
 0x2a3   : > { %v1771_v42 = vpop.f32.mrf.mxu0 }
 0x2a4   : > { %v11267_v61 = vadd.f32 %v1771_v42, %v10879_v43 }
 0x2ab   : > { %v1774_v31 = vpop.f32.mrf.mxu0 }
 0x2ac   : > { %v11272_v50 = vadd.f32 %v1774_v31, %v10892_v58  ;;  %v10068_v31 = vld [vmem:[%s10338_s23 + $0x50] sm:$0xff] }
 0x2ad   : > { %v2509_v55 = vrot.slane %v10068_v31, 3  ;;  %v10070_v31 = vld [vmem:[%s10338_s23 + $0x60] sm:$0xff] }
 0x2ae   : > { %8639 = vmatmul.msk.bf16.gmra.mxu0 %vm844_vm3, %v2506_v41  ;;  %v10069_v41 = vld [vmem:[%s10338_s23 + $0x58] sm:$0xff] }
 0x2b3   : > { %v1776_v15 = vpop.f32.mrf.mxu0 }
 0x2b4   : > { %v11276_v23 = vadd.f32 %v1776_v15, %v10899_v48  ;;  %v2510_v48 = vsel %vm2493_vm7, %v2507_v19, %v2509_v55  ;;  %v2511_v15 = vrot.slane %v10069_v41, 3 }
 0x2bb   : > { %v1779_v43 = vpop.f32.mrf.mxu0 }
 0x2bc   : > { %v11281_v4 = vadd.f32 %v1779_v43, %v10915_v49 }
 0x2be   : > { %8640 = vmatmul.msk.bf16.gmra.mxu0 %vm844_vm3, %v2508_v11 }
 0x2c3   : > { %v1781_v51 = vpop.f32.mrf.mxu0 }
 0x2c4   : > { %v11285_v58 = vadd.f32 %v1781_v51, %v10923_v59  ;;  %v2512_v59 = vsel %vm2493_vm7, %v2509_v55, %v2511_v15 }
 0x2cb   : > { %v1784_v42 = vpop.f32.mrf.mxu0 }
 0x2cc   : > { %v11290_v1 = vadd.f32 %v1784_v42, %v10940_v63  ;;  %v11303_v63 = vld [vmem:[%s14752_s22] ss:$0 sm:$0xff]  ;;  %v2513_v42 = vrot.slane %v10070_v31, 3  ;;  %s8342_s22 = sshll.u32 %s584_s1, 4  ;;  %s8343_s22 = int_to_ptr.vmem [resolvable:$true] %s8342_s22 }
 0x2ce   : > { %8641 = vmatmul.msk.bf16.gmra.mxu0 %vm844_vm3, %v2510_v48  ;;  %v2514_v41 = vsel %vm2493_vm7, %v2511_v15, %v2513_v42 }
 0x2d3   : > { %v1786_v3 = vpop.f32.mrf.mxu0 }
 0x2d4   : > { %v11294_v49 = vadd.f32 %v1786_v3, %v10949_v47 }
 0x2db   : > { %v2597_v46 = vpop.f32.mrf.mxu0 }
 0x2dc   : > { %v2687_v43 = vadd.f32 %v2597_v46, %v10966_v60 }
 0x2de   : > { %8642 = vmatmul.msk.bf16.gmra.mxu0 %vm844_vm3, %v2512_v59  ;;  %v2727_v11 = vadd.f32 %v11303_v63, %v2687_v43 }
 0x2e0   : > { %v2763_v55 = vmax.f32 %v2727_v11, 0.0 }
 0x2e3   : > { %v2599_v19 = vpop.f32.mrf.mxu0 }
 0x2e4   : > { %v2688_v47 = vadd.f32 %v2599_v19, %v10974_v20 }
 0x2e6   : > { %v2728_v51 = vadd.f32 %v11303_v63, %v2688_v47  ;;  %v10071_v47 = vld [vmem:[%s10338_s23 + $0x68] sm:$0xff] }
 0x2e7   : > { %v2515_v11 = vrot.slane %v10071_v47, 3 }
 0x2e8   : > { %v2764_v48 = vmax.f32 %v2728_v51, 0.0 }
 0x2e9   : > { %v2516_v15 = vsel %vm2493_vm7, %v2513_v42, %v2515_v11 }
 0x2ea   : > { %v11309_v60 = vpack.c.bf16 %v2764_v48, %v2763_v55 }
 0x2eb   : > { %v2602_v3 = vpop.f32.mrf.mxu0 }
 0x2ec   : > { %v2689_v46 = vadd.f32 %v2602_v3, %v10991_v29 }
 0x2ee   : > { %8643 = vmatmul.msk.bf16.gmra.mxu0 %vm844_vm3, %v2514_v41  ;;  %v2729_v43 = vadd.f32 %v11303_v63, %v2689_v46 }
 0x2f0   : > { %v2765_v51 = vmax.f32 %v2729_v43, 0.0 }
 0x2f3   : > { %v2604_v59 = vpop.f32.mrf.mxu0 }
 0x2f4   : > { %v2690_v20 = vadd.f32 %v2604_v59, %v10999_v25  ;;  %v10072_v59 = vld [vmem:[%s10338_s23 + $0x70] sm:$0xff] }
 0x2f5   : > { %v2517_v43 = vrot.slane %v10072_v59, 3 }
 0x2f6   : > { %v2730_v19 = vadd.f32 %v11303_v63, %v2690_v20 }
 0x2f7   : > { %v2518_v42 = vsel %vm2493_vm7, %v2515_v11, %v2517_v43 }
 0x2f8   : > { %v2766_v31 = vmax.f32 %v2730_v19, 0.0 }
 0x2fa   : > { %v11318_v55 = vpack.c.bf16 %v2766_v31, %v2765_v51 }
 0x2fb   : > { %v2607_v48 = vpop.f32.mrf.mxu0 }
 0x2fc   : > { %v2691_v29 = vadd.f32 %v2607_v48, %v11016_v57 }
 0x2fe   : > { %8644 = vmatmul.msk.bf16.gmra.mxu0 %vm844_vm3, %v2516_v15  ;;  %v2731_v41 = vadd.f32 %v11303_v63, %v2691_v29  ;;  %v10073_v29 = vld [vmem:[%s10338_s23 + $0x78] sm:$0xff] }
 0x300   : > { %v2767_v20 = vmax.f32 %v2731_v41, 0.0 }
 0x303   : > { %v2609_v3 = vpop.f32.mrf.mxu0 }
 0x304   : > { %v2692_v25 = vadd.f32 %v2609_v3, %v11024_v10  ;;  %v2519_v3 = vrot.slane %v10073_v29, 3 }
 0x306   : > { %v2732_v46 = vadd.f32 %v11303_v63, %v2692_v25  ;;  %v2520_v11 = vsel %vm2493_vm7, %v2517_v43, %v2519_v3 }
 0x308   : > { %v2768_v19 = vmax.f32 %v2732_v46, 0.0 }
 0x30a   : > { %v11327_v47 = vpack.c.bf16 %v2768_v19, %v2767_v20 }
 0x30b   : > { %v2612_v51 = vpop.f32.mrf.mxu0 }
 0x30c   : > { %v2693_v57 = vadd.f32 %v2612_v51, %v11041_v35 }
 0x30e   : > { %8645 = vmatmul.msk.bf16.gmra.mxu0 %vm844_vm3, %v2518_v42  ;;  %v2733_v48 = vadd.f32 %v11303_v63, %v2693_v57  ;;  %v10074_v42 = vld [vmem:[%s10338_s23 + $0x80] sm:$0xff]  ;;  %s8344_s23 = sshll.u32 %s8340_s29, 4  ;;  %s8345_s23 = int_to_ptr.hbm [resolvable:$true] %s8344_s23 }
 0x30f   : > { %v2521_v57 = vrot.slane %v10074_v42, 3  ;;  %v14753_v42 = vld [vmem:[#allocation13_spill] sm:$0xff]  ;;  %s10122_s20 = sshra.s32 %s8345_s23, 4  ;;  %s10123_s20 = int_to_ptr.hbm [resolvable:$true] %s10122_s20 }
 0x310   : > { %v2769_v41 = vmax.f32 %v2733_v48, 0.0  ;;  %s10124_s24 = scalar_lea.hbm %s10123_s20, 1  ;;  %p10129_p3 = scmp.lt.s32.totalorder %s10123_s20, %s14608_s18 }
 0x311   : > { %v2522_v43 = vsel %vm2493_vm7, %v2519_v3, %v2521_v57  ;;  %p10125_p0 = scmp.ne.s32.totalorder %s10123_s20, %s10124_s24  ;;  %p10130_p4 = scmp.lt.s32.totalorder %s10128_s19, %s10124_s24 }
 0x313   : > { %v2614_v31 = vpop.f32.mrf.mxu0  ;;  %p10126_p1 = pnand %p10125_p0, %p10313_p5  ;;  %p10131_p7 = por %p10130_p4, %p10129_p3 }
 0x314   : > { %v2694_v10 = vadd.f32 %v2614_v31, %v11051_v54 }
 0x315   : > { %p10127_p2 = pneg %p10126_p1 }
 0x316   : > { %v2734_v15 = vadd.f32 %v11303_v63, %v2694_v10 }
 0x317   : > { %p10132_p8 = pnand %p10131_p7, %p10127_p2 }
 0x318   : > { %v2770_v25 = vmax.f32 %v2734_v15, 0.0 }
 0x31a   : > { %v11336_v46 = vpack.c.bf16 %v2770_v25, %v2769_v41  ;;  %v2033_v25 = vadd.f32 %v11132_v38, %v11059_v53  ;;  %v14754_v38 = vld [vmem:[#allocation22_spill] sm:$0xff] }
 0x31b   : > { %v2617_v59 = vpop.f32.mrf.mxu0 }
 0x31c   : > { %v2695_v35 = vadd.f32 %v2617_v59, %v11068_v56  ;;  %v2187_v3 = vadd.f32 %v11103_v18, %v2033_v25  ;;  %v14758_v25 = vld [vmem:[#allocation18_spill] sm:$0xff] }
 0x31e   : > { %8646 = vmatmul.msk.bf16.gmra.mxu0 %vm844_vm3, %v2520_v11  ;;  %v2735_v19 = vadd.f32 %v11303_v63, %v2695_v35  ;;  %v2523_v11 = vrot.slane %v11078_v26, 3 }
 0x320   : > { %v2771_v31 = vmax.f32 %v2735_v19, 0.0  ;;  %v2034_v19 = vadd.f32 %v11155_v33, %v11075_v0 }
 0x323   : > { %v2619_v20 = vpop.f32.mrf.mxu0 }
 0x324   : > { %v2696_v54 = vadd.f32 %v2619_v20, %v11081_v34 }
 0x326   : > { %v2736_v51 = vadd.f32 %v11303_v63, %v2696_v54 }
 0x328   : > { %v2772_v48 = vmax.f32 %v2736_v51, 0.0  ;;  %v2524_v51 = vsel %vm2493_vm7, %v2521_v57, %v2523_v11 }
 0x32a   : > { %v11345_v10 = vpack.c.bf16 %v2772_v48, %v2771_v31  ;;  %v2188_v31 = vadd.f32 %v14753_v42, %v2034_v19 }
 0x32b   : > { %v2622_v15 = vpop.f32.mrf.mxu0 }
 0x32c   : > { %v2697_v56 = vadd.f32 %v2622_v15, %v11107_v27  ;;  %v2468_v26 = vadd.f32 %v14754_v38, %v2188_v31 }
 0x32e   : > { %8647 = vmatmul.msk.bf16.gmra.mxu0 %vm844_vm3, %v2522_v43  ;;  %v2737_v41 = vadd.f32 %v11303_v63, %v2697_v56  ;;  %v14755_v43 = vld [vmem:[#allocation17_spill] sm:$0xff]  ;;  %v14756_v56 = vld [vmem:[#allocation14_spill] sm:$0xff] }
 0x32f   : > { %v2035_v0 = vadd.f32 %v11169_v37, %v14755_v43  ;;  %v2525_v57 = vrot.slane %v14756_v56, 3 }
 0x330   : > { %v2773_v35 = vmax.f32 %v2737_v41, 0.0  ;;  %v14757_v41 = vld [vmem:[#allocation20_spill] sm:$0xff] }
 0x333   : > { %v2624_v29 = vpop.f32.mrf.mxu0 }
 0x334   : > { %v2698_v34 = vadd.f32 %v2624_v29, %v11120_v24  ;;  %v2467_v24 = vadd.f32 %v11105_v28, %v2187_v3  ;;  %v2526_v3 = vsel %vm2493_vm7, %v2523_v11, %v2525_v57  ;;  %v14761_v11 = vld [vmem:[#allocation15_spill] sm:$0xff] }
 0x336   : > { %v2738_v59 = vadd.f32 %v11303_v63, %v2698_v34  ;;  %v2189_v34 = vadd.f32 %v14757_v41, %v2035_v0 }
 0x338   : > { %v2774_v20 = vmax.f32 %v2738_v59, 0.0  ;;  %v2036_v59 = vadd.f32 %v11181_v9, %v14758_v25  ;;  %v2469_v19 = vadd.f32 %v11149_v13, %v2189_v34  ;;  %v14760_v9 = vld [vmem:[#allocation19_spill] sm:$0xff]  ;;  %v2038_v13 = vadd.f32 %v11205_v7, %v14761_v11  ;;  %v14762_v34 = vld [vmem:[#allocation21_spill] sm:$0xff] }
 0x339   : > { %v2529_v25 = vrot.slane %v14762_v34, 3 }
 0x33a   : > { %v2886_v27 = vpack.c.bf16 %v2774_v20, %v2773_v35 }
 0x33b   : > { %v2627_v54 = vpop.f32.mrf.mxu0 }
 0x33c   : > { %v2699_v53 = vadd.f32 %v2627_v54, %v2467_v24  ;;  %v2190_v54 = vadd.f32 %v11158_v36, %v2036_v59 }
 0x33e   : > { %8648 = vmatmul.msk.bf16.gmra.mxu0 %vm844_vm3, %v2524_v51  ;;  %v2739_v15 = vadd.f32 %v11303_v63, %v2699_v53  ;;  %v14759_v51 = vld [vmem:[#allocation16_spill] sm:$0xff] }
 0x33f   : > { %v2470_v24 = vadd.f32 %v14759_v51, %v2190_v54 }
 0x340   : > { %v2775_v29 = vmax.f32 %v2739_v15, 0.0 }
 0x343   : > { %v2629_v48 = vpop.f32.mrf.mxu0 }
 0x344   : > { %v2700_v18 = vadd.f32 %v2629_v48, %v2468_v26  ;;  %v2527_v26 = vrot.slane %v14760_v9, 3 }
 0x346   : > { %v2740_v33 = vadd.f32 %v11303_v63, %v2700_v18  ;;  %v2528_v43 = vsel %vm2493_vm7, %v2525_v57, %v2527_v26 }
 0x348   : > { %v2776_v28 = vmax.f32 %v2740_v33, 0.0  ;;  %v2192_v33 = vadd.f32 %v11186_v14, %v2038_v13 }
 0x34a   : > { %v2887_v35 = vpack.c.bf16 %v2776_v28, %v2775_v29  ;;  %v2472_v56 = vadd.f32 %v11188_v21, %v2192_v33  ;;  %v2530_v21 = vsel %vm2493_vm7, %v2527_v26, %v2529_v25 }
 0x34b   : > { %v2632_v20 = vpop.f32.mrf.mxu0 }
 0x34c   : > { %v2701_v37 = vadd.f32 %v2632_v20, %v2469_v19 }
 0x34e   : > { %8649 = vmatmul.msk.bf16.gmra.mxu0 %vm844_vm3, %v2526_v3  ;;  %v2741_v31 = vadd.f32 %v11303_v63, %v2701_v37 }
 0x350   : > { %v2777_v48 = vmax.f32 %v2741_v31, 0.0 }
 0x353   : > { %v2634_v42 = vpop.f32.mrf.mxu0 }
 0x354   : > { %v2702_v53 = vadd.f32 %v2634_v42, %v2470_v24 }
 0x356   : > { %v2742_v38 = vadd.f32 %v11303_v63, %v2702_v53 }
 0x358   : > { %v2778_v15 = vmax.f32 %v2742_v38, 0.0  ;;  %v1993_v38 = vpop.f32.mrf.mxu1 }
 0x35a   : > { %v2888_v18 = vpack.c.bf16 %v2778_v15, %v2777_v48 }
 0x35b   : > { %v2637_v36 = vpop.f32.mrf.mxu0 }
 0x35c   : > { %v2703_v0 = vadd.f32 %v2637_v36, %v11200_v6  ;;  %3273 = vmatpush.bf16.msrb.mxu1 %v2888_v18  ;;  %v14763_v6 = vld [vmem:[#allocation27_spill] sm:$0xff]  ;;  %v2427_v18 = vpop.f32.mrf.mxu3 }
 0x35d   : > { %v2040_v14 = vadd.f32 %v11224_v5, %v14763_v6 }
 0x35e   : > { %8650 = vmatmul.msk.bf16.gmra.mxu0 %vm844_vm3, %v2528_v43  ;;  %v2743_v28 = vadd.f32 %v11303_v63, %v2703_v0 }
 0x360   : > { %3274 = vmatpush.bf16.msrb.mxu1 %v2887_v35  ;;  %v2779_v57 = vmax.f32 %v2743_v28, 0.0  ;;  %v1996_v0 = vpop.f32.mrf.mxu1 }
 0x363   : > { %v2639_v29 = vpop.f32.mrf.mxu0 }
 0x364   : > { %v2704_v41 = vadd.f32 %v2639_v29, %v2472_v56  ;;  %3275 = vmatpush.bf16.msrb.mxu1 %v2886_v27  ;;  %v2194_v27 = vadd.f32 %v11210_v2, %v2040_v14  ;;  %v9790_v2 = vld [vmem:[%s14601_s11 + $0x8] sm:$0xf0]  ;;  %v14764_v29 = vld [vmem:[#allocation31_spill] sm:$0xff]  ;;  %v2430_v25 = vpop.f32.mrf.mxu3 }
 0x365   : > { %v14765_v14 = vld [vmem:[#allocation23_spill] sm:$0xff] }
 0x366   : > { %v2744_v7 = vadd.f32 %v11303_v63, %v2704_v41 }
 0x368   : > { %v2780_v59 = vmax.f32 %v2744_v7, 0.0  ;;  %3276 = vmatpush.bf16.msrb.mxu1 %v11345_v10  ;;  %v2474_v10 = vadd.f32 %v11215_v16, %v2194_v27  ;;  %v2042_v16 = vadd.f32 %v11239_v40, %v11203_v45  ;;  %v9793_v45 = vld [vmem:[%s14601_s11 + $0x20] sm:$0xf0] }
 0x36a   : > { %v11393_v20 = vpack.c.bf16 %v2780_v59, %v2779_v57  ;;  %v2196_v31 = vadd.f32 %v11230_v17, %v2042_v16  ;;  %v1998_v57 = vpop.f32.mrf.mxu1 }
 0x36b   : > { %v2642_v35 = vpop.f32.mrf.mxu0 }
 0x36c   : > { %v2705_v3 = vadd.f32 %v2642_v35, %v11219_v32  ;;  %3277 = vmatpush.bf16.msrb.mxu1 %v11336_v46  ;;  %v8654_v32 = vld [vmem:[%s14601_s11] sm:$0xf]  ;;  %v2476_v53 = vadd.f32 %v11232_v52, %v2196_v31  ;;  %v2044_v52 = vadd.f32 %v11254_v62, %v11222_v39  ;;  %v8678_v39 = vld [vmem:[%s14601_s11 + $0x30] sm:$0xf]  ;;  %v9796_v62 = vld [vmem:[%s14601_s11 + $0x38] sm:$0xf0]  ;;  %v2046_v35 = vadd.f32 %v1993_v38, %v14765_v14 }
 0x36d   : > { %v8655_v37 = vor.u32 %v9790_v2, %v8654_v32 }
 0x36e   : > { %8651 = vmatmul.msk.bf16.gmra.mxu0 %vm844_vm3, %v2530_v21  ;;  %v2745_v5 = vadd.f32 %v11303_v63, %v2705_v3  ;;  %v2198_v33 = vadd.f32 %v11249_v12, %v2044_v52  ;;  %v8679_v12 = vor.u32 %v9796_v62, %v8678_v39 }
 0x370   : > { %3278 = vmatpush.bf16.msrb.mxu1 %v11327_v47  ;;  %v2781_v47 = vmax.f32 %v2745_v5, 0.0  ;;  %v2478_v28 = vadd.f32 %v14764_v29, %v2198_v33  ;;  %v2432_v5 = vpop.f32.mrf.mxu3  ;;  %v9802_v29 = vld [vmem:[%s14601_s11 + $0x68] sm:$0xf0] }
 0x373   : > { %v2644_v19 = vpop.f32.mrf.mxu0 }
 0x374   : > { %v2706_v54 = vadd.f32 %v2644_v19, %v2474_v10  ;;  %3279 = vmatpush.bf16.msrb.mxu1 %v11318_v55 }
 0x376   : > { %v2746_v46 = vadd.f32 %v11303_v63, %v2706_v54  ;;  %v2001_v54 = vpop.f32.mrf.mxu1 }
 0x378   : > { %v2782_v51 = vmax.f32 %v2746_v46, 0.0  ;;  %3280 = vmatpush.bf16.msrb.mxu1 %v11309_v60  ;;  %v8666_v60 = vld [vmem:[%s14601_s11 + $0x18] sm:$0xf] }
 0x379   : > { %v8667_v15 = vor.u32 %v9793_v45, %v8666_v60 }
 0x37a   : > { %v11414_v24 = vpack.c.bf16 %v2782_v51, %v2781_v47  ;;  %v8690_v47 = vld [vmem:[%s14601_s11 + $0x48] sm:$0xf]  ;;  %v9799_v51 = vld [vmem:[%s14601_s11 + $0x50] sm:$0xf0] }
 0x37b   : > { %v2647_v55 = vpop.f32.mrf.mxu0  ;;  %3281 = vmatmul.bf16.vlgmr.msrb.gmra.mxu1 %v8655_v37  ;;  %v8691_v31 = vor.u32 %v9799_v51, %v8690_v47 }
 0x37c   : > { %v2707_v42 = vadd.f32 %v2647_v55, %v11234_v22  ;;  %v2147_v22 = vpop.f32.mrf.mxu2  ;;  %v14766_v55 = vld [vmem:[#allocation25_spill] sm:$0xff] }
 0x37d   : > { %v2200_v19 = vadd.f32 %v2147_v22, %v2046_v35 }
 0x37e   : > { %v2747_v26 = vadd.f32 %v11303_v63, %v2707_v42  ;;  %v2047_v42 = vadd.f32 %v1996_v0, %v14766_v55 }
 0x37f   : > { %v2480_v32 = vadd.f32 %v2427_v18, %v2200_v19 }
 0x380   : > { %v2783_v17 = vmax.f32 %v2747_v26, 0.0 }
 0x383   : > { %v2649_v9 = vpop.f32.mrf.mxu0 }
 0x384   : > { %v2708_v48 = vadd.f32 %v2649_v9, %v2476_v53  ;;  %v2150_v56 = vpop.f32.mrf.mxu2  ;;  %v2435_v9 = vpop.f32.mrf.mxu3 }
 0x385   : > { %v2201_v26 = vadd.f32 %v2150_v56, %v2047_v42  ;;  %v8702_v56 = vld [vmem:[%s14601_s11 + $0x60] sm:$0xf] }
 0x386   : > { %v2748_v40 = vadd.f32 %v11303_v63, %v2708_v48  ;;  %v14767_v48 = vld [vmem:[#allocation26_spill] sm:$0xff] }
 0x387   : > { %v2048_v60 = vadd.f32 %v1998_v57, %v14767_v48 }
 0x388   : > { %v2784_v11 = vmax.f32 %v2748_v40, 0.0  ;;  %v2003_v40 = vpop.f32.mrf.mxu1 }
 0x389   : > { %v2050_v57 = vadd.f32 %v2003_v40, %v11267_v61  ;;  %v9805_v61 = vld [vmem:[%s14601_s11 + $0x80] sm:$0xf0] }
 0x38a   : > { %v11429_v13 = vpack.c.bf16 %v2784_v11, %v2783_v17 }
 0x38b   : > { %v2652_v36 = vpop.f32.mrf.mxu0  ;;  %3286 = vmatmul.bf16.gmra.mxu1 %v8667_v15  ;;  %v2481_v15 = vadd.f32 %v2430_v25, %v2201_v26 }
 0x38c   : > { %v2709_v43 = vadd.f32 %v2652_v36, %v11247_v30  ;;  %v2152_v3 = vpop.f32.mrf.mxu2  ;;  %v2437_v36 = vpop.f32.mrf.mxu3 }
 0x38d   : > { %v2202_v17 = vadd.f32 %v2152_v3, %v2048_v60 }
 0x38e   : > { %v2749_v7 = vadd.f32 %v11303_v63, %v2709_v43 }
 0x38f   : > { %v2482_v18 = vadd.f32 %v2432_v5, %v2202_v17 }
 0x390   : > { %v2785_v59 = vmax.f32 %v2749_v7, 0.0 }
 0x393   : > { %v2654_v41 = vpop.f32.mrf.mxu0 }
 0x394   : > { %v2710_v34 = vadd.f32 %v2654_v41, %v2478_v28  ;;  %v2155_v16 = vpop.f32.mrf.mxu2  ;;  %v2006_v28 = vpop.f32.mrf.mxu1  ;;  %v2049_v41 = vadd.f32 %v2001_v54, %v11261_v8 }
 0x396   : > { %v2750_v30 = vadd.f32 %v11303_v63, %v2710_v34  ;;  %v8703_v34 = vor.u32 %v9802_v29, %v8702_v56 }
 0x398   : > { %v2786_v6 = vmax.f32 %v2750_v30, 0.0  ;;  %v2203_v30 = vadd.f32 %v2155_v16, %v2049_v41 }
 0x39a   : > { %v11443_v21 = vpack.c.bf16 %v2786_v6, %v2785_v59  ;;  %v2440_v6 = vpop.f32.mrf.mxu3  ;;  %v2483_v14 = vadd.f32 %v2435_v9, %v2203_v30 }
 0x39b   : > { %v2657_v27 = vpop.f32.mrf.mxu0  ;;  %3291 = vmatmul.bf16.gmra.mxu1 %v8679_v12 }
 0x39c   : > { %v2711_v10 = vadd.f32 %v2657_v27, %v11264_v44  ;;  %v2157_v11 = vpop.f32.mrf.mxu2  ;;  %v2008_v3 = vpop.f32.mrf.mxu1 }
 0x39d   : > { %v2204_v35 = vadd.f32 %v2157_v11, %v2050_v57  ;;  %v8726_v11 = vld [vmem:[%s14601_s11 + $0x90] sm:$0xf] }
 0x39e   : > { %v2751_v46 = vadd.f32 %v11303_v63, %v2711_v10 }
 0x39f   : > { %v2484_v10 = vadd.f32 %v2437_v36, %v2204_v35 }
 0x3a0   : > { %v2787_v53 = vmax.f32 %v2751_v46, 0.0 }
 0x3a3   : > { %v2659_v2 = vpop.f32.mrf.mxu0 }
 0x3a4   : > { %v2712_v37 = vadd.f32 %v2659_v2, %v2480_v32  ;;  %v2160_v25 = vpop.f32.mrf.mxu2  ;;  %v8714_v32 = vld [vmem:[%s14601_s11 + $0x78] sm:$0xf]  ;;  %v2051_v2 = vadd.f32 %v2006_v28, %v11272_v50  ;;  %v2011_v55 = vpop.f32.mrf.mxu1 }
 0x3a5   : > { %v8715_v47 = vor.u32 %v9805_v61, %v8714_v32 }
 0x3a6   : > { %v2752_v44 = vadd.f32 %v11303_v63, %v2712_v37  ;;  %v2442_v37 = vpop.f32.mrf.mxu3  ;;  %v2205_v42 = vadd.f32 %v2160_v25, %v2051_v2 }
 0x3a8   : > { %v2788_v38 = vmax.f32 %v2752_v44, 0.0  ;;  %v2052_v44 = vadd.f32 %v2008_v3, %v11276_v23  ;;  %v2485_v9 = vadd.f32 %v2440_v6, %v2205_v42  ;;  %v9808_v23 = vld [vmem:[%s14601_s11 + $0x98] sm:$0xf0]  ;;  %v9789_v42 = vld [vmem:[%s14601_s11 + $0x4] sm:$0xf] }
 0x3aa   : > { %v11456_v45 = vpack.c.bf16 %v2788_v38, %v2787_v53 }
 0x3ab   : > { %v2662_v22 = vpop.f32.mrf.mxu0  ;;  %3296 = vmatmul.bf16.gmra.mxu1 %v8691_v31 }
 0x3ac   : > { %v2713_v52 = vadd.f32 %v2662_v22, %v2481_v15  ;;  %v2162_v19 = vpop.f32.mrf.mxu2  ;;  %v2013_v50 = vpop.f32.mrf.mxu1 }
 0x3ad   : > { %v2206_v26 = vadd.f32 %v2162_v19, %v2052_v44  ;;  %v2054_v29 = vadd.f32 %v2013_v50, %v11285_v58  ;;  %v8738_v58 = vld [vmem:[%s14601_s11 + $0xa8] sm:$0xf]  ;;  %v9817_v50 = vld [vmem:[%s14601_s11 + $0xe0] sm:$0xf0] }
 0x3ae   : > { %v2753_v0 = vadd.f32 %v11303_v63, %v2713_v52  ;;  %v2445_v60 = vpop.f32.mrf.mxu3  ;;  %v2053_v52 = vadd.f32 %v2011_v55, %v11281_v4 }
 0x3af   : > { %v2486_v40 = vadd.f32 %v2442_v37, %v2206_v26 }
 0x3b0   : > { %v2789_v39 = vmax.f32 %v2753_v0, 0.0 }
 0x3b3   : > { %v2664_v43 = vpop.f32.mrf.mxu0 }
 0x3b4   : > { %v2714_v33 = vadd.f32 %v2664_v43, %v2482_v18  ;;  %v2165_v38 = vpop.f32.mrf.mxu2  ;;  %v8727_v43 = vor.u32 %v9808_v23, %v8726_v11 }
 0x3b5   : > { %v2207_v56 = vadd.f32 %v2165_v38, %v2053_v52  ;;  %v8674_v52 = vld [vmem:[%s14601_s11 + $0x20] sm:$0xf] }
 0x3b6   : > { %v2754_v7 = vadd.f32 %v11303_v63, %v2714_v33  ;;  %v2447_v41 = vpop.f32.mrf.mxu3 }
 0x3b8   : > { %v2790_v62 = vmax.f32 %v2754_v7, 0.0 }
 0x3ba   : > { %v2894_v12 = vpack.c.bf16 %v2790_v62, %v2789_v39  ;;  %v2487_v39 = vadd.f32 %v2445_v60, %v2207_v56  ;;  %v9795_v56 = vld [vmem:[%s14601_s11 + $0x34] sm:$0xf] }
 0x3bb   : > { %v2667_v59 = vpop.f32.mrf.mxu0  ;;  %3301 = vmatmul.bf16.gmra.mxu1 %v8703_v34  ;;  %v2016_v34 = vpop.f32.mrf.mxu1 }
 0x3bc   : > { %v2715_v27 = vadd.f32 %v2667_v59, %v2483_v14  ;;  %v2167_v36 = vpop.f32.mrf.mxu2  ;;  %v9811_v14 = vld [vmem:[%s14601_s11 + $0xb0] sm:$0xf0]  ;;  %v2055_v3 = vadd.f32 %v2016_v34, %v11290_v1  ;;  %v8686_v34 = vld [vmem:[%s14601_s11 + $0x38] sm:$0xf] }
 0x3bd   : > { %v2208_v62 = vadd.f32 %v2167_v36, %v2054_v29  ;;  %v8739_v19 = vor.u32 %v9811_v14, %v8738_v58  ;;  %v8680_v29 = vld [vmem:[%s14601_s11 + $0x3c] sm:$0xf0] }
 0x3be   : > { %v2755_v5 = vadd.f32 %v11303_v63, %v2715_v27  ;;  %v2450_v35 = vpop.f32.mrf.mxu3 }
 0x3bf   : > { %v2488_v30 = vadd.f32 %v2447_v41, %v2208_v62  ;;  %v8683_v41 = vor.u32 %v9795_v56, %v8680_v29  ;;  %v8746_v56 = vld [vmem:[%s14601_s11 + $0xb0] sm:$0xf]  ;;  %v9812_v29 = vld [vmem:[%s14601_s11 + $0xb8] sm:$0xf0] }
 0x3c0   : > { %v2791_v51 = vmax.f32 %v2755_v5, 0.0 }
 0x3c3   : > { %v2669_v8 = vpop.f32.mrf.mxu0 }
 0x3c4   : > { %v2716_v54 = vadd.f32 %v2669_v8, %v2484_v10  ;;  %v2170_v4 = vpop.f32.mrf.mxu2  ;;  %v2018_v10 = vpop.f32.mrf.mxu1 }
 0x3c6   : > { %v2756_v46 = vadd.f32 %v11303_v63, %v2716_v54  ;;  %v2056_v54 = vadd.f32 %v2018_v10, %v11294_v49  ;;  %v2452_v1 = vpop.f32.mrf.mxu3 }
 0x3c8   : > { %v2792_v16 = vmax.f32 %v2756_v46, 0.0 }
 0x3ca   : > { %v2895_v31 = vpack.c.bf16 %v2792_v16, %v2791_v51 }
 0x3cb   : > { %v2672_v53 = vpop.f32.mrf.mxu0  ;;  %3306 = vmatmul.bf16.gmra.mxu1 %v8715_v47 }
 0x3cc   : > { %v2717_v48 = vadd.f32 %v2672_v53, %v2485_v9  ;;  %v2172_v61 = vpop.f32.mrf.mxu2 }
 0x3cd   : > { %v2210_v37 = vadd.f32 %v2172_v61, %v2056_v54 }
 0x3ce   : > { %v2757_v15 = vadd.f32 %v11303_v63, %v2717_v48  ;;  %v8662_v48 = vld [vmem:[%s14601_s11 + $0x8] sm:$0xf] }
 0x3cf   : > { %v2490_v51 = vadd.f32 %v2452_v1, %v2210_v37 }
 0x3d0   : > { %v2793_v0 = vmax.f32 %v2757_v15, 0.0  ;;  %v8668_v15 = vld [vmem:[%s14601_s11 + $0x24] sm:$0xf0] }
 0x3d3   : > { %v2674_v22 = vpop.f32.mrf.mxu0 }
 0x3d4   : > { %v2718_v17 = vadd.f32 %v2674_v22, %v2486_v40  ;;  %v9792_v22 = vld [vmem:[%s14601_s11 + $0x1c] sm:$0xf] }
 0x3d5   : > { %v8671_v11 = vor.u32 %v9792_v22, %v8668_v15 }
 0x3d6   : > { %v2758_v18 = vadd.f32 %v11303_v63, %v2718_v17 }
 0x3d8   : > { %v2794_v33 = vmax.f32 %v2758_v18, 0.0  ;;  %v9794_v18 = vld [vmem:[%s14601_s11 + $0x28] sm:$0xf0] }
 0x3d9   : > { %v8675_v36 = vor.u32 %v9794_v18, %v8674_v52  ;;  %v9810_v52 = vld [vmem:[%s14601_s11 + $0xac] sm:$0xf]  ;;  %v8740_v18 = vld [vmem:[%s14601_s11 + $0xb4] sm:$0xf0] }
 0x3da   : > { %v2896_v28 = vpack.c.bf16 %v2794_v33, %v2793_v0  ;;  %v8774_v0 = vld [vmem:[%s14601_s11 + $0xf0] sm:$0xf]  ;;  %v9820_v33 = vld [vmem:[%s14601_s11 + $0xf8] sm:$0xf0] }
 0x3db   : > { %v2677_v7 = vpop.f32.mrf.mxu0  ;;  %3311 = vmatmul.bf16.gmra.mxu1 %v8727_v43 }
 0x3dc   : > { %3386 = vmatpush.bf16.msra.mxu2 %v2896_v28  ;;  %v2719_v25 = vadd.f32 %v2677_v7, %v2487_v39  ;;  %v8775_v28 = vor.u32 %v9820_v33, %v8774_v0  ;;  %v9797_v39 = vld [vmem:[%s14601_s11 + $0x40] sm:$0xf0]  ;;  %v8743_v0 = vor.u32 %v9810_v52, %v8740_v18 }
 0x3dd   : > { %v8687_v62 = vor.u32 %v9797_v39, %v8686_v34  ;;  %v8846_v34 = vld [vmem:[%s14601_s11 + $0x180] sm:$0xf]  ;;  %v9838_v39 = vld [vmem:[%s14601_s11 + $0x188] sm:$0xf0] }
 0x3de   : > { %v2759_v59 = vadd.f32 %v11303_v63, %v2719_v25 }
 0x3e0   : > { %3387 = vmatpush.bf16.msra.mxu2 %v2895_v31  ;;  %v2795_v8 = vmax.f32 %v2759_v59, 0.0  ;;  %v8692_v59 = vld [vmem:[%s14601_s11 + $0x54] sm:$0xf0] }
 0x3e3   : > { %v2679_v57 = vpop.f32.mrf.mxu0 }
 0x3e4   : > { %v2720_v6 = vadd.f32 %v2679_v57, %v2488_v30  ;;  %3388 = vmatpush.bf16.msra.mxu2 %v2894_v12  ;;  %v2209_v12 = vadd.f32 %v2170_v4, %v2055_v3  ;;  %v8786_v4 = vld [vmem:[%s14601_s11 + $0x108] sm:$0xf]  ;;  %v9823_v30 = vld [vmem:[%s14601_s11 + $0x110] sm:$0xf0]  ;;  %v9798_v57 = vld [vmem:[%s14601_s11 + $0x4c] sm:$0xf] }
 0x3e5   : > { %v8695_v58 = vor.u32 %v9798_v57, %v8692_v59  ;;  %v9800_v3 = vld [vmem:[%s14601_s11 + $0x58] sm:$0xf0] }
 0x3e6   : > { %v2760_v27 = vadd.f32 %v11303_v63, %v2720_v6  ;;  %v2489_v46 = vadd.f32 %v2450_v35, %v2209_v12  ;;  %v8787_v6 = vor.u32 %v9823_v30, %v8786_v4  ;;  %v8698_v35 = vld [vmem:[%s14601_s11 + $0x50] sm:$0xf]  ;;  %v8847_v30 = vor.u32 %v9838_v39, %v8846_v34 }
 0x3e7   : > { %v8704_v12 = vld [vmem:[%s14601_s11 + $0x6c] sm:$0xf0] }
 0x3e8   : > { %v2796_v5 = vmax.f32 %v2760_v27, 0.0  ;;  %3389 = vmatpush.bf16.msra.mxu2 %v11456_v45  ;;  %v8750_v45 = vld [vmem:[%s14601_s11 + $0xc0] sm:$0xf]  ;;  %v8699_v27 = vor.u32 %v9800_v3, %v8698_v35  ;;  %v8752_v4 = vld [vmem:[%s14601_s11 + $0xcc] sm:$0xf0] }
 0x3ea   : > { %v2897_v32 = vpack.c.bf16 %v2796_v5, %v2795_v8  ;;  %v9826_v8 = vld [vmem:[%s14601_s11 + $0x128] sm:$0xf0]  ;;  %v9801_v5 = vld [vmem:[%s14601_s11 + $0x64] sm:$0xf] }
 0x3eb   : > { %v2682_v2 = vpop.f32.mrf.mxu0  ;;  %3316 = vmatmul.bf16.gmra.mxu1 %v8739_v19  ;;  %v8798_v19 = vld [vmem:[%s14601_s11 + $0x120] sm:$0xf] }
 0x3ec   : > { %3390 = vmatpush.bf16.msra.mxu2 %v11443_v21  ;;  %v2721_v47 = vadd.f32 %v2682_v2, %v2489_v46  ;;  %v9814_v21 = vld [vmem:[%s14601_s11 + $0xc8] sm:$0xf0]  ;;  %v8799_v54 = vor.u32 %v9826_v8, %v8798_v19  ;;  %v8710_v2 = vld [vmem:[%s14601_s11 + $0x68] sm:$0xf]  ;;  %v9803_v46 = vld [vmem:[%s14601_s11 + $0x70] sm:$0xf0] }
 0x3ed   : > { %v8751_v31 = vor.u32 %v9814_v21, %v8750_v45  ;;  %v8711_v37 = vor.u32 %v9803_v46, %v8710_v2  ;;  %v8716_v45 = vld [vmem:[%s14601_s11 + $0x84] sm:$0xf0]  ;;  %v9852_v19 = vld [vmem:[%s14768_s3 + $0x18] sm:$0xff] }
 0x3ee   : > { %v2761_v49 = vadd.f32 %v11303_v63, %v2721_v47  ;;  %v8810_v47 = vld [vmem:[%s14601_s11 + $0x138] sm:$0xf]  ;;  %3860 = vmatpush.bf16.msrb.mxu0 %v9852_v19 }
 0x3ef   : > { %v8858_v8 = vld [vmem:[%s14601_s11 + $0x198] sm:$0xf] }
 0x3f0   : > { %3391 = vmatpush.bf16.msra.mxu2 %v11429_v13  ;;  %v8656_v13 = vld [vmem:[%s14601_s11 + $0xc] sm:$0xf0]  ;;  %v2797_v38 = vmax.f32 %v2761_v49, 0.0 }
 0x3f1   : > { %v8659_v53 = vor.u32 %v9789_v42, %v8656_v13  ;;  %v8722_v42 = vld [vmem:[%s14601_s11 + $0x80] sm:$0xf]  ;;  %v9806_v13 = vld [vmem:[%s14601_s11 + $0x88] sm:$0xf0] }
 0x3f3   : > { %v2684_v16 = vpop.f32.mrf.mxu0 }
 0x3f4   : > { %v2722_v55 = vadd.f32 %v2684_v16, %v2490_v51  ;;  %3392 = vmatpush.bf16.msra.mxu2 %v11414_v24  ;;  %v9829_v51 = vld [vmem:[%s14601_s11 + $0x140] sm:$0xf0]  ;;  %v9804_v16 = vld [vmem:[%s14601_s11 + $0x7c] sm:$0xf] }
 0x3f5   : > { %v8811_v49 = vor.u32 %v9829_v51, %v8810_v47 }
 0x3f6   : > { %v2762_v44 = vadd.f32 %v11303_v63, %v2722_v55  ;;  %v9791_v63 = vld [vmem:[%s14601_s11 + $0x10] sm:$0xf0]  ;;  %v8719_v55 = vor.u32 %v9804_v16, %v8716_v45  ;;  %v8770_v16 = vld [vmem:[%s14601_s11 + $0xe0] sm:$0xf]  ;;  %v9818_v45 = vld [vmem:[%s14601_s11 + $0xe8] sm:$0xf0] }
 0x3f7   : > { %v8663_v60 = vor.u32 %v9791_v63, %v8662_v48 }
 0x3f8   : > { %v2798_v9 = vmax.f32 %v2762_v44, 0.0  ;;  %v11516_v26 = vpop.f32.mrf.mxu1  ;;  %3393 = vmatpush.bf16.msra.mxu2 %v11393_v20  ;;  %v8762_v20 = vld [vmem:[%s14601_s11 + $0xd8] sm:$0xf]  ;;  %v8723_v44 = vor.u32 %v9806_v13, %v8722_v42  ;;  %v8771_v42 = vor.u32 %v9818_v45, %v8770_v16 }
 0x3f9   : > { %v8763_v17 = vor.u32 %v9817_v50, %v8762_v20  ;;  %v8734_v20 = vld [vmem:[%s14601_s11 + $0x98] sm:$0xf]  ;;  %v9809_v50 = vld [vmem:[%s14601_s11 + $0xa0] sm:$0xf0] }
 0x3fa   : > { %v2898_v24 = vpack.c.bf16 %v2798_v9, %v2797_v38  ;;  %v9832_v38 = vld [vmem:[%s14601_s11 + $0x158] sm:$0xf0]  ;;  %v9807_v9 = vld [vmem:[%s14601_s11 + $0x94] sm:$0xf]  ;;  %v8735_v22 = vor.u32 %v9809_v50, %v8734_v20 }
 0x3fb   : > { %3321 = vmatmul.bf16.gmra.mxu1 %v8751_v31  ;;  %3394 = vmatmul.bf16.vlgmr.msra.gmra.mxu2 %v8659_v53  ;;  %v8822_v53 = vld [vmem:[%s14601_s11 + $0x150] sm:$0xf] }
 0x3fc   : > { %3505 = vmatpush.bf16.msra.mxu3 %v2898_v24  ;;  %v8728_v24 = vld [vmem:[%s14601_s11 + $0x9c] sm:$0xf0]  ;;  %v8823_v48 = vor.u32 %v9832_v38, %v8822_v53  ;;  %v8870_v38 = vld [vmem:[%s14601_s11 + $0x1b0] sm:$0xf] }
 0x3fd   : > { %v8731_v63 = vor.u32 %v9807_v9, %v8728_v24  ;;  %v9844_v24 = vld [vmem:[%s14601_s11 + $0x1b8] sm:$0xf0] }
 0x3fe   : > { %v8871_v50 = vor.u32 %v9844_v24, %v8870_v38  ;;  %v9824_v24 = vld [vmem:[%s14601_s11 + $0x118] sm:$0xf0] }
 0x400   : > { %v11525_v40 = vpop.f32.mrf.mxu1  ;;  %3506 = vmatpush.bf16.msra.mxu3 %v2897_v32  ;;  %v8707_v32 = vor.u32 %v9801_v5, %v8704_v12  ;;  %v9851_v5 = vld [vmem:[%s14768_s3 + $0x10] sm:$0xff]  ;;  %v9841_v12 = vld [vmem:[%s14601_s11 + $0x1a0] sm:$0xf0] }
 0x401   : > { %3861 = vmatpush.bf16.msrb.mxu0 %v9851_v5  ;;  %v9847_v5 = vld [vmem:[%s14601_s11 + $0x1d0] sm:$0xf0] }
 0x403   : > { %8892 = vmatmul.msk.bf16.vlgmr.msra.gmra.mxu3 %vm3209_vm8, %v8663_v60 }
 0x408   : > { %v11540_v23 = vpop.f32.mrf.mxu1 }
 0x40b   : > { %3326 = vmatmul.bf16.gmra.mxu1 %v8763_v17  ;;  %3399 = vmatmul.bf16.gmra.mxu2 %v8671_v11  ;;  %v8834_v17 = vld [vmem:[%s14601_s11 + $0x168] sm:$0xf]  ;;  %v9835_v11 = vld [vmem:[%s14601_s11 + $0x170] sm:$0xf0] }
 0x410   : > { %v11548_v43 = vpop.f32.mrf.mxu1 }
 0x413   : > { %8893 = vmatmul.msk.bf16.gmra.mxu3 %vm3209_vm8, %v8675_v36  ;;  %v8835_v36 = vor.u32 %v9835_v11, %v8834_v17 }
 0x418   : > { %v11563_v7 = vpop.f32.mrf.mxu1 }
 0x41b   : > { %3331 = vmatmul.bf16.gmra.mxu1 %v8775_v28  ;;  %3404 = vmatmul.bf16.gmra.mxu2 %v8683_v41  ;;  %v8747_v28 = vor.u32 %v9812_v29, %v8746_v56 }
 0x420   : > { %v11571_v25 = vpop.f32.mrf.mxu1 }
 0x423   : > { %8894 = vmatmul.msk.bf16.gmra.mxu3 %vm3209_vm8, %v8687_v62  ;;  %v9813_v62 = vld [vmem:[%s14601_s11 + $0xc4] sm:$0xf] }
 0x424   : > { %v8755_v57 = vor.u32 %v9813_v62, %v8752_v4 }
 0x428   : > { %v11586_v14 = vpop.f32.mrf.mxu1 }
 0x42b   : > { %3336 = vmatmul.bf16.gmra.mxu1 %v8787_v6  ;;  %3409 = vmatmul.bf16.gmra.mxu2 %v8695_v58  ;;  %v8758_v6 = vld [vmem:[%s14601_s11 + $0xc8] sm:$0xf]  ;;  %v9815_v58 = vld [vmem:[%s14601_s11 + $0xd0] sm:$0xf0] }
 0x42c   : > { %v8759_v3 = vor.u32 %v9815_v58, %v8758_v6  ;;  %v8882_v6 = vld [vmem:[%s14601_s11 + $0x1c8] sm:$0xf] }
 0x430   : > { %v11594_v10 = vpop.f32.mrf.mxu1 }
 0x433   : > { %8895 = vmatmul.msk.bf16.gmra.mxu3 %vm3209_vm8, %v8699_v27 }
 0x438   : > { %v11609_v61 = vpop.f32.mrf.mxu1 }
 0x43b   : > { %3341 = vmatmul.bf16.gmra.mxu1 %v8799_v54  ;;  %3414 = vmatmul.bf16.gmra.mxu2 %v8707_v32  ;;  %v9816_v54 = vld [vmem:[%s14601_s11 + $0xdc] sm:$0xf]  ;;  %v8764_v32 = vld [vmem:[%s14601_s11 + $0xe4] sm:$0xf0] }
 0x43c   : > { %v8767_v47 = vor.u32 %v9816_v54, %v8764_v32  ;;  %v8788_v54 = vld [vmem:[%s14601_s11 + $0x114] sm:$0xf0] }
 0x440   : > { %v11617_v1 = vpop.f32.mrf.mxu1 }
 0x443   : > { %8896 = vmatmul.msk.bf16.gmra.mxu3 %vm3209_vm8, %v8711_v37  ;;  %v8859_v37 = vor.u32 %v9841_v12, %v8858_v8  ;;  %v9822_v12 = vld [vmem:[%s14601_s11 + $0x10c] sm:$0xf] }
 0x448   : > { %v11632_v21 = vpop.f32.mrf.mxu1 }
 0x44b   : > { %3346 = vmatmul.bf16.gmra.mxu1 %v8811_v49  ;;  %3419 = vmatmul.bf16.gmra.mxu2 %v8719_v55 }
 0x450   : > { %v11640_v31 = vpop.f32.mrf.mxu1 }
 0x453   : > { %8897 = vmatmul.msk.bf16.gmra.mxu3 %vm3209_vm8, %v8723_v44 }
 0x458   : > { %v11655_v60 = vpop.f32.mrf.mxu1 }
 0x45b   : > { %3351 = vmatmul.bf16.gmra.mxu1 %v8823_v48  ;;  %3424 = vmatmul.bf16.gmra.mxu2 %v8731_v63  ;;  %v9819_v48 = vld [vmem:[%s14601_s11 + $0xf4] sm:$0xf] }
 0x460   : > { %v11663_v15 = vpop.f32.mrf.mxu1 }
 0x463   : > { %8898 = vmatmul.msk.bf16.gmra.mxu3 %vm3209_vm8, %v8735_v22 }
 0x468   : > { %v11678_v33 = vpop.f32.mrf.mxu1 }
 0x46b   : > { %3356 = vmatmul.bf16.gmra.mxu1 %v8835_v36  ;;  %3429 = vmatmul.bf16.gmra.mxu2 %v8743_v0  ;;  %v8782_v36 = vld [vmem:[%s14601_s11 + $0xf8] sm:$0xf]  ;;  %v9821_v0 = vld [vmem:[%s14601_s11 + $0x100] sm:$0xf0] }
 0x46c   : > { %v8783_v62 = vor.u32 %v9821_v0, %v8782_v36 }
 0x470   : > { %v11686_v41 = vpop.f32.mrf.mxu1 }
 0x473   : > { %8899 = vmatmul.msk.bf16.gmra.mxu3 %vm3209_vm8, %v8747_v28 }
 0x478   : > { %v11701_v59 = vpop.f32.mrf.mxu1 }
 0x47b   : > { %3361 = vmatmul.bf16.gmra.mxu1 %v8847_v30  ;;  %3434 = vmatmul.bf16.gmra.mxu2 %v8755_v57 }
 0x47e   : > { %v3395_v35 = vpop.f32.mrf.mxu2 }
 0x47f   : > { %v3396_v44 = vadd.f32 %v3395_v35, %v11516_v26  ;;  %v8776_v26 = vld [vmem:[%s14601_s11 + $0xfc] sm:$0xf0] }
 0x480   : > { %v11709_v27 = vpop.f32.mrf.mxu1  ;;  %v8779_v22 = vor.u32 %v9819_v48, %v8776_v26 }
 0x483   : > { %8900 = vmatmul.msk.bf16.gmra.mxu3 %vm3209_vm8, %v8759_v3  ;;  %v9850_v3 = vld [vmem:[%s14768_s3 + $0x8] sm:$0xff] }
 0x484   : > { %4007 = vmatpush.bf16.msra.mxu1 %v9850_v3 }
 0x486   : > { %v3397_v2 = vpop.f32.mrf.mxu2  ;;  %v3508_v46 = vpop.f32.mrf.mxu3 }
 0x487   : > { %v3398_v53 = vadd.f32 %v3397_v2, %v11525_v40  ;;  %v3509_v40 = vadd.f32 %v3508_v46, %v3396_v44 }
 0x488   : > { %v11730_v51 = vpop.f32.mrf.mxu1 }
 0x48b   : > { %3366 = vmatmul.bf16.gmra.mxu1 %v8859_v37  ;;  %3439 = vmatmul.bf16.gmra.mxu2 %v8767_v47 }
 0x48e   : > { %v3400_v49 = vpop.f32.mrf.mxu2  ;;  %v3510_v55 = vpop.f32.mrf.mxu3 }
 0x48f   : > { %v3511_v9 = vadd.f32 %v3510_v55, %v3398_v53  ;;  %v3401_v52 = vadd.f32 %v3400_v49, %v11540_v23  ;;  %v8883_v49 = vor.u32 %v9847_v5, %v8882_v6  ;;  %v8791_v55 = vor.u32 %v9822_v12, %v8788_v54 }
 0x490   : > { %v11738_v13 = vpop.f32.mrf.mxu1 }
 0x491   : > { %v11755_v17 = vpack.c.bf16 %v3511_v9, %v3509_v40  ;;  %v8794_v9 = vld [vmem:[%s14601_s11 + $0x110] sm:$0xf] }
 0x493   : > { %8901 = vmatmul.msk.bf16.gmra.mxu3 %vm3209_vm8, %v8771_v42  ;;  %v3643_v18 = vshll.u32 %v11755_v17, 16  ;;  %v3641_v57 = vshrl.u32 %v11755_v17, 16  ;;  %v4124_v58 = vrot.slane %v11755_v17, 1  ;;  %v9849_v42 = vld [vmem:[%s14768_s3] sm:$0xff] }
 0x494   : > { %4008 = vmatpush.bf16.msra.mxu1 %v9849_v42 }
 0x495   : > { %v3645_v23 = vrot.slane %v3643_v18, 1 }
 0x496   : > { %v3402_v63 = vpop.f32.mrf.mxu2  ;;  %v3513_v20 = vpop.f32.mrf.mxu3 }
 0x497   : > { %v3403_v56 = vadd.f32 %v3402_v63, %v11548_v43  ;;  %v3514_v34 = vadd.f32 %v3513_v20, %v3401_v52  ;;  %v3646_v8 = vor.u32 %v3645_v23, %v3641_v57 }
 0x498   : > { %v11757_v11 = vpop.f32.mrf.mxu1 }
 0x49b   : > { %3371 = vmatmul.bf16.gmra.mxu1 %v8871_v50  ;;  %3444 = vmatmul.bf16.gmra.mxu2 %v8779_v22  ;;  %v8795_v50 = vor.u32 %v9824_v24, %v8794_v9 }
 0x49e   : > { %v3405_v29 = vpop.f32.mrf.mxu2  ;;  %v3515_v28 = vpop.f32.mrf.mxu3 }
 0x49f   : > { %v3516_v39 = vadd.f32 %v3515_v28, %v3403_v56  ;;  %v3406_v38 = vadd.f32 %v3405_v29, %v11563_v7  ;;  %v11814_v7 = vld [vmem:[%s14601_s11 + $0x1e0] sm:$0xff] }
 0x4a0   : > { %v11768_v4 = vpop.f32.mrf.mxu1  ;;  %v3101_v18 = vunpack.c.l.b16 %v11814_v7  ;;  %v9825_v28 = vld [vmem:[%s14601_s11 + $0x124] sm:$0xf] }
 0x4a1   : > { %v11770_v30 = vpack.c.bf16 %v3516_v39, %v3514_v34  ;;  %v8800_v34 = vld [vmem:[%s14601_s11 + $0x12c] sm:$0xf0] }
 0x4a2   : > { %v3164_v12 = vpack.c.b16 %v3101_v18, %v3101_v18  ;;  %v8803_v54 = vor.u32 %v9825_v28, %v8800_v34 }
 0x4a3   : > { %8902 = vmatmul.msk.bf16.gmra.mxu3 %vm3209_vm8, %v8783_v62  ;;  %v3648_v43 = vshll.u32 %v11770_v30, 16  ;;  %v3652_v35 = vshrl.u32 %v11770_v30, 16  ;;  %v4125_v19 = vrot.slane %v11770_v30, 1  ;;  %v4824_v39 = vrot.slane %v11770_v30, 2 }
 0x4a5   : > { %v3650_v32 = vrot.slane %v3648_v43, 1  ;;  %v4533_v2 = vrot.slane %v3652_v35, 1  ;;  %v11794_v46 = vsel %vm1161_vm2, %v4124_v58, %v4125_v19  ;;  %v4534_v37 = vrot.slane %v3648_v43, 2 }
 0x4a6   : > { %v3407_v47 = vpop.f32.mrf.mxu2  ;;  %v3518_v16 = vpop.f32.mrf.mxu3 }
 0x4a7   : > { %v3651_v45 = vsel %vm695_vm1, %v3646_v8, %v3650_v32  ;;  %v4535_v53 = vor.u32 %v4534_v37, %v4533_v2  ;;  %v3408_v48 = vadd.f32 %v3407_v47, %v11571_v25  ;;  %v3519_v63 = vadd.f32 %v3518_v16, %v3406_v38  ;;  %v8806_v16 = vld [vmem:[%s14601_s11 + $0x128] sm:$0xf] }
 0x4a8   : > { %v11800_v44 = vpop.f32.mrf.mxu1  ;;  %8925 = vmatmul.msk.bf16.vlgmr.msrb.gmra.mxu0 %vm3209_vm8, %v3651_v45  ;;  %v3654_v29 = vor.u32 %v3652_v35, %v3650_v32  ;;  %v9827_v45 = vld [vmem:[%s14601_s11 + $0x130] sm:$0xf0] }
 0x4ab   : > { %3376 = vmatmul.bf16.gmra.mxu1 %v8883_v49  ;;  %3449 = vmatmul.bf16.gmra.mxu2 %v8791_v55 }
 0x4ae   : > { %v3410_v26 = vpop.f32.mrf.mxu2  ;;  %v3520_v40 = vpop.f32.mrf.mxu3 }
 0x4af   : > { %v3521_v20 = vadd.f32 %v3520_v40, %v3408_v48  ;;  %v3411_v47 = vadd.f32 %v3410_v26, %v11586_v14 }
 0x4b0   : > { %v11816_v22 = vpop.f32.mrf.mxu1 }
 0x4b1   : > { %v11818_v52 = vpack.c.bf16 %v3521_v20, %v3519_v63  ;;  %v9828_v20 = vld [vmem:[%s14601_s11 + $0x13c] sm:$0xf] }
 0x4b3   : > { %8903 = vmatmul.msk.bf16.gmra.mxu3 %vm3209_vm8, %v8795_v50  ;;  %v3656_v25 = vshll.u32 %v11818_v52, 16  ;;  %v3660_v36 = vshrl.u32 %v11818_v52, 16  ;;  %v4127_v0 = vrot.slane %v11818_v52, 1  ;;  %v4825_v56 = vrot.slane %v11818_v52, 2  ;;  %v8812_v50 = vld [vmem:[%s14601_s11 + $0x144] sm:$0xf0] }
 0x4b4   : > { %v5524_v18 = vrot.slane %v11818_v52, 3 }
 0x4b5   : > { %v3658_v62 = vrot.slane %v3656_v25, 1  ;;  %v11834_v23 = vsel %vm1161_vm2, %v4125_v19, %v4127_v0  ;;  %v4536_v57 = vrot.slane %v3660_v36, 1  ;;  %v4537_v6 = vrot.slane %v3656_v25, 2 }
 0x4b6   : > { %v3412_v58 = vpop.f32.mrf.mxu2  ;;  %v3523_v43 = vpop.f32.mrf.mxu3  ;;  %v11837_v35 = vsel %vm1827_vm5, %v4824_v39, %v4825_v56  ;;  %v5233_v3 = vrot.slane %v3660_v36, 2  ;;  %v5234_v8 = vrot.slane %v3656_v25, 3 }
 0x4b7   : > { %14769 = vst [vmem:[#allocation28_spill] sm:$0xff] %v11837_v35  ;;  %v3659_v5 = vsel %vm695_vm1, %v3654_v29, %v3658_v62  ;;  %v4538_v2 = vor.u32 %v4537_v6, %v4536_v57  ;;  %v3413_v49 = vadd.f32 %v3412_v58, %v11594_v10  ;;  %v3524_v38 = vadd.f32 %v3523_v43, %v3411_v47 }
 0x4b8   : > { %v11840_v32 = vpop.f32.mrf.mxu1  ;;  %8926 = vmatmul.msk.bf16.gmra.mxu0 %vm3209_vm8, %v3659_v5  ;;  %v5235_v19 = vor.u32 %v5234_v8, %v5233_v3  ;;  %v3662_v10 = vor.u32 %v3660_v36, %v3658_v62  ;;  %v8815_v8 = vor.u32 %v9828_v20, %v8812_v50  ;;  %v9831_v20 = vld [vmem:[%s14601_s11 + $0x154] sm:$0xf]  ;;  %v8824_v50 = vld [vmem:[%s14601_s11 + $0x15c] sm:$0xf0] }
 0x4b9   : > { %v11844_v37 = vsel %vm1547_vm4, %v4535_v53, %v4538_v2  ;;  %v8807_v53 = vor.u32 %v9827_v45, %v8806_v16  ;;  %v8818_v16 = vld [vmem:[%s14601_s11 + $0x140] sm:$0xf]  ;;  %v9830_v45 = vld [vmem:[%s14601_s11 + $0x148] sm:$0xf0] }
 0x4bb   : > { %3381 = vmatmul.bf16.gmra.mxu1 %v3164_v12  ;;  %3454 = vmatmul.bf16.gmra.mxu2 %v8803_v54 }
 0x4be   : > { %v3415_v55 = vpop.f32.mrf.mxu2  ;;  %v3525_v42 = vpop.f32.mrf.mxu3 }
 0x4bf   : > { %v3526_v9 = vadd.f32 %v3525_v42, %v3413_v49  ;;  %v3416_v47 = vadd.f32 %v3415_v55, %v11609_v61 }
 0x4c0   : > { %v11854_v24 = vpop.f32.mrf.mxu1 }
 0x4c1   : > { %v11856_v14 = vpack.c.bf16 %v3526_v9, %v3524_v38  ;;  %v8819_v9 = vor.u32 %v9830_v45, %v8818_v16  ;;  %v8827_v16 = vor.u32 %v9831_v20, %v8824_v50 }
 0x4c3   : > { %8904 = vmatmul.msk.bf16.gmra.mxu3 %vm3209_vm8, %v8807_v53  ;;  %v3664_v48 = vshll.u32 %v11856_v14, 16  ;;  %v3668_v26 = vshrl.u32 %v11856_v14, 16  ;;  %v4129_v40 = vrot.slane %v11856_v14, 1  ;;  %v4827_v63 = vrot.slane %v11856_v14, 2 }
 0x4c4   : > { %v5525_v25 = vrot.slane %v11856_v14, 3 }
 0x4c5   : > { %v3666_v29 = vrot.slane %v3664_v48, 1  ;;  %v11872_v28 = vsel %vm1161_vm2, %v4127_v0, %v4129_v40  ;;  %v4540_v34 = vrot.slane %v3668_v26, 1  ;;  %v4541_v39 = vrot.slane %v3664_v48, 2 }
 0x4c6   : > { %v3417_v57 = vpop.f32.mrf.mxu2  ;;  %v3528_v36 = vpop.f32.mrf.mxu3  ;;  %v11875_v62 = vsel %vm1827_vm5, %v4825_v56, %v4827_v63  ;;  %v5236_v6 = vrot.slane %v3668_v26, 2  ;;  %v5237_v58 = vrot.slane %v3664_v48, 3  ;;  %v11878_v43 = vsel %vm2493_vm7, %v5524_v18, %v5525_v25 }
 0x4c7   : > { %14770 = vst [vmem:[#allocation29_spill] sm:$0xff] %v11875_v62  ;;  %v3667_v3 = vsel %vm695_vm1, %v3662_v10, %v3666_v29  ;;  %v4542_v0 = vor.u32 %v4541_v39, %v4540_v34 }
 0x4c8   : > { %14771 = vst [vmem:[#allocation24_spill] sm:$0xff] %v11878_v43  ;;  %v11881_v5 = vpop.f32.mrf.mxu1  ;;  %8927 = vmatmul.msk.bf16.gmra.mxu0 %vm3209_vm8, %v3667_v3  ;;  %v5238_v12 = vor.u32 %v5237_v58, %v5236_v6 }
 0x4c9   : > { %v11885_v54 = vsel %vm1547_vm4, %v4538_v2, %v4542_v0  ;;  %v3418_v2 = vadd.f32 %v3417_v57, %v11617_v1  ;;  %v3670_v1 = vor.u32 %v3668_v26, %v3666_v29 }
 0x4ca   : > { %v11888_v56 = vsel %vm2213_vm6, %v5235_v19, %v5238_v12  ;;  %v3529_v19 = vadd.f32 %v3528_v36, %v3416_v47 }
 0x4cb   : > { %14772 = vst [vmem:[#allocation30_spill] sm:$0xff] %v11888_v56  ;;  %3459 = vmatmul.bf16.gmra.mxu2 %v8815_v8  ;;  %8951 = vmatmul.msk.bf16.vlgmr.msra.gmra.mxu1 %vm3209_vm8, %v11755_v17 }
 0x4ce   : > { %v3420_v49 = vpop.f32.mrf.mxu2  ;;  %v3530_v42 = vpop.f32.mrf.mxu3 }
 0x4cf   : > { %v3531_v38 = vadd.f32 %v3530_v42, %v3418_v2 }
 0x4d0   : > { %v11900_v61 = vpop.f32.mrf.mxu1 }
 0x4d1   : > { %v11902_v55 = vpack.c.bf16 %v3531_v38, %v3529_v19  ;;  %v3421_v19 = vadd.f32 %v3420_v49, %v11632_v21  ;;  %v9833_v38 = vld [vmem:[%s14601_s11 + $0x160] sm:$0xf0] }
 0x4d3   : > { %8905 = vmatmul.msk.bf16.gmra.mxu3 %vm3209_vm8, %v8819_v9  ;;  %v3672_v17 = vshll.u32 %v11902_v55, 16  ;;  %v3676_v53 = vshrl.u32 %v11902_v55, 16  ;;  %v4131_v48 = vrot.slane %v11902_v55, 1  ;;  %v4829_v10 = vrot.slane %v11902_v55, 2 }
 0x4d4   : > { %v5527_v18 = vrot.slane %v11902_v55, 3 }
 0x4d5   : > { %v3674_v34 = vrot.slane %v3672_v17, 1  ;;  %v11917_v39 = vsel %vm1161_vm2, %v4129_v40, %v4131_v48  ;;  %v4544_v57 = vrot.slane %v3676_v53, 1  ;;  %v4545_v36 = vrot.slane %v3672_v17, 2 }
 0x4d6   : > { %v3422_v6 = vpop.f32.mrf.mxu2  ;;  %v3533_v58 = vpop.f32.mrf.mxu3  ;;  %v11920_v26 = vsel %vm1827_vm5, %v4827_v63, %v4829_v10  ;;  %v5240_v29 = vrot.slane %v3676_v53, 2  ;;  %v5241_v3 = vrot.slane %v3672_v17, 3  ;;  %v11923_v8 = vsel %vm2493_vm7, %v5525_v25, %v5527_v18  ;;  %v8830_v25 = vld [vmem:[%s14601_s11 + $0x158] sm:$0xf] }
 0x4d7   : > { %14773 = vst [vmem:[#allocation35_spill] sm:$0xff] %v11920_v26  ;;  %v3675_v47 = vsel %vm695_vm1, %v3670_v1, %v3674_v34  ;;  %v4546_v40 = vor.u32 %v4545_v36, %v4544_v57  ;;  %v8831_v20 = vor.u32 %v9833_v38, %v8830_v25 }
 0x4d8   : > { %14774 = vst [vmem:[#allocation32_spill] sm:$0xff] %v11923_v8  ;;  %v11926_v45 = vpop.f32.mrf.mxu1  ;;  %8928 = vmatmul.msk.bf16.gmra.mxu0 %vm3209_vm8, %v3675_v47  ;;  %v5242_v2 = vor.u32 %v5241_v3, %v5240_v29 }
 0x4d9   : > { %v11930_v42 = vsel %vm1547_vm4, %v4542_v0, %v4546_v40  ;;  %v3423_v0 = vadd.f32 %v3422_v6, %v11640_v31  ;;  %v3678_v31 = vor.u32 %v3676_v53, %v3674_v34  ;;  %v9834_v6 = vld [vmem:[%s14601_s11 + $0x16c] sm:$0xf] }
 0x4da   : > { %14775 = vst [vmem:[#allocation33_spill] sm:$0xff] %v11930_v42  ;;  %v11933_v63 = vsel %vm2213_vm6, %v5238_v12, %v5242_v2  ;;  %v3534_v12 = vadd.f32 %v3533_v58, %v3421_v19  ;;  %v8836_v58 = vld [vmem:[%s14601_s11 + $0x174] sm:$0xf0] }
 0x4db   : > { %14776 = vst [vmem:[#allocation34_spill] sm:$0xff] %v11933_v63  ;;  %3464 = vmatmul.bf16.gmra.mxu2 %v8827_v16  ;;  %8952 = vmatmul.msk.bf16.gmra.mxu1 %vm3209_vm8, %v11770_v30 }
 0x4de   : > { %v3425_v9 = vpop.f32.mrf.mxu2  ;;  %v3535_v17 = vpop.f32.mrf.mxu3 }
 0x4df   : > { %v3536_v1 = vadd.f32 %v3535_v17, %v3423_v0 }
 0x4e0   : > { %v11945_v21 = vpop.f32.mrf.mxu1 }
 0x4e1   : > { %v11947_v49 = vpack.c.bf16 %v3536_v1, %v3534_v12  ;;  %v8839_v1 = vor.u32 %v9834_v6, %v8836_v58 }
 0x4e3   : > { %8906 = vmatmul.msk.bf16.gmra.mxu3 %vm3209_vm8, %v8831_v20  ;;  %v3680_v30 = vshll.u32 %v11947_v49, 16  ;;  %v3684_v50 = vshrl.u32 %v11947_v49, 16  ;;  %v4133_v57 = vrot.slane %v11947_v49, 1  ;;  %v4831_v36 = vrot.slane %v11947_v49, 2 }
 0x4e4   : > { %v5529_v29 = vrot.slane %v11947_v49, 3 }
 0x4e5   : > { %v3682_v3 = vrot.slane %v3680_v30, 1  ;;  %v11962_v47 = vsel %vm1161_vm2, %v4131_v48, %v4133_v57  ;;  %v4548_v16 = vrot.slane %v3684_v50, 1  ;;  %v4549_v19 = vrot.slane %v3680_v30, 2 }
 0x4e6   : > { %v3427_v25 = vpop.f32.mrf.mxu2  ;;  %v3538_v38 = vpop.f32.mrf.mxu3  ;;  %v11965_v53 = vsel %vm1827_vm5, %v4829_v10, %v4831_v36  ;;  %v5244_v34 = vrot.slane %v3684_v50, 2  ;;  %v5245_v0 = vrot.slane %v3680_v30, 3  ;;  %v11968_v17 = vsel %vm2493_vm7, %v5527_v18, %v5529_v29  ;;  %v8842_v18 = vld [vmem:[%s14601_s11 + $0x170] sm:$0xf] }
 0x4e7   : > { %14777 = vst [vmem:[#allocation36_spill] sm:$0xff] %v11965_v53  ;;  %v3683_v12 = vsel %vm695_vm1, %v3678_v31, %v3682_v3  ;;  %v4550_v48 = vor.u32 %v4549_v19, %v4548_v16  ;;  %v3426_v30 = vadd.f32 %v3425_v9, %v11655_v60  ;;  %v9836_v31 = vld [vmem:[%s14601_s11 + $0x178] sm:$0xf0] }
 0x4e8   : > { %14778 = vst [vmem:[#allocation37_spill] sm:$0xff] %v11968_v17  ;;  %v11971_v20 = vpop.f32.mrf.mxu1  ;;  %8929 = vmatmul.msk.bf16.gmra.mxu0 %vm3209_vm8, %v3683_v12  ;;  %v5246_v8 = vor.u32 %v5245_v0, %v5244_v34  ;;  %v8843_v19 = vor.u32 %v9836_v31, %v8842_v18 }
 0x4e9   : > { %v11975_v43 = vsel %vm1547_vm4, %v4546_v40, %v4550_v48  ;;  %v3428_v40 = vadd.f32 %v3427_v25, %v11663_v15  ;;  %v3686_v15 = vor.u32 %v3684_v50, %v3682_v3  ;;  %v9837_v25 = vld [vmem:[%s14601_s11 + $0x184] sm:$0xf] }
 0x4ea   : > { %14779 = vst [vmem:[#allocation38_spill] sm:$0xff] %v11975_v43  ;;  %v11978_v10 = vsel %vm2213_vm6, %v5242_v2, %v5246_v8  ;;  %v3539_v2 = vadd.f32 %v3538_v38, %v3426_v30  ;;  %v8848_v38 = vld [vmem:[%s14601_s11 + $0x18c] sm:$0xf0] }
 0x4eb   : > { %14780 = vst [vmem:[#allocation12_spill] sm:$0xff] %v11978_v10  ;;  %3469 = vmatmul.bf16.gmra.mxu2 %v8839_v1  ;;  %8953 = vmatmul.msk.bf16.gmra.mxu1 %vm3209_vm8, %v11818_v52  ;;  %v8851_v10 = vor.u32 %v9837_v25, %v8848_v38 }
 0x4ee   : > { %v3430_v6 = vpop.f32.mrf.mxu2  ;;  %v3540_v58 = vpop.f32.mrf.mxu3 }
 0x4ef   : > { %v3541_v16 = vadd.f32 %v3540_v58, %v3428_v40 }
 0x4f0   : > { %v11990_v60 = vpop.f32.mrf.mxu1 }
 0x4f1   : > { %v11992_v9 = vpack.c.bf16 %v3541_v16, %v3539_v2 }
 0x4f3   : > { %8907 = vmatmul.msk.bf16.gmra.mxu3 %vm3209_vm8, %v8843_v19  ;;  %v3688_v52 = vshll.u32 %v11992_v9, 16  ;;  %v3692_v34 = vshrl.u32 %v11992_v9, 16  ;;  %v4135_v0 = vrot.slane %v11992_v9, 1  ;;  %v4833_v12 = vrot.slane %v11992_v9, 2 }
 0x4f4   : > { %v5531_v1 = vrot.slane %v11992_v9, 3 }
 0x4f5   : > { %v3690_v30 = vrot.slane %v3688_v52, 1  ;;  %v12007_v18 = vsel %vm1161_vm2, %v4133_v57, %v4135_v0  ;;  %v4552_v31 = vrot.slane %v3692_v34, 1  ;;  %v4553_v40 = vrot.slane %v3688_v52, 2 }
 0x4f6   : > { %v3432_v58 = vpop.f32.mrf.mxu2  ;;  %v3543_v2 = vpop.f32.mrf.mxu3  ;;  %v12010_v50 = vsel %vm1827_vm5, %v4831_v36, %v4833_v12  ;;  %v5248_v3 = vrot.slane %v3692_v34, 2  ;;  %v5249_v16 = vrot.slane %v3688_v52, 3  ;;  %v12013_v19 = vsel %vm2493_vm7, %v5529_v29, %v5531_v1  ;;  %v8854_v29 = vld [vmem:[%s14601_s11 + $0x188] sm:$0xf] }
 0x4f7   : > { %14781 = vst [vmem:[#allocation39_spill] sm:$0xff] %v12010_v50  ;;  %v3691_v17 = vsel %vm695_vm1, %v3686_v15, %v3690_v30  ;;  %v4554_v57 = vor.u32 %v4553_v40, %v4552_v31  ;;  %v3431_v52 = vadd.f32 %v3430_v6, %v11678_v33 }
 0x4f8   : > { %14782 = vst [vmem:[#allocation40_spill] sm:$0xff] %v12013_v19  ;;  %v12016_v63 = vpop.f32.mrf.mxu1  ;;  %8930 = vmatmul.msk.bf16.gmra.mxu0 %vm3209_vm8, %v3691_v17  ;;  %v5250_v56 = vor.u32 %v5249_v16, %v5248_v3  ;;  %v9839_v17 = vld [vmem:[%s14601_s11 + $0x190] sm:$0xf0] }
 0x4f9   : > { %v12020_v53 = vsel %vm1547_vm4, %v4550_v48, %v4554_v57  ;;  %v3433_v48 = vadd.f32 %v3432_v58, %v11686_v41  ;;  %v8855_v31 = vor.u32 %v9839_v17, %v8854_v29  ;;  %v3694_v41 = vor.u32 %v3692_v34, %v3690_v30  ;;  %v9840_v58 = vld [vmem:[%s14601_s11 + $0x19c] sm:$0xf] }
 0x4fa   : > { %14783 = vst [vmem:[#allocation13_spill] sm:$0xff] %v12020_v53  ;;  %v12023_v36 = vsel %vm2213_vm6, %v5246_v8, %v5250_v56  ;;  %v3544_v8 = vadd.f32 %v3543_v2, %v3431_v52  ;;  %v8860_v2 = vld [vmem:[%s14601_s11 + $0x1a4] sm:$0xf0] }
 0x4fb   : > { %14784 = vst [vmem:[#allocation22_spill] sm:$0xff] %v12023_v36  ;;  %3474 = vmatmul.bf16.gmra.mxu2 %v8851_v10  ;;  %8954 = vmatmul.msk.bf16.gmra.mxu1 %vm3209_vm8, %v11856_v14  ;;  %v8863_v36 = vor.u32 %v9840_v58, %v8860_v2 }
 0x4fe   : > { %v3435_v15 = vpop.f32.mrf.mxu2  ;;  %v3545_v25 = vpop.f32.mrf.mxu3 }
 0x4ff   : > { %v3546_v38 = vadd.f32 %v3545_v25, %v3433_v48 }
 0x500   : > { %v12035_v33 = vpop.f32.mrf.mxu1 }
 0x501   : > { %v12037_v10 = vpack.c.bf16 %v3546_v38, %v3544_v8 }
 0x503   : > { %8908 = vmatmul.msk.bf16.gmra.mxu3 %vm3209_vm8, %v8855_v31  ;;  %v3696_v14 = vshll.u32 %v12037_v10, 16  ;;  %v3700_v6 = vshrl.u32 %v12037_v10, 16  ;;  %v4137_v40 = vrot.slane %v12037_v10, 1  ;;  %v4835_v3 = vrot.slane %v12037_v10, 2 }
 0x504   : > { %v5533_v16 = vrot.slane %v12037_v10, 3 }
 0x505   : > { %v3698_v52 = vrot.slane %v3696_v14, 1  ;;  %v12052_v29 = vsel %vm1161_vm2, %v4135_v0, %v4137_v40  ;;  %v4556_v17 = vrot.slane %v3700_v6, 1  ;;  %v4557_v48 = vrot.slane %v3696_v14, 2 }
 0x506   : > { %v3437_v25 = vpop.f32.mrf.mxu2  ;;  %v3548_v8 = vpop.f32.mrf.mxu3  ;;  %v12055_v34 = vsel %vm1827_vm5, %v4833_v12, %v4835_v3  ;;  %v5252_v30 = vrot.slane %v3700_v6, 2  ;;  %v5253_v38 = vrot.slane %v3696_v14, 3  ;;  %v12058_v31 = vsel %vm2493_vm7, %v5531_v1, %v5533_v16  ;;  %v8866_v1 = vld [vmem:[%s14601_s11 + $0x1a0] sm:$0xf] }
 0x507   : > { %14785 = vst [vmem:[#allocation17_spill] sm:$0xff] %v12055_v34  ;;  %v3699_v19 = vsel %vm695_vm1, %v3694_v41, %v3698_v52  ;;  %v4558_v0 = vor.u32 %v4557_v48, %v4556_v17  ;;  %v3436_v14 = vadd.f32 %v3435_v15, %v11701_v59 }
 0x508   : > { %14786 = vst [vmem:[#allocation14_spill] sm:$0xff] %v12058_v31  ;;  %v12061_v50 = vpop.f32.mrf.mxu1  ;;  %8931 = vmatmul.msk.bf16.gmra.mxu0 %vm3209_vm8, %v3699_v19  ;;  %v5254_v26 = vor.u32 %v5253_v38, %v5252_v30  ;;  %v9842_v19 = vld [vmem:[%s14601_s11 + $0x1a8] sm:$0xf0] }
 0x509   : > { %v12065_v53 = vsel %vm1547_vm4, %v4554_v57, %v4558_v0  ;;  %v3438_v57 = vadd.f32 %v3437_v25, %v11709_v27  ;;  %v8867_v17 = vor.u32 %v9842_v19, %v8866_v1  ;;  %v3702_v27 = vor.u32 %v3700_v6, %v3698_v52  ;;  %v9843_v25 = vld [vmem:[%s14601_s11 + $0x1b4] sm:$0xf] }
 0x50a   : > { %14787 = vst [vmem:[#allocation20_spill] sm:$0xff] %v12065_v53  ;;  %v12068_v12 = vsel %vm2213_vm6, %v5250_v56, %v5254_v26  ;;  %v3549_v56 = vadd.f32 %v3548_v8, %v3436_v14  ;;  %v8872_v8 = vld [vmem:[%s14601_s11 + $0x1bc] sm:$0xf0] }
 0x50b   : > { %14788 = vst [vmem:[#allocation18_spill] sm:$0xff] %v12068_v12  ;;  %3479 = vmatmul.bf16.gmra.mxu2 %v8863_v36  ;;  %8955 = vmatmul.msk.bf16.gmra.mxu1 %vm3209_vm8, %v11902_v55  ;;  %v8875_v12 = vor.u32 %v9843_v25, %v8872_v8 }
 0x50e   : > { %v3440_v41 = vpop.f32.mrf.mxu2  ;;  %v3550_v58 = vpop.f32.mrf.mxu3 }
 0x50f   : > { %v3551_v2 = vadd.f32 %v3550_v58, %v3438_v57 }
 0x510   : > { %v12080_v59 = vpop.f32.mrf.mxu1 }
 0x511   : > { %v12082_v36 = vpack.c.bf16 %v3551_v2, %v3549_v56 }
 0x513   : > { %8909 = vmatmul.msk.bf16.gmra.mxu3 %vm3209_vm8, %v8867_v17  ;;  %v3704_v55 = vshll.u32 %v12082_v36, 16  ;;  %v3708_v15 = vshrl.u32 %v12082_v36, 16  ;;  %v4139_v48 = vrot.slane %v12082_v36, 1  ;;  %v4837_v30 = vrot.slane %v12082_v36, 2 }
 0x514   : > { %v5535_v38 = vrot.slane %v12082_v36, 3 }
 0x515   : > { %v3706_v14 = vrot.slane %v3704_v55, 1  ;;  %v12097_v1 = vsel %vm1161_vm2, %v4137_v40, %v4139_v48  ;;  %v4560_v19 = vrot.slane %v3708_v15, 1  ;;  %v4561_v57 = vrot.slane %v3704_v55, 2 }
 0x516   : > { %v3442_v58 = vpop.f32.mrf.mxu2  ;;  %v3553_v56 = vpop.f32.mrf.mxu3  ;;  %v12100_v6 = vsel %vm1827_vm5, %v4835_v3, %v4837_v30  ;;  %v5256_v52 = vrot.slane %v3708_v15, 2  ;;  %v5257_v2 = vrot.slane %v3704_v55, 3  ;;  %v12103_v17 = vsel %vm2493_vm7, %v5533_v16, %v5535_v38  ;;  %v8878_v16 = vld [vmem:[%s14601_s11 + $0x1b8] sm:$0xf] }
 0x517   : > { %14789 = vst [vmem:[#allocation16_spill] sm:$0xff] %v12100_v6  ;;  %v3707_v31 = vsel %vm695_vm1, %v3702_v27, %v3706_v14  ;;  %v4562_v40 = vor.u32 %v4561_v57, %v4560_v19  ;;  %v3441_v55 = vadd.f32 %v3440_v41, %v11730_v51  ;;  %v9854_v57 = vld [vmem:[%s14768_s3 + $0x28] sm:$0xff] }
 0x518   : > { %14790 = vst [vmem:[#allocation19_spill] sm:$0xff] %v12103_v17  ;;  %v12106_v34 = vpop.f32.mrf.mxu1  ;;  %8932 = vmatmul.msk.bf16.gmra.mxu0 %vm3209_vm8, %v3707_v31  ;;  %v5258_v53 = vor.u32 %v5257_v2, %v5256_v52  ;;  %v9845_v31 = vld [vmem:[%s14601_s11 + $0x1c0] sm:$0xf0]  ;;  %v9846_v52 = vld [vmem:[%s14601_s11 + $0x1cc] sm:$0xf]  ;;  %4233 = vmatpush.bf16.msrb.mxu2 %v9854_v57 }
 0x519   : > { %v12110_v62 = vsel %vm1547_vm4, %v4558_v0, %v4562_v40  ;;  %v3443_v0 = vadd.f32 %v3442_v58, %v11738_v13  ;;  %v8879_v19 = vor.u32 %v9845_v31, %v8878_v16  ;;  %v8884_v2 = vld [vmem:[%s14601_s11 + $0x1d4] sm:$0xf0] }
 0x51a   : > { %14791 = vst [vmem:[#allocation15_spill] sm:$0xff] %v12110_v62  ;;  %v12113_v3 = vsel %vm2213_vm6, %v5254_v26, %v5258_v53  ;;  %v3554_v26 = vadd.f32 %v3553_v56, %v3441_v55  ;;  %v3710_v56 = vor.u32 %v3708_v15, %v3706_v14  ;;  %v8887_v62 = vor.u32 %v9846_v52, %v8884_v2  ;;  %v9855_v2 = vld [vmem:[%s14768_s3 + $0x30] sm:$0xff] }
 0x51b   : > { %14792 = vst [vmem:[#allocation21_spill] sm:$0xff] %v12113_v3  ;;  %3484 = vmatmul.bf16.gmra.mxu2 %v8875_v12  ;;  %8956 = vmatmul.msk.bf16.gmra.mxu1 %vm3209_vm8, %v11947_v49 }
 0x51e   : > { %v3445_v27 = vpop.f32.mrf.mxu2  ;;  %v3555_v25 = vpop.f32.mrf.mxu3 }
 0x51f   : > { %v3556_v8 = vadd.f32 %v3555_v25, %v3443_v0 }
 0x520   : > { %v12125_v51 = vpop.f32.mrf.mxu1 }
 0x521   : > { %v12127_v12 = vpack.c.bf16 %v3556_v8, %v3554_v26 }
 0x523   : > { %8910 = vmatmul.msk.bf16.gmra.mxu3 %vm3209_vm8, %v8879_v19  ;;  %v3712_v49 = vshll.u32 %v12127_v12, 16  ;;  %v3716_v41 = vshrl.u32 %v12127_v12, 16  ;;  %v4141_v13 = vrot.slane %v12127_v12, 1  ;;  %v4839_v58 = vrot.slane %v12127_v12, 2 }
 0x524   : > { %v5537_v55 = vrot.slane %v12127_v12, 3 }
 0x525   : > { %v12144_v16 = vpop.f32.mrf.mxu0  ;;  %v3714_v31 = vrot.slane %v3712_v49, 1  ;;  %v12147_v0 = vsel %vm1161_vm2, %v4139_v48, %v4141_v13  ;;  %v4564_v25 = vrot.slane %v3716_v41, 1  ;;  %v4565_v26 = vrot.slane %v3712_v49, 2  ;;  %v9853_v48 = vld [vmem:[%s14768_s3 + $0x20] sm:$0xff] }
 0x526   : > { %v3447_v15 = vpop.f32.mrf.mxu2  ;;  %v3558_v14 = vpop.f32.mrf.mxu3  ;;  %v12150_v8 = vsel %vm1827_vm5, %v4837_v30, %v4839_v58  ;;  %v5260_v19 = vrot.slane %v3716_v41, 2  ;;  %v5261_v17 = vrot.slane %v3712_v49, 3  ;;  %v12153_v3 = vsel %vm2493_vm7, %v5535_v38, %v5537_v55  ;;  %4234 = vmatpush.bf16.msrb.mxu2 %v9853_v48 }
 0x527   : > { %14793 = vst [vmem:[#allocation27_spill] sm:$0xff] %v12150_v8  ;;  %v3715_v6 = vsel %vm695_vm1, %v3710_v56, %v3714_v31  ;;  %v4566_v43 = vor.u32 %v4565_v26, %v4564_v25  ;;  %v3446_v49 = vadd.f32 %v3445_v27, %v11757_v11  ;;  %v9856_v56 = vld [vmem:[%s14768_s3 + $0x38] sm:$0xff] }
 0x528   : > { %14794 = vst [vmem:[#allocation31_spill] sm:$0xff] %v12153_v3  ;;  %v12159_v57 = vpop.f32.mrf.mxu1  ;;  %8933 = vmatmul.msk.bf16.gmra.mxu0 %vm3209_vm8, %v3715_v6  ;;  %v5262_v35 = vor.u32 %v5261_v17, %v5260_v19  ;;  %v8890_v6 = vld [vmem:[%s14601_s11 + $0x1d0] sm:$0xf]  ;;  %v9848_v17 = vld [vmem:[%s14601_s11 + $0x1d8] sm:$0xf0]  ;;  %4399 = vmatpush.bf16.msrb.mxu3 %v9856_v56  ;;  %v3102_v19 = vunpack.c.h.b16 %v11814_v7 }
 0x529   : > { %v12163_v30 = vsel %vm1547_vm4, %v4562_v40, %v4566_v43  ;;  %v8891_v52 = vor.u32 %v9848_v17, %v8890_v6 }
 0x52a   : > { %14795 = vst [vmem:[#allocation23_spill] sm:$0xff] %v12163_v30  ;;  %v12166_v38 = vsel %vm2213_vm6, %v5258_v53, %v5262_v35  ;;  %v3448_v53 = vadd.f32 %v3447_v15, %v11768_v4 }
 0x52b   : > { %14796 = vst [vmem:[#allocation25_spill] sm:$0xff] %v12166_v38  ;;  %3489 = vmatmul.bf16.gmra.mxu2 %v8887_v62  ;;  %8957 = vmatmul.msk.bf16.gmra.mxu1 %vm3209_vm8, %v11992_v9  ;;  %v3559_v9 = vadd.f32 %v3558_v14, %v3446_v49  ;;  %v3718_v49 = vor.u32 %v3716_v41, %v3714_v31 }
 0x52c   : > { %4400 = vmatpush.bf16.msrb.mxu3 %v9855_v2  ;;  %v3165_v31 = vpack.c.b16 %v3102_v19, %v3102_v19 }
 0x52d   : > { %v12181_v40 = vpop.f32.mrf.mxu0 }
 0x52e   : > { %v3450_v11 = vpop.f32.mrf.mxu2  ;;  %v3560_v62 = vpop.f32.mrf.mxu3 }
 0x52f   : > { %v3561_v27 = vadd.f32 %v3560_v62, %v3448_v53 }
 0x530   : > { %v12186_v25 = vpop.f32.mrf.mxu1 }
 0x531   : > { %v12188_v26 = vpack.c.bf16 %v3561_v27, %v3559_v9 }
 0x533   : > { %8911 = vmatmul.msk.bf16.gmra.mxu3 %vm3209_vm8, %v8891_v52  ;;  %v3720_v4 = vshll.u32 %v12188_v26, 16  ;;  %v3724_v15 = vshrl.u32 %v12188_v26, 16  ;;  %v4143_v14 = vrot.slane %v12188_v26, 1  ;;  %v4841_v48 = vrot.slane %v12188_v26, 2 }
 0x534   : > { %v5539_v56 = vrot.slane %v12188_v26, 3 }
 0x535   : > { %v12197_v6 = vpop.f32.mrf.mxu0  ;;  %v3722_v17 = vrot.slane %v3720_v4, 1  ;;  %v12200_v53 = vsel %vm1161_vm2, %v4141_v13, %v4143_v14  ;;  %v4568_v7 = vrot.slane %v3724_v15, 1  ;;  %v4569_v62 = vrot.slane %v3720_v4, 2  ;;  %v2880_v13 = vld [vmem:[%s14601_s11 + $0x1e8] sm:$0xf] }
 0x536   : > { %v3452_v9 = vpop.f32.mrf.mxu2  ;;  %v3563_v27 = vpop.f32.mrf.mxu3  ;;  %v12203_v52 = vsel %vm1827_vm5, %v4839_v58, %v4841_v48  ;;  %v5264_v2 = vrot.slane %v3724_v15, 2  ;;  %v5265_v3 = vrot.slane %v3720_v4, 3  ;;  %v12206_v38 = vsel %vm2493_vm7, %v5537_v55, %v5539_v56 }
 0x537   : > { %14797 = vst [vmem:[#allocation26_spill] sm:$0xff] %v12203_v52  ;;  %v3723_v41 = vsel %vm695_vm1, %v3718_v49, %v3722_v17  ;;  %v4570_v30 = vor.u32 %v4569_v62, %v4568_v7  ;;  %v3451_v55 = vadd.f32 %v3450_v11, %v11800_v44  ;;  %v3103_v19 = vunpack.c.l.b16 %v2880_v13 }
 0x538   : > { %14798 = vst [vmem:[#allocation41_spill] sm:$0xff] %v12206_v38  ;;  %v12209_v8 = vpop.f32.mrf.mxu1  ;;  %8934 = vmatmul.msk.bf16.gmra.mxu0 %vm3209_vm8, %v3723_v41  ;;  %v5266_v42 = vor.u32 %v5265_v3, %v5264_v2  ;;  %v3453_v49 = vadd.f32 %v3452_v9, %v11816_v22  ;;  %v3726_v11 = vor.u32 %v3724_v15, %v3722_v17 }
 0x539   : > { %v12216_v58 = vsel %vm1547_vm4, %v4566_v43, %v4570_v30  ;;  %v3564_v3 = vadd.f32 %v3563_v27, %v3451_v55  ;;  %v3166_v43 = vpack.c.b16 %v3103_v19, %v3103_v19 }
 0x53a   : > { %14799 = vst [vmem:[#allocation42_spill] sm:$0xff] %v12216_v58  ;;  %v12219_v4 = vsel %vm2213_vm6, %v5262_v35, %v5266_v42 }
 0x53b   : > { %14800 = vst [vmem:[#allocation43_spill] sm:$0xff] %v12219_v4  ;;  %3494 = vmatmul.bf16.gmra.mxu2 %v3165_v31  ;;  %8958 = vmatmul.msk.bf16.gmra.mxu1 %vm3209_vm8, %v12037_v10 }
 0x53d   : > { %v12225_v41 = vpop.f32.mrf.mxu0 }
 0x53e   : > { %v3455_v38 = vpop.f32.mrf.mxu2  ;;  %v3565_v7 = vpop.f32.mrf.mxu3 }
 0x53f   : > { %v3566_v62 = vadd.f32 %v3565_v7, %v3453_v49 }
 0x540   : > { %v3384_v2 = vpop.f32.mrf.mxu1 }
 0x541   : > { %v12227_v52 = vpack.c.bf16 %v3566_v62, %v3564_v3 }
 0x543   : > { %8912 = vmatmul.msk.bf16.gmra.mxu3 %vm3209_vm8, %v3166_v43  ;;  %v3728_v44 = vshll.u32 %v12227_v52, 16  ;;  %v3732_v35 = vshrl.u32 %v12227_v52, 16  ;;  %v4145_v10 = vrot.slane %v12227_v52, 1  ;;  %v4843_v22 = vrot.slane %v12227_v52, 2 }
 0x544   : > { %v5541_v9 = vrot.slane %v12227_v52, 3 }
 0x545   : > { %v12235_v31 = vpop.f32.mrf.mxu0  ;;  %v3730_v27 = vrot.slane %v3728_v44, 1  ;;  %v12238_v13 = vsel %vm1161_vm2, %v4143_v14, %v4145_v10  ;;  %v4572_v55 = vrot.slane %v3732_v35, 1  ;;  %v4573_v19 = vrot.slane %v3728_v44, 2 }
 0x546   : > { %14801 = vst [vmem:[#allocation44_spill] sm:$0xff] %v12238_v13  ;;  %v3457_v49 = vpop.f32.mrf.mxu2  ;;  %v3568_v7 = vpop.f32.mrf.mxu3  ;;  %v12241_v3 = vsel %vm1827_vm5, %v4841_v48, %v4843_v22  ;;  %v5268_v62 = vrot.slane %v3732_v35, 2  ;;  %v5269_v43 = vrot.slane %v3728_v44, 3  ;;  %v12244_v2 = vsel %vm2493_vm7, %v5539_v56, %v5541_v9 }
 0x547   : > { %14802 = vst [vmem:[#allocation45_spill] sm:$0xff] %v12241_v3  ;;  %v3731_v15 = vsel %vm695_vm1, %v3726_v11, %v3730_v27  ;;  %v4574_v4 = vor.u32 %v4573_v19, %v4572_v55  ;;  %v3456_v44 = vadd.f32 %v3455_v38, %v11840_v32  ;;  %v3458_v56 = vadd.f32 %v3457_v49, %v11854_v24 }
 0x548   : > { %14803 = vst [vmem:[#allocation46_spill] sm:$0xff] %v12244_v2  ;;  %8935 = vmatmul.msk.bf16.gmra.mxu0 %vm3209_vm8, %v3731_v15  ;;  %v4010_v17 = vpop.f32.mrf.mxu1  ;;  %v5270_v14 = vor.u32 %v5269_v43, %v5268_v62  ;;  %v3734_v38 = vor.u32 %v3732_v35, %v3730_v27 }
 0x549   : > { %v12249_v58 = vadd.f32 %v4010_v17, %v12144_v16  ;;  %v12252_v13 = vsel %vm1547_vm4, %v4570_v30, %v4574_v4  ;;  %v3569_v19 = vadd.f32 %v3568_v7, %v3456_v44 }
 0x54a   : > { %14804 = vst [vmem:[#allocation47_spill] sm:$0xff] %v12252_v13  ;;  %v12255_v48 = vsel %vm2213_vm6, %v5266_v42, %v5270_v14 }
 0x54b   : > { %14805 = vst [vmem:[#allocation48_spill] sm:$0xff] %v12255_v48  ;;  %8959 = vmatmul.msk.bf16.gmra.mxu1 %vm3209_vm8, %v12082_v36  ;;  %8981 = vmatmul.msk.bf16.vlgmr.msrb.gmra.mxu2 %vm3209_vm8, %v11794_v46 }
 0x54d   : > { %v12263_v11 = vpop.f32.mrf.mxu0 }
 0x54e   : > { %v3460_v16 = vpop.f32.mrf.mxu2  ;;  %v3570_v55 = vpop.f32.mrf.mxu3 }
 0x54f   : > { %v3571_v30 = vadd.f32 %v3570_v55, %v3458_v56 }
 0x550   : > { %v4012_v62 = vpop.f32.mrf.mxu1 }
 0x551   : > { %v12265_v43 = vpack.c.bf16 %v3571_v30, %v3569_v19  ;;  %v12268_v42 = vadd.f32 %v4012_v62, %v12181_v40 }
 0x553   : > { %9011 = vmatmul.msk.bf16.vlgmr.msrb.gmra.mxu3 %vm3209_vm8, %v11834_v23  ;;  %v3736_v32 = vshll.u32 %v12265_v43, 16  ;;  %v3740_v46 = vshrl.u32 %v12265_v43, 16  ;;  %v4147_v24 = vrot.slane %v12265_v43, 1  ;;  %v4845_v36 = vrot.slane %v12265_v43, 2 }
 0x554   : > { %v5543_v49 = vrot.slane %v12265_v43, 3 }
 0x555   : > { %v12277_v7 = vpop.f32.mrf.mxu0  ;;  %v3738_v15 = vrot.slane %v3736_v32, 1  ;;  %v12280_v40 = vsel %vm1161_vm2, %v4145_v10, %v4147_v24  ;;  %v4576_v17 = vrot.slane %v3740_v46, 1  ;;  %v4577_v44 = vrot.slane %v3736_v32, 2 }
 0x556   : > { %v3462_v56 = vpop.f32.mrf.mxu2  ;;  %v3573_v55 = vpop.f32.mrf.mxu3  ;;  %v12283_v19 = vsel %vm1827_vm5, %v4843_v22, %v4845_v36  ;;  %v5272_v30 = vrot.slane %v3740_v46, 2  ;;  %v5273_v62 = vrot.slane %v3736_v32, 3  ;;  %v12286_v2 = vsel %vm2493_vm7, %v5541_v9, %v5543_v49 }
 0x557   : > { %14806 = vst [vmem:[#allocation49_spill] sm:$0xff] %v12283_v19  ;;  %v3739_v35 = vsel %vm695_vm1, %v3734_v38, %v3738_v15  ;;  %v4578_v48 = vor.u32 %v4577_v44, %v4576_v17  ;;  %v3461_v32 = vadd.f32 %v3460_v16, %v11881_v5  ;;  %v3463_v9 = vadd.f32 %v3462_v56, %v11900_v61 }
 0x558   : > { %14807 = vst [vmem:[#allocation50_spill] sm:$0xff] %v12286_v2  ;;  %8936 = vmatmul.msk.bf16.gmra.mxu0 %vm3209_vm8, %v3739_v35  ;;  %v4015_v27 = vpop.f32.mrf.mxu1  ;;  %v5274_v10 = vor.u32 %v5273_v62, %v5272_v30  ;;  %v3742_v16 = vor.u32 %v3740_v46, %v3738_v15 }
 0x559   : > { %v12291_v3 = vadd.f32 %v4015_v27, %v12197_v6  ;;  %v12294_v13 = vsel %vm1547_vm4, %v4574_v4, %v4578_v48  ;;  %v3574_v44 = vadd.f32 %v3573_v55, %v3461_v32 }
 0x55a   : > { %14808 = vst [vmem:[#allocation51_spill] sm:$0xff] %v12294_v13  ;;  %v12297_v22 = vsel %vm2213_vm6, %v5270_v14, %v5274_v10 }
 0x55b   : > { %14809 = vst [vmem:[#allocation52_spill] sm:$0xff] %v12297_v22  ;;  %8960 = vmatmul.msk.bf16.gmra.mxu1 %vm3209_vm8, %v12127_v12  ;;  %8982 = vmatmul.msk.bf16.gmra.mxu2 %vm3209_vm8, %v11834_v23 }
 0x55d   : > { %v12305_v38 = vpop.f32.mrf.mxu0 }
 0x55e   : > { %v3465_v6 = vpop.f32.mrf.mxu2  ;;  %v3575_v17 = vpop.f32.mrf.mxu3 }
 0x55f   : > { %v3576_v4 = vadd.f32 %v3575_v17, %v3463_v9 }
 0x560   : > { %v4017_v30 = vpop.f32.mrf.mxu1 }
 0x561   : > { %v12307_v62 = vpack.c.bf16 %v3576_v4, %v3574_v44  ;;  %v12310_v14 = vadd.f32 %v4017_v30, %v12225_v41 }
 0x563   : > { %9012 = vmatmul.msk.bf16.gmra.mxu3 %vm3209_vm8, %v11872_v28  ;;  %v3744_v5 = vshll.u32 %v12307_v62, 16  ;;  %v3748_v23 = vshrl.u32 %v12307_v62, 16  ;;  %v4149_v61 = vrot.slane %v12307_v62, 1  ;;  %v4847_v12 = vrot.slane %v12307_v62, 2 }
 0x564   : > { %v5545_v56 = vrot.slane %v12307_v62, 3 }
 0x565   : > { %v12319_v55 = vpop.f32.mrf.mxu0  ;;  %v3746_v35 = vrot.slane %v3744_v5, 1  ;;  %v12322_v41 = vsel %vm1161_vm2, %v4147_v24, %v4149_v61  ;;  %v4580_v27 = vrot.slane %v3748_v23, 1  ;;  %v4581_v32 = vrot.slane %v3744_v5, 2 }
 0x566   : > { %v3467_v9 = vpop.f32.mrf.mxu2  ;;  %v3578_v17 = vpop.f32.mrf.mxu3  ;;  %v12325_v44 = vsel %vm1827_vm5, %v4845_v36, %v4847_v12  ;;  %v5276_v4 = vrot.slane %v3748_v23, 2  ;;  %v5277_v30 = vrot.slane %v3744_v5, 3  ;;  %v12328_v2 = vsel %vm2493_vm7, %v5543_v49, %v5545_v56 }
 0x567   : > { %14810 = vst [vmem:[#allocation53_spill] sm:$0xff] %v12325_v44  ;;  %v3747_v46 = vsel %vm695_vm1, %v3742_v16, %v3746_v35  ;;  %v4582_v22 = vor.u32 %v4581_v32, %v4580_v27  ;;  %v3466_v5 = vadd.f32 %v3465_v6, %v11926_v45  ;;  %v3468_v49 = vadd.f32 %v3467_v9, %v11945_v21 }
 0x568   : > { %14811 = vst [vmem:[#allocation54_spill] sm:$0xff] %v12328_v2  ;;  %8937 = vmatmul.msk.bf16.gmra.mxu0 %vm3209_vm8, %v3747_v46  ;;  %v4020_v15 = vpop.f32.mrf.mxu1  ;;  %v5278_v24 = vor.u32 %v5277_v30, %v5276_v4  ;;  %v3750_v6 = vor.u32 %v3748_v23, %v3746_v35 }
 0x569   : > { %v12333_v19 = vadd.f32 %v4020_v15, %v12235_v31  ;;  %v12336_v13 = vsel %vm1547_vm4, %v4578_v48, %v4582_v22  ;;  %v3579_v32 = vadd.f32 %v3578_v17, %v3466_v5 }
 0x56a   : > { %14812 = vst [vmem:[#allocation55_spill] sm:$0xff] %v12336_v13  ;;  %v12339_v36 = vsel %vm2213_vm6, %v5274_v10, %v5278_v24 }
 0x56b   : > { %14813 = vst [vmem:[#allocation56_spill] sm:$0xff] %v12339_v36  ;;  %8961 = vmatmul.msk.bf16.gmra.mxu1 %vm3209_vm8, %v12188_v26  ;;  %8983 = vmatmul.msk.bf16.gmra.mxu2 %vm3209_vm8, %v11872_v28 }
 0x56d   : > { %v12347_v16 = vpop.f32.mrf.mxu0 }
 0x56e   : > { %v3470_v31 = vpop.f32.mrf.mxu2  ;;  %v3580_v27 = vpop.f32.mrf.mxu3 }
 0x56f   : > { %v3581_v48 = vadd.f32 %v3580_v27, %v3468_v49 }
 0x570   : > { %v4022_v4 = vpop.f32.mrf.mxu1 }
 0x571   : > { %v12349_v30 = vpack.c.bf16 %v3581_v48, %v3579_v32  ;;  %v12352_v10 = vadd.f32 %v4022_v4, %v12263_v11 }
 0x573   : > { %9013 = vmatmul.msk.bf16.gmra.mxu3 %vm3209_vm8, %v11917_v39  ;;  %v3752_v45 = vshll.u32 %v12349_v30, 16  ;;  %v3756_v28 = vshrl.u32 %v12349_v30, 16  ;;  %v4151_v21 = vrot.slane %v12349_v30, 1  ;;  %v4849_v26 = vrot.slane %v12349_v30, 2 }
 0x574   : > { %v5547_v9 = vrot.slane %v12349_v30, 3 }
 0x575   : > { %v12361_v17 = vpop.f32.mrf.mxu0  ;;  %v3754_v46 = vrot.slane %v3752_v45, 1  ;;  %v12364_v11 = vsel %vm1161_vm2, %v4149_v61, %v4151_v21  ;;  %v4584_v15 = vrot.slane %v3756_v28, 1  ;;  %v4585_v5 = vrot.slane %v3752_v45, 2 }
 0x576   : > { %v3472_v49 = vpop.f32.mrf.mxu2  ;;  %v3583_v27 = vpop.f32.mrf.mxu3  ;;  %v12367_v32 = vsel %vm1827_vm5, %v4847_v12, %v4849_v26  ;;  %v5280_v48 = vrot.slane %v3756_v28, 2  ;;  %v5281_v4 = vrot.slane %v3752_v45, 3  ;;  %v12370_v2 = vsel %vm2493_vm7, %v5545_v56, %v5547_v9 }
 0x577   : > { %14814 = vst [vmem:[#allocation57_spill] sm:$0xff] %v12367_v32  ;;  %v3755_v23 = vsel %vm695_vm1, %v3750_v6, %v3754_v46  ;;  %v4586_v36 = vor.u32 %v4585_v5, %v4584_v15  ;;  %v3471_v45 = vadd.f32 %v3470_v31, %v11971_v20  ;;  %v3473_v56 = vadd.f32 %v3472_v49, %v11990_v60 }
 0x578   : > { %14815 = vst [vmem:[#allocation58_spill] sm:$0xff] %v12370_v2  ;;  %8938 = vmatmul.msk.bf16.gmra.mxu0 %vm3209_vm8, %v3755_v23  ;;  %v4025_v35 = vpop.f32.mrf.mxu1  ;;  %v5282_v61 = vor.u32 %v5281_v4, %v5280_v48  ;;  %v3758_v31 = vor.u32 %v3756_v28, %v3754_v46 }
 0x579   : > { %v12375_v44 = vadd.f32 %v4025_v35, %v12277_v7  ;;  %v12378_v13 = vsel %vm1547_vm4, %v4582_v22, %v4586_v36  ;;  %v3584_v5 = vadd.f32 %v3583_v27, %v3471_v45 }
 0x57a   : > { %14816 = vst [vmem:[#allocation59_spill] sm:$0xff] %v12378_v13  ;;  %v12381_v12 = vsel %vm2213_vm6, %v5278_v24, %v5282_v61 }
 0x57b   : > { %14817 = vst [vmem:[#allocation60_spill] sm:$0xff] %v12381_v12  ;;  %8962 = vmatmul.msk.bf16.gmra.mxu1 %vm3209_vm8, %v12227_v52  ;;  %8984 = vmatmul.msk.bf16.gmra.mxu2 %vm3209_vm8, %v11917_v39 }
 0x57d   : > { %v12389_v6 = vpop.f32.mrf.mxu0 }
 0x57e   : > { %v3475_v7 = vpop.f32.mrf.mxu2  ;;  %v3585_v15 = vpop.f32.mrf.mxu3 }
 0x57f   : > { %v3586_v22 = vadd.f32 %v3585_v15, %v3473_v56 }
 0x580   : > { %v4027_v48 = vpop.f32.mrf.mxu1 }
 0x581   : > { %v12391_v4 = vpack.c.bf16 %v3586_v22, %v3584_v5  ;;  %v12394_v24 = vadd.f32 %v4027_v48, %v12305_v38 }
 0x583   : > { %9014 = vmatmul.msk.bf16.gmra.mxu3 %vm3209_vm8, %v11962_v47  ;;  %v3760_v20 = vshll.u32 %v12391_v4, 16  ;;  %v3764_v39 = vshrl.u32 %v12391_v4, 16  ;;  %v4153_v60 = vrot.slane %v12391_v4, 1  ;;  %v4851_v52 = vrot.slane %v12391_v4, 2 }
 0x584   : > { %v5549_v49 = vrot.slane %v12391_v4, 3 }
 0x585   : > { %v12403_v27 = vpop.f32.mrf.mxu0  ;;  %v3762_v23 = vrot.slane %v3760_v20, 1  ;;  %v12406_v38 = vsel %vm1161_vm2, %v4151_v21, %v4153_v60  ;;  %v4588_v35 = vrot.slane %v3764_v39, 1  ;;  %v4589_v45 = vrot.slane %v3760_v20, 2 }
 0x586   : > { %v3477_v56 = vpop.f32.mrf.mxu2  ;;  %v3588_v15 = vpop.f32.mrf.mxu3  ;;  %v12409_v5 = vsel %vm1827_vm5, %v4849_v26, %v4851_v52  ;;  %v5284_v22 = vrot.slane %v3764_v39, 2  ;;  %v5285_v48 = vrot.slane %v3760_v20, 3  ;;  %v12412_v2 = vsel %vm2493_vm7, %v5547_v9, %v5549_v49 }
 0x587   : > { %14818 = vst [vmem:[#allocation61_spill] sm:$0xff] %v12409_v5  ;;  %v3763_v28 = vsel %vm695_vm1, %v3758_v31, %v3762_v23  ;;  %v4590_v12 = vor.u32 %v4589_v45, %v4588_v35  ;;  %v3476_v20 = vadd.f32 %v3475_v7, %v12016_v63  ;;  %v3478_v9 = vadd.f32 %v3477_v56, %v12035_v33 }
 0x588   : > { %14819 = vst [vmem:[#allocation62_spill] sm:$0xff] %v12412_v2  ;;  %8939 = vmatmul.msk.bf16.gmra.mxu0 %vm3209_vm8, %v3763_v28  ;;  %v4030_v46 = vpop.f32.mrf.mxu1  ;;  %v5286_v21 = vor.u32 %v5285_v48, %v5284_v22  ;;  %v3766_v7 = vor.u32 %v3764_v39, %v3762_v23 }
 0x589   : > { %v12417_v32 = vadd.f32 %v4030_v46, %v12319_v55  ;;  %v12420_v13 = vsel %vm1547_vm4, %v4586_v36, %v4590_v12  ;;  %v3589_v45 = vadd.f32 %v3588_v15, %v3476_v20 }
 0x58a   : > { %14820 = vst [vmem:[#allocation63_spill] sm:$0xff] %v12420_v13  ;;  %v12423_v26 = vsel %vm2213_vm6, %v5282_v61, %v5286_v21 }
 0x58b   : > { %14821 = vst [vmem:[#allocation64_spill] sm:$0xff] %v12423_v26  ;;  %8963 = vmatmul.msk.bf16.gmra.mxu1 %vm3209_vm8, %v12265_v43  ;;  %8985 = vmatmul.msk.bf16.gmra.mxu2 %vm3209_vm8, %v11962_v47 }
 0x58d   : > { %v12431_v31 = vpop.f32.mrf.mxu0 }
 0x58e   : > { %v3480_v55 = vpop.f32.mrf.mxu2  ;;  %v3590_v35 = vpop.f32.mrf.mxu3 }
 0x58f   : > { %v3591_v36 = vadd.f32 %v3590_v35, %v3478_v9 }
 0x590   : > { %v4032_v22 = vpop.f32.mrf.mxu1 }
 0x591   : > { %v12433_v48 = vpack.c.bf16 %v3591_v36, %v3589_v45  ;;  %v12436_v61 = vadd.f32 %v4032_v22, %v12347_v16 }
 0x593   : > { %9015 = vmatmul.msk.bf16.gmra.mxu3 %vm3209_vm8, %v12007_v18  ;;  %v3768_v63 = vshll.u32 %v12433_v48, 16  ;;  %v3772_v47 = vshrl.u32 %v12433_v48, 16  ;;  %v4155_v33 = vrot.slane %v12433_v48, 1  ;;  %v4853_v43 = vrot.slane %v12433_v48, 2 }
 0x594   : > { %v5551_v56 = vrot.slane %v12433_v48, 3 }
 0x595   : > { %v12445_v15 = vpop.f32.mrf.mxu0  ;;  %v3770_v28 = vrot.slane %v3768_v63, 1  ;;  %v12448_v16 = vsel %vm1161_vm2, %v4153_v60, %v4155_v33  ;;  %v4592_v46 = vrot.slane %v3772_v47, 1  ;;  %v4593_v20 = vrot.slane %v3768_v63, 2 }
 0x596   : > { %v3482_v9 = vpop.f32.mrf.mxu2  ;;  %v3593_v35 = vpop.f32.mrf.mxu3  ;;  %v12451_v45 = vsel %vm1827_vm5, %v4851_v52, %v4853_v43  ;;  %v5288_v36 = vrot.slane %v3772_v47, 2  ;;  %v5289_v22 = vrot.slane %v3768_v63, 3  ;;  %v12454_v2 = vsel %vm2493_vm7, %v5549_v49, %v5551_v56 }
 0x597   : > { %14822 = vst [vmem:[#allocation65_spill] sm:$0xff] %v12451_v45  ;;  %v3771_v39 = vsel %vm695_vm1, %v3766_v7, %v3770_v28  ;;  %v4594_v26 = vor.u32 %v4593_v20, %v4592_v46  ;;  %v3481_v63 = vadd.f32 %v3480_v55, %v12061_v50  ;;  %v3483_v49 = vadd.f32 %v3482_v9, %v12080_v59 }
 0x598   : > { %14823 = vst [vmem:[#allocation66_spill] sm:$0xff] %v12454_v2  ;;  %8940 = vmatmul.msk.bf16.gmra.mxu0 %vm3209_vm8, %v3771_v39  ;;  %v4035_v23 = vpop.f32.mrf.mxu1  ;;  %v5290_v60 = vor.u32 %v5289_v22, %v5288_v36  ;;  %v3774_v22 = vor.u32 %v3772_v47, %v3770_v28 }
 0x599   : > { %v12459_v5 = vadd.f32 %v4035_v23, %v12361_v17  ;;  %v12462_v13 = vsel %vm1547_vm4, %v4590_v12, %v4594_v26  ;;  %v3594_v20 = vadd.f32 %v3593_v35, %v3481_v63 }
 0x59a   : > { %14824 = vst [vmem:[#allocation67_spill] sm:$0xff] %v12462_v13  ;;  %v12465_v52 = vsel %vm2213_vm6, %v5286_v21, %v5290_v60  ;;  %v9858_v21 = vld [vmem:[%s14768_s3 + $0x48] sm:$0xff] }
 0x59b   : > { %14825 = vst [vmem:[#allocation68_spill] sm:$0xff] %v12465_v52  ;;  %8964 = vmatmul.msk.bf16.gmra.mxu1 %vm3209_vm8, %v12307_v62  ;;  %8986 = vmatmul.msk.bf16.gmra.mxu2 %vm3209_vm8, %v12007_v18 }
 0x59c   : > { %4690 = vmatpush.bf16.msra.mxu0 %v9858_v21 }
 0x59d   : > { %v12473_v7 = vpop.f32.mrf.mxu0 }
 0x59e   : > { %v3485_v17 = vpop.f32.mrf.mxu2  ;;  %v3595_v46 = vpop.f32.mrf.mxu3 }
 0x59f   : > { %v3596_v12 = vadd.f32 %v3595_v46, %v3483_v49  ;;  %v3486_v18 = vadd.f32 %v3485_v17, %v12106_v34 }
 0x5a0   : > { %v4037_v36 = vpop.f32.mrf.mxu1 }
 0x5a1   : > { %v12478_v50 = vpack.c.bf16 %v3596_v12, %v3594_v20  ;;  %v12481_v62 = vadd.f32 %v4037_v36, %v12389_v6  ;;  %v9857_v6 = vld [vmem:[%s14768_s3 + $0x40] sm:$0xff] }
 0x5a2   : > { %4691 = vmatpush.bf16.msra.mxu0 %v9857_v6 }
 0x5a3   : > { %9016 = vmatmul.msk.bf16.gmra.mxu3 %vm3209_vm8, %v12052_v29  ;;  %v3776_v59 = vshll.u32 %v12478_v50, 16  ;;  %v3780_v55 = vshrl.u32 %v12478_v50, 16  ;;  %v4157_v9 = vrot.slane %v12478_v50, 1  ;;  %v4855_v35 = vrot.slane %v12478_v50, 2 }
 0x5a4   : > { %v5553_v39 = vrot.slane %v12478_v50, 3 }
 0x5a5   : > { %v12494_v34 = vpop.f32.mrf.mxu0  ;;  %v3778_v23 = vrot.slane %v3776_v59, 1  ;;  %v12497_v63 = vsel %vm1161_vm2, %v4155_v33, %v4157_v9  ;;  %v4596_v49 = vrot.slane %v3780_v55, 1  ;;  %v4597_v17 = vrot.slane %v3776_v59, 2 }
 0x5a6   : > { %14826 = vst [vmem:[#allocation69_spill] sm:$0xff] %v12497_v63  ;;  %v3487_v46 = vpop.f32.mrf.mxu2  ;;  %v3598_v20 = vpop.f32.mrf.mxu3  ;;  %v12500_v12 = vsel %vm1827_vm5, %v4853_v43, %v4855_v35  ;;  %v5292_v47 = vrot.slane %v3780_v55, 2  ;;  %v5293_v28 = vrot.slane %v3776_v59, 3  ;;  %v12503_v36 = vsel %vm2493_vm7, %v5551_v56, %v5553_v39 }
 0x5a7   : > { %14827 = vst [vmem:[#allocation70_spill] sm:$0xff] %v12500_v12  ;;  %v3599_v21 = vadd.f32 %v3598_v20, %v3486_v18  ;;  %v3779_v2 = vsel %vm695_vm1, %v3774_v22, %v3778_v23  ;;  %v4598_v52 = vor.u32 %v4597_v17, %v4596_v49  ;;  %v3488_v56 = vadd.f32 %v3487_v46, %v12125_v51 }
 0x5a8   : > { %14828 = vst [vmem:[#allocation71_spill] sm:$0xff] %v12503_v36  ;;  %8941 = vmatmul.msk.bf16.gmra.mxu0 %vm3209_vm8, %v3779_v2  ;;  %v4040_v33 = vpop.f32.mrf.mxu1  ;;  %v5294_v45 = vor.u32 %v5293_v28, %v5292_v47  ;;  %v3782_v28 = vor.u32 %v3780_v55, %v3778_v23 }
 0x5a9   : > { %v3634_v13 = vpack.c.bf16 %v3599_v21, %v3599_v21  ;;  %v12508_v63 = vadd.f32 %v4040_v33, %v12403_v27  ;;  %v12511_v43 = vsel %vm1547_vm4, %v4594_v26, %v4598_v52 }
 0x5aa   : > { %v12514_v59 = vsel %vm2213_vm6, %v5290_v60, %v5294_v45 }
 0x5ab   : > { %14829 = vst [vmem:[#allocation72_spill] sm:$0xff] %v12514_v59  ;;  %v4159_v18 = vrot.slane %v3634_v13, 1  ;;  %8965 = vmatmul.msk.bf16.gmra.mxu1 %vm3209_vm8, %v12349_v30  ;;  %8987 = vmatmul.msk.bf16.gmra.mxu2 %vm3209_vm8, %v12052_v29  ;;  %v3784_v22 = vshll.u32 %v3634_v13, 16 }
 0x5ad   : > { %v12521_v2 = vpop.f32.mrf.mxu0  ;;  %v12524_v27 = vsel %vm1161_vm2, %v4157_v9, %v4159_v18  ;;  %v3786_v46 = vrot.slane %v3784_v22, 1 }
 0x5ae   : > { %v3490_v26 = vpop.f32.mrf.mxu2  ;;  %v3600_v6 = vpop.f32.mrf.mxu3 }
 0x5af   : > { %v3601_v49 = vadd.f32 %v3600_v6, %v3488_v56  ;;  %v3491_v30 = vadd.f32 %v3490_v26, %v12159_v57  ;;  %v3787_v23 = vsel %vm695_vm1, %v3782_v28, %v3786_v46 }
 0x5b0   : > { %v4042_v60 = vpop.f32.mrf.mxu1 }
 0x5b1   : > { %v12526_v17 = vpack.c.bf16 %v3601_v49, %v3599_v21  ;;  %v12529_v51 = vadd.f32 %v4042_v60, %v12431_v31 }
 0x5b3   : > { %9017 = vmatmul.msk.bf16.gmra.mxu3 %vm3209_vm8, %v12097_v1  ;;  %v4371_v29 = vrot.slane %v12526_v17, 1  ;;  %v4601_v20 = vshrl.u32 %v12526_v17, 16  ;;  %v4604_v13 = vshll.u32 %v12526_v17, 16  ;;  %v4857_v47 = vrot.slane %v12526_v17, 2 }
 0x5b4   : > { %v5555_v21 = vrot.slane %v12526_v17, 3 }
 0x5b5   : > { %v12539_v33 = vpop.f32.mrf.mxu0  ;;  %v12542_v31 = vsel %vm1161_vm2, %v4157_v9, %v4371_v29  ;;  %v4603_v57 = vrot.slane %v4601_v20, 1  ;;  %v4606_v56 = vrot.slane %v4604_v13, 2  ;;  %v12545_v18 = vsel %vm1827_vm5, %v4855_v35, %v4857_v47 }
 0x5b6   : > { %v3492_v22 = vpop.f32.mrf.mxu2  ;;  %v3603_v26 = vpop.f32.mrf.mxu3  ;;  %v5296_v6 = vrot.slane %v4601_v20, 2  ;;  %v5297_v49 = vrot.slane %v4604_v13, 3  ;;  %v12548_v60 = vsel %vm2493_vm7, %v5553_v39, %v5555_v21 }
 0x5b7   : > { %14830 = vst [vmem:[#allocation73_spill] sm:$0xff] %v12548_v60  ;;  %v3604_v55 = vadd.f32 %v3603_v26, %v3491_v30  ;;  %v4607_v17 = vor.u32 %v4606_v56, %v4603_v57  ;;  %v3493_v20 = vadd.f32 %v3492_v22, %v12186_v25 }
 0x5b8   : > { %8942 = vmatmul.msk.bf16.gmra.mxu0 %vm3209_vm8, %v3787_v23  ;;  %v4045_v9 = vpop.f32.mrf.mxu1  ;;  %v5298_v36 = vor.u32 %v5297_v49, %v5296_v6  ;;  %v9860_v23 = vld [vmem:[%s14768_s3 + $0x58] sm:$0xff] }
 0x5b9   : > { %v4363_v59 = vpack.c.bf16 %v3604_v55, %v3604_v55  ;;  %v12553_v12 = vadd.f32 %v4045_v9, %v12445_v15  ;;  %v12556_v35 = vsel %vm1547_vm4, %v4598_v52, %v4607_v17  ;;  %4933 = vmatpush.bf16.msrb.mxu1 %v9860_v23 }
 0x5ba   : > { %v12560_v39 = vsel %vm2213_vm6, %v5294_v45, %v5298_v36 }
 0x5bb   : > { %8966 = vmatmul.msk.bf16.gmra.mxu1 %vm3209_vm8, %v12391_v4  ;;  %8988 = vmatmul.msk.bf16.gmra.mxu2 %vm3209_vm8, %v12097_v1  ;;  %v4373_v46 = vrot.slane %v4363_v59, 1  ;;  %v4610_v30 = vshrl.u32 %v4363_v59, 16  ;;  %v4613_v13 = vshll.u32 %v4363_v59, 16  ;;  %v4859_v28 = vrot.slane %v4363_v59, 2 }
 0x5bd   : > { %v3910_v15 = vpop.f32.mrf.mxu0  ;;  %v12567_v57 = vsel %vm1161_vm2, %v4371_v29, %v4373_v46  ;;  %v4612_v52 = vrot.slane %v4610_v30, 1  ;;  %v4615_v56 = vrot.slane %v4613_v13, 2  ;;  %v12570_v25 = vsel %vm1827_vm5, %v4857_v47, %v4859_v28 }
 0x5be   : > { %v3495_v45 = vpop.f32.mrf.mxu2  ;;  %v3605_v22 = vpop.f32.mrf.mxu3 }
 0x5bf   : > { %v3606_v26 = vadd.f32 %v3605_v22, %v3493_v20  ;;  %v4616_v4 = vor.u32 %v4615_v56, %v4612_v52  ;;  %v3496_v29 = vadd.f32 %v3495_v45, %v12209_v8  ;;  %v9859_v45 = vld [vmem:[%s14768_s3 + $0x50] sm:$0xff] }
 0x5c0   : > { %v4047_v6 = vpop.f32.mrf.mxu1  ;;  %4934 = vmatpush.bf16.msrb.mxu1 %v9859_v45 }
 0x5c1   : > { %v12572_v49 = vpack.c.bf16 %v3606_v26, %v3604_v55  ;;  %v12575_v1 = vadd.f32 %v4047_v6, %v12473_v7  ;;  %v12578_v59 = vsel %vm1547_vm4, %v4607_v17, %v4616_v4 }
 0x5c3   : > { %9018 = vmatmul.msk.bf16.gmra.mxu3 %vm3209_vm8, %v12147_v0  ;;  %v14660_v9 = vrot.slane %v12572_v49, 2  ;;  %v5301_v55 = vshrl.u32 %v12572_v49, 16  ;;  %v5304_v20 = vshll.u32 %v12572_v49, 16  ;;  %v14659_v7 = vrot.slane %v12572_v49, 3 }
 0x5c5   : > { %v3913_v46 = vpop.f32.mrf.mxu0  ;;  %v12593_v8 = vsel %vm1827_vm5, %v4857_v47, %v14660_v9  ;;  %v5303_v17 = vrot.slane %v5301_v55, 2  ;;  %v5306_v30 = vrot.slane %v5304_v20, 3  ;;  %v12598_v13 = vsel %vm2493_vm7, %v5555_v21, %v14659_v7 }
 0x5c6   : > { %14831 = vst [vmem:[#allocation74_spill] sm:$0xff] %v12598_v13  ;;  %v3497_v28 = vpop.f32.mrf.mxu2  ;;  %v3608_v52 = vpop.f32.mrf.mxu3 }
 0x5c7   : > { %v12600_v56 = vadd.f32 %v3608_v52, %v3496_v29  ;;  %v12605_v22 = vor.u32 %v5306_v30, %v5303_v17 }
 0x5c8   : > { %v4050_v26 = vpop.f32.mrf.mxu1  ;;  %9041 = vmatmul.msk.bf16.vlgmr.msra.gmra.mxu0 %vm3209_vm8, %v11844_v37 }
 0x5c9   : > { %v12610_v47 = vadd.f32 %v4050_v26, %v12494_v34  ;;  %v12614_v21 = vsel %vm2213_vm6, %v5298_v36, %v12605_v22 }
 0x5ca   : > { %14832 = vst [vmem:[#allocation75_spill] sm:$0xff] %v12614_v21 }
 0x5cb   : > { %8967 = vmatmul.msk.bf16.gmra.mxu1 %vm3209_vm8, %v12433_v48  ;;  %8989 = vmatmul.msk.bf16.gmra.mxu2 %vm3209_vm8, %v12147_v0 }
 0x5cd   : > { %v3915_v4 = vpop.f32.mrf.mxu0 }
 0x5ce   : > { %v3610_v6 = vpop.f32.mrf.mxu3  ;;  %v4236_v29 = vpop.f32.mrf.mxu2 }
 0x5cf   : > { %v4326_v23 = vadd.f32 %v4236_v29, %v12249_v58 }
 0x5d0   : > { %v4052_v37 = vpop.f32.mrf.mxu1 }
 0x5d1   : > { %v12622_v34 = vadd.f32 %v4052_v37, %v12521_v2  ;;  %v14834_v37 = vld [vmem:[#allocation33_spill] sm:$0xff] }
 0x5d3   : > { %9019 = vmatmul.msk.bf16.gmra.mxu3 %vm3209_vm8, %v12200_v53 }
 0x5d5   : > { %v3918_v36 = vpop.f32.mrf.mxu0 }
 0x5d6   : > { %v4238_v55 = vpop.f32.mrf.mxu2  ;;  %v4402_v20 = vpop.f32.mrf.mxu3 }
 0x5d7   : > { %v4327_v48 = vadd.f32 %v4238_v55, %v12268_v42  ;;  %v12627_v17 = vadd.f32 %v4402_v20, %v4326_v23 }
 0x5d8   : > { %v4055_v0 = vpop.f32.mrf.mxu1  ;;  %9042 = vmatmul.msk.bf16.gmra.mxu0 %vm3209_vm8, %v11885_v54  ;;  %v14833_v54 = vld [vmem:[#allocation44_spill] sm:$0xff] }
 0x5d9   : > { %v12632_v58 = vadd.f32 %v4055_v0, %v12539_v33 }
 0x5db   : > { %8968 = vmatmul.msk.bf16.gmra.mxu1 %vm3209_vm8, %v12478_v50  ;;  %8990 = vmatmul.msk.bf16.gmra.mxu2 %vm3209_vm8, %v12200_v53 }
 0x5dd   : > { %v3920_v2 = vpop.f32.mrf.mxu0 }
 0x5de   : > { %v4241_v30 = vpop.f32.mrf.mxu2  ;;  %v4404_v28 = vpop.f32.mrf.mxu3 }
 0x5df   : > { %v4328_v42 = vadd.f32 %v4241_v30, %v12291_v3  ;;  %v12639_v52 = vadd.f32 %v4404_v28, %v4327_v48 }
 0x5e0   : > { %v4057_v45 = vpop.f32.mrf.mxu1 }
 0x5e1   : > { %v12641_v26 = vadd.f32 %v4057_v45, %v3910_v15  ;;  %v14835_v15 = vld [vmem:[#allocation28_spill] sm:$0xff] }
 0x5e3   : > { %9020 = vmatmul.msk.bf16.gmra.mxu3 %vm3209_vm8, %v14833_v54 }
 0x5e5   : > { %v3923_v33 = vpop.f32.mrf.mxu0 }
 0x5e6   : > { %v4243_v6 = vpop.f32.mrf.mxu2  ;;  %v4407_v29 = vpop.f32.mrf.mxu3 }
 0x5e7   : > { %v4329_v50 = vadd.f32 %v4243_v6, %v12310_v14  ;;  %v12646_v23 = vadd.f32 %v4407_v29, %v4328_v42 }
 0x5e8   : > { %v4060_v53 = vpop.f32.mrf.mxu1  ;;  %9043 = vmatmul.msk.bf16.gmra.mxu0 %vm3209_vm8, %v14834_v37  ;;  %v5063_v37 = vpack.c.bf16 %v12600_v56, %v12600_v56 }
 0x5e9   : > { %v12650_v3 = vadd.f32 %v4060_v53, %v3913_v46  ;;  %v14836_v53 = vld [vmem:[#allocation38_spill] sm:$0xff] }
 0x5eb   : > { %8991 = vmatmul.msk.bf16.gmra.mxu2 %vm3209_vm8, %v14833_v54  ;;  %9071 = vmatmul.msk.bf16.vlgmr.msrb.gmra.mxu1 %vm3209_vm8, %v14835_v15 }
 0x5ed   : > { %v3925_v55 = vpop.f32.mrf.mxu0 }
 0x5ee   : > { %v4246_v20 = vpop.f32.mrf.mxu2  ;;  %v4409_v48 = vpop.f32.mrf.mxu3 }
 0x5ef   : > { %v4330_v0 = vadd.f32 %v4246_v20, %v12333_v19  ;;  %v12657_v14 = vadd.f32 %v4409_v48, %v4329_v50 }
 0x5f0   : > { %v4062_v30 = vpop.f32.mrf.mxu1 }
 0x5f1   : > { %v12659_v28 = vadd.f32 %v4062_v30, %v3915_v4  ;;  %v14837_v4 = vld [vmem:[#allocation29_spill] sm:$0xff] }
 0x5f3   : > { %9021 = vmatmul.msk.bf16.gmra.mxu3 %vm3209_vm8, %v12280_v40 }
 0x5f5   : > { %v3928_v46 = vpop.f32.mrf.mxu0 }
 0x5f6   : > { %v4248_v42 = vpop.f32.mrf.mxu2  ;;  %v4412_v45 = vpop.f32.mrf.mxu3 }
 0x5f7   : > { %v4331_v54 = vadd.f32 %v4248_v42, %v12352_v10  ;;  %v12664_v6 = vadd.f32 %v4412_v45, %v4330_v0  ;;  %v5313_v42 = vshll.u32 %v5063_v37, 16 }
 0x5f8   : > { %v4065_v29 = vpop.f32.mrf.mxu1  ;;  %9044 = vmatmul.msk.bf16.gmra.mxu0 %vm3209_vm8, %v14836_v53 }
 0x5f9   : > { %v12668_v19 = vadd.f32 %v4065_v29, %v3918_v36  ;;  %v5310_v36 = vshrl.u32 %v5063_v37, 16  ;;  %v5315_v29 = vrot.slane %v5313_v42, 3 }
 0x5fb   : > { %8992 = vmatmul.msk.bf16.gmra.mxu2 %vm3209_vm8, %v12280_v40  ;;  %9072 = vmatmul.msk.bf16.gmra.mxu1 %vm3209_vm8, %v14837_v4  ;;  %v5312_v45 = vrot.slane %v5310_v36, 2  ;;  %v14841_v36 = vrot.slane %v12572_v49, 3 }
 0x5fd   : > { %v3930_v50 = vpop.f32.mrf.mxu0 }
 0x5fe   : > { %v4251_v15 = vpop.f32.mrf.mxu2  ;;  %v4414_v10 = vpop.f32.mrf.mxu3 }
 0x5ff   : > { %v4332_v20 = vadd.f32 %v4251_v15, %v12375_v44  ;;  %v12677_v48 = vadd.f32 %v4414_v10, %v4331_v54  ;;  %v5073_v44 = vrot.slane %v5063_v37, 2  ;;  %v5559_v54 = vrot.slane %v5063_v37, 3  ;;  %v14838_v10 = vld [vmem:[#allocation13_spill] sm:$0xff] }
 0x600   : > { %v4067_v0 = vpop.f32.mrf.mxu1 }
 0x601   : > { %v12679_v30 = vadd.f32 %v4067_v0, %v3920_v2  ;;  %v14839_v0 = vrot.slane %v12572_v49, 2  ;;  %v12698_v42 = vsel %vm2493_vm7, %v14841_v36, %v5559_v54  ;;  %v14845_v36 = vld [vmem:[#allocation20_spill] sm:$0xff] }
 0x602   : > { %14842 = vst [vmem:[#allocation33_spill] sm:$0xff] %v12698_v42  ;;  %v14847_v42 = vld [vmem:[#allocation15_spill] sm:$0xff] }
 0x603   : > { %9022 = vmatmul.msk.bf16.gmra.mxu3 %vm3209_vm8, %v12322_v41  ;;  %v12693_v13 = vsel %vm1827_vm5, %v14839_v0, %v5073_v44 }
 0x604   : > { %14840 = vst [vmem:[#allocation44_spill] sm:$0xff] %v12693_v13 }
 0x605   : > { %v3933_v40 = vpop.f32.mrf.mxu0 }
 0x606   : > { %v4253_v53 = vpop.f32.mrf.mxu2  ;;  %v4417_v7 = vpop.f32.mrf.mxu3 }
 0x607   : > { %v4333_v56 = vadd.f32 %v4253_v53, %v12394_v24  ;;  %v12684_v9 = vadd.f32 %v4417_v7, %v4332_v20  ;;  %v14843_v24 = vld [vmem:[#allocation35_spill] sm:$0xff]  ;;  %v5316_v7 = vor.u32 %v5315_v29, %v5312_v45 }
 0x608   : > { %v4070_v15 = vpop.f32.mrf.mxu1  ;;  %9045 = vmatmul.msk.bf16.gmra.mxu0 %vm3209_vm8, %v14838_v10 }
 0x609   : > { %v12688_v2 = vadd.f32 %v4070_v15, %v3923_v33  ;;  %v12706_v33 = vsel %vm2213_vm6, %v12605_v22, %v5316_v7 }
 0x60a   : > { %14844 = vst [vmem:[#allocation28_spill] sm:$0xff] %v12706_v33  ;;  %v14849_v33 = vld [vmem:[#allocation23_spill] sm:$0xff] }
 0x60b   : > { %8993 = vmatmul.msk.bf16.gmra.mxu2 %vm3209_vm8, %v12322_v41  ;;  %9073 = vmatmul.msk.bf16.gmra.mxu1 %vm3209_vm8, %v14843_v24 }
 0x60d   : > { %v3935_v37 = vpop.f32.mrf.mxu0 }
 0x60e   : > { %v4256_v20 = vpop.f32.mrf.mxu2  ;;  %v4419_v53 = vpop.f32.mrf.mxu3 }
 0x60f   : > { %v4334_v44 = vadd.f32 %v4256_v20, %v12417_v32  ;;  %v12709_v49 = vadd.f32 %v4419_v53, %v4333_v56 }
 0x610   : > { %v4072_v54 = vpop.f32.mrf.mxu1 }
 0x611   : > { %v12711_v15 = vadd.f32 %v4072_v54, %v3925_v55  ;;  %v14846_v55 = vld [vmem:[#allocation36_spill] sm:$0xff] }
 0x613   : > { %9023 = vmatmul.msk.bf16.gmra.mxu3 %vm3209_vm8, %v12364_v11 }
 0x615   : > { %v3938_v41 = vpop.f32.mrf.mxu0 }
 0x616   : > { %v4258_v10 = vpop.f32.mrf.mxu2  ;;  %v4422_v45 = vpop.f32.mrf.mxu3 }
 0x617   : > { %v4335_v29 = vadd.f32 %v4258_v10, %v12436_v61  ;;  %v12716_v0 = vadd.f32 %v4422_v45, %v4334_v44 }
 0x618   : > { %v4075_v22 = vpop.f32.mrf.mxu1  ;;  %9046 = vmatmul.msk.bf16.gmra.mxu0 %vm3209_vm8, %v14845_v36 }
 0x619   : > { %v12720_v32 = vadd.f32 %v4075_v22, %v3928_v46 }
 0x61b   : > { %8994 = vmatmul.msk.bf16.gmra.mxu2 %vm3209_vm8, %v12364_v11  ;;  %9074 = vmatmul.msk.bf16.gmra.mxu1 %vm3209_vm8, %v14846_v55 }
 0x61d   : > { %v3940_v56 = vpop.f32.mrf.mxu0 }
 0x61e   : > { %v4261_v7 = vpop.f32.mrf.mxu2  ;;  %v4424_v20 = vpop.f32.mrf.mxu3 }
 0x61f   : > { %v4336_v53 = vadd.f32 %v4261_v7, %v12459_v5  ;;  %v12727_v61 = vadd.f32 %v4424_v20, %v4335_v29 }
 0x620   : > { %v4077_v44 = vpop.f32.mrf.mxu1 }
 0x621   : > { %v12729_v54 = vadd.f32 %v4077_v44, %v3930_v50  ;;  %v14848_v50 = vld [vmem:[#allocation39_spill] sm:$0xff] }
 0x623   : > { %9024 = vmatmul.msk.bf16.gmra.mxu3 %vm3209_vm8, %v12406_v38 }
 0x625   : > { %v3943_v46 = vpop.f32.mrf.mxu0 }
 0x626   : > { %v4263_v10 = vpop.f32.mrf.mxu2  ;;  %v4427_v45 = vpop.f32.mrf.mxu3 }
 0x627   : > { %v4337_v11 = vadd.f32 %v4263_v10, %v12481_v62  ;;  %v12734_v22 = vadd.f32 %v4427_v45, %v4336_v53 }
 0x628   : > { %v4080_v36 = vpop.f32.mrf.mxu1  ;;  %9047 = vmatmul.msk.bf16.gmra.mxu0 %vm3209_vm8, %v14847_v42 }
 0x629   : > { %v12738_v5 = vadd.f32 %v4080_v36, %v3933_v40 }
 0x62b   : > { %8995 = vmatmul.msk.bf16.gmra.mxu2 %vm3209_vm8, %v12406_v38  ;;  %9075 = vmatmul.msk.bf16.gmra.mxu1 %vm3209_vm8, %v14848_v50 }
 0x62d   : > { %v3945_v29 = vpop.f32.mrf.mxu0 }
 0x62e   : > { %v4266_v7 = vpop.f32.mrf.mxu2  ;;  %v4429_v20 = vpop.f32.mrf.mxu3 }
 0x62f   : > { %v4338_v44 = vadd.f32 %v4266_v7, %v12508_v63  ;;  %v12745_v62 = vadd.f32 %v4429_v20, %v4337_v11 }
 0x630   : > { %v4082_v53 = vpop.f32.mrf.mxu1 }
 0x631   : > { %v12747_v10 = vadd.f32 %v4082_v53, %v3935_v37  ;;  %v14850_v37 = vld [vmem:[#allocation17_spill] sm:$0xff] }
 0x633   : > { %9025 = vmatmul.msk.bf16.gmra.mxu3 %vm3209_vm8, %v12448_v16 }
 0x635   : > { %v3948_v40 = vpop.f32.mrf.mxu0 }
 0x636   : > { %v4268_v42 = vpop.f32.mrf.mxu2  ;;  %v4432_v45 = vpop.f32.mrf.mxu3 }
 0x637   : > { %v4339_v38 = vadd.f32 %v4268_v42, %v12529_v51  ;;  %v12752_v36 = vadd.f32 %v4432_v45, %v4338_v44  ;;  %v14851_v45 = vld [vmem:[#allocation69_spill] sm:$0xff] }
 0x638   : > { %v4085_v60 = vpop.f32.mrf.mxu1  ;;  %9048 = vmatmul.msk.bf16.gmra.mxu0 %vm3209_vm8, %v14849_v33 }
 0x639   : > { %v12756_v63 = vadd.f32 %v4085_v60, %v3938_v41 }
 0x63b   : > { %8996 = vmatmul.msk.bf16.gmra.mxu2 %vm3209_vm8, %v12448_v16  ;;  %9076 = vmatmul.msk.bf16.gmra.mxu1 %vm3209_vm8, %v14850_v37  ;;  %v9862_v16 = vld [vmem:[%s14768_s3 + $0x68] sm:$0xff] }
 0x63c   : > { %5099 = vmatpush.bf16.msra.mxu2 %v9862_v16 }
 0x63d   : > { %v3950_v11 = vpop.f32.mrf.mxu0 }
 0x63e   : > { %v4271_v7 = vpop.f32.mrf.mxu2  ;;  %v4434_v20 = vpop.f32.mrf.mxu3 }
 0x63f   : > { %v4340_v53 = vadd.f32 %v4271_v7, %v12553_v12  ;;  %v12763_v51 = vadd.f32 %v4434_v20, %v4339_v38  ;;  %v14852_v20 = vld [vmem:[#allocation42_spill] sm:$0xff] }
 0x640   : > { %v4087_v44 = vpop.f32.mrf.mxu1 }
 0x641   : > { %v12765_v42 = vadd.f32 %v4087_v44, %v3940_v56  ;;  %v9861_v56 = vld [vmem:[%s14768_s3 + $0x60] sm:$0xff] }
 0x642   : > { %5100 = vmatpush.bf16.msra.mxu2 %v9861_v56 }
 0x643   : > { %9026 = vmatmul.msk.bf16.gmra.mxu3 %vm3209_vm8, %v14851_v45 }
 0x645   : > { %v4693_v60 = vpop.f32.mrf.mxu0 }
 0x646   : > { %v4783_v33 = vadd.f32 %v4693_v60, %v12627_v17  ;;  %v4273_v41 = vpop.f32.mrf.mxu2  ;;  %v4437_v13 = vpop.f32.mrf.mxu3  ;;  %v14853_v17 = vld [vmem:[#allocation16_spill] sm:$0xff] }
 0x647   : > { %v4341_v12 = vadd.f32 %v4273_v41, %v12575_v1  ;;  %v12774_v38 = vadd.f32 %v4437_v13, %v4340_v53  ;;  %v9864_v1 = vld [vmem:[%s14768_s3 + $0x78] sm:$0xff] }
 0x648   : > { %v4090_v7 = vpop.f32.mrf.mxu1  ;;  %9049 = vmatmul.msk.bf16.gmra.mxu0 %vm3209_vm8, %v14852_v20  ;;  %5390 = vmatpush.bf16.msra.mxu3 %v9864_v1 }
 0x649   : > { %v12781_v44 = vadd.f32 %v4090_v7, %v3943_v46 }
 0x64b   : > { %8997 = vmatmul.msk.bf16.gmra.mxu2 %vm3209_vm8, %v14851_v45  ;;  %9077 = vmatmul.msk.bf16.gmra.mxu1 %vm3209_vm8, %v14853_v17  ;;  %v9863_v45 = vld [vmem:[%s14768_s3 + $0x70] sm:$0xff] }
 0x64c   : > { %5391 = vmatpush.bf16.msra.mxu3 %v9863_v45 }
 0x64d   : > { %v4695_v13 = vpop.f32.mrf.mxu0 }
 0x64e   : > { %v4784_v53 = vadd.f32 %v4695_v13, %v12639_v52  ;;  %v4276_v16 = vpop.f32.mrf.mxu2  ;;  %v4439_v60 = vpop.f32.mrf.mxu3 }
 0x64f   : > { %v4342_v46 = vadd.f32 %v4276_v16, %v12610_v47  ;;  %v12792_v41 = vadd.f32 %v4439_v60, %v4341_v12  ;;  %v14854_v60 = vld [vmem:[#allocation47_spill] sm:$0xff] }
 0x650   : > { %v4092_v56 = vpop.f32.mrf.mxu1 }
 0x651   : > { %v12797_v7 = vadd.f32 %v4092_v56, %v3945_v29  ;;  %v14855_v29 = vld [vmem:[#allocation27_spill] sm:$0xff] }
 0x653   : > { %9027 = vmatmul.msk.bf16.gmra.mxu3 %vm3209_vm8, %v12542_v31 }
 0x655   : > { %v4698_v20 = vpop.f32.mrf.mxu0 }
 0x656   : > { %v4785_v52 = vadd.f32 %v4698_v20, %v12646_v23  ;;  %v4278_v1 = vpop.f32.mrf.mxu2  ;;  %v4442_v13 = vpop.f32.mrf.mxu3 }
 0x657   : > { %v4343_v47 = vadd.f32 %v4278_v1, %v12622_v34  ;;  %v12803_v12 = vadd.f32 %v4442_v13, %v4342_v46 }
 0x658   : > { %v4095_v16 = vpop.f32.mrf.mxu1  ;;  %9050 = vmatmul.msk.bf16.gmra.mxu0 %vm3209_vm8, %v14854_v60 }
 0x659   : > { %v12807_v21 = vadd.f32 %v4095_v16, %v3948_v40 }
 0x65b   : > { %8998 = vmatmul.msk.bf16.gmra.mxu2 %vm3209_vm8, %v12524_v27  ;;  %9078 = vmatmul.msk.bf16.gmra.mxu1 %vm3209_vm8, %v14855_v29 }
 0x65d   : > { %v4700_v31 = vpop.f32.mrf.mxu0 }
 0x65e   : > { %v4786_v23 = vadd.f32 %v4700_v31, %v12657_v14  ;;  %v4281_v45 = vpop.f32.mrf.mxu2  ;;  %v4444_v56 = vpop.f32.mrf.mxu3  ;;  %v14856_v31 = vld [vmem:[#allocation51_spill] sm:$0xff] }
 0x65f   : > { %v4344_v34 = vadd.f32 %v4281_v45, %v12632_v58  ;;  %v12815_v46 = vadd.f32 %v4444_v56, %v4343_v47 }
 0x660   : > { %v4097_v20 = vpop.f32.mrf.mxu1 }
 0x661   : > { %v12817_v1 = vadd.f32 %v4097_v20, %v3950_v11  ;;  %v14857_v11 = vld [vmem:[#allocation26_spill] sm:$0xff] }
 0x663   : > { %9028 = vmatmul.msk.bf16.gmra.mxu3 %vm3209_vm8, %v12567_v57 }
 0x665   : > { %v4703_v40 = vpop.f32.mrf.mxu0 }
 0x666   : > { %v4787_v27 = vadd.f32 %v4703_v40, %v12664_v6  ;;  %v4283_v13 = vpop.f32.mrf.mxu2  ;;  %v4447_v16 = vpop.f32.mrf.mxu3 }
 0x667   : > { %v4345_v60 = vadd.f32 %v4283_v13, %v12641_v26  ;;  %v12823_v14 = vadd.f32 %v4447_v16, %v4344_v34 }
 0x668   : > { %9051 = vmatmul.msk.bf16.gmra.mxu0 %vm3209_vm8, %v14856_v31  ;;  %v4936_v58 = vpop.f32.mrf.mxu1 }
 0x669   : > { %v12827_v47 = vadd.f32 %v4936_v58, %v4783_v33  ;;  %v14858_v33 = vld [vmem:[#allocation30_spill] sm:$0xff] }
 0x66b   : > { %9079 = vmatmul.msk.bf16.gmra.mxu1 %vm3209_vm8, %v14857_v11  ;;  %9101 = vmatmul.msk.bf16.vlgmr.msra.gmra.mxu2 %vm3209_vm8, %v14837_v4 }
 0x66d   : > { %v4705_v57 = vpop.f32.mrf.mxu0 }
 0x66e   : > { %v4788_v6 = vadd.f32 %v4705_v57, %v12677_v48  ;;  %v4286_v45 = vpop.f32.mrf.mxu2  ;;  %v4449_v56 = vpop.f32.mrf.mxu3  ;;  %v14859_v57 = vld [vmem:[#allocation55_spill] sm:$0xff] }
 0x66f   : > { %v4346_v26 = vadd.f32 %v4286_v45, %v12650_v3  ;;  %v12835_v34 = vadd.f32 %v4449_v56, %v4345_v60 }
 0x670   : > { %v4938_v20 = vpop.f32.mrf.mxu1 }
 0x671   : > { %v12837_v40 = vadd.f32 %v4938_v20, %v4784_v53  ;;  %v14860_v53 = vld [vmem:[#allocation45_spill] sm:$0xff] }
 0x673   : > { %9131 = vmatmul.msk.bf16.vlgmr.msra.gmra.mxu3 %vm3209_vm8, %v14858_v33 }
 0x675   : > { %v4708_v13 = vpop.f32.mrf.mxu0 }
 0x676   : > { %v4789_v16 = vadd.f32 %v4708_v13, %v12684_v9  ;;  %v4288_v31 = vpop.f32.mrf.mxu2  ;;  %v4452_v4 = vpop.f32.mrf.mxu3 }
 0x677   : > { %v4347_v58 = vadd.f32 %v4288_v31, %v12659_v28  ;;  %v12843_v48 = vadd.f32 %v4452_v4, %v4346_v26 }
 0x678   : > { %9052 = vmatmul.msk.bf16.gmra.mxu0 %vm3209_vm8, %v14859_v57  ;;  %v4941_v3 = vpop.f32.mrf.mxu1 }
 0x679   : > { %v12847_v60 = vadd.f32 %v4941_v3, %v4785_v52  ;;  %v14861_v52 = vld [vmem:[#allocation34_spill] sm:$0xff] }
 0x67b   : > { %9080 = vmatmul.msk.bf16.gmra.mxu1 %vm3209_vm8, %v14860_v53  ;;  %9102 = vmatmul.msk.bf16.gmra.mxu2 %vm3209_vm8, %v14843_v24 }
 0x67d   : > { %v4710_v45 = vpop.f32.mrf.mxu0 }
 0x67e   : > { %v4790_v9 = vadd.f32 %v4710_v45, %v12709_v49  ;;  %v4291_v56 = vpop.f32.mrf.mxu2  ;;  %v4454_v20 = vpop.f32.mrf.mxu3  ;;  %v14862_v45 = vld [vmem:[#allocation59_spill] sm:$0xff] }
 0x67f   : > { %v4348_v28 = vadd.f32 %v4291_v56, %v12668_v19  ;;  %v12855_v26 = vadd.f32 %v4454_v20, %v4347_v58 }
 0x680   : > { %v4943_v33 = vpop.f32.mrf.mxu1 }
 0x681   : > { %v12857_v13 = vadd.f32 %v4943_v33, %v4786_v23  ;;  %v14863_v23 = vld [vmem:[#allocation49_spill] sm:$0xff] }
 0x683   : > { %9132 = vmatmul.msk.bf16.gmra.mxu3 %vm3209_vm8, %v14861_v52 }
 0x685   : > { %v4713_v31 = vpop.f32.mrf.mxu0 }
 0x686   : > { %v4791_v4 = vadd.f32 %v4713_v31, %v12716_v0  ;;  %v4293_v57 = vpop.f32.mrf.mxu2  ;;  %v4457_v24 = vpop.f32.mrf.mxu3 }
 0x687   : > { %v4349_v3 = vadd.f32 %v4293_v57, %v12679_v30  ;;  %v12863_v49 = vadd.f32 %v4457_v24, %v4348_v28 }
 0x688   : > { %9053 = vmatmul.msk.bf16.gmra.mxu0 %vm3209_vm8, %v14862_v45  ;;  %v4946_v19 = vpop.f32.mrf.mxu1 }
 0x689   : > { %v12867_v58 = vadd.f32 %v4946_v19, %v4787_v27  ;;  %v14864_v27 = vld [vmem:[#allocation12_spill] sm:$0xff] }
 0x68b   : > { %9081 = vmatmul.msk.bf16.gmra.mxu1 %vm3209_vm8, %v14863_v23  ;;  %9103 = vmatmul.msk.bf16.gmra.mxu2 %vm3209_vm8, %v14846_v55 }
 0x68d   : > { %v4715_v56 = vpop.f32.mrf.mxu0 }
 0x68e   : > { %v4792_v0 = vadd.f32 %v4715_v56, %v12727_v61  ;;  %v4296_v20 = vpop.f32.mrf.mxu2  ;;  %v4459_v33 = vpop.f32.mrf.mxu3  ;;  %v14865_v56 = vld [vmem:[#allocation63_spill] sm:$0xff] }
 0x68f   : > { %v4350_v30 = vadd.f32 %v4296_v20, %v12688_v2  ;;  %v12875_v28 = vadd.f32 %v4459_v33, %v4349_v3 }
 0x690   : > { %v4948_v52 = vpop.f32.mrf.mxu1 }
 0x691   : > { %v12877_v31 = vadd.f32 %v4948_v52, %v4788_v6  ;;  %v14866_v6 = vld [vmem:[#allocation53_spill] sm:$0xff] }
 0x693   : > { %9133 = vmatmul.msk.bf16.gmra.mxu3 %vm3209_vm8, %v14864_v27 }
 0x695   : > { %v4718_v57 = vpop.f32.mrf.mxu0 }
 0x696   : > { %v4793_v24 = vadd.f32 %v4718_v57, %v12734_v22  ;;  %v4298_v45 = vpop.f32.mrf.mxu2  ;;  %v4462_v55 = vpop.f32.mrf.mxu3 }
 0x697   : > { %v4351_v19 = vadd.f32 %v4298_v45, %v12711_v15  ;;  %v12883_v61 = vadd.f32 %v4462_v55, %v4350_v30 }
 0x698   : > { %9054 = vmatmul.msk.bf16.gmra.mxu0 %vm3209_vm8, %v14865_v56  ;;  %v4951_v2 = vpop.f32.mrf.mxu1 }
 0x699   : > { %v12887_v3 = vadd.f32 %v4951_v2, %v4789_v16  ;;  %v14867_v16 = vld [vmem:[#allocation22_spill] sm:$0xff] }
 0x69b   : > { %9082 = vmatmul.msk.bf16.gmra.mxu1 %vm3209_vm8, %v14866_v6  ;;  %9104 = vmatmul.msk.bf16.gmra.mxu2 %vm3209_vm8, %v14848_v50 }
 0x69d   : > { %v4720_v20 = vpop.f32.mrf.mxu0 }
 0x69e   : > { %v4794_v22 = vadd.f32 %v4720_v20, %v12745_v62  ;;  %v4301_v33 = vpop.f32.mrf.mxu2  ;;  %v4464_v52 = vpop.f32.mrf.mxu3  ;;  %v14868_v20 = vld [vmem:[#allocation67_spill] sm:$0xff] }
 0x69f   : > { %v4352_v15 = vadd.f32 %v4301_v33, %v12720_v32  ;;  %v12895_v30 = vadd.f32 %v4464_v52, %v4351_v19 }
 0x6a0   : > { %v4953_v27 = vpop.f32.mrf.mxu1 }
 0x6a1   : > { %v12897_v57 = vadd.f32 %v4953_v27, %v4790_v9  ;;  %v14869_v9 = vld [vmem:[#allocation57_spill] sm:$0xff] }
 0x6a3   : > { %9134 = vmatmul.msk.bf16.gmra.mxu3 %vm3209_vm8, %v14867_v16 }
 0x6a5   : > { %v4723_v45 = vpop.f32.mrf.mxu0 }
 0x6a6   : > { %v12902_v55 = vadd.f32 %v4723_v45, %v12752_v36  ;;  %v4303_v50 = vpop.f32.mrf.mxu2  ;;  %v4467_v56 = vpop.f32.mrf.mxu3 }
 0x6a7   : > { %v4353_v62 = vadd.f32 %v4303_v50, %v12729_v54  ;;  %v12905_v2 = vadd.f32 %v4467_v56, %v4352_v15 }
 0x6a8   : > { %9055 = vmatmul.msk.bf16.gmra.mxu0 %vm3209_vm8, %v14868_v20  ;;  %v4956_v32 = vpop.f32.mrf.mxu1 }
 0x6a9   : > { %v12909_v19 = vadd.f32 %v4956_v32, %v4791_v4  ;;  %v14870_v4 = vld [vmem:[#allocation18_spill] sm:$0xff] }
 0x6ab   : > { %9083 = vmatmul.msk.bf16.gmra.mxu1 %vm3209_vm8, %v14869_v9  ;;  %9105 = vmatmul.msk.bf16.gmra.mxu2 %vm3209_vm8, %v14850_v37 }
 0x6ad   : > { %v4725_v36 = vpop.f32.mrf.mxu0 }
 0x6ae   : > { %v12916_v33 = vadd.f32 %v4725_v36, %v12763_v51  ;;  %v4306_v52 = vpop.f32.mrf.mxu2  ;;  %v4469_v54 = vpop.f32.mrf.mxu3 }
 0x6af   : > { %v4354_v15 = vadd.f32 %v4306_v52, %v12738_v5  ;;  %v12919_v27 = vadd.f32 %v4469_v54, %v4353_v62 }
 0x6b0   : > { %v4958_v16 = vpop.f32.mrf.mxu1 }
 0x6b1   : > { %v12921_v45 = vadd.f32 %v4958_v16, %v4792_v0  ;;  %v14871_v0 = vld [vmem:[#allocation61_spill] sm:$0xff] }
 0x6b3   : > { %9135 = vmatmul.msk.bf16.gmra.mxu3 %vm3209_vm8, %v14870_v4  ;;  %v14872_v4 = vld [vmem:[#allocation21_spill] sm:$0xff] }
 0x6b5   : > { %v4728_v50 = vpop.f32.mrf.mxu0 }
 0x6b6   : > { %v12926_v56 = vadd.f32 %v4728_v50, %v12774_v38  ;;  %v4308_v37 = vpop.f32.mrf.mxu2  ;;  %v4472_v20 = vpop.f32.mrf.mxu3 }
 0x6b7   : > { %v4355_v51 = vadd.f32 %v4308_v37, %v12747_v10  ;;  %v12929_v32 = vadd.f32 %v4472_v20, %v4354_v15 }
 0x6b8   : > { %9056 = vmatmul.msk.bf16.gmra.mxu0 %vm3209_vm8, %v12511_v43  ;;  %v4961_v5 = vpop.f32.mrf.mxu1 }
 0x6b9   : > { %v12933_v62 = vadd.f32 %v4961_v5, %v4793_v24  ;;  %v9866_v24 = vld [vmem:[%s14768_s3 + $0x88] sm:$0xff] }
 0x6ba   : > { %5633 = vmatpush.bf16.msrb.mxu0 %v9866_v24  ;;  %v14873_v5 = vld [vmem:[#allocation65_spill] sm:$0xff] }
 0x6bb   : > { %9084 = vmatmul.msk.bf16.gmra.mxu1 %vm3209_vm8, %v14871_v0  ;;  %9106 = vmatmul.msk.bf16.gmra.mxu2 %vm3209_vm8, %v14853_v17  ;;  %v9865_v17 = vld [vmem:[%s14768_s3 + $0x80] sm:$0xff] }
 0x6bd   : > { %v4730_v38 = vpop.f32.mrf.mxu0 }
 0x6be   : > { %v12940_v36 = vadd.f32 %v4730_v38, %v12792_v41  ;;  %v4311_v52 = vpop.f32.mrf.mxu2  ;;  %v4474_v10 = vpop.f32.mrf.mxu3  ;;  %5634 = vmatpush.bf16.msrb.mxu0 %v9865_v17 }
 0x6bf   : > { %v4356_v54 = vadd.f32 %v4311_v52, %v12756_v63  ;;  %v12943_v15 = vadd.f32 %v4474_v10, %v4355_v51 }
 0x6c0   : > { %v4963_v43 = vpop.f32.mrf.mxu1 }
 0x6c1   : > { %v12948_v16 = vadd.f32 %v4963_v43, %v4794_v22 }
 0x6c3   : > { %9136 = vmatmul.msk.bf16.gmra.mxu3 %vm3209_vm8, %v14872_v4 }
 0x6c5   : > { %v4733_v41 = vpop.f32.mrf.mxu0 }
 0x6c6   : > { %v12956_v63 = vadd.f32 %v4733_v41, %v12803_v12  ;;  %v4313_v50 = vpop.f32.mrf.mxu2  ;;  %v4477_v37 = vpop.f32.mrf.mxu3 }
 0x6c7   : > { %v4357_v20 = vadd.f32 %v4313_v50, %v12765_v42  ;;  %v12959_v51 = vadd.f32 %v4477_v37, %v4356_v54  ;;  %v14875_v50 = vld [vmem:[#allocation70_spill] sm:$0xff] }
 0x6c8   : > { %9057 = vmatmul.msk.bf16.gmra.mxu0 %vm3209_vm8, %v12556_v35  ;;  %v12963_v22 = vpop.f32.mrf.mxu1  ;;  %v14874_v35 = vld [vmem:[#allocation25_spill] sm:$0xff] }
 0x6cb   : > { %9085 = vmatmul.msk.bf16.gmra.mxu1 %vm3209_vm8, %v14873_v5  ;;  %9107 = vmatmul.msk.bf16.gmra.mxu2 %vm3209_vm8, %v14855_v29 }
 0x6cd   : > { %v4735_v12 = vpop.f32.mrf.mxu0 }
 0x6ce   : > { %v12970_v38 = vadd.f32 %v4735_v12, %v12815_v46  ;;  %v4316_v52 = vpop.f32.mrf.mxu2  ;;  %v4479_v10 = vpop.f32.mrf.mxu3 }
 0x6cf   : > { %v4358_v42 = vadd.f32 %v4316_v52, %v12781_v44  ;;  %v12973_v54 = vadd.f32 %v4479_v10, %v4357_v20 }
 0x6d0   : > { %v12975_v43 = vpop.f32.mrf.mxu1 }
 0x6d3   : > { %9137 = vmatmul.msk.bf16.gmra.mxu3 %vm3209_vm8, %v14874_v35 }
 0x6d5   : > { %v4738_v24 = vpop.f32.mrf.mxu0 }
 0x6d6   : > { %v12980_v4 = vadd.f32 %v4738_v24, %v12823_v14  ;;  %v4318_v29 = vpop.f32.mrf.mxu2  ;;  %v4482_v17 = vpop.f32.mrf.mxu3 }
 0x6d7   : > { %v4359_v46 = vadd.f32 %v4318_v29, %v12797_v7  ;;  %v12983_v41 = vadd.f32 %v4482_v17, %v4358_v42 }
 0x6d8   : > { %9058 = vmatmul.msk.bf16.gmra.mxu0 %vm3209_vm8, %v12578_v59  ;;  %v12987_v44 = vpop.f32.mrf.mxu1  ;;  %v14876_v59 = vld [vmem:[#allocation43_spill] sm:$0xff] }
 0x6db   : > { %9086 = vmatmul.msk.bf16.gmra.mxu1 %vm3209_vm8, %v14875_v50  ;;  %9108 = vmatmul.msk.bf16.gmra.mxu2 %vm3209_vm8, %v14857_v11 }
 0x6dd   : > { %v4740_v37 = vpop.f32.mrf.mxu0 }
 0x6de   : > { %v12994_v14 = vadd.f32 %v4740_v37, %v12835_v34  ;;  %v4321_v20 = vpop.f32.mrf.mxu2  ;;  %v4484_v12 = vpop.f32.mrf.mxu3  ;;  %v14877_v37 = vld [vmem:[#allocation24_spill] sm:$0xff] }
 0x6df   : > { %v4360_v7 = vadd.f32 %v4321_v20, %v12807_v21  ;;  %v12997_v52 = vadd.f32 %v4484_v12, %v4359_v46 }
 0x6e0   : > { %v12999_v10 = vpop.f32.mrf.mxu1 }
 0x6e3   : > { %9138 = vmatmul.msk.bf16.gmra.mxu3 %vm3209_vm8, %v14876_v59  ;;  %v14879_v59 = vld [vmem:[#allocation48_spill] sm:$0xff] }
 0x6e5   : > { %v4743_v42 = vpop.f32.mrf.mxu0 }
 0x6e6   : > { %v4803_v35 = vadd.f32 %v4743_v42, %v12843_v48  ;;  %v4323_v24 = vpop.f32.mrf.mxu2  ;;  %v4487_v11 = vpop.f32.mrf.mxu3 }
 0x6e7   : > { %v4361_v29 = vadd.f32 %v4323_v24, %v12817_v1  ;;  %v13005_v34 = vadd.f32 %v4487_v11, %v4360_v7 }
 0x6e8   : > { %v13007_v17 = vpop.f32.mrf.mxu1  ;;  %9161 = vmatmul.msk.bf16.vlgmr.msrb.gmra.mxu0 %vm3209_vm8, %v14877_v37 }
 0x6eb   : > { %9087 = vmatmul.msk.bf16.gmra.mxu1 %vm3209_vm8, %v12545_v18  ;;  %9109 = vmatmul.msk.bf16.gmra.mxu2 %vm3209_vm8, %v14860_v53 }
 0x6ed   : > { %v4745_v21 = vpop.f32.mrf.mxu0 }
 0x6ee   : > { %v13016_v48 = vadd.f32 %v4745_v21, %v12855_v26  ;;  %v4489_v46 = vpop.f32.mrf.mxu3  ;;  %v5102_v20 = vpop.f32.mrf.mxu2 }
 0x6ef   : > { %v13018_v1 = vadd.f32 %v4489_v46, %v4361_v29  ;;  %v5192_v12 = vadd.f32 %v5102_v20, %v12827_v47  ;;  %v14880_v29 = vld [vmem:[#allocation32_spill] sm:$0xff] }
 0x6f0   : > { %14878 = vst [vmem:[#allocation38_spill] sm:$0xff] %v13016_v48  ;;  %v13021_v7 = vpop.f32.mrf.mxu1 }
 0x6f3   : > { %9139 = vmatmul.msk.bf16.gmra.mxu3 %vm3209_vm8, %v14879_v59 }
 0x6f5   : > { %v4748_v42 = vpop.f32.mrf.mxu0 }
 0x6f6   : > { %v4805_v24 = vadd.f32 %v4748_v42, %v12863_v49  ;;  %v5104_v11 = vpop.f32.mrf.mxu2  ;;  %v5393_v53 = vpop.f32.mrf.mxu3  ;;  %v14883_v42 = vld [vmem:[#allocation52_spill] sm:$0xff] }
 0x6f7   : > { %v5193_v37 = vadd.f32 %v5104_v11, %v12837_v40  ;;  %v13027_v26 = vadd.f32 %v5393_v53, %v5192_v12 }
 0x6f8   : > { %v13029_v21 = vpop.f32.mrf.mxu1  ;;  %9162 = vmatmul.msk.bf16.gmra.mxu0 %vm3209_vm8, %v14880_v29 }
 0x6fb   : > { %9088 = vmatmul.msk.bf16.gmra.mxu1 %vm3209_vm8, %v12570_v25  ;;  %9110 = vmatmul.msk.bf16.gmra.mxu2 %vm3209_vm8, %v14863_v23 }
 0x6fd   : > { %v4750_v47 = vpop.f32.mrf.mxu0 }
 0x6fe   : > { %v13038_v49 = vadd.f32 %v4750_v47, %v12875_v28  ;;  %v5107_v46 = vpop.f32.mrf.mxu2  ;;  %v5395_v20 = vpop.f32.mrf.mxu3 }
 0x6ff   : > { %v5194_v40 = vadd.f32 %v5107_v46, %v12847_v60  ;;  %v13041_v12 = vadd.f32 %v5395_v20, %v5193_v37 }
 0x700   : > { %14881 = vst [vmem:[#allocation29_spill] sm:$0xff] %v13038_v49  ;;  %v13043_v59 = vpop.f32.mrf.mxu1  ;;  %v14884_v49 = vld [vmem:[#allocation37_spill] sm:$0xff] }
 0x701   : > { %14882 = vst [vmem:[#allocation13_spill] sm:$0xff] %v13043_v59 }
 0x703   : > { %9140 = vmatmul.msk.bf16.gmra.mxu3 %vm3209_vm8, %v14883_v42 }
 0x705   : > { %v4753_v11 = vpop.f32.mrf.mxu0 }
 0x706   : > { %v4807_v25 = vadd.f32 %v4753_v11, %v12883_v61  ;;  %v5109_v53 = vpop.f32.mrf.mxu2  ;;  %v5398_v23 = vpop.f32.mrf.mxu3  ;;  %v14887_v11 = vld [vmem:[#allocation56_spill] sm:$0xff] }
 0x707   : > { %v5195_v29 = vadd.f32 %v5109_v53, %v12857_v13  ;;  %v13049_v28 = vadd.f32 %v5398_v23, %v5194_v40 }
 0x708   : > { %v4986_v47 = vpop.f32.mrf.mxu1  ;;  %9163 = vmatmul.msk.bf16.gmra.mxu0 %vm3209_vm8, %v14884_v49 }
 0x709   : > { %v13053_v60 = vadd.f32 %v4986_v47, %v4803_v35 }
 0x70b   : > { %9111 = vmatmul.msk.bf16.gmra.mxu2 %vm3209_vm8, %v14866_v6 }
 0x70d   : > { %v4755_v37 = vpop.f32.mrf.mxu0 }
 0x70e   : > { %v13058_v46 = vadd.f32 %v4755_v37, %v12895_v30  ;;  %v5112_v61 = vpop.f32.mrf.mxu2  ;;  %v5400_v20 = vpop.f32.mrf.mxu3  ;;  %v14888_v37 = vld [vmem:[#allocation40_spill] sm:$0xff] }
 0x70f   : > { %v5196_v42 = vadd.f32 %v5112_v61, %v12867_v58  ;;  %v13061_v13 = vadd.f32 %v5400_v20, %v5195_v29 }
 0x710   : > { %14885 = vst [vmem:[#allocation35_spill] sm:$0xff] %v13058_v46  ;;  %v13063_v40 = vpop.f32.mrf.mxu1 }
 0x711   : > { %14886 = vst [vmem:[#allocation20_spill] sm:$0xff] %v13063_v40 }
 0x713   : > { %9141 = vmatmul.msk.bf16.gmra.mxu3 %vm3209_vm8, %v14887_v11 }
 0x715   : > { %v4758_v35 = vpop.f32.mrf.mxu0 }
 0x716   : > { %v4809_v49 = vadd.f32 %v4758_v35, %v12905_v2  ;;  %v5114_v53 = vpop.f32.mrf.mxu2  ;;  %v5403_v6 = vpop.f32.mrf.mxu3  ;;  %v14891_v35 = vld [vmem:[#allocation60_spill] sm:$0xff] }
 0x717   : > { %v5197_v23 = vadd.f32 %v5114_v53, %v12877_v31  ;;  %v13069_v30 = vadd.f32 %v5403_v6, %v5196_v42 }
 0x718   : > { %v4991_v47 = vpop.f32.mrf.mxu1  ;;  %9164 = vmatmul.msk.bf16.gmra.mxu0 %vm3209_vm8, %v14888_v37 }
 0x719   : > { %v13073_v58 = vadd.f32 %v4991_v47, %v4805_v24 }
 0x71b   : > { %9112 = vmatmul.msk.bf16.gmra.mxu2 %vm3209_vm8, %v14869_v9 }
 0x71d   : > { %v4760_v29 = vpop.f32.mrf.mxu0 }
 0x71e   : > { %v13078_v61 = vadd.f32 %v4760_v29, %v12919_v27  ;;  %v5117_v2 = vpop.f32.mrf.mxu2  ;;  %v5405_v20 = vpop.f32.mrf.mxu3  ;;  %v14893_v29 = vld [vmem:[#allocation14_spill] sm:$0xff] }
 0x71f   : > { %v5198_v11 = vadd.f32 %v5117_v2, %v12887_v3  ;;  %v13081_v31 = vadd.f32 %v5405_v20, %v5197_v23 }
 0x720   : > { %14889 = vst [vmem:[#allocation36_spill] sm:$0xff] %v13078_v61  ;;  %v13083_v42 = vpop.f32.mrf.mxu1 }
 0x721   : > { %14890 = vst [vmem:[#allocation15_spill] sm:$0xff] %v13083_v42 }
 0x723   : > { %9142 = vmatmul.msk.bf16.gmra.mxu3 %vm3209_vm8, %v14891_v35 }
 0x725   : > { %v4763_v24 = vpop.f32.mrf.mxu0 }
 0x726   : > { %v13088_v53 = vadd.f32 %v4763_v24, %v12929_v32  ;;  %v5119_v9 = vpop.f32.mrf.mxu2  ;;  %v5408_v6 = vpop.f32.mrf.mxu3  ;;  %v14896_v24 = vld [vmem:[#allocation64_spill] sm:$0xff] }
 0x727   : > { %v5199_v27 = vadd.f32 %v5119_v9, %v12897_v57  ;;  %v13091_v47 = vadd.f32 %v5408_v6, %v5198_v11 }
 0x728   : > { %14892 = vst [vmem:[#allocation39_spill] sm:$0xff] %v13088_v53  ;;  %v4996_v37 = vpop.f32.mrf.mxu1  ;;  %9165 = vmatmul.msk.bf16.gmra.mxu0 %vm3209_vm8, %v14893_v29 }
 0x729   : > { %v13095_v3 = vadd.f32 %v4996_v37, %v4807_v25 }
 0x72b   : > { %9113 = vmatmul.msk.bf16.gmra.mxu2 %vm3209_vm8, %v14871_v0 }
 0x72d   : > { %v4765_v23 = vpop.f32.mrf.mxu0 }
 0x72e   : > { %v13100_v2 = vadd.f32 %v4765_v23, %v12943_v15  ;;  %v5122_v32 = vpop.f32.mrf.mxu2  ;;  %v5410_v20 = vpop.f32.mrf.mxu3  ;;  %v14898_v23 = vld [vmem:[#allocation19_spill] sm:$0xff] }
 0x72f   : > { %v5200_v35 = vadd.f32 %v5122_v32, %v12909_v19  ;;  %v13103_v57 = vadd.f32 %v5410_v20, %v5199_v27 }
 0x730   : > { %14894 = vst [vmem:[#allocation23_spill] sm:$0xff] %v13100_v2  ;;  %v13105_v11 = vpop.f32.mrf.mxu1 }
 0x731   : > { %14895 = vst [vmem:[#allocation17_spill] sm:$0xff] %v13105_v11 }
 0x733   : > { %9143 = vmatmul.msk.bf16.gmra.mxu3 %vm3209_vm8, %v14896_v24 }
 0x735   : > { %v4768_v25 = vpop.f32.mrf.mxu0 }
 0x736   : > { %v13110_v9 = vadd.f32 %v4768_v25, %v12959_v51  ;;  %v5124_v0 = vpop.f32.mrf.mxu2  ;;  %v5413_v6 = vpop.f32.mrf.mxu3 }
 0x737   : > { %v5201_v15 = vadd.f32 %v5124_v0, %v12921_v45  ;;  %v13113_v37 = vadd.f32 %v5413_v6, %v5200_v35  ;;  %v14900_v35 = vld [vmem:[#allocation68_spill] sm:$0xff] }
 0x738   : > { %14897 = vst [vmem:[#allocation69_spill] sm:$0xff] %v13110_v9  ;;  %v5001_v29 = vpop.f32.mrf.mxu1  ;;  %9166 = vmatmul.msk.bf16.gmra.mxu0 %vm3209_vm8, %v14898_v23 }
 0x739   : > { %v13117_v19 = vadd.f32 %v5001_v29, %v4809_v49 }
 0x73b   : > { %9114 = vmatmul.msk.bf16.gmra.mxu2 %vm3209_vm8, %v14873_v5 }
 0x73d   : > { %v4770_v27 = vpop.f32.mrf.mxu0 }
 0x73e   : > { %v13122_v32 = vadd.f32 %v4770_v27, %v12973_v54  ;;  %v5127_v51 = vpop.f32.mrf.mxu2  ;;  %v5415_v20 = vpop.f32.mrf.mxu3  ;;  %v14902_v54 = vld [vmem:[#allocation31_spill] sm:$0xff] }
 0x73f   : > { %v5202_v24 = vadd.f32 %v5127_v51, %v12933_v62  ;;  %v13125_v45 = vadd.f32 %v5415_v20, %v5201_v15  ;;  %v14904_v51 = vld [vmem:[#allocation72_spill] sm:$0xff] }
 0x740   : > { %14899 = vst [vmem:[#allocation42_spill] sm:$0xff] %v13122_v32 }
 0x743   : > { %9144 = vmatmul.msk.bf16.gmra.mxu3 %vm3209_vm8, %v14900_v35 }
 0x745   : > { %v4773_v25 = vpop.f32.mrf.mxu0 }
 0x746   : > { %v13130_v49 = vadd.f32 %v4773_v25, %v12983_v41  ;;  %v5129_v0 = vpop.f32.mrf.mxu2  ;;  %v5418_v6 = vpop.f32.mrf.mxu3 }
 0x747   : > { %v5203_v5 = vadd.f32 %v5129_v0, %v12948_v16  ;;  %v13133_v29 = vadd.f32 %v5418_v6, %v5202_v24 }
 0x748   : > { %14901 = vst [vmem:[#allocation16_spill] sm:$0xff] %v13130_v49  ;;  %9167 = vmatmul.msk.bf16.gmra.mxu0 %vm3209_vm8, %v14902_v54 }
 0x74b   : > { %9115 = vmatmul.msk.bf16.gmra.mxu2 %vm3209_vm8, %v14875_v50  ;;  %v14906_v50 = vld [vmem:[#allocation41_spill] sm:$0xff] }
 0x74d   : > { %v4775_v62 = vpop.f32.mrf.mxu0 }
 0x74e   : > { %v13140_v15 = vadd.f32 %v4775_v62, %v12997_v52  ;;  %v13142_v23 = vpop.f32.mrf.mxu2  ;;  %v5420_v41 = vpop.f32.mrf.mxu3 }
 0x74f   : > { %v13144_v27 = vadd.f32 %v5420_v41, %v5203_v5  ;;  %v14909_v41 = vld [vmem:[#allocation46_spill] sm:$0xff] }
 0x750   : > { %14903 = vst [vmem:[#allocation47_spill] sm:$0xff] %v13140_v15 }
 0x753   : > { %9145 = vmatmul.msk.bf16.gmra.mxu3 %vm3209_vm8, %v14904_v51  ;;  %v13186_v51 = vld [vmem:[%s14595_s5] ss:$0 sm:$0xff] }
 0x755   : > { %v4778_v16 = vpop.f32.mrf.mxu0 }
 0x756   : > { %v13149_v20 = vadd.f32 %v4778_v16, %v13005_v34  ;;  %v13151_v24 = vpop.f32.mrf.mxu2  ;;  %v13153_v35 = vpop.f32.mrf.mxu3  ;;  %v13171_v34 = vld [vmem:[%s14908_s4] ss:$0 sm:$0xff] }
 0x758   : > { %14905 = vst [vmem:[#allocation27_spill] sm:$0xff] %v13149_v20  ;;  %9168 = vmatmul.msk.bf16.gmra.mxu0 %vm3209_vm8, %v14906_v50 }
 0x75b   : > { %9116 = vmatmul.msk.bf16.gmra.mxu2 %vm3209_vm8, %v12545_v18 }
 0x75d   : > { %v4780_v52 = vpop.f32.mrf.mxu0 }
 0x75e   : > { %v13160_v25 = vadd.f32 %v4780_v52, %v13018_v1  ;;  %v13162_v0 = vpop.f32.mrf.mxu2  ;;  %v13164_v6 = vpop.f32.mrf.mxu3 }
 0x760   : > { %14907 = vst [vmem:[#allocation51_spill] sm:$0xff] %v13160_v25 }
 0x763   : > { %9146 = vmatmul.msk.bf16.gmra.mxu3 %vm3209_vm8, %v12560_v39 }
 0x765   : > { %v5636_v5 = vpop.f32.mrf.mxu0 }
 0x766   : > { %v5726_v54 = vadd.f32 %v5636_v5, %v13027_v26  ;;  %v13174_v18 = vpop.f32.mrf.mxu2  ;;  %v13176_v62 = vpop.f32.mrf.mxu3 }
 0x768   : > { %v5766_v1 = vadd.f32 %v13171_v34, %v5726_v54  ;;  %9169 = vmatmul.msk.bf16.gmra.mxu0 %vm3209_vm8, %v14909_v41  ;;  %v13197_v54 = vld [vmem:[%s14596_s6] ss:$0 sm:$0xff] }
 0x769   : > { %v14910_v41 = vld [vmem:[#allocation75_spill] sm:$0xff] }
 0x76a   : > { %v5802_v39 = vmax.f32 %v5766_v1, 0.0 }
 0x76b   : > { %9117 = vmatmul.msk.bf16.gmra.mxu2 %vm3209_vm8, %v12593_v8 }
 0x76c   : > { %v5842_v5 = vmul.f32 %v13186_v51, %v5802_v39 }
 0x76d   : > { %v5638_v16 = vpop.f32.mrf.mxu0 }
 0x76e   : > { %v5727_v26 = vadd.f32 %v5638_v16, %v13041_v12  ;;  %v13189_v50 = vpop.f32.mrf.mxu2  ;;  %v13191_v52 = vpop.f32.mrf.mxu3  ;;  %v13203_v25 = vadd.f32 %v13197_v54, %v5842_v5  ;;  %v14911_v5 = vld [vmem:[#allocation50_spill] sm:$0xff] }
 0x770   : > { %v5767_v8 = vadd.f32 %v13171_v34, %v5727_v26  ;;  %v5953_v26 = vrot.slane %v13203_v25, 1 }
 0x772   : > { %v5803_v1 = vmax.f32 %v5767_v8, 0.0 }
 0x773   : > { %9147 = vmatmul.msk.bf16.gmra.mxu3 %vm3209_vm8, %v14910_v41 }
 0x774   : > { %v5843_v12 = vmul.f32 %v13186_v51, %v5803_v1 }
 0x775   : > { %v5641_v16 = vpop.f32.mrf.mxu0 }
 0x776   : > { %v13207_v20 = vadd.f32 %v13197_v54, %v5843_v12  ;;  %v5728_v39 = vadd.f32 %v5641_v16, %v13049_v28  ;;  %v13210_v15 = vpop.f32.mrf.mxu2  ;;  %v13212_v49 = vpop.f32.mrf.mxu3  ;;  %v14912_v12 = vld [vmem:[#allocation44_spill] sm:$0xff] }
 0x778   : > { %v5954_v8 = vrot.slane %v13207_v20, 1  ;;  %v5768_v41 = vadd.f32 %v13171_v34, %v5728_v39  ;;  %9170 = vmatmul.msk.bf16.gmra.mxu0 %vm3209_vm8, %v14911_v5 }
 0x77a   : > { %v5804_v1 = vmax.f32 %v5768_v41, 0.0  ;;  %v5955_v32 = vsel %vm1161_vm2, %v5953_v26, %v5954_v8 }
 0x77b   : > { %9118 = vmatmul.msk.bf16.gmra.mxu2 %vm3209_vm8, %v14912_v12  ;;  %v6054_v28 = vmax.f32 %v13203_v25, %v5955_v32  ;;  %v14913_v12 = vld [vmem:[#allocation28_spill] sm:$0xff] }
 0x77c   : > { %v5844_v16 = vmul.f32 %v13186_v51, %v5804_v1 }
 0x77d   : > { %v5643_v9 = vpop.f32.mrf.mxu0 }
 0x77e   : > { %v5884_v2 = vadd.f32 %v13197_v54, %v5844_v16  ;;  %v5729_v53 = vadd.f32 %v5643_v9, %v13061_v13  ;;  %v13226_v61 = vpop.f32.mrf.mxu2  ;;  %v13228_v39 = vpop.f32.mrf.mxu3 }
 0x780   : > { %v5956_v5 = vrot.slane %v5884_v2, 1  ;;  %v5769_v41 = vadd.f32 %v13171_v34, %v5729_v53 }
 0x782   : > { %v5805_v26 = vmax.f32 %v5769_v41, 0.0  ;;  %v5957_v11 = vsel %vm1161_vm2, %v5954_v8, %v5956_v5  ;;  %v14915_v8 = vld [vmem:[#allocation54_spill] sm:$0xff] }
 0x783   : > { %9148 = vmatmul.msk.bf16.gmra.mxu3 %vm3209_vm8, %v14913_v12  ;;  %v6055_v32 = vmax.f32 %v13207_v20, %v5957_v11 }
 0x784   : > { %v5845_v25 = vmul.f32 %v13186_v51, %v5805_v26 }
 0x785   : > { %v5646_v1 = vpop.f32.mrf.mxu0 }
 0x786   : > { %v5885_v13 = vadd.f32 %v13197_v54, %v5845_v25  ;;  %v5730_v9 = vadd.f32 %v5646_v1, %v13069_v30  ;;  %v13238_v16 = vpop.f32.mrf.mxu2  ;;  %v13240_v46 = vpop.f32.mrf.mxu3 }
 0x787   : > { %14914 = vst [vmem:[#allocation26_spill] sm:$0xff] %v13238_v16 }
 0x788   : > { %v5958_v53 = vrot.slane %v5885_v13, 1  ;;  %v5770_v41 = vadd.f32 %v13171_v34, %v5730_v9  ;;  %9171 = vmatmul.msk.bf16.gmra.mxu0 %vm3209_vm8, %v14915_v8 }
 0x78a   : > { %v5806_v12 = vmax.f32 %v5770_v41, 0.0  ;;  %v5959_v11 = vsel %vm1161_vm2, %v5956_v5, %v5958_v53 }
 0x78b   : > { %v13246_v20 = vmax.f32 %v5884_v2, %v5959_v11 }
 0x78c   : > { %v5846_v26 = vmul.f32 %v13186_v51, %v5806_v12 }
 0x78d   : > { %v5648_v25 = vpop.f32.mrf.mxu0 }
 0x78e   : > { %v5886_v30 = vadd.f32 %v13197_v54, %v5846_v26  ;;  %v5731_v1 = vadd.f32 %v5648_v25, %v13081_v31  ;;  %v5152_v42 = vpop.f32.mrf.mxu2  ;;  %v13251_v40 = vpop.f32.mrf.mxu3  ;;  %v6135_v26 = vrot.slane %v13246_v20, 2 }
 0x78f   : > { %14916 = vst [vmem:[#allocation30_spill] sm:$0xff] %v13251_v40  ;;  %v5212_v9 = vadd.f32 %v5152_v42, %v13053_v60 }
 0x790   : > { %v5960_v48 = vrot.slane %v5886_v30, 1  ;;  %v5771_v8 = vadd.f32 %v13171_v34, %v5731_v1 }
 0x792   : > { %v5807_v41 = vmax.f32 %v5771_v8, 0.0  ;;  %v5961_v5 = vsel %vm1161_vm2, %v5958_v53, %v5960_v48 }
 0x793   : > { %v13256_v2 = vmax.f32 %v5885_v13, %v5961_v5 }
 0x794   : > { %v5847_v12 = vmul.f32 %v13186_v51, %v5807_v41  ;;  %v14918_v41 = vld [vmem:[#allocation58_spill] sm:$0xff] }
 0x795   : > { %v5651_v11 = vpop.f32.mrf.mxu0  ;;  %v6136_v31 = vrot.slane %v13256_v2, 2 }
 0x796   : > { %v5887_v25 = vadd.f32 %v13197_v54, %v5847_v12  ;;  %v5732_v40 = vadd.f32 %v5651_v11, %v13091_v47  ;;  %v13263_v60 = vpop.f32.mrf.mxu2  ;;  %v5443_v42 = vpop.f32.mrf.mxu3 }
 0x797   : > { %14917 = vst [vmem:[#allocation55_spill] sm:$0xff] %v13263_v60  ;;  %v13265_v1 = vadd.f32 %v5443_v42, %v5212_v9  ;;  %v6137_v53 = vsel %vm1827_vm5, %v6135_v26, %v6136_v31 }
 0x798   : > { %v5962_v13 = vrot.slane %v5887_v25, 1  ;;  %v5772_v8 = vadd.f32 %v13171_v34, %v5732_v40  ;;  %9172 = vmatmul.msk.bf16.gmra.mxu0 %vm3209_vm8, %v14918_v41  ;;  %v13271_v5 = vmax.f32 %v6054_v28, %v6137_v53 }
 0x79a   : > { %14919 = vst [vmem:[#allocation45_spill] sm:$0xff] %v13271_v5  ;;  %v5808_v16 = vmax.f32 %v5772_v8, 0.0  ;;  %v5963_v12 = vsel %vm1161_vm2, %v5960_v48, %v5962_v13 }
 0x79b   : > { %v13274_v59 = vmax.f32 %v5886_v30, %v5963_v12 }
 0x79c   : > { %v5848_v47 = vmul.f32 %v13186_v51, %v5808_v16 }
 0x79d   : > { %v5653_v11 = vpop.f32.mrf.mxu0  ;;  %v6138_v9 = vrot.slane %v13274_v59, 2 }
 0x79e   : > { %v5888_v26 = vadd.f32 %v13197_v54, %v5848_v47  ;;  %v5733_v42 = vadd.f32 %v5653_v11, %v13103_v57  ;;  %v5157_v40 = vpop.f32.mrf.mxu2  ;;  %v13280_v60 = vpop.f32.mrf.mxu3 }
 0x79f   : > { %v5214_v28 = vadd.f32 %v5157_v40, %v13073_v58  ;;  %v6139_v53 = vsel %vm1827_vm5, %v6136_v31, %v6138_v9 }
 0x7a0   : > { %v5964_v8 = vrot.slane %v5888_v26, 1  ;;  %v5773_v48 = vadd.f32 %v13171_v34, %v5733_v42  ;;  %v13285_v30 = vmax.f32 %v6055_v32, %v6139_v53 }
 0x7a2   : > { %14920 = vst [vmem:[#allocation34_spill] sm:$0xff] %v13285_v30  ;;  %v5809_v16 = vmax.f32 %v5773_v48, 0.0  ;;  %v5965_v41 = vsel %vm1161_vm2, %v5962_v13, %v5964_v8 }
 0x7a3   : > { %v13290_v47 = vmax.f32 %v5887_v25, %v5965_v41  ;;  %v14921_v41 = vld [vmem:[#allocation62_spill] sm:$0xff] }
 0x7a4   : > { %v5849_v57 = vmul.f32 %v13186_v51, %v5809_v16 }
 0x7a5   : > { %v5656_v11 = vpop.f32.mrf.mxu0  ;;  %v6140_v58 = vrot.slane %v13290_v47, 2 }
 0x7a6   : > { %v5889_v31 = vadd.f32 %v13197_v54, %v5849_v57  ;;  %v5734_v40 = vadd.f32 %v5656_v11, %v13113_v37  ;;  %v13296_v42 = vpop.f32.mrf.mxu2  ;;  %v5448_v32 = vpop.f32.mrf.mxu3 }
 0x7a7   : > { %v13298_v53 = vadd.f32 %v5448_v32, %v5214_v28  ;;  %v6141_v13 = vsel %vm1827_vm5, %v6138_v9, %v6140_v58 }
 0x7a8   : > { %v5966_v48 = vrot.slane %v5889_v31, 1  ;;  %v5774_v25 = vadd.f32 %v13171_v34, %v5734_v40  ;;  %9173 = vmatmul.msk.bf16.gmra.mxu0 %vm3209_vm8, %v14921_v41  ;;  %v6238_v16 = vmax.f32 %v13246_v20, %v6141_v13 }
 0x7aa   : > { %v5810_v12 = vmax.f32 %v5774_v25, 0.0  ;;  %v5967_v57 = vsel %vm1161_vm2, %v5964_v8, %v5966_v48 }
 0x7ab   : > { %v13306_v5 = vmax.f32 %v5888_v26, %v5967_v57 }
 0x7ac   : > { %v5850_v37 = vmul.f32 %v13186_v51, %v5810_v12 }
 0x7ad   : > { %v5658_v11 = vpop.f32.mrf.mxu0  ;;  %v6142_v28 = vrot.slane %v13306_v5, 2 }
 0x7ae   : > { %v5890_v9 = vadd.f32 %v13197_v54, %v5850_v37  ;;  %v5735_v32 = vadd.f32 %v5658_v11, %v13125_v45  ;;  %v5162_v40 = vpop.f32.mrf.mxu2  ;;  %v13312_v30 = vpop.f32.mrf.mxu3 }
 0x7af   : > { %14922 = vst [vmem:[#allocation59_spill] sm:$0xff] %v13312_v30  ;;  %v5216_v41 = vadd.f32 %v5162_v40, %v13095_v3  ;;  %v6143_v20 = vsel %vm1827_vm5, %v6140_v58, %v6142_v28 }
 0x7b0   : > { %v5968_v13 = vrot.slane %v5890_v9, 1  ;;  %v5775_v26 = vadd.f32 %v13171_v34, %v5735_v32  ;;  %v6239_v8 = vmax.f32 %v13256_v2, %v6143_v20  ;;  %v14923_v20 = vld [vmem:[#allocation66_spill] sm:$0xff] }
 0x7b2   : > { %v5811_v12 = vmax.f32 %v5775_v26, 0.0  ;;  %v5969_v25 = vsel %vm1161_vm2, %v5966_v48, %v5968_v13  ;;  %v13319_v57 = vpack.c.bf16 %v6239_v8, %v6238_v16 }
 0x7b3   : > { %v13321_v37 = vmax.f32 %v5889_v31, %v5969_v25 }
 0x7b4   : > { %v5851_v45 = vmul.f32 %v13186_v51, %v5811_v12 }
 0x7b5   : > { %v5661_v11 = vpop.f32.mrf.mxu0  ;;  %v6144_v30 = vrot.slane %v13321_v37, 2 }
 0x7b6   : > { %v5891_v3 = vadd.f32 %v13197_v54, %v5851_v45  ;;  %v5736_v58 = vadd.f32 %v5661_v11, %v13133_v29  ;;  %v13327_v40 = vpop.f32.mrf.mxu2  ;;  %v5453_v32 = vpop.f32.mrf.mxu3 }
 0x7b7   : > { %v13329_v2 = vadd.f32 %v5453_v32, %v5216_v41  ;;  %v6145_v48 = vsel %vm1827_vm5, %v6142_v28, %v6144_v30 }
 0x7b8   : > { %v5970_v16 = vrot.slane %v5891_v3, 1  ;;  %v5776_v31 = vadd.f32 %v13171_v34, %v5736_v58  ;;  %9174 = vmatmul.msk.bf16.gmra.mxu0 %vm3209_vm8, %v14923_v20  ;;  %v6240_v26 = vmax.f32 %v13274_v59, %v6145_v48 }
 0x7ba   : > { %v5812_v8 = vmax.f32 %v5776_v31, 0.0  ;;  %v5971_v12 = vsel %vm1161_vm2, %v5968_v13, %v5970_v16 }
 0x7bb   : > { %v13337_v25 = vmax.f32 %v5890_v9, %v5971_v12  ;;  %v5038_v9 = vadd.f32 %v12963_v22, %v12902_v55 }
 0x7bc   : > { %v5852_v29 = vmul.f32 %v13186_v51, %v5812_v8 }
 0x7bd   : > { %v5663_v45 = vpop.f32.mrf.mxu0  ;;  %v6146_v41 = vrot.slane %v13337_v25, 2  ;;  %v5204_v8 = vadd.f32 %v13142_v23, %v5038_v9 }
 0x7be   : > { %v5892_v28 = vadd.f32 %v13197_v54, %v5852_v29  ;;  %v5737_v11 = vadd.f32 %v5663_v45, %v13144_v27  ;;  %v5167_v58 = vpop.f32.mrf.mxu2  ;;  %v13343_v32 = vpop.f32.mrf.mxu3 }
 0x7bf   : > { %v5218_v20 = vadd.f32 %v5167_v58, %v13117_v19  ;;  %v6147_v59 = vsel %vm1827_vm5, %v6144_v30, %v6146_v41  ;;  %v5495_v19 = vadd.f32 %v13153_v35, %v5204_v8  ;;  %v14924_v35 = vld [vmem:[#allocation71_spill] sm:$0xff] }
 0x7c0   : > { %v5972_v13 = vrot.slane %v5892_v28, 1  ;;  %v5777_v48 = vadd.f32 %v13171_v34, %v5737_v11  ;;  %v6241_v31 = vmax.f32 %v13290_v47, %v6147_v59 }
 0x7c2   : > { %v5813_v12 = vmax.f32 %v5777_v48, 0.0  ;;  %v5973_v27 = vsel %vm1161_vm2, %v5970_v16, %v5972_v13  ;;  %v13353_v29 = vpack.c.bf16 %v6241_v31, %v6240_v26  ;;  %v5039_v16 = vadd.f32 %v12975_v43, %v12916_v33 }
 0x7c3   : > { %v13355_v45 = vmax.f32 %v5891_v3, %v5973_v27 }
 0x7c4   : > { %v5853_v30 = vmul.f32 %v13186_v51, %v5813_v12  ;;  %v5205_v48 = vadd.f32 %v13151_v24, %v5039_v16  ;;  %v5040_v24 = vadd.f32 %v12987_v44, %v12926_v56 }
 0x7c5   : > { %v5666_v58 = vpop.f32.mrf.mxu0  ;;  %v6148_v55 = vrot.slane %v13355_v45, 2 }
 0x7c6   : > { %v5893_v22 = vadd.f32 %v13197_v54, %v5853_v30  ;;  %v5738_v11 = vadd.f32 %v5666_v58, %v5495_v19  ;;  %v5458_v47 = vpop.f32.mrf.mxu3 }
 0x7c7   : > { %v13361_v59 = vadd.f32 %v5458_v47, %v5218_v20  ;;  %v6149_v23 = vsel %vm1827_vm5, %v6146_v41, %v6148_v55  ;;  %v5496_v41 = vadd.f32 %v13164_v6, %v5205_v48  ;;  %v5206_v6 = vadd.f32 %v13162_v0, %v5040_v24 }
 0x7c8   : > { %v5974_v3 = vrot.slane %v5893_v22, 1  ;;  %v5778_v26 = vadd.f32 %v13171_v34, %v5738_v11  ;;  %9175 = vmatmul.msk.bf16.gmra.mxu0 %vm3209_vm8, %v14924_v35  ;;  %v6242_v9 = vmax.f32 %v13306_v5, %v6149_v23  ;;  %v5041_v0 = vadd.f32 %v12999_v10, %v12940_v36 }
 0x7c9   : > { %v5497_v16 = vadd.f32 %v13176_v62, %v5206_v6 }
 0x7ca   : > { %v5814_v31 = vmax.f32 %v5778_v26, 0.0  ;;  %v5975_v8 = vsel %vm1161_vm2, %v5972_v13, %v5974_v3  ;;  %v5207_v48 = vadd.f32 %v13174_v18, %v5041_v0  ;;  %v5042_v18 = vadd.f32 %v13007_v17, %v12956_v63 }
 0x7cb   : > { %v13372_v20 = vmax.f32 %v5892_v28, %v5975_v8 }
 0x7cc   : > { %v5854_v12 = vmul.f32 %v13186_v51, %v5814_v31 }
 0x7cd   : > { %v5668_v33 = vpop.f32.mrf.mxu0  ;;  %v6150_v43 = vrot.slane %v13372_v20, 2 }
 0x7ce   : > { %v5894_v27 = vadd.f32 %v13197_v54, %v5854_v12  ;;  %v5739_v19 = vadd.f32 %v5668_v33, %v5496_v41  ;;  %v5498_v12 = vadd.f32 %v13191_v52, %v5207_v48  ;;  %v5208_v52 = vadd.f32 %v13189_v50, %v5042_v18 }
 0x7cf   : > { %v6151_v30 = vsel %vm1827_vm5, %v6148_v55, %v6150_v43  ;;  %v5043_v50 = vadd.f32 %v13021_v7, %v12970_v38 }
 0x7d0   : > { %v5976_v5 = vrot.slane %v5894_v27, 1  ;;  %v5779_v13 = vadd.f32 %v13171_v34, %v5739_v19  ;;  %v6243_v28 = vmax.f32 %v13321_v37, %v6151_v30 }
 0x7d2   : > { %v5815_v58 = vmax.f32 %v5779_v13, 0.0  ;;  %v5977_v11 = vsel %vm1161_vm2, %v5974_v3, %v5976_v5  ;;  %v13385_v47 = vpack.c.bf16 %v6243_v28, %v6242_v9 }
 0x7d3   : > { %v13387_v23 = vmax.f32 %v5893_v22, %v5977_v11  ;;  %v14925_v22 = vld [vmem:[#allocation73_spill] sm:$0xff] }
 0x7d4   : > { %v5855_v55 = vmul.f32 %v13186_v51, %v5815_v58  ;;  %v5499_v58 = vadd.f32 %v13212_v49, %v5208_v52 }
 0x7d5   : > { %v5671_v26 = vpop.f32.mrf.mxu0  ;;  %v6152_v56 = vrot.slane %v13387_v23, 2 }
 0x7d6   : > { %v5895_v44 = vadd.f32 %v13197_v54, %v5855_v55  ;;  %v5740_v35 = vadd.f32 %v5671_v26, %v5497_v16 }
 0x7d7   : > { %v6153_v37 = vsel %vm1827_vm5, %v6150_v43, %v6152_v56 }
 0x7d8   : > { %v5978_v3 = vrot.slane %v5895_v44, 1  ;;  %v5780_v9 = vadd.f32 %v13171_v34, %v5740_v35  ;;  %9176 = vmatmul.msk.bf16.gmra.mxu0 %vm3209_vm8, %v14925_v22  ;;  %v6244_v62 = vmax.f32 %v13337_v25, %v6153_v37  ;;  %v14926_v35 = vld [vmem:[#allocation74_spill] sm:$0xff] }
 0x7da   : > { %v5816_v31 = vmax.f32 %v5780_v9, 0.0  ;;  %v5979_v8 = vsel %vm1161_vm2, %v5976_v5, %v5978_v3 }
 0x7db   : > { %v13402_v41 = vmax.f32 %v5894_v27, %v5979_v8 }
 0x7dc   : > { %v5856_v33 = vmul.f32 %v13186_v51, %v5816_v31 }
 0x7dd   : > { %v5673_v36 = vpop.f32.mrf.mxu0  ;;  %v6154_v10 = vrot.slane %v13402_v41, 2 }
 0x7de   : > { %v5896_v43 = vadd.f32 %v13197_v54, %v5856_v33  ;;  %v5741_v19 = vadd.f32 %v5673_v36, %v5498_v12 }
 0x7df   : > { %v6155_v30 = vsel %vm1827_vm5, %v6152_v56, %v6154_v10 }
 0x7e0   : > { %v5980_v25 = vrot.slane %v5896_v43, 1  ;;  %v5781_v24 = vadd.f32 %v13171_v34, %v5741_v19  ;;  %v6245_v27 = vmax.f32 %v13355_v45, %v6155_v30 }
 0x7e2   : > { %v5817_v5 = vmax.f32 %v5781_v24, 0.0  ;;  %v5981_v13 = vsel %vm1161_vm2, %v5978_v3, %v5980_v25  ;;  %v13415_v28 = vpack.c.bf16 %v6245_v27, %v6244_v62 }
 0x7e3   : > { %v6067_v6 = vmax.f32 %v5895_v44, %v5981_v13  ;;  %v5209_v44 = vadd.f32 %v13210_v15, %v5043_v50  ;;  %v5044_v15 = vadd.f32 %v13029_v21, %v12980_v4  ;;  %v14929_v13 = vld [vmem:[#allocation26_spill] sm:$0xff] }
 0x7e4   : > { %v5857_v11 = vmul.f32 %v13186_v51, %v5817_v5  ;;  %v14928_v5 = vld [vmem:[#allocation33_spill] sm:$0xff] }
 0x7e5   : > { %v5676_v16 = vpop.f32.mrf.mxu0  ;;  %v6156_v55 = vrot.slane %v6067_v6, 2  ;;  %v5500_v9 = vadd.f32 %v13228_v39, %v5209_v44  ;;  %v5210_v39 = vadd.f32 %v13226_v61, %v5044_v15 }
 0x7e6   : > { %v5897_v63 = vadd.f32 %v13197_v54, %v5857_v11  ;;  %v5742_v17 = vadd.f32 %v5676_v16, %v5499_v58 }
 0x7e7   : > { %v6157_v26 = vsel %vm1827_vm5, %v6154_v10, %v6156_v55  ;;  %v5501_v19 = vadd.f32 %v13240_v46, %v5210_v39 }
 0x7e8   : > { %v5982_v45 = vrot.slane %v5897_v63, 1  ;;  %v5782_v56 = vadd.f32 %v13171_v34, %v5742_v17  ;;  %9177 = vmatmul.msk.bf16.gmra.mxu0 %vm3209_vm8, %v14926_v35  ;;  %v6246_v49 = vmax.f32 %v13372_v20, %v6157_v26 }
 0x7ea   : > { %v5818_v37 = vmax.f32 %v5782_v56, 0.0  ;;  %v5983_v0 = vsel %vm1161_vm2, %v5980_v25, %v5982_v45 }
 0x7eb   : > { %v13429_v3 = vmax.f32 %v5896_v43, %v5983_v0 }
 0x7ec   : > { %v5858_v22 = vmul.f32 %v13186_v51, %v5818_v37 }
 0x7ed   : > { %v5678_v38 = vpop.f32.mrf.mxu0  ;;  %v6158_v7 = vrot.slane %v13429_v3, 2 }
 0x7ee   : > { %v5898_v62 = vadd.f32 %v13197_v54, %v5858_v22  ;;  %v5743_v48 = vadd.f32 %v5678_v38, %v5500_v9 }
 0x7ef   : > { %v6159_v31 = vsel %vm1827_vm5, %v6156_v55, %v6158_v7 }
 0x7f0   : > { %v5984_v20 = vrot.slane %v5898_v62, 1  ;;  %v5783_v8 = vadd.f32 %v13171_v34, %v5743_v48  ;;  %v6247_v12 = vmax.f32 %v13387_v23, %v6159_v31  ;;  %v14927_v23 = vld [vmem:[#allocation13_spill] sm:$0xff] }
 0x7f1   : > { %v5045_v61 = vadd.f32 %v14927_v23, %v12994_v14 }
 0x7f2   : > { %v5819_v33 = vmax.f32 %v5783_v8, 0.0  ;;  %v5985_v36 = vsel %vm1161_vm2, %v5982_v45, %v5984_v20  ;;  %v13442_v10 = vpack.c.bf16 %v6247_v12, %v6246_v49  ;;  %v14932_v8 = vld [vmem:[#allocation20_spill] sm:$0xff] }
 0x7f3   : > { %v6069_v43 = vmax.f32 %v5897_v63, %v5985_v36  ;;  %v5211_v58 = vadd.f32 %v14929_v13, %v5045_v61  ;;  %v14930_v63 = vld [vmem:[#allocation30_spill] sm:$0xff]  ;;  %v14933_v36 = vld [vmem:[#allocation55_spill] sm:$0xff] }
 0x7f4   : > { %v5859_v30 = vmul.f32 %v13186_v51, %v5819_v33 }
 0x7f5   : > { %v5681_v18 = vpop.f32.mrf.mxu0  ;;  %v6160_v25 = vrot.slane %v6069_v43, 2  ;;  %v5502_v17 = vadd.f32 %v14930_v63, %v5211_v58 }
 0x7f6   : > { %v5899_v4 = vadd.f32 %v13197_v54, %v5859_v30  ;;  %v5744_v21 = vadd.f32 %v5681_v18, %v5501_v19 }
 0x7f7   : > { %v6161_v24 = vsel %vm1827_vm5, %v6158_v7, %v6160_v25 }
 0x7f8   : > { %v5986_v27 = vrot.slane %v5899_v4, 1  ;;  %v5784_v52 = vadd.f32 %v13171_v34, %v5744_v21  ;;  %9178 = vmatmul.msk.bf16.gmra.mxu0 %vm3209_vm8, %v14928_v5  ;;  %v6248_v46 = vmax.f32 %v13402_v41, %v6161_v24 }
 0x7fa   : > { %v5987_v11 = vsel %vm1161_vm2, %v5984_v20, %v5986_v27  ;;  %v5820_v16 = vmax.f32 %v5784_v52, 0.0  ;;  %v14931_v20 = vld [vmem:[#allocation38_spill] sm:$0xff] }
 0x7fb   : > { %v13456_v55 = vmax.f32 %v5898_v62, %v5987_v11  ;;  %v5047_v12 = vadd.f32 %v14932_v8, %v14931_v20 }
 0x7fc   : > { %v5860_v26 = vmul.f32 %v13186_v51, %v5820_v16 }
 0x7fd   : > { %v5683_v14 = vpop.f32.mrf.mxu0  ;;  %v6162_v50 = vrot.slane %v13456_v55, 2  ;;  %v5213_v19 = vadd.f32 %v14933_v36, %v5047_v12 }
 0x7fe   : > { %v5900_v45 = vadd.f32 %v13197_v54, %v5860_v26  ;;  %v5745_v56 = vadd.f32 %v5683_v14, %v5502_v17 }
 0x7ff   : > { %v6163_v35 = vsel %vm1827_vm5, %v6160_v25, %v6162_v50 }
 0x800   : > { %v5988_v41 = vrot.slane %v5900_v45, 1  ;;  %v5785_v49 = vadd.f32 %v13171_v34, %v5745_v56  ;;  %v6249_v44 = vmax.f32 %v6067_v6, %v6163_v35 }
 0x802   : > { %v5989_v37 = vsel %vm1161_vm2, %v5986_v27, %v5988_v41  ;;  %v5821_v0 = vmax.f32 %v5785_v49, 0.0  ;;  %v6302_v9 = vpack.c.bf16 %v6249_v44, %v6248_v46 }
 0x803   : > { %v6071_v22 = vmax.f32 %v5899_v4, %v5989_v37  ;;  %v5504_v4 = vadd.f32 %v13280_v60, %v5213_v19 }
 0x804   : > { %v5861_v38 = vmul.f32 %v13186_v51, %v5821_v0 }
 0x805   : > { %v5686_v7 = vpop.f32.mrf.mxu0  ;;  %v6164_v62 = vrot.slane %v6071_v22, 2 }
 0x806   : > { %v5901_v48 = vadd.f32 %v13197_v54, %v5861_v38  ;;  %v5746_v31 = vadd.f32 %v5686_v7, %v13265_v1  ;;  %v14936_v38 = vld [vmem:[#allocation59_spill] sm:$0xff] }
 0x807   : > { %v6165_v15 = vsel %vm1827_vm5, %v6162_v50, %v6164_v62  ;;  %v14934_v50 = vld [vmem:[#allocation29_spill] sm:$0xff] }
 0x808   : > { %v5990_v39 = vrot.slane %v5901_v48, 1  ;;  %v5786_v6 = vadd.f32 %v13171_v34, %v5746_v31  ;;  %v6250_v33 = vmax.f32 %v13429_v3, %v6165_v15 }
 0x80a   : > { %v5991_v30 = vsel %vm1161_vm2, %v5988_v41, %v5990_v39  ;;  %v5822_v18 = vmax.f32 %v5786_v6, 0.0 }
 0x80b   : > { %v13475_v25 = vmax.f32 %v5900_v45, %v5991_v30 }
 0x80c   : > { %v5862_v1 = vmul.f32 %v13186_v51, %v5822_v18 }
 0x80d   : > { %v5688_v21 = vpop.f32.mrf.mxu0  ;;  %v6166_v24 = vrot.slane %v13475_v25, 2 }
 0x80e   : > { %v5902_v23 = vadd.f32 %v13197_v54, %v5862_v1  ;;  %v5747_v61 = vadd.f32 %v5688_v21, %v5504_v4  ;;  %v14937_v4 = vld [vmem:[#allocation35_spill] sm:$0xff]  ;;  %v14938_v1 = vld [vmem:[#allocation17_spill] sm:$0xff] }
 0x80f   : > { %v6167_v27 = vsel %vm1827_vm5, %v6164_v62, %v6166_v24  ;;  %v5051_v21 = vadd.f32 %v14938_v1, %v14937_v4 }
 0x810   : > { %v5992_v3 = vrot.slane %v5902_v23, 1  ;;  %v5787_v52 = vadd.f32 %v13171_v34, %v5747_v61  ;;  %v6251_v5 = vmax.f32 %v6069_v43, %v6167_v27  ;;  %v14935_v43 = vld [vmem:[#allocation15_spill] sm:$0xff]  ;;  %v5460_v61 = vpop.f32.mrf.mxu3 }
 0x811   : > { %v5049_v45 = vadd.f32 %v14935_v43, %v14934_v50  ;;  %v5217_v27 = vadd.f32 %v13327_v40, %v5051_v21 }
 0x812   : > { %v5823_v46 = vmax.f32 %v5787_v52, 0.0  ;;  %v6303_v13 = vpack.c.bf16 %v6251_v5, %v6250_v33  ;;  %v5993_v58 = vsel %vm1161_vm2, %v5990_v39, %v5992_v3  ;;  %v5003_v33 = vpop.f32.mrf.mxu1 }
 0x813   : > { %v13484_v11 = vmax.f32 %v5901_v48, %v5993_v58  ;;  %v5215_v49 = vadd.f32 %v13296_v42, %v5049_v45  ;;  %v5508_v5 = vadd.f32 %v13343_v32, %v5217_v27 }
 0x814   : > { %v5863_v60 = vmul.f32 %v13186_v51, %v5823_v46  ;;  %6441 = vmatpush.bf16.msra.mxu1 %v6303_v13 }
 0x815   : > { %v5691_v16 = vpop.f32.mrf.mxu0  ;;  %v6168_v63 = vrot.slane %v13484_v11, 2 }
 0x816   : > { %v5903_v17 = vadd.f32 %v13197_v54, %v5863_v60  ;;  %v5748_v26 = vadd.f32 %v5691_v16, %v13298_v53  ;;  %v5506_v53 = vadd.f32 %v14936_v38, %v5215_v49 }
 0x817   : > { %v6169_v14 = vsel %vm1827_vm5, %v6166_v24, %v6168_v63 }
 0x818   : > { %v5994_v56 = vrot.slane %v5903_v17, 1  ;;  %v5788_v35 = vadd.f32 %v13171_v34, %v5748_v26  ;;  %6442 = vmatpush.bf16.msra.mxu1 %v6302_v9  ;;  %v6252_v41 = vmax.f32 %v13456_v55, %v6169_v14  ;;  %v14940_v26 = vld [vmem:[#allocation45_spill] sm:$0xff] }
 0x81a   : > { %v5824_v44 = vmax.f32 %v5788_v35, 0.0  ;;  %v5995_v37 = vsel %vm1161_vm2, %v5992_v3, %v5994_v56  ;;  %v5006_v60 = vpop.f32.mrf.mxu1 }
 0x81b   : > { %v13497_v0 = vmax.f32 %v5902_v23, %v5995_v37 }
 0x81c   : > { %v5864_v7 = vmul.f32 %v13186_v51, %v5824_v44  ;;  %6443 = vmatpush.bf16.msra.mxu1 %v13442_v10 }
 0x81d   : > { %v5693_v62 = vpop.f32.mrf.mxu0  ;;  %v6170_v48 = vrot.slane %v13497_v0, 2 }
 0x81e   : > { %v5904_v9 = vadd.f32 %v13197_v54, %v5864_v7  ;;  %v5749_v31 = vadd.f32 %v5693_v62, %v5506_v53  ;;  %v14942_v53 = vld [vmem:[#allocation36_spill] sm:$0xff] }
 0x81f   : > { %v6171_v55 = vsel %vm1827_vm5, %v6168_v63, %v6170_v48  ;;  %v5053_v7 = vadd.f32 %v5003_v33, %v14942_v53 }
 0x820   : > { %v5996_v42 = vrot.slane %v5904_v9, 1  ;;  %v5789_v15 = vadd.f32 %v13171_v34, %v5749_v31  ;;  %6444 = vmatpush.bf16.msra.mxu1 %v13415_v28  ;;  %v6253_v20 = vmax.f32 %v6071_v22, %v6171_v55  ;;  %v5169_v22 = vpop.f32.mrf.mxu2 }
 0x821   : > { %v5219_v55 = vadd.f32 %v5169_v22, %v5053_v7 }
 0x822   : > { %v5825_v8 = vmax.f32 %v5789_v15, 0.0  ;;  %v5997_v12 = vsel %vm1161_vm2, %v5994_v56, %v5996_v42  ;;  %v13508_v39 = vpack.c.bf16 %v6253_v20, %v6252_v41  ;;  %v5463_v56 = vpop.f32.mrf.mxu3  ;;  %v5008_v31 = vpop.f32.mrf.mxu1 }
 0x823   : > { %v13510_v10 = vmax.f32 %v5903_v17, %v5997_v12  ;;  %v14939_v17 = vld [vmem:[#allocation34_spill] sm:$0xff]  ;;  %v5510_v12 = vadd.f32 %v5460_v61, %v5219_v55 }
 0x824   : > { %v5865_v6 = vmul.f32 %v13186_v51, %v5825_v8  ;;  %6445 = vmatpush.bf16.msra.mxu1 %v13385_v47  ;;  %v14941_v14 = vpack.c.bf16 %v14939_v17, %v14940_v26 }
 0x825   : > { %v5696_v36 = vpop.f32.mrf.mxu0  ;;  %v6172_v19 = vrot.slane %v13510_v10, 2 }
 0x826   : > { %v5905_v30 = vadd.f32 %v13197_v54, %v5865_v6  ;;  %v5750_v28 = vadd.f32 %v5696_v36, %v13329_v2 }
 0x827   : > { %v6173_v18 = vsel %vm1827_vm5, %v6170_v48, %v6172_v19 }
 0x828   : > { %v5998_v24 = vrot.slane %v5905_v30, 1  ;;  %v5790_v23 = vadd.f32 %v13171_v34, %v5750_v28  ;;  %6446 = vmatpush.bf16.msra.mxu1 %v13353_v29  ;;  %v6254_v47 = vmax.f32 %v13475_v25, %v6173_v18  ;;  %v5172_v50 = vpop.f32.mrf.mxu2  ;;  %v14943_v28 = vld [vmem:[#allocation39_spill] sm:$0xff] }
 0x829   : > { %v5054_v22 = vadd.f32 %v5006_v60, %v14943_v28  ;;  %v14944_v60 = vld [vmem:[#allocation23_spill] sm:$0xff] }
 0x82a   : > { %v5826_v3 = vmax.f32 %v5790_v23, 0.0  ;;  %v5999_v52 = vsel %vm1161_vm2, %v5996_v42, %v5998_v24  ;;  %v5465_v6 = vpop.f32.mrf.mxu3  ;;  %v5011_v61 = vpop.f32.mrf.mxu1 }
 0x82b   : > { %v13525_v2 = vmax.f32 %v5904_v9, %v5999_v52  ;;  %v5220_v21 = vadd.f32 %v5172_v50, %v5054_v22 }
 0x82c   : > { %v5866_v46 = vmul.f32 %v13186_v51, %v5826_v3  ;;  %6447 = vmatpush.bf16.msra.mxu1 %v13319_v57 }
 0x82d   : > { %v5698_v13 = vpop.f32.mrf.mxu0  ;;  %v6174_v58 = vrot.slane %v13525_v2, 2  ;;  %v5511_v3 = vadd.f32 %v5463_v56, %v5220_v21 }
 0x82e   : > { %v5906_v29 = vadd.f32 %v13197_v54, %v5866_v46  ;;  %v5751_v25 = vadd.f32 %v5698_v13, %v5508_v5 }
 0x82f   : > { %v6175_v40 = vsel %vm1827_vm5, %v6172_v19, %v6174_v58 }
 0x830   : > { %v6000_v16 = vrot.slane %v5906_v29, 1  ;;  %v5791_v63 = vadd.f32 %v13171_v34, %v5751_v25  ;;  %6448 = vmatpush.bf16.msra.mxu1 %v14941_v14  ;;  %v6255_v32 = vmax.f32 %v13484_v11, %v6175_v40  ;;  %v5174_v20 = vpop.f32.mrf.mxu2  ;;  %v5055_v40 = vadd.f32 %v5008_v31, %v14944_v60 }
 0x832   : > { %v5827_v57 = vmax.f32 %v5791_v63, 0.0  ;;  %v6001_v43 = vsel %vm1161_vm2, %v5998_v24, %v6000_v16  ;;  %v13539_v45 = vpack.c.bf16 %v6255_v32, %v6254_v47  ;;  %v5221_v26 = vadd.f32 %v5174_v20, %v5055_v40  ;;  %v5013_v56 = vpop.f32.mrf.mxu1 }
 0x833   : > { %v13541_v35 = vmax.f32 %v5905_v30, %v6001_v43 }
 0x834   : > { %v5867_v41 = vmul.f32 %v13186_v51, %v5827_v57  ;;  %v5512_v57 = vadd.f32 %v5465_v6, %v5221_v26 }
 0x835   : > { %v5701_v49 = vpop.f32.mrf.mxu0  ;;  %v6176_v44 = vrot.slane %v13541_v35, 2 }
 0x836   : > { %v5907_v37 = vadd.f32 %v13197_v54, %v5867_v41  ;;  %v5752_v38 = vadd.f32 %v5701_v49, %v13361_v59 }
 0x837   : > { %v6177_v11 = vsel %vm1827_vm5, %v6174_v58, %v6176_v44 }
 0x838   : > { %v6002_v62 = vrot.slane %v5907_v37, 1  ;;  %v5792_v48 = vadd.f32 %v13171_v34, %v5752_v38  ;;  %v6256_v9 = vmax.f32 %v13497_v0, %v6177_v11  ;;  %v5177_v5 = vpop.f32.mrf.mxu2 }
 0x83a   : > { %v5828_v42 = vmax.f32 %v5792_v48, 0.0  ;;  %v6003_v15 = vsel %vm1161_vm2, %v6000_v16, %v6002_v62 }
 0x83b   : > { %v13552_v8 = vmax.f32 %v5906_v29, %v6003_v15 }
 0x83c   : > { %v5868_v59 = vmul.f32 %v13186_v51, %v5828_v42 }
 0x83d   : > { %v5703_v36 = vpop.f32.mrf.mxu0  ;;  %v6178_v33 = vrot.slane %v13552_v8, 2 }
 0x83e   : > { %v5908_v19 = vadd.f32 %v13197_v54, %v5868_v59  ;;  %v5753_v30 = vadd.f32 %v5703_v36, %v5510_v12 }
 0x83f   : > { %v6179_v0 = vsel %vm1827_vm5, %v6176_v44, %v6178_v33 }
 0x840   : > { %v6004_v18 = vrot.slane %v5908_v19, 1  ;;  %v5793_v4 = vadd.f32 %v13171_v34, %v5753_v30  ;;  %v6257_v1 = vmax.f32 %v13510_v10, %v6179_v0  ;;  %v5468_v10 = vpop.f32.mrf.mxu3  ;;  %v5179_v38 = vpop.f32.mrf.mxu2  ;;  %v14946_v0 = vld [vmem:[#allocation42_spill] sm:$0xff] }
 0x841   : > { %v5016_v30 = vpop.f32.mrf.mxu1  ;;  %v5057_v28 = vadd.f32 %v5013_v56, %v14946_v0  ;;  %v14949_v0 = vld [vmem:[#allocation27_spill] sm:$0xff] }
 0x842   : > { %v5829_v24 = vmax.f32 %v5793_v4, 0.0  ;;  %v6005_v23 = vsel %vm1161_vm2, %v6002_v62, %v6004_v18  ;;  %v13562_v47 = vpack.c.bf16 %v6257_v1, %v6256_v9 }
 0x843   : > { %v13564_v27 = vmax.f32 %v5907_v37, %v6005_v23  ;;  %v5223_v21 = vadd.f32 %v5179_v38, %v5057_v28 }
 0x844   : > { %v5869_v52 = vmul.f32 %v13186_v51, %v5829_v24 }
 0x845   : > { %v5706_v46 = vpop.f32.mrf.mxu0  ;;  %v6180_v13 = vrot.slane %v13564_v27, 2 }
 0x846   : > { %v5909_v58 = vadd.f32 %v13197_v54, %v5869_v52  ;;  %v5754_v29 = vadd.f32 %v5706_v46, %v5511_v3 }
 0x847   : > { %v6181_v25 = vsel %vm1827_vm5, %v6178_v33, %v6180_v13 }
 0x848   : > { %v6006_v16 = vrot.slane %v5909_v58, 1  ;;  %v5794_v63 = vadd.f32 %v13171_v34, %v5754_v29  ;;  %v6258_v17 = vmax.f32 %v13525_v2, %v6181_v25  ;;  %v14945_v2 = vld [vmem:[#allocation69_spill] sm:$0xff]  ;;  %v5470_v9 = vpop.f32.mrf.mxu3  ;;  %v5182_v1 = vpop.f32.mrf.mxu2 }
 0x849   : > { %v5056_v53 = vadd.f32 %v5011_v61, %v14945_v2  ;;  %v5514_v52 = vadd.f32 %v5470_v9, %v5223_v21  ;;  %v14948_v2 = vld [vmem:[#allocation47_spill] sm:$0xff] }
 0x84a   : > { %v5830_v14 = vmax.f32 %v5794_v63, 0.0  ;;  %v6007_v32 = vsel %vm1161_vm2, %v6004_v18, %v6006_v16  ;;  %v5018_v63 = vpop.f32.mrf.mxu1 }
 0x84b   : > { %v13574_v50 = vmax.f32 %v5908_v19, %v6007_v32  ;;  %v5222_v31 = vadd.f32 %v5177_v5, %v5056_v53  ;;  %v5059_v53 = vadd.f32 %v5018_v63, %v14948_v2 }
 0x84c   : > { %v5870_v43 = vmul.f32 %v13186_v51, %v5830_v14 }
 0x84d   : > { %v5708_v41 = vpop.f32.mrf.mxu0  ;;  %v6182_v49 = vrot.slane %v13574_v50, 2  ;;  %v5513_v12 = vadd.f32 %v5468_v10, %v5222_v31 }
 0x84e   : > { %v5910_v44 = vadd.f32 %v13197_v54, %v5870_v43  ;;  %v5755_v37 = vadd.f32 %v5708_v41, %v5512_v57 }
 0x84f   : > { %v6183_v11 = vsel %vm1827_vm5, %v6180_v13, %v6182_v49 }
 0x850   : > { %v6008_v7 = vrot.slane %v5910_v44, 1  ;;  %v5795_v62 = vadd.f32 %v13171_v34, %v5755_v37  ;;  %v6259_v48 = vmax.f32 %v13541_v35, %v6183_v11  ;;  %v5473_v61 = vpop.f32.mrf.mxu3  ;;  %v5184_v57 = vpop.f32.mrf.mxu2 }
 0x851   : > { %v5225_v9 = vadd.f32 %v5184_v57, %v5059_v53 }
 0x852   : > { %v5831_v55 = vmax.f32 %v5795_v62, 0.0  ;;  %v6009_v42 = vsel %vm1161_vm2, %v6006_v16, %v6008_v7  ;;  %v13584_v15 = vpack.c.bf16 %v6259_v48, %v6258_v17 }
 0x853   : > { %v13586_v20 = vmax.f32 %v5909_v58, %v6009_v42  ;;  %v5021_v42 = vpop.f32.mrf.mxu1 }
 0x854   : > { %v5871_v59 = vmul.f32 %v13186_v51, %v5831_v55  ;;  %v5060_v28 = vadd.f32 %v5021_v42, %v14949_v0 }
 0x855   : > { %v5711_v6 = vpop.f32.mrf.mxu0  ;;  %v6184_v36 = vrot.slane %v13586_v20, 2 }
 0x856   : > { %v5911_v33 = vadd.f32 %v13197_v54, %v5871_v59  ;;  %v5756_v19 = vadd.f32 %v5711_v6, %v5513_v12 }
 0x857   : > { %v6185_v35 = vsel %vm1827_vm5, %v6182_v49, %v6184_v36 }
 0x858   : > { %v6010_v22 = vrot.slane %v5911_v33, 1  ;;  %v5796_v18 = vadd.f32 %v13171_v34, %v5756_v19  ;;  %v6260_v4 = vmax.f32 %v13552_v8, %v6185_v35  ;;  %v14947_v8 = vld [vmem:[#allocation16_spill] sm:$0xff]  ;;  %v5475_v49 = vpop.f32.mrf.mxu3 }
 0x859   : > { %v5058_v25 = vadd.f32 %v5016_v30, %v14947_v8  ;;  %v5516_v59 = vadd.f32 %v5475_v49, %v5225_v9 }
 0x85a   : > { %v5832_v24 = vmax.f32 %v5796_v18, 0.0  ;;  %v6011_v23 = vsel %vm1161_vm2, %v6008_v7, %v6010_v22  ;;  %v10075_v18 = vld [vmem:[%s14908_s4] ss:$0 sm:$0xff] }
 0x85b   : > { %v13596_v3 = vmax.f32 %v5910_v44, %v6011_v23  ;;  %v5224_v17 = vadd.f32 %v5182_v1, %v5058_v25 }
 0x85c   : > { %v5872_v5 = vmul.f32 %v13186_v51, %v5832_v24 }
 0x85d   : > { %v5713_v46 = vpop.f32.mrf.mxu0  ;;  %v6186_v13 = vrot.slane %v13596_v3, 2  ;;  %v5515_v56 = vadd.f32 %v5473_v61, %v5224_v17 }
 0x85e   : > { %v5912_v58 = vadd.f32 %v13197_v54, %v5872_v5  ;;  %v5757_v29 = vadd.f32 %v5713_v46, %v5514_v52  ;;  %v10076_v52 = vld [vmem:[%s14595_s5] ss:$0 sm:$0xff]  ;;  %v5023_v46 = vpop.f32.mrf.mxu1 }
 0x85f   : > { %v6187_v10 = vsel %vm1827_vm5, %v6184_v36, %v6186_v13  ;;  %v5187_v36 = vpop.f32.mrf.mxu2 }
 0x860   : > { %v6012_v60 = vrot.slane %v5912_v58, 1  ;;  %v5797_v40 = vadd.f32 %v13171_v34, %v5757_v29  ;;  %v6261_v16 = vmax.f32 %v13564_v27, %v6187_v10  ;;  %v5226_v1 = vadd.f32 %v5187_v36, %v5060_v28 }
 0x861   : > { %v10179_v28 = vmov 65535  }
 0x862   : > { %v5833_v26 = vmax.f32 %v5797_v40, 0.0  ;;  %v6013_v14 = vsel %vm1161_vm2, %v6010_v22, %v6012_v60  ;;  %v13606_v32 = vpack.c.bf16 %v6261_v16, %v6260_v4 }
 0x863   : > { %v13608_v43 = vmax.f32 %v5911_v33, %v6013_v14 }
 0x864   : > { %v5873_v41 = vmul.f32 %v13186_v51, %v5833_v26 }
 0x865   : > { %v5716_v44 = vpop.f32.mrf.mxu0  ;;  %v6188_v37 = vrot.slane %v13608_v43, 2 }
 0x866   : > { %v5913_v38 = vadd.f32 %v13197_v54, %v5873_v41  ;;  %v5758_v27 = vadd.f32 %v5716_v44, %v5515_v56 }
 0x867   : > { %v6189_v11 = vsel %vm1827_vm5, %v6186_v13, %v6188_v37  ;;  %v5189_v8 = vpop.f32.mrf.mxu2 }
 0x868   : > { %v6014_v7 = vrot.slane %v5913_v38, 1  ;;  %v5798_v62 = vadd.f32 %v13171_v34, %v5758_v27  ;;  %v6262_v48 = vmax.f32 %v13574_v50, %v6189_v11  ;;  %v5478_v34 = vpop.f32.mrf.mxu3 }
 0x869   : > { %v5517_v61 = vadd.f32 %v5478_v34, %v5226_v1 }
 0x86a   : > { %v5834_v31 = vmax.f32 %v5798_v62, 0.0  ;;  %v6015_v55 = vsel %vm1161_vm2, %v6012_v60, %v6014_v7  ;;  %v14950_v60 = vld [vmem:[#allocation51_spill] sm:$0xff] }
 0x86b   : > { %v13618_v12 = vmax.f32 %v5912_v58, %v6015_v55  ;;  %v5061_v40 = vadd.f32 %v5023_v46, %v14950_v60  ;;  %v9189_v46 = vld [vmem:[%s14602_s12 + $0x8] sm:$0xf]  ;;  %v9183_v60 = vld [vmem:[%s14602_s12 + $0xc] sm:$0xf0] }
 0x86c   : > { %v5874_v6 = vmul.f32 %v13186_v51, %v5834_v31 }
 0x86d   : > { %v5718_v33 = vpop.f32.mrf.mxu0  ;;  %v6190_v19 = vrot.slane %v13618_v12, 2  ;;  %v5227_v14 = vadd.f32 %v5189_v8, %v5061_v40  ;;  %v9201_v8 = vld [vmem:[%s14602_s12 + $0x20] sm:$0xf] }
 0x86e   : > { %v5914_v30 = vadd.f32 %v13197_v54, %v5874_v6  ;;  %v5759_v35 = vadd.f32 %v5718_v33, %v5516_v59 }
 0x86f   : > { %v6191_v50 = vsel %vm1827_vm5, %v6188_v37, %v6190_v19 }
 0x870   : > { %v6016_v22 = vrot.slane %v5914_v30, 1  ;;  %v5799_v4 = vadd.f32 %v10075_v18, %v5759_v35  ;;  %v6263_v51 = vmax.f32 %v13586_v20, %v6191_v50  ;;  %v10077_v20 = vld [vmem:[%s14596_s6] ss:$0 sm:$0xff]  ;;  %v5480_v26 = vpop.f32.mrf.mxu3 }
 0x871   : > { %v5518_v49 = vadd.f32 %v5480_v26, %v5227_v14  ;;  %v9870_v26 = vld [vmem:[%s14602_s12 + $0x1c] sm:$0xf] }
 0x872   : > { %v5835_v21 = vmax.f32 %v5799_v4, 0.0  ;;  %v6017_v24 = vsel %vm1161_vm2, %v6014_v7, %v6016_v22  ;;  %v13630_v23 = vpack.c.bf16 %v6263_v51, %v6262_v48  ;;  %v9181_v51 = vld [vmem:[%s14602_s12] sm:$0xf] }
 0x873   : > { %v6085_v54 = vmax.f32 %v5913_v38, %v6017_v24 }
 0x874   : > { %v5875_v5 = vmul.f32 %v10076_v52, %v5835_v21 }
 0x875   : > { %v5721_v13 = vpop.f32.mrf.mxu0  ;;  %v6192_v58 = vrot.slane %v6085_v54, 2 }
 0x876   : > { %v5915_v29 = vadd.f32 %v10077_v20, %v5875_v5  ;;  %v5760_v10 = vadd.f32 %v5721_v13, %v5517_v61  ;;  %v9869_v13 = vld [vmem:[%s14602_s12 + $0x10] sm:$0xf0] }
 0x877   : > { %v6193_v25 = vsel %vm1827_vm5, %v6190_v19, %v6192_v58 }
 0x878   : > { %v6018_v16 = vrot.slane %v5915_v29, 1  ;;  %v5800_v63 = vadd.f32 %v10075_v18, %v5760_v10  ;;  %v6264_v17 = vmax.f32 %v13596_v3, %v6193_v25  ;;  %v9872_v25 = vld [vmem:[%s14602_s12 + $0x28] sm:$0xf0] }
 0x87a   : > { %v6019_v57 = vsel %vm1161_vm2, %v6016_v22, %v6018_v16  ;;  %v5836_v56 = vmax.f32 %v5800_v63, 0.0  ;;  %v6087_v34 = vmax.f32 %v5915_v29, %v6018_v16  ;;  %v6436_v22 = vsel %vm2493_vm7, 4294967295, %v10179_v28  ;;  %v9875_v63 = vld [vmem:[%s14602_s12 + $0x40] sm:$0xf0] }
 0x87b   : > { %v6086_v41 = vmax.f32 %v5914_v30, %v6019_v57  ;;  %v6437_v61 = vsel %vm1827_vm5, %v6436_v22, 0  ;;  %v9217_v57 = vld [vmem:[%s14602_s12 + $0x48] sm:$0xf] }
 0x87c   : > { %v5876_v44 = vmul.f32 %v10076_v52, %v5836_v56  ;;  %v9877_v56 = vld [vmem:[%s14602_s12 + $0x50] sm:$0xf0] }
 0x87d   : > { %v5723_v37 = vpop.f32.mrf.mxu0  ;;  %v6194_v38 = vrot.slane %v6086_v41, 2 }
 0x87e   : > { %v5916_v27 = vadd.f32 %v10077_v20, %v5876_v44  ;;  %v5761_v11 = vadd.f32 %v5723_v37, %v5518_v49  ;;  %v9225_v49 = vld [vmem:[%s14602_s12 + $0x50] sm:$0xf]  ;;  %v9878_v44 = vld [vmem:[%s14602_s12 + $0x58] sm:$0xf0] }
 0x87f   : > { %v6195_v2 = vsel %vm1827_vm5, %v6192_v58, %v6194_v38  ;;  %v9226_v37 = vor.u32 %v9878_v44, %v9225_v49  ;;  %v9910_v49 = vld [vmem:[%s14597_s7 + $0xc8] sm:$0xff] }
 0x880   : > { %v6090_v53 = vrot.slane %v5916_v27, 1  ;;  %v5801_v7 = vadd.f32 %v10075_v18, %v5761_v11  ;;  %v6265_v62 = vmax.f32 %v13608_v43, %v6195_v2  ;;  %v9229_v2 = vld [vmem:[%s14602_s12 + $0x60] sm:$0xf] }
 0x882   : > { %v6091_v3 = vsel %vm1161_vm2, %v6018_v16, %v6090_v53  ;;  %v5837_v48 = vmax.f32 %v5801_v7, 0.0  ;;  %v6310_v9 = vpack.c.bf16 %v6265_v62, %v6264_v17  ;;  %v9213_v16 = vld [vmem:[%s14602_s12 + $0x38] sm:$0xf]  ;;  %v9237_v62 = vld [vmem:[%s14602_s12 + $0x68] sm:$0xf] }
 0x883   : > { %v6097_v31 = vmax.f32 %v5915_v29, %v6091_v3  ;;  %v9871_v29 = vld [vmem:[%s14602_s12 + $0x20] sm:$0xf0]  ;;  %v9214_v17 = vor.u32 %v9875_v63, %v9213_v16  ;;  %v9881_v3 = vld [vmem:[%s14602_s12 + $0x70] sm:$0xf0] }
 0x884   : > { %v5877_v55 = vmul.f32 %v10076_v52, %v5837_v48  ;;  %v9238_v48 = vor.u32 %v9881_v3, %v9237_v62  ;;  %v9889_v63 = vld [vmem:[%s14597_s7 + $0x20] sm:$0xff] }
 0x885   : > { %v6196_v42 = vrot.slane %v6097_v31, 2  ;;  %v9219_v31 = vld [vmem:[%s14602_s12 + $0x54] sm:$0xf0] }
 0x886   : > { %v5917_v59 = vadd.f32 %v10077_v20, %v5877_v55  ;;  %v9190_v20 = vor.u32 %v9869_v13, %v9189_v46  ;;  %v9886_v13 = vld [vmem:[%s14597_s7 + $0x8] sm:$0xff] }
 0x887   : > { %v6197_v6 = vsel %vm1827_vm5, %v6194_v38, %v6196_v42  ;;  %v9873_v38 = vld [vmem:[%s14602_s12 + $0x34] sm:$0xf] }
 0x888   : > { %v6092_v36 = vrot.slane %v5917_v59, 1  ;;  %v6266_v33 = vmax.f32 %v13618_v12, %v6197_v6  ;;  %v9868_v12 = vld [vmem:[%s14602_s12 + $0x8] sm:$0xf0]  ;;  %v9241_v6 = vld [vmem:[%s14602_s12 + $0x78] sm:$0xf] }
 0x889   : > { %v9182_v24 = vor.u32 %v9868_v12, %v9181_v51  ;;  %v9243_v51 = vld [vmem:[%s14602_s12 + $0x84] sm:$0xf0] }
 0x88a   : > { %v6093_v19 = vsel %vm1161_vm2, %v6090_v53, %v6092_v36  ;;  %v6099_v30 = vmax.f32 %v5917_v59, %v6092_v36  ;;  %v9880_v53 = vld [vmem:[%s14602_s12 + $0x68] sm:$0xf0]  ;;  %v9883_v36 = vld [vmem:[%s14602_s12 + $0x80] sm:$0xf0] }
 0x88b   : > { %v6098_v35 = vmax.f32 %v5916_v27, %v6093_v19  ;;  %6449 = vmatmul.bf16.vlgmr.msra.gmra.mxu1 %v9182_v24  ;;  %v9207_v27 = vld [vmem:[%s14602_s12 + $0x3c] sm:$0xf0]  ;;  %v9230_v7 = vor.u32 %v9880_v53, %v9229_v2  ;;  %v9884_v59 = vld [vmem:[%s14602_s12 + $0x88] sm:$0xf0]  ;;  %v9242_v19 = vor.u32 %v9883_v36, %v9241_v6 }
 0x88c   : > { %v6200_v50 = vrot.slane %v6099_v30, 2  ;;  %v9210_v11 = vor.u32 %v9873_v38, %v9207_v27  ;;  %v9879_v30 = vld [vmem:[%s14602_s12 + $0x64] sm:$0xf] }
 0x88d   : > { %v6198_v43 = vrot.slane %v6098_v35, 2  ;;  %v9231_v35 = vld [vmem:[%s14602_s12 + $0x6c] sm:$0xf0]  ;;  %v9909_v2 = vld [vmem:[%s14597_s7 + $0xc0] sm:$0xff] }
 0x88e   : > { %v6269_v0 = vmax.f32 %v6087_v34, %v6200_v50  ;;  %v9234_v34 = vor.u32 %v9879_v30, %v9231_v35 }
 0x88f   : > { %v6199_v18 = vsel %vm1827_vm5, %v6196_v42, %v6198_v43  ;;  %v6201_v4 = vsel %vm1827_vm5, %v6198_v43, %v6200_v50  ;;  %v9249_v42 = vld [vmem:[%s14602_s12 + $0x80] sm:$0xf]  ;;  %v6295_v50 = vld [vmem:[%s14602_s12 + $0x98] sm:$0xf] }
 0x890   : > { %v6267_v1 = vmax.f32 %v6085_v54, %v6199_v18  ;;  %v6268_v21 = vmax.f32 %v6086_v41, %v6201_v4  ;;  %v9193_v54 = vld [vmem:[%s14602_s12 + $0x18] sm:$0xf]  ;;  %v9218_v41 = vor.u32 %v9877_v56, %v9217_v57  ;;  %v6377_v43 = vunpack.c.l.b16 %v6295_v50  ;;  %v9882_v4 = vld [vmem:[%s14602_s12 + $0x7c] sm:$0xf] }
 0x891   : > { %v9194_v10 = vor.u32 %v9871_v29, %v9193_v54  ;;  %v9246_v12 = vor.u32 %v9882_v4, %v9243_v51 }
 0x892   : > { %v6311_v52 = vpack.c.bf16 %v6267_v1, %v6266_v33  ;;  %v6312_v5 = vpack.c.bf16 %v6269_v0, %v6268_v21  ;;  %v9250_v33 = vor.u32 %v9884_v59, %v9249_v42  ;;  %v6294_v0 = vld [vmem:[%s14602_s12 + $0x90] sm:$0xff]  ;;  %v6398_v28 = vpack.c.b16 %v6377_v43, %v6377_v43 }
 0x893   : > { %v6375_v22 = vunpack.c.l.b16 %v6294_v0  ;;  %v6376_v1 = vunpack.c.h.b16 %v6294_v0 }
 0x894   : > { %6484 = vmatpush.bf16.msrb.mxu2 %v6311_v52  ;;  %v6439_v58 = vand.u32 %v6437_v61, %v6312_v5  ;;  %v9888_v61 = vld [vmem:[%s14597_s7 + $0x18] sm:$0xff]  ;;  %v9887_v5 = vld [vmem:[%s14597_s7 + $0x10] sm:$0xff] }
 0x895   : > { %v6396_v18 = vpack.c.b16 %v6375_v22, %v6375_v22  ;;  %v6397_v24 = vpack.c.b16 %v6376_v1, %v6376_v1 }
 0x896   : > { %6534 = vmatpush.bf16.msrb.mxu3 %v6439_v58 }
 0x898   : > { %6485 = vmatpush.bf16.msrb.mxu2 %v6310_v9  ;;  %v9876_v9 = vld [vmem:[%s14602_s12 + $0x4c] sm:$0xf] }
 0x899   : > { %9251 = vmatmul.msk.bf16.vlgmr.msrb.gmra.mxu3 %vm6413_vm9, %v9190_v20  ;;  %v9222_v55 = vor.u32 %v9876_v9, %v9219_v31  ;;  %v9885_v20 = vld [vmem:[%s14597_s7] sm:$0xff] }
 0x89b   : > { %6454 = vmatmul.bf16.gmra.mxu1 %v9194_v10  ;;  %v9896_v10 = vld [vmem:[%s14597_s7 + $0x58] sm:$0xff] }
 0x89c   : > { %6486 = vmatpush.bf16.msrb.mxu2 %v13630_v23  ;;  %v9202_v23 = vor.u32 %v9872_v25, %v9201_v8  ;;  %v9892_v8 = vld [vmem:[%s14597_s7 + $0x38] sm:$0xff]  ;;  %6848 = vmatpush.bf16.msra.mxu3 %v9896_v10 }
 0x89d   : > { %6681 = vmatpush.bf16.msrb.mxu1 %v9892_v8 }
 0x8a0   : > { %6487 = vmatpush.bf16.msrb.mxu2 %v13606_v32  ;;  %v9867_v32 = vld [vmem:[%s14602_s12 + $0x4] sm:$0xf] }
 0x8a1   : > { %v9186_v40 = vor.u32 %v9867_v32, %v9183_v60  ;;  %v9891_v32 = vld [vmem:[%s14597_s7 + $0x30] sm:$0xff] }
 0x8a2   : > { %6682 = vmatpush.bf16.msrb.mxu1 %v9891_v32 }
 0x8a4   : > { %6488 = vmatpush.bf16.msrb.mxu2 %v13584_v15  ;;  %v9205_v15 = vld [vmem:[%s14602_s12 + $0x30] sm:$0xf] }
 0x8a8   : > { %6489 = vmatpush.bf16.msrb.mxu2 %v13562_v47  ;;  %v9874_v47 = vld [vmem:[%s14602_s12 + $0x38] sm:$0xf0] }
 0x8a9   : > { %9252 = vmatmul.msk.bf16.gmra.mxu3 %vm6413_vm9, %v9202_v23  ;;  %v9895_v23 = vld [vmem:[%s14597_s7 + $0x50] sm:$0xff] }
 0x8aa   : > { %6849 = vmatpush.bf16.msra.mxu3 %v9895_v23 }
 0x8ac   : > { %6490 = vmatpush.bf16.msrb.mxu2 %v13539_v45  ;;  %v9206_v45 = vor.u32 %v9874_v47, %v9205_v15  ;;  %v9890_v15 = vld [vmem:[%s14597_s7 + $0x28] sm:$0xff] }
 0x8ad   : > { %6683 = vmatpush.bf16.msrb.mxu1 %v9890_v15 }
 0x8ae   : > { %6459 = vmatmul.bf16.gmra.mxu1 %v9206_v45  ;;  %v9893_v45 = vld [vmem:[%s14597_s7 + $0x40] sm:$0xff] }
 0x8b0   : > { %6491 = vmatpush.bf16.msrb.mxu2 %v13508_v39  ;;  %v9195_v39 = vld [vmem:[%s14602_s12 + $0x24] sm:$0xf0] }
 0x8b1   : > { %v9198_v14 = vor.u32 %v9870_v26, %v9195_v39  ;;  %6684 = vmatpush.bf16.msrb.mxu1 %v9889_v63  ;;  %v9912_v26 = vld [vmem:[%s14597_s7 + $0xd8] sm:$0xff] }
 0x8b2   : > { %7318 = vmatpush.bf16.msra.mxu0 %v9912_v26 }
 0x8b3   : > { %6492 = vmatmul.bf16.vlgmr.msrb.gmra.mxu2 %v9186_v40  ;;  %v9894_v40 = vld [vmem:[%s14597_s7 + $0x48] sm:$0xff] }
 0x8b4   : > { %6749 = vmatpush.bf16.msra.mxu2 %v9888_v61  ;;  %6850 = vmatpush.bf16.msra.mxu3 %v9894_v40 }
 0x8b8   : > { %6750 = vmatpush.bf16.msra.mxu2 %v9887_v5  ;;  %6851 = vmatpush.bf16.msra.mxu3 %v9893_v45 }
 0x8b9   : > { %9253 = vmatmul.msk.bf16.gmra.mxu3 %vm6413_vm9, %v9214_v17 }
 0x8bc   : > { %6751 = vmatpush.bf16.msra.mxu2 %v9886_v13 }
 0x8be   : > { %6464 = vmatmul.bf16.gmra.mxu1 %v9218_v41 }
 0x8c0   : > { %6752 = vmatpush.bf16.msra.mxu2 %v9885_v20 }
 0x8c3   : > { %6497 = vmatmul.bf16.gmra.mxu2 %v9198_v14  ;;  %v9911_v14 = vld [vmem:[%s14597_s7 + $0xd0] sm:$0xff] }
 0x8c4   : > { %7319 = vmatpush.bf16.msra.mxu0 %v9911_v14  ;;  %v9903_v14 = vld [vmem:[%s14597_s7 + $0x90] sm:$0xff] }
 0x8c8   : > { %7320 = vmatpush.bf16.msra.mxu0 %v9910_v49 }
 0x8c9   : > { %9254 = vmatmul.msk.bf16.gmra.mxu3 %vm6413_vm9, %v9226_v37 }
 0x8cc   : > { %7321 = vmatpush.bf16.msra.mxu0 %v9909_v2 }
 0x8ce   : > { %6469 = vmatmul.bf16.gmra.mxu1 %v9230_v7 }
 0x8d3   : > { %6502 = vmatmul.bf16.gmra.mxu2 %v9210_v11 }
 0x8d9   : > { %9255 = vmatmul.msk.bf16.gmra.mxu3 %vm6413_vm9, %v9238_v48 }
 0x8de   : > { %6474 = vmatmul.bf16.gmra.mxu1 %v9242_v19 }
 0x8e3   : > { %6507 = vmatmul.bf16.gmra.mxu2 %v9222_v55 }
 0x8e9   : > { %9256 = vmatmul.msk.bf16.gmra.mxu3 %vm6413_vm9, %v9250_v33 }
 0x8ee   : > { %6479 = vmatmul.bf16.gmra.mxu1 %v6396_v18 }
 0x8f3   : > { %6512 = vmatmul.bf16.gmra.mxu2 %v9234_v34 }
 0x8f9   : > { %9257 = vmatmul.msk.bf16.gmra.mxu3 %vm6413_vm9, %v6398_v28 }
 0x903   : > { %6517 = vmatmul.bf16.gmra.mxu2 %v9246_v12 }
 0x908   : > { %v6450_v21 = vpop.f32.mrf.mxu1 }
 0x910   : > { %v6452_v52 = vpop.f32.mrf.mxu1 }
 0x913   : > { %6522 = vmatmul.bf16.gmra.mxu2 %v6397_v24 }
 0x918   : > { %v6455_v58 = vpop.f32.mrf.mxu1 }
 0x91c   : > { %v6536_v46 = vpop.f32.mrf.mxu3 }
 0x920   : > { %v6457_v29 = vpop.f32.mrf.mxu1 }
 0x924   : > { %v6538_v54 = vpop.f32.mrf.mxu3 }
 0x92b   : > { %v6460_v60 = vpop.f32.mrf.mxu1 }
 0x92c   : > { %v6541_v25 = vpop.f32.mrf.mxu3 }
 0x933   : > { %v6462_v17 = vpop.f32.mrf.mxu1 }
 0x934   : > { %v6543_v47 = vpop.f32.mrf.mxu3 }
 0x936   : > { %v6493_v16 = vpop.f32.mrf.mxu2 }
 0x937   : > { %v6494_v57 = vadd.f32 %v6493_v16, %v6450_v21 }
 0x939   : > { %v6537_v44 = vadd.f32 %v6536_v46, %v6494_v57 }
 0x93b   : > { %v13826_v38 = vpop.f32.mrf.mxu1 }
 0x93c   : > { %v6546_v39 = vpop.f32.mrf.mxu3 }
 0x93e   : > { %v6495_v56 = vpop.f32.mrf.mxu2 }
 0x93f   : > { %v6496_v41 = vadd.f32 %v6495_v56, %v6452_v52 }
 0x941   : > { %v13824_v37 = vadd.f32 %v6538_v54, %v6496_v41 }
 0x943   : > { %v6570_v27 = vpack.c.bf16 %v13824_v37, %v6537_v44  ;;  %v13833_v7 = vpop.f32.mrf.mxu1  ;;  %v9902_v44 = vld [vmem:[%s14597_s7 + $0x88] sm:$0xff] }
 0x944   : > { %v6548_v11 = vpop.f32.mrf.mxu3 }
 0x945   : > { %9303 = vmatmul.msk.bf16.vlgmr.msra.gmra.mxu2 %vm6661_vm10, %v6570_v27  ;;  %v6596_v9 = vshll.u32 %v6570_v27, 16  ;;  %v6594_v36 = vshrl.u32 %v6570_v27, 16  ;;  %v6794_v19 = vrot.slane %v6570_v27, 1 }
 0x946   : > { %v6498_v53 = vpop.f32.mrf.mxu2 }
 0x947   : > { %v6499_v3 = vadd.f32 %v6498_v53, %v6455_v58  ;;  %v6598_v59 = vrot.slane %v6596_v9, 1 }
 0x949   : > { %v13837_v55 = vadd.f32 %v6541_v25, %v6499_v3  ;;  %v6599_v0 = vor.u32 %v6598_v59, %v6594_v36 }
 0x94b   : > { %v13844_v34 = vpop.f32.mrf.mxu1 }
 0x94c   : > { %v13835_v62 = vpop.f32.mrf.mxu3 }
 0x94e   : > { %v6500_v48 = vpop.f32.mrf.mxu2 }
 0x94f   : > { %v6501_v31 = vadd.f32 %v6500_v48, %v6457_v29  ;;  %v9904_v29 = vld [vmem:[%s14597_s7 + $0x98] sm:$0xff]  ;;  %v9901_v48 = vld [vmem:[%s14597_s7 + $0x80] sm:$0xff] }
 0x950   : > { %7108 = vmatpush.bf16.msrb.mxu2 %v9904_v29 }
 0x951   : > { %v13839_v42 = vadd.f32 %v6543_v47, %v6501_v31 }
 0x953   : > { %v6571_v6 = vpack.c.bf16 %v13839_v42, %v13837_v55  ;;  %v13852_v52 = vpop.f32.mrf.mxu1 }
 0x954   : > { %v6553_v33 = vpop.f32.mrf.mxu3  ;;  %7109 = vmatpush.bf16.msrb.mxu2 %v9903_v14 }
 0x955   : > { %v6601_v30 = vshll.u32 %v6571_v6, 16  ;;  %9304 = vmatmul.msk.bf16.gmra.mxu2 %vm6661_vm10, %v6571_v6  ;;  %v6605_v35 = vshrl.u32 %v6571_v6, 16  ;;  %v6795_v50 = vrot.slane %v6571_v6, 1  ;;  %v7492_v23 = vrot.slane %v6571_v6, 3 }
 0x956   : > { %v6503_v43 = vpop.f32.mrf.mxu2  ;;  %v7264_v32 = vrot.slane %v6571_v6, 2 }
 0x957   : > { %v6603_v28 = vrot.slane %v6601_v30, 1  ;;  %v7367_v22 = vrot.slane %v6605_v35, 2  ;;  %v6796_v18 = vsel %vm1161_vm2, %v6794_v19, %v6795_v50  ;;  %v7368_v4 = vrot.slane %v6601_v30, 3 }
 0x958   : > { %9332 = vmatmul.msk.bf16.vlgmr.msra.gmra.mxu3 %vm6661_vm10, %v6796_v18  ;;  %v6504_v21 = vadd.f32 %v6503_v43, %v6460_v60  ;;  %7110 = vmatpush.bf16.msrb.mxu2 %v9902_v44  ;;  %v9908_v43 = vld [vmem:[%s14597_s7 + $0xb8] sm:$0xff] }
 0x959   : > { %v6604_v51 = vsel %vm695_vm1, %v6599_v0, %v6603_v28  ;;  %v7369_v12 = vor.u32 %v7368_v4, %v7367_v22  ;;  %v6607_v40 = vor.u32 %v6605_v35, %v6603_v28  ;;  %v9900_v4 = vld [vmem:[%s14597_s7 + $0x78] sm:$0xff]  ;;  %7211 = vmatpush.bf16.msrb.mxu3 %v9908_v43 }
 0x95a   : > { %9282 = vmatmul.msk.bf16.vlgmr.msrb.gmra.mxu1 %vm6661_vm10, %v6604_v51  ;;  %v13854_v5 = vadd.f32 %v6546_v39, %v6504_v21  ;;  %v9907_v21 = vld [vmem:[%s14597_s7 + $0xb0] sm:$0xff] }
 0x95b   : > { %v13866_v16 = vpop.f32.mrf.mxu1  ;;  %6963 = vmatpush.bf16.msra.mxu1 %v9900_v4 }
 0x95c   : > { %v13850_v1 = vpop.f32.mrf.mxu3  ;;  %7111 = vmatpush.bf16.msrb.mxu2 %v9901_v48 }
 0x95d   : > { %7212 = vmatpush.bf16.msrb.mxu3 %v9907_v21 }
 0x95e   : > { %v6505_v24 = vpop.f32.mrf.mxu2 }
 0x95f   : > { %v6506_v61 = vadd.f32 %v6505_v24, %v6462_v17 }
 0x961   : > { %v13856_v46 = vadd.f32 %v6548_v11, %v6506_v61 }
 0x963   : > { %v6572_v13 = vpack.c.bf16 %v13856_v46, %v13854_v5  ;;  %v13890_v2 = vpop.f32.mrf.mxu1 }
 0x964   : > { %v13860_v58 = vpop.f32.mrf.mxu3 }
 0x965   : > { %v6609_v20 = vshll.u32 %v6572_v13, 16  ;;  %9305 = vmatmul.msk.bf16.gmra.mxu2 %vm6661_vm10, %v6572_v13  ;;  %v6613_v54 = vshrl.u32 %v6572_v13, 16  ;;  %v6797_v10 = vrot.slane %v6572_v13, 1  ;;  %v7493_v8 = vrot.slane %v6572_v13, 3 }
 0x966   : > { %v6508_v25 = vpop.f32.mrf.mxu2  ;;  %v7265_v60 = vrot.slane %v6572_v13, 2 }
 0x967   : > { %v6611_v15 = vrot.slane %v6609_v20, 1  ;;  %v7371_v47 = vrot.slane %v6609_v20, 3  ;;  %v7370_v45 = vrot.slane %v6613_v54, 2  ;;  %v6798_v63 = vsel %vm1161_vm2, %v6795_v50, %v6797_v10 }
 0x968   : > { %v13870_v17 = vsel %vm2493_vm7, %v7492_v23, %v7493_v8  ;;  %v7266_v26 = vsel %vm1827_vm5, %v7264_v32, %v7265_v60  ;;  %9333 = vmatmul.msk.bf16.gmra.mxu3 %vm6661_vm10, %v6798_v63  ;;  %v6509_v49 = vadd.f32 %v6508_v25, %v13826_v38  ;;  %v9897_v32 = vld [vmem:[%s14597_s7 + $0x60] sm:$0xff] }
 0x969   : > { %v6612_v39 = vsel %vm695_vm1, %v6607_v40, %v6611_v15  ;;  %9448 = vmatmul.msk.bf16.vlgmr.msra.gmra.mxu0 %vm6661_vm10, %v7266_v26  ;;  %v7372_v57 = vor.u32 %v7371_v47, %v7370_v45 }
 0x96a   : > { %9283 = vmatmul.msk.bf16.gmra.mxu1 %vm6661_vm10, %v6612_v39  ;;  %v13893_v53 = vadd.f32 %v13835_v62, %v6509_v49 }
 0x96b   : > { %v13883_v41 = vsel %vm2213_vm6, %v7369_v12, %v7372_v57  ;;  %v13914_v35 = vpop.f32.mrf.mxu1  ;;  %v9899_v12 = vld [vmem:[%s14597_s7 + $0x70] sm:$0xff] }
 0x96c   : > { %v13880_v56 = vpop.f32.mrf.mxu3  ;;  %6964 = vmatpush.bf16.msra.mxu1 %v9899_v12 }
 0x96e   : > { %v6510_v27 = vpop.f32.mrf.mxu2 }
 0x96f   : > { %v6511_v11 = vadd.f32 %v6510_v27, %v13833_v7 }
 0x971   : > { %v13895_v3 = vadd.f32 %v6553_v33, %v6511_v11  ;;  %v6615_v33 = vor.u32 %v6613_v54, %v6611_v15  ;;  %v13977_v15 = vpack.c.bf16 %v13837_v55, %v13824_v37 }
 0x973   : > { %v13902_v38 = vpack.c.bf16 %v13895_v3, %v13893_v53  ;;  %v6482_v29 = vpop.f32.mrf.mxu1 }
 0x974   : > { %v13904_v9 = vpop.f32.mrf.mxu3 }
 0x975   : > { %v6617_v7 = vshll.u32 %v13902_v38, 16  ;;  %9306 = vmatmul.msk.bf16.gmra.mxu2 %vm6661_vm10, %v13902_v38  ;;  %v6621_v62 = vshrl.u32 %v13902_v38, 16  ;;  %v6799_v31 = vrot.slane %v13902_v38, 1  ;;  %v7495_v59 = vrot.slane %v13902_v38, 3 }
 0x976   : > { %v6513_v6 = vpop.f32.mrf.mxu2  ;;  %v7267_v36 = vrot.slane %v13902_v38, 2  ;;  %v7016_v38 = vshll.u32 %v13977_v15, 16 }
 0x977   : > { %v6619_v19 = vrot.slane %v6617_v7, 1  ;;  %v6800_v30 = vsel %vm1161_vm2, %v6797_v10, %v6799_v31  ;;  %v13917_v50 = vsel %vm2493_vm7, %v7493_v8, %v7495_v59  ;;  %v7374_v28 = vrot.slane %v6621_v62, 2  ;;  %v9898_v10 = vld [vmem:[%s14597_s7 + $0x68] sm:$0xff] }
 0x978   : > { %v7268_v0 = vsel %vm1827_vm5, %v7265_v60, %v7267_v36  ;;  %v7375_v22 = vrot.slane %v6617_v7, 3  ;;  %9334 = vmatmul.msk.bf16.gmra.mxu3 %vm6661_vm10, %v6800_v30  ;;  %v6514_v13 = vadd.f32 %v6513_v6, %v13844_v34  ;;  %v9906_v8 = vld [vmem:[%s14597_s7 + $0xa8] sm:$0xff]  ;;  %v13957_v34 = vpack.c.bf16 %v13854_v5, %v13839_v42  ;;  %6965 = vmatpush.bf16.msra.mxu1 %v9898_v10 }
 0x979   : > { %v6620_v18 = vsel %vm695_vm1, %v6615_v33, %v6619_v19  ;;  %9449 = vmatmul.msk.bf16.gmra.mxu0 %vm6661_vm10, %v7268_v0  ;;  %7213 = vmatpush.bf16.msrb.mxu3 %v9906_v8  ;;  %v6623_v45 = vor.u32 %v6621_v62, %v6619_v19 }
 0x97a   : > { %9284 = vmatmul.msk.bf16.gmra.mxu1 %vm6661_vm10, %v6620_v18  ;;  %v7376_v51 = vor.u32 %v7375_v22, %v7374_v28  ;;  %v13950_v25 = vadd.f32 %v13850_v1, %v6514_v13  ;;  %v9905_v1 = vld [vmem:[%s14597_s7 + $0xa0] sm:$0xff]  ;;  %v7021_v47 = vshrl.u32 %v13957_v34, 16  ;;  %v7024_v44 = vshll.u32 %v13957_v34, 16 }
 0x97b   : > { %v14008_v28 = vpack.c.bf16 %v13893_v53, %v13856_v46 }
 0x97c   : > { %v13937_v24 = vsel %vm2213_vm6, %v7372_v57, %v7376_v51  ;;  %v13939_v61 = vpop.f32.mrf.mxu3  ;;  %6966 = vmatpush.bf16.msra.mxu1 %v9897_v32  ;;  %v7023_v62 = vrot.slane %v7021_v47, 1 }
 0x97d   : > { %7214 = vmatpush.bf16.msrb.mxu3 %v9905_v1  ;;  %v7030_v21 = vshrl.u32 %v14008_v28, 16  ;;  %v7033_v46 = vshll.u32 %v14008_v28, 16 }
 0x97e   : > { %v6515_v20 = vpop.f32.mrf.mxu2 }
 0x97f   : > { %v6516_v54 = vadd.f32 %v6515_v20, %v13852_v52  ;;  %v7035_v47 = vrot.slane %v7033_v46, 2 }
 0x981   : > { %v13953_v23 = vadd.f32 %v13860_v58, %v6516_v54 }
 0x983   : > { %v13961_v52 = vpack.c.bf16 %v13953_v23, %v13950_v25 }
 0x984   : > { %v6568_v58 = vpop.f32.mrf.mxu3 }
 0x985   : > { %v6625_v60 = vshll.u32 %v13961_v52, 16  ;;  %9307 = vmatmul.msk.bf16.gmra.mxu2 %vm6661_vm10, %v13961_v52  ;;  %v6629_v42 = vshrl.u32 %v13961_v52, 16  ;;  %v6801_v5 = vrot.slane %v13961_v52, 1  ;;  %v7497_v40 = vrot.slane %v13961_v52, 3 }
 0x986   : > { %v6518_v63 = vpop.f32.mrf.mxu2  ;;  %v7269_v26 = vrot.slane %v13961_v52, 2 }
 0x987   : > { %v6627_v39 = vrot.slane %v6625_v60, 1  ;;  %v6519_v14 = vadd.f32 %v6518_v63, %v13866_v16  ;;  %v6802_v57 = vsel %vm1161_vm2, %v6799_v31, %v6801_v5  ;;  %v13984_v49 = vsel %vm2493_vm7, %v7495_v59, %v7497_v40 }
 0x988   : > { %v7270_v37 = vsel %vm1827_vm5, %v7267_v36, %v7269_v26  ;;  %v7378_v55 = vrot.slane %v6629_v42, 2  ;;  %v7379_v27 = vrot.slane %v6625_v60, 3  ;;  %9335 = vmatmul.msk.bf16.gmra.mxu3 %vm6661_vm10, %v6802_v57  ;;  %v7013_v16 = vshrl.u32 %v13977_v15, 16 }
 0x989   : > { %v6628_v11 = vsel %vm695_vm1, %v6623_v45, %v6627_v39  ;;  %v13990_v48 = vadd.f32 %v13880_v56, %v6519_v14  ;;  %9450 = vmatmul.msk.bf16.gmra.mxu0 %vm6661_vm10, %v7270_v37  ;;  %v7026_v31 = vrot.slane %v7024_v44, 2  ;;  %v7018_v36 = vrot.slane %v7016_v38, 2 }
 0x98a   : > { %9285 = vmatmul.msk.bf16.gmra.mxu1 %vm6661_vm10, %v6628_v11  ;;  %v7380_v7 = vor.u32 %v7379_v27, %v7378_v55  ;;  %v7015_v6 = vrot.slane %v7013_v16, 1  ;;  %v6631_v29 = vor.u32 %v6629_v42, %v6627_v39  ;;  %v7158_v27 = vrot.slane %v13957_v34, 2 }
 0x98b   : > { %v6583_v56 = vpack.c.bf16 %v13990_v48, %v13990_v48  ;;  %v7027_v30 = vor.u32 %v7026_v31, %v7023_v62  ;;  %v14039_v11 = vpack.c.bf16 %v13950_v25, %v13895_v3  ;;  %v7157_v62 = vrot.slane %v13977_v15, 2 }
 0x98c   : > { %v13998_v59 = vsel %vm2213_vm6, %v7376_v51, %v7380_v7  ;;  %v7019_v22 = vor.u32 %v7018_v36, %v7015_v6  ;;  %v6909_v31 = vrot.slane %v13977_v15, 1  ;;  %v14056_v15 = vpack.c.bf16 %v13990_v48, %v13953_v23 }
 0x98d   : > { %v6633_v43 = vshll.u32 %v6583_v56, 16  ;;  %v6803_v4 = vrot.slane %v6583_v56, 1  ;;  %v7039_v56 = vshrl.u32 %v14039_v11, 16  ;;  %v7042_v6 = vshll.u32 %v14039_v11, 16 }
 0x98e   : > { %v6520_v33 = vpop.f32.mrf.mxu2  ;;  %v7028_v51 = vsel %vm1547_vm4, %v7019_v22, %v7027_v30  ;;  %v7159_v36 = vsel %vm1827_vm5, %v7157_v62, %v7158_v27  ;;  %v6912_v22 = vrot.slane %v14008_v28, 1  ;;  %v6914_v46 = vrot.slane %v14039_v11, 1 }
 0x98f   : > { %v6521_v19 = vadd.f32 %v6520_v33, %v13890_v2  ;;  %v6635_v12 = vrot.slane %v6633_v43, 1  ;;  %v6804_v10 = vsel %vm1161_vm2, %v6801_v5, %v6803_v4  ;;  %v7032_v5 = vrot.slane %v7030_v21, 1  ;;  %v9918_v21 = vld [vmem:[%s14597_s7 + $0x108] sm:$0xff] }
 0x990   : > { %v7044_v33 = vrot.slane %v7042_v6, 2  ;;  %v7160_v43 = vrot.slane %v14008_v28, 2  ;;  %v7048_v4 = vshrl.u32 %v14056_v15, 16 }
 0x991   : > { %v14004_v0 = vadd.f32 %v13904_v9, %v6521_v19  ;;  %v6636_v58 = vsel %vm695_vm1, %v6631_v29, %v6635_v12  ;;  %v7036_v44 = vor.u32 %v7035_v47, %v7032_v5  ;;  %v9919_v12 = vld [vmem:[%s14597_s7 + $0x110] sm:$0xff]  ;;  %v7162_v29 = vrot.slane %v14039_v11, 2  ;;  %v9914_v47 = vld [vmem:[%s14597_s7 + $0xe8] sm:$0xff] }
 0x992   : > { %v7161_v23 = vsel %vm1827_vm5, %v7158_v27, %v7160_v43  ;;  %v7050_v28 = vrot.slane %v7048_v4, 1 }
 0x993   : > { %v7251_v18 = vpack.c.bf16 %v14004_v0, %v13990_v48  ;;  %v7037_v16 = vsel %vm1547_vm4, %v7027_v30, %v7036_v44 }
 0x995   : > { %9390 = vmatmul.msk.bf16.vlgmr.msrb.gmra.mxu2 %vm6661_vm10, %v7028_v51  ;;  %v7499_v2 = vrot.slane %v7251_v18, 3  ;;  %v7271_v9 = vrot.slane %v7251_v18, 2  ;;  %v7383_v20 = vshrl.u32 %v7251_v18, 16  ;;  %v7386_v54 = vshll.u32 %v7251_v18, 16  ;;  %v9920_v18 = vld [vmem:[%s14597_s7 + $0x118] sm:$0xff] }
 0x996   : > { %v6523_v13 = vpop.f32.mrf.mxu2  ;;  %7546 = vmatpush.bf16.msra.mxu2 %v9920_v18  ;;  %v7051_v51 = vshll.u32 %v14056_v15, 16 }
 0x997   : > { %v6524_v53 = vadd.f32 %v6523_v13, %v13914_v35  ;;  %v14019_v8 = vsel %vm2493_vm7, %v7497_v40, %v7499_v2  ;;  %v7272_v52 = vsel %vm1827_vm5, %v7269_v26, %v7271_v9  ;;  %v7385_v32 = vrot.slane %v7383_v20, 2 }
 0x998   : > { %v7388_v1 = vrot.slane %v7386_v54, 3  ;;  %9336 = vmatmul.msk.bf16.gmra.mxu3 %vm6661_vm10, %v6804_v10  ;;  %v6893_v54 = vpack.c.bf16 %v14004_v0, %v14004_v0  ;;  %v9916_v0 = vld [vmem:[%s14597_s7 + $0xf8] sm:$0xff] }
 0x999   : > { %v6567_v60 = vadd.f32 %v13939_v61, %v6524_v53  ;;  %9451 = vmatmul.msk.bf16.gmra.mxu0 %vm6661_vm10, %v7272_v52  ;;  %7443 = vmatpush.bf16.msrb.mxu1 %v9916_v0 }
 0x99a   : > { %9286 = vmatmul.msk.bf16.gmra.mxu1 %vm6661_vm10, %v6636_v58  ;;  %v7389_v35 = vor.u32 %v7388_v1, %v7385_v32  ;;  %7547 = vmatpush.bf16.msra.mxu2 %v9919_v12  ;;  %v7057_v10 = vshrl.u32 %v6893_v54, 16  ;;  %v7060_v52 = vshll.u32 %v6893_v54, 16  ;;  %v7163_v32 = vsel %vm1827_vm5, %v7160_v43, %v7162_v29 }
 0x99b   : > { %v7252_v42 = vpack.c.bf16 %v6567_v60, %v6567_v60  ;;  %v6915_v1 = vsel %vm1161_vm2, %v6912_v22, %v6914_v46  ;;  %v6918_v6 = vrot.slane %v6893_v54, 1 }
 0x99c   : > { %v14028_v40 = vsel %vm2213_vm6, %v7380_v7, %v7389_v35  ;;  %v6910_v7 = vrot.slane %v13957_v34, 1  ;;  %v7041_v34 = vrot.slane %v7039_v56, 1  ;;  %v7059_v58 = vrot.slane %v7057_v10, 1 }
 0x99d   : > { %v7392_v45 = vshrl.u32 %v7252_v42, 16  ;;  %v7395_v63 = vshll.u32 %v7252_v42, 16  ;;  %v7501_v26 = vrot.slane %v7252_v42, 3  ;;  %v7273_v38 = vrot.slane %v7252_v42, 2 }
 0x99e   : > { %v6525_v39 = vpop.f32.mrf.mxu2  ;;  %v6911_v25 = vsel %vm1161_vm2, %v6909_v31, %v6910_v7  ;;  %v7045_v19 = vor.u32 %v7044_v33, %v7041_v34  ;;  %v6913_v48 = vsel %vm1161_vm2, %v6910_v7, %v6912_v22  ;;  %7548 = vmatpush.bf16.msra.mxu2 %v9918_v21  ;;  %v7062_v60 = vrot.slane %v7060_v52, 2 }
 0x99f   : > { %v14031_v14 = vsel %vm2493_vm7, %v7499_v2, %v7501_v26  ;;  %v7394_v57 = vrot.slane %v7392_v45, 2  ;;  %v7397_v61 = vrot.slane %v7395_v63, 3  ;;  %v7274_v3 = vsel %vm1827_vm5, %v7271_v9, %v7273_v38  ;;  %v9917_v9 = vld [vmem:[%s14597_s7 + $0x100] sm:$0xff] }
 0x9a0   : > { %v7046_v30 = vsel %vm1547_vm4, %v7036_v44, %v7045_v19  ;;  %v7053_v2 = vrot.slane %v7051_v51, 2  ;;  %v7063_v5 = vor.u32 %v7062_v60, %v7059_v58  ;;  %v7164_v63 = vrot.slane %v14056_v15, 2  ;;  %v9913_v39 = vld [vmem:[%s14597_s7 + $0xe0] sm:$0xff] }
 0x9a1   : > { %v7398_v37 = vor.u32 %v7397_v61, %v7394_v57  ;;  %v6916_v26 = vrot.slane %v14056_v15, 1  ;;  %v7166_v56 = vrot.slane %v6893_v54, 2 }
 0x9a2   : > { %v7054_v13 = vor.u32 %v7053_v2, %v7050_v28  ;;  %7549 = vmatpush.bf16.msra.mxu2 %v9917_v9 }
 0x9a3   : > { %v14034_v55 = vsel %vm2213_vm6, %v7389_v35, %v7398_v37  ;;  %v9915_v35 = vld [vmem:[%s14597_s7 + $0xf0] sm:$0xff]  ;;  %v7165_v37 = vsel %vm1827_vm5, %v7162_v29, %v7164_v63  ;;  %v6917_v27 = vsel %vm1161_vm2, %v6914_v46, %v6916_v26  ;;  %v7167_v34 = vsel %vm1827_vm5, %v7164_v63, %v7166_v56 }
 0x9a4   : > { %v7055_v20 = vsel %vm1547_vm4, %v7045_v19, %v7054_v13  ;;  %7444 = vmatpush.bf16.msrb.mxu1 %v9915_v35  ;;  %v7064_v45 = vsel %vm1547_vm4, %v7054_v13, %v7063_v5  ;;  %v6919_v33 = vsel %vm1161_vm2, %v6916_v26, %v6918_v6 }
 0x9a5   : > { %9391 = vmatmul.msk.bf16.gmra.mxu2 %vm6661_vm10, %v7037_v16 }
 0x9a8   : > { %9419 = vmatmul.msk.bf16.vlgmr.msrb.gmra.mxu3 %vm6661_vm10, %v7159_v36  ;;  %7445 = vmatpush.bf16.msrb.mxu1 %v9914_v47 }
 0x9a9   : > { %9452 = vmatmul.msk.bf16.gmra.mxu0 %vm6661_vm10, %v7274_v3 }
 0x9aa   : > { %9361 = vmatmul.msk.bf16.vlgmr.msra.gmra.mxu1 %vm6661_vm10, %v6911_v25 }
 0x9ac   : > { %7446 = vmatpush.bf16.msrb.mxu1 %v9913_v39 }
 0x9b5   : > { %9392 = vmatmul.msk.bf16.gmra.mxu2 %vm6661_vm10, %v7046_v30 }
 0x9b8   : > { %9420 = vmatmul.msk.bf16.gmra.mxu3 %vm6661_vm10, %v7161_v23 }
 0x9ba   : > { %9362 = vmatmul.msk.bf16.gmra.mxu1 %vm6661_vm10, %v6913_v48 }
 0x9c5   : > { %9393 = vmatmul.msk.bf16.gmra.mxu2 %vm6661_vm10, %v7055_v20 }
 0x9c8   : > { %v6754_v53 = vpop.f32.mrf.mxu2  ;;  %9421 = vmatmul.msk.bf16.gmra.mxu3 %vm6661_vm10, %v7163_v32 }
 0x9ca   : > { %9363 = vmatmul.msk.bf16.gmra.mxu1 %vm6661_vm10, %v6915_v1 }
 0x9d0   : > { %v6756_v42 = vpop.f32.mrf.mxu2 }
 0x9d5   : > { %9394 = vmatmul.msk.bf16.gmra.mxu2 %vm6661_vm10, %v7064_v45 }
 0x9d7   : > { %v6686_v57 = vpop.f32.mrf.mxu1 }
 0x9d8   : > { %v14106_v61 = vadd.f32 %v6754_v53, %v6686_v57  ;;  %v6759_v44 = vpop.f32.mrf.mxu2  ;;  %9422 = vmatmul.msk.bf16.gmra.mxu3 %vm6661_vm10, %v7165_v37 }
 0x9da   : > { %9364 = vmatmul.msk.bf16.gmra.mxu1 %vm6661_vm10, %v6917_v27 }
 0x9db   : > { %v6853_v11 = vpop.f32.mrf.mxu3 }
 0x9df   : > { %v6688_v16 = vpop.f32.mrf.mxu1 }
 0x9e0   : > { %v6757_v38 = vadd.f32 %v6756_v42, %v6688_v16  ;;  %v6761_v7 = vpop.f32.mrf.mxu2  ;;  %v6878_v42 = vadd.f32 %v6853_v11, %v14106_v61 }
 0x9e3   : > { %v6855_v62 = vpop.f32.mrf.mxu3 }
 0x9e4   : > { %v6879_v31 = vadd.f32 %v6855_v62, %v6757_v38 }
 0x9e5   : > { %9506 = vmatmul.msk.bf16.vlgmr.msra.gmra.mxu2 %vm6661_vm10, %v13870_v17 }
 0x9e7   : > { %v6691_v36 = vpop.f32.mrf.mxu1 }
 0x9e8   : > { %v14114_v3 = vadd.f32 %v6759_v44, %v6691_v36  ;;  %v6764_v25 = vpop.f32.mrf.mxu2  ;;  %9423 = vmatmul.msk.bf16.gmra.mxu3 %vm6661_vm10, %v7167_v34 }
 0x9ea   : > { %9365 = vmatmul.msk.bf16.gmra.mxu1 %vm6661_vm10, %v6919_v33 }
 0x9eb   : > { %v6858_v19 = vpop.f32.mrf.mxu3 }
 0x9ec   : > { %v6880_v38 = vadd.f32 %v6858_v19, %v14114_v3 }
 0x9ef   : > { %v6693_v15 = vpop.f32.mrf.mxu1 }
 0x9f0   : > { %v6762_v30 = vadd.f32 %v6761_v7, %v6693_v15  ;;  %v6766_v43 = vpop.f32.mrf.mxu2 }
 0x9f3   : > { %v6860_v22 = vpop.f32.mrf.mxu3 }
 0x9f4   : > { %v6881_v17 = vadd.f32 %v6860_v22, %v6762_v30 }
 0x9f5   : > { %9507 = vmatmul.msk.bf16.gmra.mxu2 %vm6661_vm10, %v13917_v50 }
 0x9f7   : > { %v6696_v18 = vpop.f32.mrf.mxu1 }
 0x9f8   : > { %v6765_v4 = vadd.f32 %v6764_v25, %v6696_v18  ;;  %v6769_v51 = vpop.f32.mrf.mxu2 }
 0x9fa   : > { %9477 = vmatmul.msk.bf16.vlgmr.msrb.gmra.mxu1 %vm6661_vm10, %v13883_v41 }
 0x9fb   : > { %v6863_v23 = vpop.f32.mrf.mxu3 }
 0x9fc   : > { %v6882_v48 = vadd.f32 %v6863_v23, %v6765_v4 }
 0x9ff   : > { %v6698_v12 = vpop.f32.mrf.mxu1 }
 0xa00   : > { %v6767_v28 = vadd.f32 %v6766_v43, %v6698_v12  ;;  %v14124_v2 = vpop.f32.mrf.mxu2 }
 0xa03   : > { %v6865_v21 = vpop.f32.mrf.mxu3 }
 0xa04   : > { %v6883_v13 = vadd.f32 %v6865_v21, %v6767_v28 }
 0xa05   : > { %9508 = vmatmul.msk.bf16.gmra.mxu2 %vm6661_vm10, %v13984_v49 }
 0xa07   : > { %v6701_v9 = vpop.f32.mrf.mxu1 }
 0xa08   : > { %v6770_v50 = vadd.f32 %v6769_v51, %v6701_v9  ;;  %v6774_v20 = vpop.f32.mrf.mxu2 }
 0xa0a   : > { %9478 = vmatmul.msk.bf16.gmra.mxu1 %vm6661_vm10, %v13937_v24 }
 0xa0b   : > { %v6868_v54 = vpop.f32.mrf.mxu3 }
 0xa0c   : > { %v6884_v29 = vadd.f32 %v6868_v54, %v6770_v50 }
 0xa0f   : > { %v6703_v41 = vpop.f32.mrf.mxu1 }
 0xa10   : > { %v6776_v46 = vpop.f32.mrf.mxu2  ;;  %v6772_v28 = vadd.f32 %v14124_v2, %v6703_v41  ;;  %v14158_v2 = vld [vmem:[%s14598_s8] ss:$0 sm:$0xff] }
 0xa13   : > { %v6870_v53 = vpop.f32.mrf.mxu3 }
 0xa15   : > { %9509 = vmatmul.msk.bf16.gmra.mxu2 %vm6661_vm10, %v14019_v8 }
 0xa17   : > { %v6706_v10 = vpop.f32.mrf.mxu1 }
 0xa18   : > { %v6775_v52 = vadd.f32 %v6774_v20, %v6706_v10  ;;  %v7113_v32 = vpop.f32.mrf.mxu2 }
 0xa1a   : > { %9479 = vmatmul.msk.bf16.gmra.mxu1 %vm6661_vm10, %v13998_v59  ;;  %v7323_v59 = vpop.f32.mrf.mxu0 }
 0xa1b   : > { %v6873_v49 = vpop.f32.mrf.mxu3 }
 0xa1c   : > { %v6886_v1 = vadd.f32 %v6873_v49, %v6775_v52 }
 0xa1f   : > { %v6708_v0 = vpop.f32.mrf.mxu1 }
 0xa20   : > { %v6777_v58 = vadd.f32 %v6776_v46, %v6708_v0  ;;  %v7115_v60 = vpop.f32.mrf.mxu2 }
 0xa22   : > { %v7325_v16 = vpop.f32.mrf.mxu0 }
 0xa23   : > { %v6875_v24 = vpop.f32.mrf.mxu3 }
 0xa24   : > { %v6887_v35 = vadd.f32 %v6875_v24, %v6777_v58 }
 0xa25   : > { %9510 = vmatmul.msk.bf16.gmra.mxu2 %vm6661_vm10, %v14031_v14 }
 0xa27   : > { %v6968_v5 = vpop.f32.mrf.mxu1 }
 0xa28   : > { %v6993_v8 = vadd.f32 %v6968_v5, %v6878_v42  ;;  %v7118_v47 = vpop.f32.mrf.mxu2 }
 0xa2a   : > { %v7138_v45 = vadd.f32 %v7113_v32, %v6993_v8  ;;  %9480 = vmatmul.msk.bf16.gmra.mxu1 %vm6661_vm10, %v14028_v40  ;;  %v7328_v6 = vpop.f32.mrf.mxu0 }
 0xa2b   : > { %v7216_v63 = vpop.f32.mrf.mxu3 }
 0xa2c   : > { %v7241_v26 = vadd.f32 %v7216_v63, %v7138_v45  ;;  %v14170_v63 = vld [vmem:[%s14600_s10] ss:$0 sm:$0xff] }
 0xa2e   : > { %v7348_v49 = vadd.f32 %v7323_v59, %v7241_v26 }
 0xa2f   : > { %v6970_v39 = vpop.f32.mrf.mxu1 }
 0xa30   : > { %v6994_v57 = vadd.f32 %v6970_v39, %v6879_v31  ;;  %v7120_v44 = vpop.f32.mrf.mxu2 }
 0xa32   : > { %v7139_v37 = vadd.f32 %v7115_v60, %v6994_v57 }
 0xa33   : > { %v7218_v27 = vpop.f32.mrf.mxu3 }
 0xa34   : > { %v7242_v14 = vadd.f32 %v7218_v27, %v7139_v37 }
 0xa36   : > { %v7349_v24 = vadd.f32 %v7325_v16, %v7242_v14 }
 0xa37   : > { %v6973_v61 = vpop.f32.mrf.mxu1 }
 0xa38   : > { %v6995_v11 = vadd.f32 %v6973_v61, %v6880_v38  ;;  %v7123_v7 = vpop.f32.mrf.mxu2 }
 0xa3a   : > { %v7140_v62 = vadd.f32 %v7118_v47, %v6995_v11  ;;  %9481 = vmatmul.msk.bf16.gmra.mxu1 %vm6661_vm10, %v14034_v55  ;;  %v7330_v47 = vpop.f32.mrf.mxu0 }
 0xa3b   : > { %v7221_v40 = vpop.f32.mrf.mxu3 }
 0xa3c   : > { %v7243_v56 = vadd.f32 %v7221_v40, %v7140_v62 }
 0xa3e   : > { %v7350_v25 = vadd.f32 %v7328_v6, %v7243_v56 }
 0xa3f   : > { %v6975_v36 = vpop.f32.mrf.mxu1 }
 0xa40   : > { %v6996_v31 = vadd.f32 %v6975_v36, %v6881_v17  ;;  %v7125_v34 = vpop.f32.mrf.mxu2  ;;  %v6885_v17 = vadd.f32 %v6870_v53, %v6772_v28 }
 0xa42   : > { %v7141_v33 = vadd.f32 %v7120_v44, %v6996_v31 }
 0xa43   : > { %v7223_v53 = vpop.f32.mrf.mxu3 }
 0xa44   : > { %v7244_v11 = vadd.f32 %v7223_v53, %v7141_v33 }
 0xa46   : > { %v7351_v36 = vadd.f32 %v7330_v47, %v7244_v11 }
 0xa47   : > { %v6978_v15 = vpop.f32.mrf.mxu1 }
 0xa48   : > { %v6997_v30 = vadd.f32 %v6978_v15, %v6882_v48  ;;  %v7128_v43 = vpop.f32.mrf.mxu2 }
 0xa4a   : > { %v14142_v22 = vadd.f32 %v7123_v7, %v6997_v30  ;;  %v7333_v7 = vpop.f32.mrf.mxu0 }
 0xa4b   : > { %v7226_v39 = vpop.f32.mrf.mxu3 }
 0xa4c   : > { %v7245_v33 = vadd.f32 %v7226_v39, %v14142_v22 }
 0xa4f   : > { %v6980_v3 = vpop.f32.mrf.mxu1 }
 0xa50   : > { %v6998_v19 = vadd.f32 %v6980_v3, %v6883_v13  ;;  %v7130_v18 = vpop.f32.mrf.mxu2 }
 0xa52   : > { %v14144_v4 = vadd.f32 %v7125_v34, %v6998_v19 }
 0xa53   : > { %v7228_v31 = vpop.f32.mrf.mxu3 }
 0xa54   : > { %v7246_v22 = vadd.f32 %v7228_v31, %v14144_v4 }
 0xa57   : > { %v6983_v51 = vpop.f32.mrf.mxu1 }
 0xa58   : > { %v6999_v55 = vadd.f32 %v6983_v51, %v6884_v29  ;;  %v7133_v23 = vpop.f32.mrf.mxu2 }
 0xa5a   : > { %v14146_v12 = vadd.f32 %v7128_v43, %v6999_v55 }
 0xa5f   : > { %v6985_v21 = vpop.f32.mrf.mxu1 }
 0xa60   : > { %v7000_v9 = vadd.f32 %v6985_v21, %v6885_v17  ;;  %v7135_v50 = vpop.f32.mrf.mxu2  ;;  %v7352_v17 = vadd.f32 %v7333_v7, %v7245_v33 }
 0xa62   : > { %v14149_v48 = vadd.f32 %v7130_v18, %v7000_v9 }
 0xa67   : > { %v6988_v20 = vpop.f32.mrf.mxu1 }
 0xa68   : > { %v7001_v54 = vadd.f32 %v6988_v20, %v6886_v1  ;;  %v7551_v46 = vpop.f32.mrf.mxu2 }
 0xa6a   : > { %v14151_v13 = vadd.f32 %v7133_v23, %v7001_v54  ;;  %v7335_v23 = vpop.f32.mrf.mxu0 }
 0xa6f   : > { %v6990_v10 = vpop.f32.mrf.mxu1 }
 0xa70   : > { %v7002_v52 = vadd.f32 %v6990_v10, %v6887_v35  ;;  %v7553_v32 = vpop.f32.mrf.mxu2  ;;  %v14164_v35 = vld [vmem:[%s14599_s9] ss:$0 sm:$0xff] }
 0xa72   : > { %v14153_v29 = vadd.f32 %v7135_v50, %v7002_v52 }
 0xa77   : > { %v7448_v0 = vpop.f32.mrf.mxu1 }
 0xa78   : > { %v7473_v58 = vadd.f32 %v7448_v0, %v7348_v49  ;;  %v7556_v60 = vpop.f32.mrf.mxu2 }
 0xa7a   : > { %v7576_v41 = vadd.f32 %v7551_v46, %v7473_v58  ;;  %v7231_v46 = vpop.f32.mrf.mxu3 }
 0xa7c   : > { %v7590_v1 = vadd.f32 %v14158_v2, %v7576_v41  ;;  %v7353_v41 = vadd.f32 %v7335_v23, %v7246_v22 }
 0xa7e   : > { %v7600_v5 = vmax.f32 %v7590_v1, 0.0  ;;  %v7338_v1 = vpop.f32.mrf.mxu0 }
 0xa7f   : > { %v7450_v42 = vpop.f32.mrf.mxu1 }
 0xa80   : > { %v7474_v8 = vadd.f32 %v7450_v42, %v7349_v24  ;;  %v7614_v59 = vmul.f32 %v14164_v35, %v7600_v5  ;;  %v7558_v57 = vpop.f32.mrf.mxu2 }
 0xa82   : > { %v7577_v45 = vadd.f32 %v7553_v32, %v7474_v8  ;;  %v7628_v27 = vadd.f32 %v14170_v63, %v7614_v59  ;;  %v7247_v59 = vadd.f32 %v7231_v46, %v14146_v12 }
 0xa84   : > { %v7591_v26 = vadd.f32 %v14158_v2, %v7577_v45  ;;  %v7647_v62 = vrot.slane %v7628_v27, 1 }
 0xa86   : > { %v7601_v44 = vmax.f32 %v7591_v26, 0.0  ;;  %v7233_v26 = vpop.f32.mrf.mxu3  ;;  %v7340_v12 = vpop.f32.mrf.mxu0 }
 0xa87   : > { %v7453_v37 = vpop.f32.mrf.mxu1 }
 0xa88   : > { %v7615_v16 = vmul.f32 %v14164_v35, %v7601_v44  ;;  %v7475_v14 = vadd.f32 %v7453_v37, %v7350_v25  ;;  %v7561_v30 = vpop.f32.mrf.mxu2 }
 0xa8a   : > { %v7629_v38 = vadd.f32 %v14170_v63, %v7615_v16  ;;  %v7578_v61 = vadd.f32 %v7556_v60, %v7475_v14  ;;  %v7354_v14 = vadd.f32 %v7338_v1, %v7247_v59 }
 0xa8c   : > { %v7648_v40 = vrot.slane %v7629_v38, 1  ;;  %v7592_v56 = vadd.f32 %v14158_v2, %v7578_v61 }
 0xa8e   : > { %v7602_v6 = vmax.f32 %v7592_v56, 0.0  ;;  %v7649_v34 = vsel %vm1161_vm2, %v7647_v62, %v7648_v40 }
 0xa8f   : > { %v7455_v15 = vpop.f32.mrf.mxu1  ;;  %v7673_v43 = vmax.f32 %v7628_v27, %v7649_v34 }
 0xa90   : > { %v7616_v3 = vmul.f32 %v14164_v35, %v7602_v6  ;;  %v7476_v25 = vadd.f32 %v7455_v15, %v7351_v36  ;;  %v7563_v10 = vpop.f32.mrf.mxu2  ;;  %v7248_v36 = vadd.f32 %v7233_v26, %v14149_v48 }
 0xa92   : > { %v7630_v19 = vadd.f32 %v14170_v63, %v7616_v3  ;;  %v7579_v18 = vadd.f32 %v7558_v57, %v7476_v25 }
 0xa94   : > { %v7650_v51 = vrot.slane %v7630_v19, 1  ;;  %v7593_v55 = vadd.f32 %v14158_v2, %v7579_v18 }
 0xa96   : > { %v7603_v28 = vmax.f32 %v7593_v55, 0.0  ;;  %v7651_v21 = vsel %vm1161_vm2, %v7648_v40, %v7650_v51 }
 0xa97   : > { %v7458_v9 = vpop.f32.mrf.mxu1  ;;  %v14183_v50 = vmax.f32 %v7629_v38, %v7651_v21 }
 0xa98   : > { %v7617_v20 = vmul.f32 %v14164_v35, %v7603_v28  ;;  %v7477_v54 = vadd.f32 %v7458_v9, %v7352_v17  ;;  %v7566_v39 = vpop.f32.mrf.mxu2  ;;  %v7343_v9 = vpop.f32.mrf.mxu0 }
 0xa99   : > { %v7698_v47 = vrot.slane %v14183_v50, 2 }
 0xa9a   : > { %v7631_v52 = vadd.f32 %v14170_v63, %v7617_v20  ;;  %v7580_v32 = vadd.f32 %v7561_v30, %v7477_v54  ;;  %v7236_v30 = vpop.f32.mrf.mxu3 }
 0xa9b   : > { %v7249_v21 = vadd.f32 %v7236_v30, %v14151_v13 }
 0xa9c   : > { %v7652_v49 = vrot.slane %v7631_v52, 1  ;;  %v7594_v0 = vadd.f32 %v14158_v2, %v7580_v32 }
 0xa9d   : > { %v7356_v32 = vadd.f32 %v7343_v9, %v7249_v21 }
 0xa9e   : > { %v7604_v58 = vmax.f32 %v7594_v0, 0.0  ;;  %v7653_v53 = vsel %vm1161_vm2, %v7650_v51, %v7652_v49 }
 0xa9f   : > { %v7460_v60 = vpop.f32.mrf.mxu1  ;;  %v14190_v24 = vmax.f32 %v7630_v19, %v7653_v53  ;;  %v7355_v19 = vadd.f32 %v7340_v12, %v7248_v36 }
 0xaa0   : > { %v7618_v42 = vmul.f32 %v14164_v35, %v7604_v58  ;;  %v7478_v5 = vadd.f32 %v7460_v60, %v7353_v41  ;;  %v7568_v3 = vpop.f32.mrf.mxu2  ;;  %v7345_v59 = vpop.f32.mrf.mxu0 }
 0xaa1   : > { %v7699_v8 = vrot.slane %v14190_v24, 2 }
 0xaa2   : > { %v7632_v4 = vadd.f32 %v14170_v63, %v7618_v42  ;;  %v7581_v45 = vadd.f32 %v7563_v10, %v7478_v5  ;;  %v7238_v22 = vpop.f32.mrf.mxu3 }
 0xaa3   : > { %v7700_v57 = vsel %vm1827_vm5, %v7698_v47, %v7699_v8  ;;  %v7250_v5 = vadd.f32 %v7238_v22, %v14153_v29 }
 0xaa4   : > { %v7654_v44 = vrot.slane %v7632_v4, 1  ;;  %v7595_v37 = vadd.f32 %v14158_v2, %v7581_v45  ;;  %v14199_v27 = vmax.f32 %v7673_v43, %v7700_v57 }
 0xaa6   : > { %v7605_v16 = vmax.f32 %v7595_v37, 0.0  ;;  %v7655_v38 = vsel %vm1161_vm2, %v7652_v49, %v7654_v44 }
 0xaa7   : > { %v7463_v61 = vpop.f32.mrf.mxu1  ;;  %v14202_v11 = vmax.f32 %v7631_v52, %v7655_v38 }
 0xaa8   : > { %v7619_v7 = vmul.f32 %v14164_v35, %v7605_v16  ;;  %v7479_v62 = vadd.f32 %v7463_v61, %v7354_v14  ;;  %v7571_v58 = vpop.f32.mrf.mxu2 }
 0xaa9   : > { %v7701_v40 = vrot.slane %v14202_v11, 2 }
 0xaaa   : > { %v7633_v56 = vadd.f32 %v14170_v63, %v7619_v7  ;;  %v7582_v6 = vadd.f32 %v7566_v39, %v7479_v62  ;;  %v7357_v39 = vadd.f32 %v7345_v59, %v7250_v5  ;;  %v9549_v5 = vld [vmem:[%s14604_s14 + $0x50] sm:$0xf0] }
 0xaab   : > { %v14209_v31 = vsel %vm1827_vm5, %v7699_v8, %v7701_v40 }
 0xaac   : > { %v7656_v34 = vrot.slane %v7633_v56, 1  ;;  %v7596_v15 = vadd.f32 %v14158_v2, %v7582_v6  ;;  %v7725_v43 = vmax.f32 %v14183_v50, %v14209_v31  ;;  %v9533_v50 = vld [vmem:[%s14604_s14 + $0x30] sm:$0xf0] }
 0xaae   : > { %v7606_v25 = vmax.f32 %v7596_v15, 0.0  ;;  %v7657_v18 = vsel %vm1161_vm2, %v7654_v44, %v7656_v34 }
 0xaaf   : > { %v7465_v33 = vpop.f32.mrf.mxu1  ;;  %v14215_v51 = vmax.f32 %v7632_v4, %v7657_v18 }
 0xab0   : > { %v7620_v48 = vmul.f32 %v14164_v35, %v7606_v25  ;;  %v7480_v55 = vadd.f32 %v7465_v33, %v7355_v19  ;;  %v7573_v29 = vpop.f32.mrf.mxu2  ;;  %v9629_v25 = vld [vmem:[%s14604_s14 + $0xf0] sm:$0xf0] }
 0xab1   : > { %v7703_v23 = vrot.slane %v14215_v51, 2 }
 0xab2   : > { %v7634_v28 = vadd.f32 %v14170_v63, %v7620_v48  ;;  %v7583_v17 = vadd.f32 %v7568_v3, %v7480_v55  ;;  %v9949_v3 = vld [vmem:[%s14604_s14 + $0xe4] sm:$0xf]  ;;  %v9613_v48 = vld [vmem:[%s14604_s14 + $0xd0] sm:$0xf0] }
 0xab3   : > { %v14222_v20 = vsel %vm1827_vm5, %v7701_v40, %v7703_v23  ;;  %v9632_v19 = vor.u32 %v9949_v3, %v9629_v25  ;;  %v9927_v3 = vld [vmem:[%s14604_s14 + $0x2c] sm:$0xf0] }
 0xab4   : > { %v7658_v54 = vrot.slane %v7634_v28, 1  ;;  %v7597_v46 = vadd.f32 %v14158_v2, %v7583_v17  ;;  %v7726_v10 = vmax.f32 %v14190_v24, %v14222_v20  ;;  %v9947_v24 = vld [vmem:[%s14604_s14 + $0xcc] sm:$0xf0]  ;;  %v9925_v20 = vld [vmem:[%s14604_s14 + $0x24] sm:$0xf] }
 0xab5   : > { %7978 = vmatpush.bf16.msrb.mxu0 %v9632_v19  ;;  %v9536_v31 = vor.u32 %v9925_v20, %v9533_v50  ;;  %v9923_v19 = vld [vmem:[%s14604_s14 + $0xc] sm:$0xf0]  ;;  %v9541_v20 = vld [vmem:[%s14604_s14 + $0x38] sm:$0xf0] }
 0xab6   : > { %v7607_v52 = vmax.f32 %v7597_v46, 0.0  ;;  %v7659_v49 = vsel %vm1161_vm2, %v7656_v34, %v7658_v54  ;;  %v9597_v46 = vld [vmem:[%s14604_s14 + $0xb0] sm:$0xf0] }
 0xab7   : > { %v7468_v0 = vpop.f32.mrf.mxu1  ;;  %v14228_v41 = vmax.f32 %v7633_v56, %v7659_v49 }
 0xab8   : > { %v7621_v13 = vmul.f32 %v14164_v35, %v7607_v52  ;;  %v7481_v53 = vadd.f32 %v7468_v0, %v7356_v32 }
 0xab9   : > { %v7705_v60 = vrot.slane %v14228_v41, 2 }
 0xaba   : > { %v7635_v1 = vadd.f32 %v14170_v63, %v7621_v13  ;;  %v7584_v42 = vadd.f32 %v7571_v58, %v7481_v53  ;;  %v9937_v58 = vld [vmem:[%s14604_s14 + $0x84] sm:$0xf] }
 0xabb   : > { %v14235_v8 = vsel %vm1827_vm5, %v7703_v23, %v7705_v60  ;;  %v9933_v53 = vld [vmem:[%s14604_s14 + $0x64] sm:$0xf] }
 0xabc   : > { %v7660_v47 = vrot.slane %v7635_v1, 1  ;;  %v7598_v4 = vadd.f32 %v14158_v2, %v7584_v42  ;;  %v7727_v45 = vmax.f32 %v14202_v11, %v14235_v8  ;;  %v9929_v42 = vld [vmem:[%s14604_s14 + $0x44] sm:$0xf]  ;;  %v9627_v8 = vld [vmem:[%s14604_s14 + $0xe0] sm:$0xf] }
 0xabe   : > { %v7608_v26 = vmax.f32 %v7598_v4, 0.0  ;;  %v7661_v57 = vsel %vm1161_vm2, %v7658_v54, %v7660_v47  ;;  %v9941_v54 = vld [vmem:[%s14604_s14 + $0xa4] sm:$0xf]  ;;  %v9552_v4 = vor.u32 %v9929_v42, %v9549_v5  ;;  %v9573_v42 = vld [vmem:[%s14604_s14 + $0x78] sm:$0xf0] }
 0xabf   : > { %v7470_v44 = vpop.f32.mrf.mxu1  ;;  %v7679_v37 = vmax.f32 %v7634_v28, %v7661_v57  ;;  %v9600_v22 = vor.u32 %v9941_v54, %v9597_v46  ;;  %v9921_v57 = vld [vmem:[%s14604_s14 + $0x4] sm:$0xf]  ;;  %v9587_v46 = vld [vmem:[%s14604_s14 + $0x88] sm:$0xf] }
 0xac0   : > { %v7622_v16 = vmul.f32 %v14164_v35, %v7608_v26  ;;  %v7482_v14 = vadd.f32 %v7470_v44, %v7357_v39  ;;  %v9611_v26 = vld [vmem:[%s14604_s14 + $0xc0] sm:$0xf]  ;;  %v9943_v39 = vld [vmem:[%s14604_s14 + $0xac] sm:$0xf0]  ;;  %v9950_v44 = vld [vmem:[%s14604_s14 + $0xec] sm:$0xf] }
 0xac1   : > { %v7707_v38 = vrot.slane %v7679_v37, 2 }
 0xac2   : > { %v7636_v61 = vadd.f32 %v14170_v63, %v7622_v16  ;;  %v7585_v7 = vadd.f32 %v7573_v29, %v7482_v14  ;;  %v9637_v16 = vld [vmem:[%s14604_s14 + $0xf8] sm:$0xf0] }
 0xac3   : > { %v7708_v62 = vsel %vm1827_vm5, %v7705_v60, %v7707_v38  ;;  %v9565_v60 = vld [vmem:[%s14604_s14 + $0x70] sm:$0xf0]  ;;  %v9640_v14 = vor.u32 %v9950_v44, %v9637_v16  ;;  %v9960_v16 = vld [vmem:[%s14606_s16 + $0x38] sm:$0xff] }
 0xac4   : > { %v7662_v12 = vrot.slane %v7636_v61, 1  ;;  %v7599_v11 = vadd.f32 %v14158_v2, %v7585_v7  ;;  %v7728_v40 = vmax.f32 %v14215_v51, %v7708_v62  ;;  %v9946_v7 = vld [vmem:[%s14604_s14 + $0xcc] sm:$0xf]  ;;  %v9621_v62 = vld [vmem:[%s14604_s14 + $0xd8] sm:$0xf0]  ;;  %8278 = vmatpush.bf16.msra.mxu1 %v9960_v16 }
 0xac6   : > { %v7609_v56 = vmax.f32 %v7599_v11, 0.0  ;;  %v7663_v6 = vsel %vm1161_vm2, %v7660_v47, %v7662_v12  ;;  %v7681_v28 = vmax.f32 %v7636_v61, %v7662_v12  ;;  %v9951_v47 = vld [vmem:[%s14604_s14 + $0xec] sm:$0xf0] }
 0xac7   : > { %v7680_v36 = vmax.f32 %v7635_v1, %v7663_v6  ;;  %v9568_v1 = vor.u32 %v9933_v53, %v9565_v60  ;;  %v9628_v59 = vor.u32 %v9951_v47, %v9627_v8  ;;  %v9932_v60 = vld [vmem:[%s14604_s14 + $0x54] sm:$0xf0]  ;;  %v9930_v8 = vld [vmem:[%s14604_s14 + $0x4c] sm:$0xf] }
 0xac8   : > { %v7623_v34 = vmul.f32 %v14164_v35, %v7609_v56  ;;  %v9935_v56 = vld [vmem:[%s14604_s14 + $0x6c] sm:$0xf0] }
 0xac9   : > { %v7709_v15 = vrot.slane %v7680_v36, 2 }
 0xaca   : > { %v7637_v30 = vadd.f32 %v14170_v63, %v7623_v34  ;;  %v9945_v63 = vld [vmem:[%s14604_s14 + $0xc4] sm:$0xf]  ;;  %v9931_v34 = vld [vmem:[%s14604_s14 + $0x4c] sm:$0xf0] }
 0xacb   : > { %v7710_v2 = vsel %vm1827_vm5, %v7707_v38, %v7709_v15  ;;  %v9616_v23 = vor.u32 %v9945_v63, %v9613_v48  ;;  %v9579_v38 = vld [vmem:[%s14604_s14 + $0x80] sm:$0xf]  ;;  %v9619_v63 = vld [vmem:[%s14604_s14 + $0xc8] sm:$0xf]  ;;  %v9948_v48 = vld [vmem:[%s14604_s14 + $0xd4] sm:$0xf0] }
 0xacc   : > { %v7683_v18 = vrot.slane %v7637_v30, 1  ;;  %v7729_v33 = vmax.f32 %v14228_v41, %v7710_v2  ;;  %v9581_v41 = vld [vmem:[%s14604_s14 + $0x90] sm:$0xf0]  ;;  %v9515_v2 = vld [vmem:[%s14604_s14] sm:$0xf] }
 0xacd   : > { %7979 = vmatpush.bf16.msrb.mxu0 %v9616_v23  ;;  %v9584_v13 = vor.u32 %v9937_v58, %v9581_v41  ;;  %v9603_v23 = vld [vmem:[%s14604_s14 + $0xa8] sm:$0xf]  ;;  %v9936_v41 = vld [vmem:[%s14604_s14 + $0x74] sm:$0xf0] }
 0xace   : > { %v7688_v51 = vmax.f32 %v7637_v30, %v7683_v18  ;;  %v7684_v35 = vsel %vm1161_vm2, %v7662_v12, %v7683_v18  ;;  %v9624_v12 = vor.u32 %v9946_v7, %v9621_v62  ;;  %v9531_v30 = vld [vmem:[%s14604_s14 + $0x20] sm:$0xf]  ;;  %v9635_v18 = vld [vmem:[%s14604_s14 + $0xe8] sm:$0xf]  ;;  %v9976_v62 = vld [vmem:[%s14606_s16 + $0xb8] sm:$0xff] }
 0xacf   : > { %v7687_v55 = vmax.f32 %v7636_v61, %v7684_v35  ;;  %v9939_v61 = vld [vmem:[%s14604_s14 + $0x8c] sm:$0xf0]  ;;  %v9532_v25 = vor.u32 %v9927_v3, %v9531_v30  ;;  %v9571_v58 = vld [vmem:[%s14604_s14 + $0x68] sm:$0xf]  ;;  %v9957_v30 = vld [vmem:[%s14606_s16 + $0x20] sm:$0xff] }
 0xad0   : > { %v7713_v17 = vrot.slane %v7688_v51, 2  ;;  %v9580_v11 = vor.u32 %v9939_v61, %v9579_v38  ;;  %v9516_v51 = vor.u32 %v9923_v19, %v9515_v2  ;;  %v9572_v53 = vor.u32 %v9936_v41, %v9571_v58  ;;  %v9966_v38 = vld [vmem:[%s14606_s16 + $0x68] sm:$0xff]  ;;  %v9963_v3 = vld [vmem:[%s14606_s16 + $0x50] sm:$0xff] }
 0xad1   : > { %v7711_v21 = vrot.slane %v7687_v55, 2  ;;  %7980 = vmatpush.bf16.msrb.mxu0 %v9600_v22  ;;  %v9620_v55 = vor.u32 %v9948_v48, %v9619_v63  ;;  %v9958_v61 = vld [vmem:[%s14606_s16 + $0x28] sm:$0xff]  ;;  %v9955_v19 = vld [vmem:[%s14606_s16 + $0x10] sm:$0xff]  ;;  %v9973_v63 = vld [vmem:[%s14606_s16 + $0xa0] sm:$0xff] }
 0xad2   : > { %v7732_v9 = vmax.f32 %v7681_v28, %v7713_v17  ;;  %v9944_v28 = vld [vmem:[%s14604_s14 + $0xb4] sm:$0xf0]  ;;  %v9962_v2 = vld [vmem:[%s14606_s16 + $0x48] sm:$0xff]  ;;  %v9953_v48 = vld [vmem:[%s14606_s16] sm:$0xff] }
 0xad3   : > { %v7714_v52 = vsel %vm1827_vm5, %v7711_v21, %v7713_v17  ;;  %v7712_v32 = vsel %vm1827_vm5, %v7709_v15, %v7711_v21  ;;  %v9604_v17 = vor.u32 %v9944_v28, %v9603_v23  ;;  %v9942_v21 = vld [vmem:[%s14604_s14 + $0xac] sm:$0xf]  ;;  %v9979_v23 = vld [vmem:[%s14606_s16 + $0xd0] sm:$0xff] }
 0xad4   : > { %9511 = vmatpush.msk.msra.mxu3 %vm7738_vm11, %v7732_v9  ;;  %v7731_v49 = vmax.f32 %v7680_v36, %v7714_v52  ;;  %v7730_v0 = vmax.f32 %v7679_v37, %v7712_v32  ;;  %v9547_v36 = vld [vmem:[%s14604_s14 + $0x40] sm:$0xf]  ;;  %v9605_v9 = vld [vmem:[%s14604_s14 + $0xb8] sm:$0xf0]  ;;  %v9940_v52 = vld [vmem:[%s14604_s14 + $0x94] sm:$0xf0] }
 0xad5   : > { %7981 = vmatpush.bf16.msrb.mxu0 %v9584_v13  ;;  %v9548_v15 = vor.u32 %v9931_v34, %v9547_v36  ;;  %v9608_v54 = vor.u32 %v9942_v21, %v9605_v9  ;;  %v9938_v32 = vld [vmem:[%s14604_s14 + $0x8c] sm:$0xf]  ;;  %v9588_v22 = vor.u32 %v9940_v52, %v9587_v46  ;;  %v9555_v13 = vld [vmem:[%s14604_s14 + $0x48] sm:$0xf]  ;;  %v9965_v34 = vld [vmem:[%s14606_s16 + $0x60] sm:$0xff] }
 0xad6   : > { %7750 = vmatpush.msra.mxu3 %v7731_v49  ;;  %v9589_v49 = vld [vmem:[%s14604_s14 + $0x98] sm:$0xf0]  ;;  %v9556_v47 = vor.u32 %v9932_v60, %v9555_v13  ;;  %v9982_v36 = vld [vmem:[%s14606_s16 + $0xe8] sm:$0xff]  ;;  %v9971_v28 = vld [vmem:[%s14606_s16 + $0x90] sm:$0xff] }
 0xad7   : > { %v9970_v21 = vld [vmem:[%s14606_s16 + $0x88] sm:$0xff]  ;;  %v9977_v9 = vld [vmem:[%s14606_s16 + $0xc0] sm:$0xff] }
 0xad8   : > { %7751 = vmatpush.msra.mxu3 %v7730_v0  ;;  %v9592_v0 = vor.u32 %v9938_v32, %v9589_v49  ;;  %v7795_v46 = vld [vmem:[%s14605_s15] sm:$0xf] }
 0xad9   : > { %7982 = vmatpush.bf16.msrb.mxu0 %v9568_v1  ;;  %v9934_v1 = vld [vmem:[%s14604_s14 + $0x6c] sm:$0xf]  ;;  %v7958_v52 = vperm.slane %v7795_v46, 1  ;;  %v7957_v49 = vperm.slane %v7795_v46, 0  ;;  %v7960_v60 = vperm.slane %v7795_v46, 3 }
 0xada   : > { %7752 = vmatpush.msra.mxu3 %v7729_v33  ;;  %v9952_v33 = vld [vmem:[%s14604_s14 + $0xf4] sm:$0xf0]  ;;  %v9576_v5 = vor.u32 %v9934_v1, %v9573_v42 }
 0xadb   : > { %v9636_v35 = vor.u32 %v9952_v33, %v9635_v18  ;;  %v9981_v18 = vld [vmem:[%s14606_s16 + $0xe0] sm:$0xff] }
 0xadc   : > { %7753 = vmatpush.msra.mxu3 %v7728_v40  ;;  %v9563_v40 = vld [vmem:[%s14604_s14 + $0x60] sm:$0xf] }
 0xadd   : > { %7983 = vmatpush.bf16.msrb.mxu0 %v9552_v4  ;;  %v9564_v6 = vor.u32 %v9935_v56, %v9563_v40  ;;  %v9557_v4 = vld [vmem:[%s14604_s14 + $0x58] sm:$0xf0]  ;;  %v9975_v40 = vld [vmem:[%s14606_s16 + $0xb0] sm:$0xff]  ;;  %v9961_v33 = vld [vmem:[%s14606_s16 + $0x40] sm:$0xff] }
 0xade   : > { %7754 = vmatpush.msra.mxu3 %v7727_v45  ;;  %v7733_v45 = vld [vmem:[%s14603_s13] sm:$0x1]  ;;  %v9983_v56 = vld [vmem:[%s14606_s16 + $0xf0] sm:$0xff] }
 0xae0   : > { %7755 = vmatpush.msra.mxu3 %v7726_v10  ;;  %v9595_v10 = vld [vmem:[%s14604_s14 + $0xa0] sm:$0xf] }
 0xae1   : > { %7984 = vmatpush.bf16.msrb.mxu0 %v9536_v31  ;;  %v9596_v29 = vor.u32 %v9943_v39, %v9595_v10  ;;  %v9523_v31 = vld [vmem:[%s14604_s14 + $0x8] sm:$0xf] }
 0xae2   : > { %7756 = vmatpush.msra.mxu3 %v7725_v43  ;;  %v9612_v43 = vor.u32 %v9947_v24, %v9611_v26  ;;  %v9560_v26 = vor.u32 %v9930_v8, %v9557_v4  ;;  %v9926_v24 = vld [vmem:[%s14604_s14 + $0x2c] sm:$0xf]  ;;  %v7959_v8 = vperm.slane %v7795_v46, 2 }
 0xae3   : > { %v9544_v10 = vor.u32 %v9926_v24, %v9541_v20 }
 0xae4   : > { %7757 = vmatpush.msra.mxu3 %v14199_v27  ;;  %v9517_v27 = vld [vmem:[%s14604_s14 + $0x10] sm:$0xf0] }
 0xae5   : > { %9512 = vmatmul.msk.f32.vlgmr.msra.gmra.mxu3 %vm7734_vm12, %v7733_v45  ;;  %v9520_v37 = vor.u32 %v9921_v57, %v9517_v27  ;;  %v9539_v45 = vld [vmem:[%s14604_s14 + $0x28] sm:$0xf]  ;;  %v9922_v57 = vld [vmem:[%s14604_s14 + $0xc] sm:$0xf]  ;;  %v9525_v27 = vld [vmem:[%s14604_s14 + $0x18] sm:$0xf0] }
 0xae6   : > { %7965 = vmatpush.bf16.msrb.mxu3 %v9628_v59  ;;  %v9928_v59 = vld [vmem:[%s14604_s14 + $0x34] sm:$0xf0]  ;;  %v9528_v44 = vor.u32 %v9922_v57, %v9525_v27 }
 0xae7   : > { %7985 = vmatpush.bf16.msrb.mxu0 %v9520_v37  ;;  %v9540_v50 = vor.u32 %v9928_v59, %v9539_v45  ;;  %v9968_v37 = vld [vmem:[%s14606_s16 + $0x78] sm:$0xff] }
 0xae8   : > { %8291 = vmatpush.bf16.msrb.mxu2 %v9968_v37 }
 0xaea   : > { %7966 = vmatpush.bf16.msrb.mxu3 %v9612_v43  ;;  %v9924_v43 = vld [vmem:[%s14604_s14 + $0x14] sm:$0xf0] }
 0xaeb   : > { %8004 = vmatpush.bf16.msra.mxu0 %v9640_v14  ;;  %v9524_v39 = vor.u32 %v9924_v43, %v9523_v31  ;;  %v9967_v14 = vld [vmem:[%s14606_s16 + $0x70] sm:$0xff] }
 0xaec   : > { %8292 = vmatpush.bf16.msrb.mxu2 %v9967_v14 }
 0xaee   : > { %7967 = vmatpush.bf16.msrb.mxu3 %v9596_v29  ;;  %v9959_v29 = vld [vmem:[%s14606_s16 + $0x30] sm:$0xff] }
 0xaef   : > { %8005 = vmatpush.bf16.msra.mxu0 %v9624_v12  ;;  %8279 = vmatpush.bf16.msra.mxu1 %v9959_v29  ;;  %v9984_v12 = vld [vmem:[%s14606_s16 + $0xf8] sm:$0xff] }
 0xaf0   : > { %8293 = vmatpush.bf16.msrb.mxu2 %v9966_v38 }
 0xaf2   : > { %7968 = vmatpush.bf16.msrb.mxu3 %v9580_v11 }
 0xaf3   : > { %8006 = vmatpush.bf16.msra.mxu0 %v9608_v54  ;;  %8280 = vmatpush.bf16.msra.mxu1 %v9958_v61  ;;  %v9969_v54 = vld [vmem:[%s14606_s16 + $0x80] sm:$0xff] }
 0xaf4   : > { %8294 = vmatpush.bf16.msrb.mxu2 %v9965_v34 }
 0xaf6   : > { %7969 = vmatpush.bf16.msrb.mxu3 %v9564_v6  ;;  %v9974_v6 = vld [vmem:[%s14606_s16 + $0xa8] sm:$0xff] }
 0xaf7   : > { %8007 = vmatpush.bf16.msra.mxu0 %v9592_v0  ;;  %8281 = vmatpush.bf16.msra.mxu1 %v9957_v30 }
 0xafa   : > { %7970 = vmatpush.bf16.msrb.mxu3 %v9548_v15  ;;  %v9964_v15 = vld [vmem:[%s14606_s16 + $0x58] sm:$0xff] }
 0xafb   : > { %8008 = vmatpush.bf16.msra.mxu0 %v9576_v5  ;;  %8295 = vmatpush.bf16.msrb.mxu2 %v9964_v15 }
 0xafe   : > { %7971 = vmatpush.bf16.msrb.mxu3 %v9532_v25  ;;  %v9956_v25 = vld [vmem:[%s14606_s16 + $0x18] sm:$0xff] }
 0xaff   : > { %8009 = vmatpush.bf16.msra.mxu0 %v9560_v26  ;;  %8296 = vmatpush.bf16.msrb.mxu2 %v9963_v3 }
 0xb00   : > { %8282 = vmatpush.bf16.msra.mxu1 %v9956_v25 }
 0xb02   : > { %7972 = vmatpush.bf16.msrb.mxu3 %v9516_v51  ;;  %v9954_v51 = vld [vmem:[%s14606_s16 + $0x8] sm:$0xff] }
 0xb03   : > { %8010 = vmatpush.bf16.msra.mxu0 %v9544_v10  ;;  %8297 = vmatpush.bf16.msrb.mxu2 %v9962_v2 }
 0xb04   : > { %8283 = vmatpush.bf16.msra.mxu1 %v9955_v19 }
 0xb06   : > { %7991 = vmatpush.bf16.msra.mxu3 %v9636_v35  ;;  %v9980_v35 = vld [vmem:[%s14606_s16 + $0xd8] sm:$0xff] }
 0xb07   : > { %8011 = vmatpush.bf16.msra.mxu0 %v9528_v44  ;;  %8298 = vmatpush.bf16.msrb.mxu2 %v9961_v33 }
 0xb08   : > { %8284 = vmatpush.bf16.msra.mxu1 %v9954_v51 }
 0xb0a   : > { %7992 = vmatpush.bf16.msra.mxu3 %v9620_v55  ;;  %v9972_v55 = vld [vmem:[%s14606_s16 + $0x98] sm:$0xff] }
 0xb0c   : > { %8285 = vmatpush.bf16.msra.mxu1 %v9953_v48 }
 0xb0e   : > { %7993 = vmatpush.bf16.msra.mxu3 %v9604_v17  ;;  %v9978_v17 = vld [vmem:[%s14606_s16 + $0xc8] sm:$0xff] }
 0xb12   : > { %7994 = vmatpush.bf16.msra.mxu3 %v9588_v22 }
 0xb16   : > { %7995 = vmatpush.bf16.msra.mxu3 %v9572_v53 }
 0xb1a   : > { %7996 = vmatpush.bf16.msra.mxu3 %v9556_v47 }
 0xb1e   : > { %7997 = vmatpush.bf16.msra.mxu3 %v9540_v50 }
 0xb22   : > { %7998 = vmatpush.bf16.msra.mxu3 %v9524_v39  ;;  %v8085_v39 = vld [vmem:[%s14607_s17] sm:$0x1] }
 0xb68   : > { %v7759_v7 = vpop.f32.mrf.mxu3 }
 0xb69   : > { %v7762_v11 = vpack.c.bf16 %v7759_v7, %v7759_v7 }
 0xb6b   : > { %7973 = vmatmul.bf16.vlgmr.msrb.gmra.mxu3 %v7762_v11  ;;  %7986 = vmatmul.bf16.vlgmr.msrb.gmra.mxu0 %v7762_v11 }
 0xb6c   : > { %8304 = vmatpush.bf16.msrb.mxu3 %v9976_v62  ;;  %8317 = vmatpush.bf16.msrb.mxu0 %v9984_v12 }
 0xb70   : > { %8305 = vmatpush.bf16.msrb.mxu3 %v9975_v40  ;;  %8318 = vmatpush.bf16.msrb.mxu0 %v9983_v56 }
 0xb74   : > { %8306 = vmatpush.bf16.msrb.mxu3 %v9974_v6  ;;  %8319 = vmatpush.bf16.msrb.mxu0 %v9982_v36 }
 0xb78   : > { %8320 = vmatpush.bf16.msrb.mxu0 %v9981_v18  ;;  %8307 = vmatpush.bf16.msrb.mxu3 %v9973_v63 }
 0xb7b   : > { %7999 = vmatmul.bf16.vlgmr.msra.gmra.mxu3 %v7762_v11  ;;  %8012 = vmatmul.bf16.vlgmr.msra.gmra.mxu0 %v7762_v11 }
 0xb7c   : > { %8321 = vmatpush.bf16.msrb.mxu0 %v9980_v35  ;;  %8308 = vmatpush.bf16.msrb.mxu3 %v9972_v55 }
 0xb80   : > { %8322 = vmatpush.bf16.msrb.mxu0 %v9979_v23  ;;  %8309 = vmatpush.bf16.msrb.mxu3 %v9971_v28 }
 0xb84   : > { %8323 = vmatpush.bf16.msrb.mxu0 %v9978_v17  ;;  %8310 = vmatpush.bf16.msrb.mxu3 %v9970_v21 }
 0xb88   : > { %8324 = vmatpush.bf16.msrb.mxu0 %v9977_v9  ;;  %8311 = vmatpush.bf16.msrb.mxu3 %v9969_v54 }
 0xbe8   : > { %v7987_v32 = vpop.f32.mrf.mxu0 }
 0xbe9   : > { %v7988_v22 = vadd.f32 %v7987_v32, %v7958_v52 }
 0xbeb   : > { %v8018_v0 = vpack.c.bf16 %v7988_v22, %v7988_v22 }
 0xbed   : > { %8299 = vmatmul.bf16.vlgmr.msrb.gmra.mxu2 %v8018_v0 }
 0xbee   : > { %v7974_v58 = vpop.f32.mrf.mxu3 }
 0xbef   : > { %v7975_v41 = vadd.f32 %v7974_v58, %v7957_v49 }
 0xbf0   : > { %v7989_v13 = vpop.f32.mrf.mxu0 }
 0xbf1   : > { %v8017_v53 = vpack.c.bf16 %v7975_v41, %v7975_v41 }
 0xbf3   : > { %8286 = vmatmul.bf16.vlgmr.msra.gmra.mxu1 %v8017_v53 }
 0xbf6   : > { %v7976_v1 = vpop.f32.mrf.mxu3 }
 0xbf8   : > { %v8013_v42 = vpop.f32.mrf.mxu0 }
 0xbf9   : > { %v8014_v5 = vadd.f32 %v8013_v42, %v7960_v60 }
 0xbfb   : > { %v8020_v47 = vpack.c.bf16 %v8014_v5, %v8014_v5 }
 0xbfd   : > { %8325 = vmatmul.bf16.vlgmr.msrb.gmra.mxu0 %v8020_v47 }
 0xbfe   : > { %v8000_v4 = vpop.f32.mrf.mxu3 }
 0xbff   : > { %v8001_v45 = vadd.f32 %v8000_v4, %v7959_v8 }
 0xc00   : > { %v8015_v59 = vpop.f32.mrf.mxu0 }
 0xc01   : > { %v8019_v26 = vpack.c.bf16 %v8001_v45, %v8001_v45 }
 0xc03   : > { %8312 = vmatmul.bf16.vlgmr.msrb.gmra.mxu3 %v8019_v26 }
 0xc06   : > { %v8002_v24 = vpop.f32.mrf.mxu3 }
 0xc70   : > { %v8287_v20 = vpop.f32.mrf.mxu1  ;;  %v8300_v50 = vpop.f32.mrf.mxu2 }
 0xc71   : > { %v8288_v57 = vadd.f32 %v8287_v20, %v8085_v39 }
 0xc73   : > { %v8301_v44 = vadd.f32 %v8300_v50, %v8288_v57 }
 0xc78   : > { %v8289_v31 = vpop.f32.mrf.mxu1  ;;  %v8302_v43 = vpop.f32.mrf.mxu2 }
 0xc7a   : > { %v8326_v10 = vpop.f32.mrf.mxu0 }
 0xc82   : > { %v8328_v27 = vpop.f32.mrf.mxu0 }
 0xc86   : > { %v8313_v37 = vpop.f32.mrf.mxu3 }
 0xc87   : > { %v8314_v16 = vadd.f32 %v8313_v37, %v8301_v44 }
 0xc89   : > { %v8327_v14 = vadd.f32 %v8326_v10, %v8314_v16 }
 0xc8b   : > { %8330 = vst [vmem:[%s584_s1] sm:$0x1] %v8327_v14 }
 0xc8c   : > { %10135 = shalt.err (!%p10132_p8)
}
 0xc8d   : > { %10001 = dma.vmem_to_hbm [thread:$0]  (%p10313_p5), %s8343_s22, 16, %s8345_s23, %s8332_s21  }
 0xc8e   : > { %v8315_v29 = vpop.f32.mrf.mxu3 }
 0xc8f PF: > { %p10013_p9 = scmp.ge.s32.totalorder %s10174_s30, 2  ;;  %s8356_s29 = sand.u32 1, %s10162_s27  }
 0xc90   : > { %s8357_s1 = scalar_lea.sflag [#allocation4], %s8356_s29 }
 0xc91   : > { %p10008_p10 = pnand %p10013_p9, %p10317_p6 }
 0xc93   : > { %p10009_p11 = pneg %p10008_p10 }
 0xc95   : > { %10157 = dma.done.wait (%p10009_p11), %s8357_s1, 16  }
 0xc96   : > { %10159 = vsyncadd (%p10009_p11), %s8357_s1, 4294967280  ;;  %s14952_s30 = sld [smem:[#allocation9_spill]]  ;;  %s14955_s27 = smov %s10166_s28 }
 0xc97   : > { %s14953_s3 = sld [smem:[#allocation8_spill]] }
 0xc98   : > { %s14954_s29 = sld [smem:[#allocation10_spill]] }
 0xc9c   : > { %p29_p12 = scmp.ge.s32.totalorder %s14952_s30, 4  }
 0xc9d   : > { %s14956_s28 = smov %s14953_s3 }
 0xc9e   :  { %31 = sbr.rel (!%p29_p12) target bundleno = 10 (0xa), region = 156 }
 0xca3   :  { %8362 = vsyncpa [#allocation3], 1 }
 0xca4   :  { %8364 = vsyncpa [#allocation3 + $0x1], 1 }
 0xca5   :  { %8365 = vsyncpa [#allocation4], 1 }
 0xca6   :  { %8367 = vsyncpa [#allocation4 + $0x1], 1 }

</bundles_post_ra>
